<compile_context>
chip_gen: v7x
topology: tpu7x:2x2x1
jax: 0.10.0
libtpu: 0.0.40
codegen_flags: <defaults>
</compile_context>

<pallas_src>
import functools

import jax
import jax.numpy as jnp
from jax.experimental import pallas as pl
from jax.experimental.pallas import tpu as pltpu


# Tap order for the layer-0 im2col: centre tap first, so the residual/identity
# is simply column 0 of xcol0 (no separate identity DMA stream).
_CENTER_FIRST = (4, 0, 1, 2, 3, 5, 6, 7, 8)


# --------------------------------------------------------------------------
# Kernel A: fused CRNN conv stack + GeM + hoisted GRU input projection.
# One grid step handles one (branch, batch-sample) pair.
# --------------------------------------------------------------------------
def conv_stack_kernel(pgem_ref, xcol0_ref, w0_ref, b0_ref,
                      w1_ref, b1_ref, w2_ref, b2_ref,
                      s1_ref, s2_ref, pm0_ref, pm1_ref, pm2_ref,
                      wih_ref, bih_ref, gi_ref, *, eps, n_hchunks):
    f32 = jnp.float32
    br = pl.program_id(0)                     # branch index: 0 = mel, 1 = hpcp

    def gem(y, pm, p):                        # clamp -> ^p -> 2x2 avg pool -> ^(1/p)
        y = jnp.exp(jnp.log(jnp.maximum(y, eps)) * p)
        pooled = jnp.dot(pm, y, preferred_element_type=f32)
        return jnp.exp(jnp.log(pooled) / p)

    def conv64(a, s_ref, w_ref, b_ref):       # 3x3 conv (64->64) as 9 shifted matmuls
        acc = None
        for tap in range(9):
            xs = jnp.dot(s_ref[tap], a, preferred_element_type=f32)   # shifted+padded input
            t = jnp.dot(xs, w_ref[tap], preferred_element_type=f32)
            acc = t if acc is None else acc + t
        return acc + b_ref[...]

    # ---- stage 0: Conv(1 -> 64) + BN(folded) + ReLU + residual + GeM --------
    xc = xcol0_ref[...]                                          # (H*W, 9), centre tap first
    y0 = jnp.dot(xc, w0_ref[...], preferred_element_type=f32) + b0_ref[...]
    y0 = jnp.maximum(y0, 0.0) + xc[:, 0:1]                       # residual broadcasts 1 -> 64 ch
    a1 = gem(y0, pm0_ref[...], pgem_ref[br, 0])                  # (H*W/4, 64)

    # ---- stage 1: Conv(64 -> 64) + BN + ReLU + residual + GeM ---------------
    y1 = jnp.maximum(conv64(a1, s1_ref, w1_ref, b1_ref), 0.0) + a1
    a2 = gem(y1, pm1_ref[...], pgem_ref[br, 1])                  # (H*W/16, 64)

    # ---- stage 2: pooled in height chunks so the GRU projection below needs
    #      only contiguous, already-chunked operands (no value slicing) -------
    y2 = jnp.maximum(conv64(a2, s2_ref, w2_ref, b2_ref), 0.0) + a2
    p2 = pgem_ref[br, 2]
    y2p = jnp.exp(jnp.log(jnp.maximum(y2, eps)) * p2)
    a3 = [jnp.exp(jnp.log(jnp.dot(pm2_ref[h], y2p, preferred_element_type=f32)) / p2)
          for h in range(n_hchunks)]                             # n_hchunks x (Wf, 64)

    # ---- GRU input projection, hoisted out of the recurrence ----------------
    #   seq[t, h*64 + c] = a3[h][t, c];   gi[dir] = seq @ W_ih[dir] + b_ih[dir]
    for dr in range(2):
        gi = jnp.dot(a3[0], wih_ref[dr, 0:64, :], preferred_element_type=f32)
        for h in range(1, n_hchunks):
            gi = gi + jnp.dot(a3[h], wih_ref[dr, h * 64:(h + 1) * 64, :],
                              preferred_element_type=f32)
        gi_ref[dr] = gi + bih_ref[dr]


def _pool_matrix(H, W):
    """(Ho*Wo, H*W) matrix implementing 2x2/stride-2 average pooling on flat spatial."""
    Ho, Wo = H // 2, W // 2
    r = jnp.arange(H * W)
    o = jnp.arange(Ho * Wo)
    m = (((r[None, :] // W) // 2 == o[:, None] // Wo) &
         ((r[None, :] % W) // 2 == o[:, None] % Wo))
    return m.astype(jnp.float32) * 0.25


def _shift_matrices(H, W):
    """(9, H*W, H*W) matrices: S_tap @ x == 3x3-tap shifted x with zero padding."""
    hw = H * W
    r = jnp.arange(hw)
    h, w = r // W, r % W
    mats = []
    for dh in (-1, 0, 1):
        for dw in (-1, 0, 1):
            sh, sw = h + dh, w + dw
            valid = (sh >= 0) & (sh < H) & (sw >= 0) & (sw < W)
            src = sh * W + sw
            mats.append(((r[None, :] == src[:, None]) & valid[:, None]).astype(jnp.float32))
    return jnp.stack(mats)


def _im2col_1ch(x):
    """x: (N, H, W) single channel -> (N, H*W, 9) patches, centre tap first."""
    N, H, W = x.shape
    xp = jnp.pad(x, ((0, 0), (1, 1), (1, 1)))
    taps = [(kh, kw) for kh in range(3) for kw in range(3)]
    taps = [taps[i] for i in _CENTER_FIRST]
    cols = [xp[:, kh:kh + H, kw:kw + W].reshape(N, H * W) for kh, kw in taps]
    return jnp.stack(cols, axis=-1)


def conv_stack(xin, prm, d):
    """xin: (2, B, H, W) branch-stacked single-channel inputs -> gi (2, B, 2, W//8, 3d)."""
    nbr, B, H, W = xin.shape
    assert H % 8 == 0 and W % 8 == 0
    HW0, HW1, HW2 = H * W, (H * W) // 4, (H * W) // 16
    Hf, Wf = H // 8, W // 8
    feat = 64 * Hf

    xcol0 = _im2col_1ch(xin.reshape(nbr * B, H, W)).reshape(nbr, B, HW0, 9)
    s1 = _shift_matrices(H // 2, W // 2)
    s2 = _shift_matrices(H // 4, W // 4)
    pm0 = _pool_matrix(H, W)
    pm1 = _pool_matrix(H // 2, W // 2)
    pm2 = _pool_matrix(H // 4, W // 4).reshape(Hf, Wf, HW2)

    kern = functools.partial(conv_stack_kernel, eps=1e-6, n_hchunks=Hf)
    return pl.pallas_call(
        kern,
        out_shape=jax.ShapeDtypeStruct((nbr, B, 2, Wf, 3 * d), jnp.float32),
        grid=(nbr, B),
        in_specs=[
            pl.BlockSpec(memory_space=pltpu.MemorySpace.SMEM),               # GeM p, (2, 3)
            pl.BlockSpec((None, None, HW0, 9), lambda i, j: (i, j, 0, 0)),   # xcol0
            pl.BlockSpec((None, 9, 64), lambda i, j: (i, 0, 0)),             # w0 (folded BN)
            pl.BlockSpec((None, 1, 64), lambda i, j: (i, 0, 0)),             # b0
            pl.BlockSpec((None, 9, 64, 64), lambda i, j: (i, 0, 0, 0)),      # w1
            pl.BlockSpec((None, 1, 64), lambda i, j: (i, 0, 0)),             # b1
            pl.BlockSpec((None, 9, 64, 64), lambda i, j: (i, 0, 0, 0)),      # w2
            pl.BlockSpec((None, 1, 64), lambda i, j: (i, 0, 0)),             # b2
            pl.BlockSpec((9, HW1, HW1), lambda i, j: (0, 0, 0)),             # shift mats L1
            pl.BlockSpec((9, HW2, HW2), lambda i, j: (0, 0, 0)),             # shift mats L2
            pl.BlockSpec((HW1, HW0), lambda i, j: (0, 0)),                   # pool mat L0
            pl.BlockSpec((HW2, HW1), lambda i, j: (0, 0)),                   # pool mat L1
            pl.BlockSpec((Hf, Wf, HW2), lambda i, j: (0, 0, 0)),             # pool mat L2 (chunked)
            pl.BlockSpec((None, 2, feat, 3 * d), lambda i, j: (i, 0, 0, 0)), # W_ih (fwd/bwd)
            pl.BlockSpec((None, 2, 1, 3 * d), lambda i, j: (i, 0, 0, 0)),    # b_ih (fwd/bwd)
        ],
        out_specs=pl.BlockSpec((None, None, 2, Wf, 3 * d),
                               lambda i, j: (i, j, 0, 0, 0)),
        compiler_params=pltpu.CompilerParams(
            dimension_semantics=("parallel", "parallel")),
    )(prm['pgem'], xcol0, prm['w0'], prm['b0'], prm['w1'], prm['b1'],
      prm['w2'], prm['b2'], s1, s2, pm0, pm1, pm2, prm['wih'], prm['bih'])


# --------------------------------------------------------------------------
# Kernel B: GRU recurrence.  Grid = (branch, direction); the input gates are
# precomputed in kernel A, only h @ W_hh remains in the (unrolled) time loop.
# --------------------------------------------------------------------------
def gru_kernel(gi_ref, whh_ref, bhh_ref, h_ref, *, T, d):
    f32 = jnp.float32
    bwd = pl.program_id(1).astype(f32)             # 1.0 for the backward direction
    gi = gi_ref[...]                               # (B, T, 3d) precomputed input gates
    whh = whh_ref[...]                             # (d, 3d)
    bhh = bhh_ref[...]                             # (1, 3d)
    h = jnp.zeros((gi.shape[0], d), f32)
    for t in range(T):                             # unrolled: T is small and static
        gx = gi[:, t, :] * (1.0 - bwd) + gi[:, T - 1 - t, :] * bwd
        gh = jnp.dot(h, whh, preferred_element_type=f32) + bhh
        r = jax.nn.sigmoid(gx[:, 0:d] + gh[:, 0:d])
        z = jax.nn.sigmoid(gx[:, d:2 * d] + gh[:, d:2 * d])
        n = jnp.tanh(gx[:, 2 * d:] + r * gh[:, 2 * d:])
        h = (1.0 - z) * n + z * h
    h_ref[...] = h


def gru(gi, whh, bhh, d):
    nbr, B, _, T, _ = gi.shape
    kern = functools.partial(gru_kernel, T=T, d=d)
    return pl.pallas_call(
        kern,
        out_shape=jax.ShapeDtypeStruct((nbr, 2, B, d), jnp.float32),
        grid=(nbr, 2),
        in_specs=[
            pl.BlockSpec((None, B, None, T, 3 * d), lambda i, k: (i, 0, k, 0, 0)),
            pl.BlockSpec((None, None, d, 3 * d), lambda i, k: (i, k, 0, 0)),
            pl.BlockSpec((None, None, 1, 3 * d), lambda i, k: (i, k, 0, 0)),
        ],
        out_specs=pl.BlockSpec((None, None, B, d), lambda i, k: (i, k, 0, 0)),
        compiler_params=pltpu.CompilerParams(
            dimension_semantics=("parallel", "parallel")),
    )(gi, whh, bhh)


# --------------------------------------------------------------------------
# Kernel C: fused MLP head (per-branch Linear(512,d)+ReLU, combined_extractor,
# extractor).  Concats are split matmuls; everything stays in VMEM.
# --------------------------------------------------------------------------
def head_kernel(h_ref, wlin_ref, blin_ref,
                wc1a_ref, wc1b_ref, bc1_ref, wc2_ref, bc2_ref,
                we1a_ref, we1b_ref, we1c_ref, be1_ref, we2_ref, be2_ref,
                out_ref):
    dot = lambda a, b: jnp.dot(a, b, preferred_element_type=jnp.float32)
    z = []
    for br in range(2):                                    # Linear(512, d) + ReLU per branch
        zb = (dot(h_ref[br, 0], wlin_ref[br, 0]) +         # forward-direction half
              dot(h_ref[br, 1], wlin_ref[br, 1]) +         # backward-direction half
              blin_ref[br])
        z.append(jnp.maximum(zb, 0.0))
    z_mel, z_hpcp = z
    ch = jnp.maximum(dot(z_mel, wc1a_ref[...]) + dot(z_hpcp, wc1b_ref[...]) + bc1_ref[...], 0.0)
    pred_comb = jax.nn.sigmoid(dot(ch, wc2_ref[...]) + bc2_ref[...])
    eh = jnp.maximum(dot(z_mel, we1a_ref[...]) + dot(z_hpcp, we1b_ref[...]) +
                     dot(pred_comb, we1c_ref[...]) + be1_ref[...], 0.0)
    out_ref[...] = jax.nn.sigmoid(dot(eh, we2_ref[...]) + be2_ref[...])


def head(h_all, prm, d, num_class):
    hd = prm['head']
    args = (h_all, prm['lin_w'], prm['lin_b'],
            hd['c1_w'][:d], hd['c1_w'][d:], hd['c1_b'].reshape(1, -1),
            hd['c2_w'], hd['c2_b'].reshape(1, -1),
            hd['e1_w'][:d], hd['e1_w'][d:2 * d], hd['e1_w'][2 * d:],
            hd['e1_b'].reshape(1, -1), hd['e2_w'], hd['e2_b'].reshape(1, -1))
    B = h_all.shape[2]

    def full(a):
        nd = a.ndim
        return pl.BlockSpec(a.shape, lambda i, _n=nd: (0,) * _n)

    return pl.pallas_call(
        head_kernel,
        out_shape=jax.ShapeDtypeStruct((B, num_class), jnp.float32),
        grid=(1,),
        in_specs=[full(a) for a in args],
        out_specs=pl.BlockSpec((B, num_class), lambda i: (0, 0)),
        compiler_params=pltpu.CompilerParams(dimension_semantics=("arbitrary",)),
    )(*args)


# --------------------------------------------------------------------------
# Full forward (JAX glue around the three Pallas kernels)
# --------------------------------------------------------------------------
def hpcp_forward(x, x_hpcp, prm, *, d, num_class):
    assert x.shape == x_hpcp.shape            # stacked-branch fast path (n_mels == n_hpcp)
    xin = jnp.stack([x[:, 0], x_hpcp[:, 0]], axis=0).astype(jnp.float32)   # (2, B, H, W)
    gi = conv_stack(xin, prm, d)              # (2, B, 2, W//8, 3d)
    h = gru(gi, prm['whh'], prm['bhh'], d)    # (2, 2, B, d)  (branch, direction, batch, d)
    return head(h, prm, d, num_class)         # (B, num_class)


# --------------------------------------------------------------------------
# Deterministic parameter initialization (shapes from the module __init__)
# and one-time preparation (BN folding, tap reordering, branch stacking).
# --------------------------------------------------------------------------
def init_params(n_mels, n_hpcp, d, num_class, num_class_combined, key):
    assert n_mels == n_hpcp, "stacked-branch fast path assumes equal spectral sizes"
    keys = iter(jax.random.split(key, 256))

    def nrm(shape, scale=0.05):
        return scale * jax.random.normal(next(keys), shape, dtype=jnp.float32)

    def branch(n_freq):
        p = {}
        cin = 1
        for i in range(3):
            p[f'conv{i}_w'] = nrm((3, 3, cin, 64))
            p[f'conv{i}_b'] = nrm((64,))
            p[f'bn{i}_gamma'] = 1.0 + nrm((64,))
            p[f'bn{i}_beta'] = nrm((64,))
            p[f'bn{i}_mean'] = nrm((64,))
            p[f'bn{i}_var'] = 1.0 + jnp.abs(nrm((64,)))
            p[f'gem{i}_p'] = jnp.float32(3.0)            # GeM p (nn.Parameter init value)
            cin = 64
        feat = 64 * (n_freq // 8)
        for dr in range(2):                              # 0 = forward, 1 = backward
            p[f'wih_{dr}'] = nrm((feat, 3 * d))
            p[f'whh_{dr}'] = nrm((d, 3 * d))
            p[f'bih_{dr}'] = nrm((3 * d,))
            p[f'bhh_{dr}'] = nrm((3 * d,))
        p['lin_w'] = nrm((2 * d, d))                     # nn.Linear(512, d): requires 2*d == 512
        p['lin_b'] = nrm((d,))
        return p

    head_p = {
        'c1_w': nrm((2 * d, d)), 'c1_b': nrm((d,)),
        'c2_w': nrm((d, num_class_combined)), 'c2_b': nrm((num_class_combined,)),
        'e1_w': nrm((2 * d + num_class_combined, d)), 'e1_b': nrm((d,)),
        'e2_w': nrm((d, num_class)), 'e2_b': nrm((num_class,)),
    }
    return [branch(n_mels), branch(n_hpcp)], head_p


def prepare_params(raw_branches, head_p, d):
    def fold(p, i):                                      # BN fold (inference mode)
        scale = p[f'bn{i}_gamma'] / jnp.sqrt(p[f'bn{i}_var'] + 1e-5)
        w = p[f'conv{i}_w'] * scale[None, None, None, :]
        b = ((p[f'conv{i}_b'] - p[f'bn{i}_mean']) * scale + p[f'bn{i}_beta']).reshape(1, 64)
        return w, b

    order = jnp.array(_CENTER_FIRST)
    w0, b0, w1, b1, w2, b2, pg = [], [], [], [], [], [], []
    wih, bih, whh, bhh, lw, lb = [], [], [], [], [], []
    for p in raw_branches:
        wa, ba = fold(p, 0)
        w0.append(wa.reshape(9, 64)[order]); b0.append(ba)
        wa, ba = fold(p, 1); w1.append(wa.reshape(9, 64, 64)); b1.append(ba)
        wa, ba = fold(p, 2); w2.append(wa.reshape(9, 64, 64)); b2.append(ba)
        pg.append(jnp.stack([p['gem0_p'], p['gem1_p'], p['gem2_p']]))
        wih.append(jnp.stack([p['wih_0'], p['wih_1']]))
        bih.append(jnp.stack([p['bih_0'].reshape(1, -1), p['bih_1'].reshape(1, -1)]))
        whh.append(jnp.stack([p['whh_0'], p['whh_1']]))
        bhh.append(jnp.stack([p['bhh_0'].reshape(1, -1), p['bhh_1'].reshape(1, -1)]))
        lw.append(jnp.stack([p['lin_w'][:d], p['lin_w'][d:]]))
        lb.append(p['lin_b'].reshape(1, -1))
    st = lambda xs: jnp.stack(xs, axis=0)
    return {'pgem': st(pg), 'w0': st(w0), 'b0': st(b0), 'w1': st(w1), 'b1': st(b1),
            'w2': st(w2), 'b2': st(b2), 'wih': st(wih), 'bih': st(bih),
            'whh': st(whh), 'bhh': st(bhh), 'lin_w': st(lw), 'lin_b': st(lb),
            'head': head_p}


if __name__ == "__main__":
    # d must be 256: CRNNBlock applies nn.Linear(512, d) to the (B, 2*d)
    # bidirectional GRU state, so 2*d == 512.
    n_mels, n_hpcp, d = 16, 16, 256
    num_class, num_class_combined = 8, 19
    B, T = 2, 16

    key = jax.random.PRNGKey(0)
    kx, kh, kp = jax.random.split(key, 3)
    x = jax.random.normal(kx, (B, 1, n_mels, T), dtype=jnp.float32)       # NCHW
    x_hpcp = jax.random.normal(kh, (B, 1, n_hpcp, T), dtype=jnp.float32)  # NCHW

    raw, head_raw = init_params(n_mels, n_hpcp, d, num_class, num_class_combined, kp)
    prm = prepare_params(raw, head_raw, d)

    fwd = jax.jit(functools.partial(hpcp_forward, d=d, num_class=num_class))
    pred = jax.block_until_ready(fwd(x, x_hpcp, prm))
    assert pred.shape == (B, num_class), pred.shape
    assert bool(jnp.all(jnp.isfinite(pred)))
    print("KERNEL_OK")
</pallas_src>

<mosaic_0001>
module attributes {stable_mosaic.version = 11 : i64} {
  func.func @gru_kernel(%arg0: i32, %arg1: i32, %arg2: memref<1x2x1x2x768xf32, #tpu.memory_space<vmem>>, %arg3: memref<1x1x256x768xf32, #tpu.memory_space<vmem>>, %arg4: memref<1x1x1x768xf32, #tpu.memory_space<vmem>>, %arg5: memref<1x1x2x256xf32, #tpu.memory_space<vmem>>) attributes {dimension_semantics = [#tpu.dimension_semantics<parallel>, #tpu.dimension_semantics<parallel>], iteration_bounds = array<i64: 2, 2>, scalar_prefetch = 0 : i64, scratch_operands = 0 : i64, tpu.core_type = #tpu.core_type<tc>, window_params = [{transform_indices = @transform_0, window_bounds = array<i64: 1, 2, 1, 2, 768>}, {transform_indices = @transform_1, window_bounds = array<i64: 1, 1, 256, 768>}, {transform_indices = @transform_2, window_bounds = array<i64: 1, 1, 1, 768>}, {transform_indices = @transform_3, window_bounds = array<i64: 1, 1, 2, 256>}]} {
    %0 = arith.sitofp %arg1 : i32 to f32
    %c0 = arith.constant 0 : index
    %c0_0 = arith.constant 0 : index
    %c0_1 = arith.constant 0 : index
    %c0_2 = arith.constant 0 : index
    %c0_3 = arith.constant 0 : index
    %1 = vector.load %arg2[%c0, %c0_0, %c0_1, %c0_2, %c0_3] : memref<1x2x1x2x768xf32, #tpu.memory_space<vmem>>, vector<1x2x1x2x768xf32>
    %2 = vector.shape_cast %1 : vector<1x2x1x2x768xf32> to vector<2x2x768xf32>
    %c0_4 = arith.constant 0 : index
    %c0_5 = arith.constant 0 : index
    %c0_6 = arith.constant 0 : index
    %c0_7 = arith.constant 0 : index
    %3 = vector.load %arg3[%c0_4, %c0_5, %c0_6, %c0_7] : memref<1x1x256x768xf32, #tpu.memory_space<vmem>>, vector<1x1x256x768xf32>
    %4 = vector.shape_cast %3 : vector<1x1x256x768xf32> to vector<256x768xf32>
    %c0_8 = arith.constant 0 : index
    %c0_9 = arith.constant 0 : index
    %c0_10 = arith.constant 0 : index
    %c0_11 = arith.constant 0 : index
    %5 = vector.load %arg4[%c0_8, %c0_9, %c0_10, %c0_11] : memref<1x1x1x768xf32, #tpu.memory_space<vmem>>, vector<1x1x1x768xf32>
    %6 = vector.shape_cast %5 : vector<1x1x1x768xf32> to vector<1x768xf32>
    %cst = arith.constant 0.000000e+00 : f32
    %7 = vector.broadcast %cst : f32 to vector<2x256xf32>
    %8 = vector.extract_strided_slice %2 {offsets = [0, 0, 0], sizes = [2, 1, 768], strides = [1, 1, 1]} : vector<2x2x768xf32> to vector<2x1x768xf32>
    %9 = vector.shape_cast %8 : vector<2x1x768xf32> to vector<2x768xf32>
    %cst_12 = arith.constant 1.000000e+00 : f32
    %10 = arith.subf %cst_12, %0 : f32
    %11 = vector.broadcast %10 : f32 to vector<2x768xf32>
    %12 = arith.mulf %9, %11 : vector<2x768xf32>
    %13 = vector.extract_strided_slice %2 {offsets = [0, 1, 0], sizes = [2, 1, 768], strides = [1, 1, 1]} : vector<2x2x768xf32> to vector<2x1x768xf32>
    %14 = vector.shape_cast %13 : vector<2x1x768xf32> to vector<2x768xf32>
    %15 = vector.broadcast %0 : f32 to vector<2x768xf32>
    %16 = arith.mulf %14, %15 : vector<2x768xf32>
    %17 = arith.addf %12, %16 : vector<2x768xf32>
    %cst_13 = arith.constant dense<0.000000e+00> : vector<2x768xf32>
    %18 = tpu.matmul %7, %4, %cst_13 {dimension_numbers = #tpu.dot_dimension_numbers<[1], [0], [0], [1], [0, 0, 1, 1], [], []>} : vector<2x256xf32>, vector<256x768xf32>, vector<2x768xf32> -> vector<2x768xf32>
    %19 = vector.broadcast %6 : vector<1x768xf32> to vector<2x768xf32>
    %20 = arith.addf %18, %19 : vector<2x768xf32>
    %21 = vector.extract_strided_slice %17 {offsets = [0, 0], sizes = [2, 256], strides = [1, 1]} : vector<2x768xf32> to vector<2x256xf32>
    %22 = vector.extract_strided_slice %20 {offsets = [0, 0], sizes = [2, 256], strides = [1, 1]} : vector<2x768xf32> to vector<2x256xf32>
    %23 = arith.addf %21, %22 : vector<2x256xf32>
    %24 = arith.negf %23 : vector<2x256xf32>
    %25 = math.exp %24 : vector<2x256xf32>
    %cst_14 = arith.constant 1.000000e+00 : f32
    %26 = vector.broadcast %cst_14 : f32 to vector<2x256xf32>
    %27 = arith.addf %26, %25 : vector<2x256xf32>
    %28 = arith.divf %26, %27 : vector<2x256xf32>
    %29 = vector.extract_strided_slice %17 {offsets = [0, 256], sizes = [2, 256], strides = [1, 1]} : vector<2x768xf32> to vector<2x256xf32>
    %30 = vector.extract_strided_slice %20 {offsets = [0, 256], sizes = [2, 256], strides = [1, 1]} : vector<2x768xf32> to vector<2x256xf32>
    %31 = arith.addf %29, %30 : vector<2x256xf32>
    %32 = arith.negf %31 : vector<2x256xf32>
    %33 = math.exp %32 : vector<2x256xf32>
    %cst_15 = arith.constant 1.000000e+00 : f32
    %34 = vector.broadcast %cst_15 : f32 to vector<2x256xf32>
    %35 = arith.addf %34, %33 : vector<2x256xf32>
    %36 = arith.divf %34, %35 : vector<2x256xf32>
    %37 = vector.extract_strided_slice %17 {offsets = [0, 512], sizes = [2, 256], strides = [1, 1]} : vector<2x768xf32> to vector<2x256xf32>
    %38 = vector.extract_strided_slice %20 {offsets = [0, 512], sizes = [2, 256], strides = [1, 1]} : vector<2x768xf32> to vector<2x256xf32>
    %39 = arith.mulf %28, %38 : vector<2x256xf32>
    %40 = arith.addf %37, %39 : vector<2x256xf32>
    %41 = math.tanh %40 : vector<2x256xf32>
    %cst_16 = arith.constant 1.000000e+00 : f32
    %42 = vector.broadcast %cst_16 : f32 to vector<2x256xf32>
    %43 = arith.subf %42, %36 : vector<2x256xf32>
    %44 = arith.mulf %43, %41 : vector<2x256xf32>
    %45 = arith.mulf %36, %7 : vector<2x256xf32>
    %46 = arith.addf %44, %45 : vector<2x256xf32>
    %47 = vector.extract_strided_slice %2 {offsets = [0, 1, 0], sizes = [2, 1, 768], strides = [1, 1, 1]} : vector<2x2x768xf32> to vector<2x1x768xf32>
    %48 = vector.shape_cast %47 : vector<2x1x768xf32> to vector<2x768xf32>
    %cst_17 = arith.constant 1.000000e+00 : f32
    %49 = arith.subf %cst_17, %0 : f32
    %50 = vector.broadcast %49 : f32 to vector<2x768xf32>
    %51 = arith.mulf %48, %50 : vector<2x768xf32>
    %52 = vector.extract_strided_slice %2 {offsets = [0, 0, 0], sizes = [2, 1, 768], strides = [1, 1, 1]} : vector<2x2x768xf32> to vector<2x1x768xf32>
    %53 = vector.shape_cast %52 : vector<2x1x768xf32> to vector<2x768xf32>
    %54 = vector.broadcast %0 : f32 to vector<2x768xf32>
    %55 = arith.mulf %53, %54 : vector<2x768xf32>
    %56 = arith.addf %51, %55 : vector<2x768xf32>
    %cst_18 = arith.constant dense<0.000000e+00> : vector<2x768xf32>
    %57 = tpu.matmul %46, %4, %cst_18 {dimension_numbers = #tpu.dot_dimension_numbers<[1], [0], [0], [1], [0, 0, 1, 1], [], []>} : vector<2x256xf32>, vector<256x768xf32>, vector<2x768xf32> -> vector<2x768xf32>
    %58 = vector.broadcast %6 : vector<1x768xf32> to vector<2x768xf32>
    %59 = arith.addf %57, %58 : vector<2x768xf32>
    %60 = vector.extract_strided_slice %56 {offsets = [0, 0], sizes = [2, 256], strides = [1, 1]} : vector<2x768xf32> to vector<2x256xf32>
    %61 = vector.extract_strided_slice %59 {offsets = [0, 0], sizes = [2, 256], strides = [1, 1]} : vector<2x768xf32> to vector<2x256xf32>
    %62 = arith.addf %60, %61 : vector<2x256xf32>
    %63 = arith.negf %62 : vector<2x256xf32>
    %64 = math.exp %63 : vector<2x256xf32>
    %cst_19 = arith.constant 1.000000e+00 : f32
    %65 = vector.broadcast %cst_19 : f32 to vector<2x256xf32>
    %66 = arith.addf %65, %64 : vector<2x256xf32>
    %67 = arith.divf %65, %66 : vector<2x256xf32>
    %68 = vector.extract_strided_slice %56 {offsets = [0, 256], sizes = [2, 256], strides = [1, 1]} : vector<2x768xf32> to vector<2x256xf32>
    %69 = vector.extract_strided_slice %59 {offsets = [0, 256], sizes = [2, 256], strides = [1, 1]} : vector<2x768xf32> to vector<2x256xf32>
    %70 = arith.addf %68, %69 : vector<2x256xf32>
    %71 = arith.negf %70 : vector<2x256xf32>
    %72 = math.exp %71 : vector<2x256xf32>
    %cst_20 = arith.constant 1.000000e+00 : f32
    %73 = vector.broadcast %cst_20 : f32 to vector<2x256xf32>
    %74 = arith.addf %73, %72 : vector<2x256xf32>
    %75 = arith.divf %73, %74 : vector<2x256xf32>
    %76 = vector.extract_strided_slice %56 {offsets = [0, 512], sizes = [2, 256], strides = [1, 1]} : vector<2x768xf32> to vector<2x256xf32>
    %77 = vector.extract_strided_slice %59 {offsets = [0, 512], sizes = [2, 256], strides = [1, 1]} : vector<2x768xf32> to vector<2x256xf32>
    %78 = arith.mulf %67, %77 : vector<2x256xf32>
    %79 = arith.addf %76, %78 : vector<2x256xf32>
    %80 = math.tanh %79 : vector<2x256xf32>
    %cst_21 = arith.constant 1.000000e+00 : f32
    %81 = vector.broadcast %cst_21 : f32 to vector<2x256xf32>
    %82 = arith.subf %81, %75 : vector<2x256xf32>
    %83 = arith.mulf %82, %80 : vector<2x256xf32>
    %84 = arith.mulf %75, %46 : vector<2x256xf32>
    %85 = arith.addf %83, %84 : vector<2x256xf32>
    %c0_22 = arith.constant 0 : index
    %c0_23 = arith.constant 0 : index
    %c0_24 = arith.constant 0 : index
    %c0_25 = arith.constant 0 : index
    %86 = vector.load %arg5[%c0_22, %c0_23, %c0_24, %c0_25] : memref<1x1x2x256xf32, #tpu.memory_space<vmem>>, vector<1x1x2x256xf32>
    %87 = vector.shape_cast %86 : vector<1x1x2x256xf32> to vector<2x256xf32>
    %88 = vector.shape_cast %85 : vector<2x256xf32> to vector<1x1x2x256xf32>
    tpu.vector_store %arg5[%c0_22, %c0_23, %c0_24, %c0_25], %88 {strides = array<i32>} : memref<1x1x2x256xf32, #tpu.memory_space<vmem>>, vector<1x1x2x256xf32>,
    return
  }
  func.func @transform_0(%arg0: i32, %arg1: i32) -> (i32, i32, i32, i32, i32) {
    %c0_i32 = arith.constant 0 : i32
    %c0_i32_0 = arith.constant 0 : i32
    %c0_i32_1 = arith.constant 0 : i32
    %c0_i32_2 = arith.constant 0 : i32
    return %arg0, %c0_i32, %arg1, %c0_i32_0, %c0_i32_1 : i32, i32, i32, i32, i32
  }
  func.func @transform_1(%arg0: i32, %arg1: i32) -> (i32, i32, i32, i32) {
    %c0_i32 = arith.constant 0 : i32
    %c0_i32_0 = arith.constant 0 : i32
    %c0_i32_1 = arith.constant 0 : i32
    return %arg0, %arg1, %c0_i32, %c0_i32_0 : i32, i32, i32, i32
  }
  func.func @transform_2(%arg0: i32, %arg1: i32) -> (i32, i32, i32, i32) {
    %c0_i32 = arith.constant 0 : i32
    %c0_i32_0 = arith.constant 0 : i32
    %c0_i32_1 = arith.constant 0 : i32
    return %arg0, %arg1, %c0_i32, %c0_i32_0 : i32, i32, i32, i32
  }
  func.func @transform_3(%arg0: i32, %arg1: i32) -> (i32, i32, i32, i32) {
    %c0_i32 = arith.constant 0 : i32
    %c0_i32_0 = arith.constant 0 : i32
    %c0_i32_1 = arith.constant 0 : i32
    return %arg0, %arg1, %c0_i32, %c0_i32_0 : i32, i32, i32, i32
  }
}

module attributes {stable_mosaic.version = 11 : i64} {
  func.func @conv_stack_kernel(%arg0: i32, %arg1: i32, %arg2: memref<2x3xf32, #tpu.memory_space<smem>>, %arg3: memref<1x1x256x9xf32, #tpu.memory_space<vmem>>, %arg4: memref<1x9x64xf32, #tpu.memory_space<vmem>>, %arg5: memref<1x1x64xf32, #tpu.memory_space<vmem>>, %arg6: memref<1x9x64x64xf32, #tpu.memory_space<vmem>>, %arg7: memref<1x1x64xf32, #tpu.memory_space<vmem>>, %arg8: memref<1x9x64x64xf32, #tpu.memory_space<vmem>>, %arg9: memref<1x1x64xf32, #tpu.memory_space<vmem>>, %arg10: memref<9x64x64xf32, #tpu.memory_space<vmem>>, %arg11: memref<9x16x16xf32, #tpu.memory_space<vmem>>, %arg12: memref<64x256xf32, #tpu.memory_space<vmem>>, %arg13: memref<16x64xf32, #tpu.memory_space<vmem>>, %arg14: memref<2x2x16xf32, #tpu.memory_space<vmem>>, %arg15: memref<1x2x128x768xf32, #tpu.memory_space<vmem>>, %arg16: memref<1x2x1x768xf32, #tpu.memory_space<vmem>>, %arg17: memref<1x1x2x2x768xf32, #tpu.memory_space<vmem>>) attributes {dimension_semantics = [#tpu.dimension_semantics<parallel>, #tpu.dimension_semantics<parallel>], iteration_bounds = array<i64: 2, 2>, scalar_prefetch = 0 : i64, scratch_operands = 0 : i64, tpu.core_type = #tpu.core_type<tc>, window_params = [{transform_indices = @transform_0, window_bounds = array<i64: 2, 3>}, {transform_indices = @transform_1, window_bounds = array<i64: 1, 1, 256, 9>}, {transform_indices = @transform_2, window_bounds = array<i64: 1, 9, 64>}, {transform_indices = @transform_3, window_bounds = array<i64: 1, 1, 64>}, {transform_indices = @transform_4, window_bounds = array<i64: 1, 9, 64, 64>}, {transform_indices = @transform_5, window_bounds = array<i64: 1, 1, 64>}, {transform_indices = @transform_6, window_bounds = array<i64: 1, 9, 64, 64>}, {transform_indices = @transform_7, window_bounds = array<i64: 1, 1, 64>}, {pipeline_mode = #tpu.pipeline_mode<synchronous>, transform_indices = @transform_8, window_bounds = array<i64: 9, 64, 64>}, {pipeline_mode = #tpu.pipeline_mode<synchronous>, transform_indices = @transform_9, window_bounds = array<i64: 9, 16, 16>}, {pipeline_mode = #tpu.pipeline_mode<synchronous>, transform_indices = @transform_10, window_bounds = array<i64: 64, 256>}, {pipeline_mode = #tpu.pipeline_mode<synchronous>, transform_indices = @transform_11, window_bounds = array<i64: 16, 64>}, {pipeline_mode = #tpu.pipeline_mode<synchronous>, transform_indices = @transform_12, window_bounds = array<i64: 2, 2, 16>}, {transform_indices = @transform_13, window_bounds = array<i64: 1, 2, 128, 768>}, {transform_indices = @transform_14, window_bounds = array<i64: 1, 2, 1, 768>}, {transform_indices = @transform_15, window_bounds = array<i64: 1, 1, 2, 2, 768>}]} {
    %c0 = arith.constant 0 : index
    %c0_0 = arith.constant 0 : index
    %c0_1 = arith.constant 0 : index
    %c0_2 = arith.constant 0 : index
    %0 = vector.load %arg3[%c0, %c0_0, %c0_1, %c0_2] : memref<1x1x256x9xf32, #tpu.memory_space<vmem>>, vector<1x1x256x9xf32>
    %1 = vector.shape_cast %0 : vector<1x1x256x9xf32> to vector<256x9xf32>
    %c0_3 = arith.constant 0 : index
    %c0_4 = arith.constant 0 : index
    %c0_5 = arith.constant 0 : index
    %2 = vector.load %arg4[%c0_3, %c0_4, %c0_5] : memref<1x9x64xf32, #tpu.memory_space<vmem>>, vector<1x9x64xf32>
    %3 = vector.shape_cast %2 : vector<1x9x64xf32> to vector<9x64xf32>
    %cst = arith.constant dense<0.000000e+00> : vector<256x64xf32>
    %4 = tpu.matmul %1, %3, %cst {dimension_numbers = #tpu.dot_dimension_numbers<[1], [0], [0], [1], [0, 0, 1, 1], [], []>} : vector<256x9xf32>, vector<9x64xf32>, vector<256x64xf32> -> vector<256x64xf32>
    %c0_6 = arith.constant 0 : index
    %c0_7 = arith.constant 0 : index
    %c0_8 = arith.constant 0 : index
    %5 = vector.load %arg5[%c0_6, %c0_7, %c0_8] : memref<1x1x64xf32, #tpu.memory_space<vmem>>, vector<1x1x64xf32>
    %6 = vector.shape_cast %5 : vector<1x1x64xf32> to vector<1x64xf32>
    %7 = vector.broadcast %6 : vector<1x64xf32> to vector<256x64xf32>
    %8 = arith.addf %4, %7 : vector<256x64xf32>
    %cst_9 = arith.constant 0.000000e+00 : f32
    %9 = vector.broadcast %cst_9 : f32 to vector<256x64xf32>
    %10 = arith.maximumf %8, %9 : vector<256x64xf32>
    %11 = vector.extract_strided_slice %1 {offsets = [0, 0], sizes = [256, 1], strides = [1, 1]} : vector<256x9xf32> to vector<256x1xf32>
    %12 = vector.broadcast %11 : vector<256x1xf32> to vector<256x64xf32>
    %13 = arith.addf %10, %12 : vector<256x64xf32>
    %c0_10 = arith.constant 0 : index
    %c0_11 = arith.constant 0 : index
    %14 = vector.load %arg12[%c0_10, %c0_11] : memref<64x256xf32, #tpu.memory_space<vmem>>, vector<64x256xf32>
    %15 = arith.index_cast %arg0 : i32 to index
    %c0_12 = arith.constant 0 : index
    %16 = memref.load %arg2[%15, %c0_12] : memref<2x3xf32, #tpu.memory_space<smem>>
    %cst_13 = arith.constant 9.99999997E-7 : f32
    %17 = vector.broadcast %cst_13 : f32 to vector<256x64xf32>
    %18 = arith.maximumf %13, %17 : vector<256x64xf32>
    %19 = math.log %18 : vector<256x64xf32>
    %20 = vector.broadcast %16 : f32 to vector<256x64xf32>
    %21 = arith.mulf %19, %20 : vector<256x64xf32>
    %22 = math.exp %21 : vector<256x64xf32>
    %cst_14 = arith.constant dense<0.000000e+00> : vector<64x64xf32>
    %23 = tpu.matmul %14, %22, %cst_14 {dimension_numbers = #tpu.dot_dimension_numbers<[1], [0], [0], [1], [0, 0, 1, 1], [], []>} : vector<64x256xf32>, vector<256x64xf32>, vector<64x64xf32> -> vector<64x64xf32>
    %24 = math.log %23 : vector<64x64xf32>
    %25 = vector.broadcast %16 : f32 to vector<64x64xf32>
    %26 = arith.divf %24, %25 : vector<64x64xf32>
    %27 = math.exp %26 : vector<64x64xf32>
    %c0_15 = arith.constant 0 : index
    %c0_16 = arith.constant 0 : index
    %c0_17 = arith.constant 0 : index
    %28 = vector.load %arg10[%c0_15, %c0_16, %c0_17] : memref<9x64x64xf32, #tpu.memory_space<vmem>>, vector<1x64x64xf32>
    %29 = vector.shape_cast %28 : vector<1x64x64xf32> to vector<64x64xf32>
    %cst_18 = arith.constant dense<0.000000e+00> : vector<64x64xf32>
    %30 = tpu.matmul %29, %27, %cst_18 {dimension_numbers = #tpu.dot_dimension_numbers<[1], [0], [0], [1], [0, 0, 1, 1], [], []>} : vector<64x64xf32>, vector<64x64xf32>, vector<64x64xf32> -> vector<64x64xf32>
    %c0_19 = arith.constant 0 : index
    %c0_20 = arith.constant 0 : index
    %c0_21 = arith.constant 0 : index
    %c0_22 = arith.constant 0 : index
    %31 = vector.load %arg6[%c0_19, %c0_20, %c0_21, %c0_22] : memref<1x9x64x64xf32, #tpu.memory_space<vmem>>, vector<1x1x64x64xf32>
    %32 = vector.shape_cast %31 : vector<1x1x64x64xf32> to vector<64x64xf32>
    %cst_23 = arith.constant dense<0.000000e+00> : vector<64x64xf32>
    %33 = tpu.matmul %30, %32, %cst_23 {dimension_numbers = #tpu.dot_dimension_numbers<[1], [0], [0], [1], [0, 0, 1, 1], [], []>} : vector<64x64xf32>, vector<64x64xf32>, vector<64x64xf32> -> vector<64x64xf32>
    %c1 = arith.constant 1 : index
    %c0_24 = arith.constant 0 : index
    %c0_25 = arith.constant 0 : index
    %34 = vector.load %arg10[%c1, %c0_24, %c0_25] : memref<9x64x64xf32, #tpu.memory_space<vmem>>, vector<1x64x64xf32>
    %35 = vector.shape_cast %34 : vector<1x64x64xf32> to vector<64x64xf32>
    %cst_26 = arith.constant dense<0.000000e+00> : vector<64x64xf32>
    %36 = tpu.matmul %35, %27, %cst_26 {dimension_numbers = #tpu.dot_dimension_numbers<[1], [0], [0], [1], [0, 0, 1, 1], [], []>} : vector<64x64xf32>, vector<64x64xf32>, vector<64x64xf32> -> vector<64x64xf32>
    %c0_27 = arith.constant 0 : index
    %c1_28 = arith.constant 1 : index
    %c0_29 = arith.constant 0 : index
    %c0_30 = arith.constant 0 : index
    %37 = vector.load %arg6[%c0_27, %c1_28, %c0_29, %c0_30] : memref<1x9x64x64xf32, #tpu.memory_space<vmem>>, vector<1x1x64x64xf32>
    %38 = vector.shape_cast %37 : vector<1x1x64x64xf32> to vector<64x64xf32>
    %cst_31 = arith.constant dense<0.000000e+00> : vector<64x64xf32>
    %39 = tpu.matmul %36, %38, %cst_31 {dimension_numbers = #tpu.dot_dimension_numbers<[1], [0], [0], [1], [0, 0, 1, 1], [], []>} : vector<64x64xf32>, vector<64x64xf32>, vector<64x64xf32> -> vector<64x64xf32>
    %40 = arith.addf %33, %39 : vector<64x64xf32>
    %c2 = arith.constant 2 : index
    %c0_32 = arith.constant 0 : index
    %c0_33 = arith.constant 0 : index
    %41 = vector.load %arg10[%c2, %c0_32, %c0_33] : memref<9x64x64xf32, #tpu.memory_space<vmem>>, vector<1x64x64xf32>
    %42 = vector.shape_cast %41 : vector<1x64x64xf32> to vector<64x64xf32>
    %cst_34 = arith.constant dense<0.000000e+00> : vector<64x64xf32>
    %43 = tpu.matmul %42, %27, %cst_34 {dimension_numbers = #tpu.dot_dimension_numbers<[1], [0], [0], [1], [0, 0, 1, 1], [], []>} : vector<64x64xf32>, vector<64x64xf32>, vector<64x64xf32> -> vector<64x64xf32>
    %c0_35 = arith.constant 0 : index
    %c2_36 = arith.constant 2 : index
    %c0_37 = arith.constant 0 : index
    %c0_38 = arith.constant 0 : index
    %44 = vector.load %arg6[%c0_35, %c2_36, %c0_37, %c0_38] : memref<1x9x64x64xf32, #tpu.memory_space<vmem>>, vector<1x1x64x64xf32>
    %45 = vector.shape_cast %44 : vector<1x1x64x64xf32> to vector<64x64xf32>
    %cst_39 = arith.constant dense<0.000000e+00> : vector<64x64xf32>
    %46 = tpu.matmul %43, %45, %cst_39 {dimension_numbers = #tpu.dot_dimension_numbers<[1], [0], [0], [1], [0, 0, 1, 1], [], []>} : vector<64x64xf32>, vector<64x64xf32>, vector<64x64xf32> -> vector<64x64xf32>
    %47 = arith.addf %40, %46 : vector<64x64xf32>
    %c3 = arith.constant 3 : index
    %c0_40 = arith.constant 0 : index
    %c0_41 = arith.constant 0 : index
    %48 = vector.load %arg10[%c3, %c0_40, %c0_41] : memref<9x64x64xf32, #tpu.memory_space<vmem>>, vector<1x64x64xf32>
    %49 = vector.shape_cast %48 : vector<1x64x64xf32> to vector<64x64xf32>
    %cst_42 = arith.constant dense<0.000000e+00> : vector<64x64xf32>
    %50 = tpu.matmul %49, %27, %cst_42 {dimension_numbers = #tpu.dot_dimension_numbers<[1], [0], [0], [1], [0, 0, 1, 1], [], []>} : vector<64x64xf32>, vector<64x64xf32>, vector<64x64xf32> -> vector<64x64xf32>
    %c0_43 = arith.constant 0 : index
    %c3_44 = arith.constant 3 : index
    %c0_45 = arith.constant 0 : index
    %c0_46 = arith.constant 0 : index
    %51 = vector.load %arg6[%c0_43, %c3_44, %c0_45, %c0_46] : memref<1x9x64x64xf32, #tpu.memory_space<vmem>>, vector<1x1x64x64xf32>
    %52 = vector.shape_cast %51 : vector<1x1x64x64xf32> to vector<64x64xf32>
    %cst_47 = arith.constant dense<0.000000e+00> : vector<64x64xf32>
    %53 = tpu.matmul %50, %52, %cst_47 {dimension_numbers = #tpu.dot_dimension_numbers<[1], [0], [0], [1], [0, 0, 1, 1], [], []>} : vector<64x64xf32>, vector<64x64xf32>, vector<64x64xf32> -> vector<64x64xf32>
    %54 = arith.addf %47, %53 : vector<64x64xf32>
    %c4 = arith.constant 4 : index
    %c0_48 = arith.constant 0 : index
    %c0_49 = arith.constant 0 : index
    %55 = vector.load %arg10[%c4, %c0_48, %c0_49] : memref<9x64x64xf32, #tpu.memory_space<vmem>>, vector<1x64x64xf32>
    %56 = vector.shape_cast %55 : vector<1x64x64xf32> to vector<64x64xf32>
    %cst_50 = arith.constant dense<0.000000e+00> : vector<64x64xf32>
    %57 = tpu.matmul %56, %27, %cst_50 {dimension_numbers = #tpu.dot_dimension_numbers<[1], [0], [0], [1], [0, 0, 1, 1], [], []>} : vector<64x64xf32>, vector<64x64xf32>, vector<64x64xf32> -> vector<64x64xf32>
    %c0_51 = arith.constant 0 : index
    %c4_52 = arith.constant 4 : index
    %c0_53 = arith.constant 0 : index
    %c0_54 = arith.constant 0 : index
    %58 = vector.load %arg6[%c0_51, %c4_52, %c0_53, %c0_54] : memref<1x9x64x64xf32, #tpu.memory_space<vmem>>, vector<1x1x64x64xf32>
    %59 = vector.shape_cast %58 : vector<1x1x64x64xf32> to vector<64x64xf32>
    %cst_55 = arith.constant dense<0.000000e+00> : vector<64x64xf32>
    %60 = tpu.matmul %57, %59, %cst_55 {dimension_numbers = #tpu.dot_dimension_numbers<[1], [0], [0], [1], [0, 0, 1, 1], [], []>} : vector<64x64xf32>, vector<64x64xf32>, vector<64x64xf32> -> vector<64x64xf32>
    %61 = arith.addf %54, %60 : vector<64x64xf32>
    %c5 = arith.constant 5 : index
    %c0_56 = arith.constant 0 : index
    %c0_57 = arith.constant 0 : index
    %62 = vector.load %arg10[%c5, %c0_56, %c0_57] : memref<9x64x64xf32, #tpu.memory_space<vmem>>, vector<1x64x64xf32>
    %63 = vector.shape_cast %62 : vector<1x64x64xf32> to vector<64x64xf32>
    %cst_58 = arith.constant dense<0.000000e+00> : vector<64x64xf32>
    %64 = tpu.matmul %63, %27, %cst_58 {dimension_numbers = #tpu.dot_dimension_numbers<[1], [0], [0], [1], [0, 0, 1, 1], [], []>} : vector<64x64xf32>, vector<64x64xf32>, vector<64x64xf32> -> vector<64x64xf32>
    %c0_59 = arith.constant 0 : index
    %c5_60 = arith.constant 5 : index
    %c0_61 = arith.constant 0 : index
    %c0_62 = arith.constant 0 : index
    %65 = vector.load %arg6[%c0_59, %c5_60, %c0_61, %c0_62] : memref<1x9x64x64xf32, #tpu.memory_space<vmem>>, vector<1x1x64x64xf32>
    %66 = vector.shape_cast %65 : vector<1x1x64x64xf32> to vector<64x64xf32>
    %cst_63 = arith.constant dense<0.000000e+00> : vector<64x64xf32>
    %67 = tpu.matmul %64, %66, %cst_63 {dimension_numbers = #tpu.dot_dimension_numbers<[1], [0], [0], [1], [0, 0, 1, 1], [], []>} : vector<64x64xf32>, vector<64x64xf32>, vector<64x64xf32> -> vector<64x64xf32>
    %68 = arith.addf %61, %67 : vector<64x64xf32>
    %c6 = arith.constant 6 : index
    %c0_64 = arith.constant 0 : index
    %c0_65 = arith.constant 0 : index
    %69 = vector.load %arg10[%c6, %c0_64, %c0_65] : memref<9x64x64xf32, #tpu.memory_space<vmem>>, vector<1x64x64xf32>
    %70 = vector.shape_cast %69 : vector<1x64x64xf32> to vector<64x64xf32>
    %cst_66 = arith.constant dense<0.000000e+00> : vector<64x64xf32>
    %71 = tpu.matmul %70, %27, %cst_66 {dimension_numbers = #tpu.dot_dimension_numbers<[1], [0], [0], [1], [0, 0, 1, 1], [], []>} : vector<64x64xf32>, vector<64x64xf32>, vector<64x64xf32> -> vector<64x64xf32>
    %c0_67 = arith.constant 0 : index
    %c6_68 = arith.constant 6 : index
    %c0_69 = arith.constant 0 : index
    %c0_70 = arith.constant 0 : index
    %72 = vector.load %arg6[%c0_67, %c6_68, %c0_69, %c0_70] : memref<1x9x64x64xf32, #tpu.memory_space<vmem>>, vector<1x1x64x64xf32>
    %73 = vector.shape_cast %72 : vector<1x1x64x64xf32> to vector<64x64xf32>
    %cst_71 = arith.constant dense<0.000000e+00> : vector<64x64xf32>
    %74 = tpu.matmul %71, %73, %cst_71 {dimension_numbers = #tpu.dot_dimension_numbers<[1], [0], [0], [1], [0, 0, 1, 1], [], []>} : vector<64x64xf32>, vector<64x64xf32>, vector<64x64xf32> -> vector<64x64xf32>
    %75 = arith.addf %68, %74 : vector<64x64xf32>
    %c7 = arith.constant 7 : index
    %c0_72 = arith.constant 0 : index
    %c0_73 = arith.constant 0 : index
    %76 = vector.load %arg10[%c7, %c0_72, %c0_73] : memref<9x64x64xf32, #tpu.memory_space<vmem>>, vector<1x64x64xf32>
    %77 = vector.shape_cast %76 : vector<1x64x64xf32> to vector<64x64xf32>
    %cst_74 = arith.constant dense<0.000000e+00> : vector<64x64xf32>
    %78 = tpu.matmul %77, %27, %cst_74 {dimension_numbers = #tpu.dot_dimension_numbers<[1], [0], [0], [1], [0, 0, 1, 1], [], []>} : vector<64x64xf32>, vector<64x64xf32>, vector<64x64xf32> -> vector<64x64xf32>
    %c0_75 = arith.constant 0 : index
    %c7_76 = arith.constant 7 : index
    %c0_77 = arith.constant 0 : index
    %c0_78 = arith.constant 0 : index
    %79 = vector.load %arg6[%c0_75, %c7_76, %c0_77, %c0_78] : memref<1x9x64x64xf32, #tpu.memory_space<vmem>>, vector<1x1x64x64xf32>
    %80 = vector.shape_cast %79 : vector<1x1x64x64xf32> to vector<64x64xf32>
    %cst_79 = arith.constant dense<0.000000e+00> : vector<64x64xf32>
    %81 = tpu.matmul %78, %80, %cst_79 {dimension_numbers = #tpu.dot_dimension_numbers<[1], [0], [0], [1], [0, 0, 1, 1], [], []>} : vector<64x64xf32>, vector<64x64xf32>, vector<64x64xf32> -> vector<64x64xf32>
    %82 = arith.addf %75, %81 : vector<64x64xf32>
    %c8 = arith.constant 8 : index
    %c0_80 = arith.constant 0 : index
    %c0_81 = arith.constant 0 : index
    %83 = vector.load %arg10[%c8, %c0_80, %c0_81] : memref<9x64x64xf32, #tpu.memory_space<vmem>>, vector<1x64x64xf32>
    %84 = vector.shape_cast %83 : vector<1x64x64xf32> to vector<64x64xf32>
    %cst_82 = arith.constant dense<0.000000e+00> : vector<64x64xf32>
    %85 = tpu.matmul %84, %27, %cst_82 {dimension_numbers = #tpu.dot_dimension_numbers<[1], [0], [0], [1], [0, 0, 1, 1], [], []>} : vector<64x64xf32>, vector<64x64xf32>, vector<64x64xf32> -> vector<64x64xf32>
    %c0_83 = arith.constant 0 : index
    %c8_84 = arith.constant 8 : index
    %c0_85 = arith.constant 0 : index
    %c0_86 = arith.constant 0 : index
    %86 = vector.load %arg6[%c0_83, %c8_84, %c0_85, %c0_86] : memref<1x9x64x64xf32, #tpu.memory_space<vmem>>, vector<1x1x64x64xf32>
    %87 = vector.shape_cast %86 : vector<1x1x64x64xf32> to vector<64x64xf32>
    %cst_87 = arith.constant dense<0.000000e+00> : vector<64x64xf32>
    %88 = tpu.matmul %85, %87, %cst_87 {dimension_numbers = #tpu.dot_dimension_numbers<[1], [0], [0], [1], [0, 0, 1, 1], [], []>} : vector<64x64xf32>, vector<64x64xf32>, vector<64x64xf32> -> vector<64x64xf32>
    %89 = arith.addf %82, %88 : vector<64x64xf32>
    %c0_88 = arith.constant 0 : index
    %c0_89 = arith.constant 0 : index
    %c0_90 = arith.constant 0 : index
    %90 = vector.load %arg7[%c0_88, %c0_89, %c0_90] : memref<1x1x64xf32, #tpu.memory_space<vmem>>, vector<1x1x64xf32>
    %91 = vector.shape_cast %90 : vector<1x1x64xf32> to vector<1x64xf32>
    %92 = vector.broadcast %91 : vector<1x64xf32> to vector<64x64xf32>
    %93 = arith.addf %89, %92 : vector<64x64xf32>
    %cst_91 = arith.constant 0.000000e+00 : f32
    %94 = vector.broadcast %cst_91 : f32 to vector<64x64xf32>
    %95 = arith.maximumf %93, %94 : vector<64x64xf32>
    %96 = arith.addf %95, %27 : vector<64x64xf32>
    %c0_92 = arith.constant 0 : index
    %c0_93 = arith.constant 0 : index
    %97 = vector.load %arg13[%c0_92, %c0_93] : memref<16x64xf32, #tpu.memory_space<vmem>>, vector<16x64xf32>
    %98 = arith.index_cast %arg0 : i32 to index
    %c1_94 = arith.constant 1 : index
    %99 = memref.load %arg2[%98, %c1_94] : memref<2x3xf32, #tpu.memory_space<smem>>
    %cst_95 = arith.constant 9.99999997E-7 : f32
    %100 = vector.broadcast %cst_95 : f32 to vector<64x64xf32>
    %101 = arith.maximumf %96, %100 : vector<64x64xf32>
    %102 = math.log %101 : vector<64x64xf32>
    %103 = vector.broadcast %99 : f32 to vector<64x64xf32>
    %104 = arith.mulf %102, %103 : vector<64x64xf32>
    %105 = math.exp %104 : vector<64x64xf32>
    %cst_96 = arith.constant dense<0.000000e+00> : vector<16x64xf32>
    %106 = tpu.matmul %97, %105, %cst_96 {dimension_numbers = #tpu.dot_dimension_numbers<[1], [0], [0], [1], [0, 0, 1, 1], [], []>} : vector<16x64xf32>, vector<64x64xf32>, vector<16x64xf32> -> vector<16x64xf32>
    %107 = math.log %106 : vector<16x64xf32>
    %108 = vector.broadcast %99 : f32 to vector<16x64xf32>
    %109 = arith.divf %107, %108 : vector<16x64xf32>
    %110 = math.exp %109 : vector<16x64xf32>
    %c0_97 = arith.constant 0 : index
    %c0_98 = arith.constant 0 : index
    %c0_99 = arith.constant 0 : index
    %111 = vector.load %arg11[%c0_97, %c0_98, %c0_99] : memref<9x16x16xf32, #tpu.memory_space<vmem>>, vector<1x16x16xf32>
    %112 = vector.shape_cast %111 : vector<1x16x16xf32> to vector<16x16xf32>
    %cst_100 = arith.constant dense<0.000000e+00> : vector<16x64xf32>
    %113 = tpu.matmul %112, %110, %cst_100 {dimension_numbers = #tpu.dot_dimension_numbers<[1], [0], [0], [1], [0, 0, 1, 1], [], []>} : vector<16x16xf32>, vector<16x64xf32>, vector<16x64xf32> -> vector<16x64xf32>
    %c0_101 = arith.constant 0 : index
    %c0_102 = arith.constant 0 : index
    %c0_103 = arith.constant 0 : index
    %c0_104 = arith.constant 0 : index
    %114 = vector.load %arg8[%c0_101, %c0_102, %c0_103, %c0_104] : memref<1x9x64x64xf32, #tpu.memory_space<vmem>>, vector<1x1x64x64xf32>
    %115 = vector.shape_cast %114 : vector<1x1x64x64xf32> to vector<64x64xf32>
    %cst_105 = arith.constant dense<0.000000e+00> : vector<16x64xf32>
    %116 = tpu.matmul %113, %115, %cst_105 {dimension_numbers = #tpu.dot_dimension_numbers<[1], [0], [0], [1], [0, 0, 1, 1], [], []>} : vector<16x64xf32>, vector<64x64xf32>, vector<16x64xf32> -> vector<16x64xf32>
    %c1_106 = arith.constant 1 : index
    %c0_107 = arith.constant 0 : index
    %c0_108 = arith.constant 0 : index
    %117 = vector.load %arg11[%c1_106, %c0_107, %c0_108] : memref<9x16x16xf32, #tpu.memory_space<vmem>>, vector<1x16x16xf32>
    %118 = vector.shape_cast %117 : vector<1x16x16xf32> to vector<16x16xf32>
    %cst_109 = arith.constant dense<0.000000e+00> : vector<16x64xf32>
    %119 = tpu.matmul %118, %110, %cst_109 {dimension_numbers = #tpu.dot_dimension_numbers<[1], [0], [0], [1], [0, 0, 1, 1], [], []>} : vector<16x16xf32>, vector<16x64xf32>, vector<16x64xf32> -> vector<16x64xf32>
    %c0_110 = arith.constant 0 : index
    %c1_111 = arith.constant 1 : index
    %c0_112 = arith.constant 0 : index
    %c0_113 = arith.constant 0 : index
    %120 = vector.load %arg8[%c0_110, %c1_111, %c0_112, %c0_113] : memref<1x9x64x64xf32, #tpu.memory_space<vmem>>, vector<1x1x64x64xf32>
    %121 = vector.shape_cast %120 : vector<1x1x64x64xf32> to vector<64x64xf32>
    %cst_114 = arith.constant dense<0.000000e+00> : vector<16x64xf32>
    %122 = tpu.matmul %119, %121, %cst_114 {dimension_numbers = #tpu.dot_dimension_numbers<[1], [0], [0], [1], [0, 0, 1, 1], [], []>} : vector<16x64xf32>, vector<64x64xf32>, vector<16x64xf32> -> vector<16x64xf32>
    %123 = arith.addf %116, %122 : vector<16x64xf32>
    %c2_115 = arith.constant 2 : index
    %c0_116 = arith.constant 0 : index
    %c0_117 = arith.constant 0 : index
    %124 = vector.load %arg11[%c2_115, %c0_116, %c0_117] : memref<9x16x16xf32, #tpu.memory_space<vmem>>, vector<1x16x16xf32>
    %125 = vector.shape_cast %124 : vector<1x16x16xf32> to vector<16x16xf32>
    %cst_118 = arith.constant dense<0.000000e+00> : vector<16x64xf32>
    %126 = tpu.matmul %125, %110, %cst_118 {dimension_numbers = #tpu.dot_dimension_numbers<[1], [0], [0], [1], [0, 0, 1, 1], [], []>} : vector<16x16xf32>, vector<16x64xf32>, vector<16x64xf32> -> vector<16x64xf32>
    %c0_119 = arith.constant 0 : index
    %c2_120 = arith.constant 2 : index
    %c0_121 = arith.constant 0 : index
    %c0_122 = arith.constant 0 : index
    %127 = vector.load %arg8[%c0_119, %c2_120, %c0_121, %c0_122] : memref<1x9x64x64xf32, #tpu.memory_space<vmem>>, vector<1x1x64x64xf32>
    %128 = vector.shape_cast %127 : vector<1x1x64x64xf32> to vector<64x64xf32>
    %cst_123 = arith.constant dense<0.000000e+00> : vector<16x64xf32>
    %129 = tpu.matmul %126, %128, %cst_123 {dimension_numbers = #tpu.dot_dimension_numbers<[1], [0], [0], [1], [0, 0, 1, 1], [], []>} : vector<16x64xf32>, vector<64x64xf32>, vector<16x64xf32> -> vector<16x64xf32>
    %130 = arith.addf %123, %129 : vector<16x64xf32>
    %c3_124 = arith.constant 3 : index
    %c0_125 = arith.constant 0 : index
    %c0_126 = arith.constant 0 : index
    %131 = vector.load %arg11[%c3_124, %c0_125, %c0_126] : memref<9x16x16xf32, #tpu.memory_space<vmem>>, vector<1x16x16xf32>
    %132 = vector.shape_cast %131 : vector<1x16x16xf32> to vector<16x16xf32>
    %cst_127 = arith.constant dense<0.000000e+00> : vector<16x64xf32>
    %133 = tpu.matmul %132, %110, %cst_127 {dimension_numbers = #tpu.dot_dimension_numbers<[1], [0], [0], [1], [0, 0, 1, 1], [], []>} : vector<16x16xf32>, vector<16x64xf32>, vector<16x64xf32> -> vector<16x64xf32>
    %c0_128 = arith.constant 0 : index
    %c3_129 = arith.constant 3 : index
    %c0_130 = arith.constant 0 : index
    %c0_131 = arith.constant 0 : index
    %134 = vector.load %arg8[%c0_128, %c3_129, %c0_130, %c0_131] : memref<1x9x64x64xf32, #tpu.memory_space<vmem>>, vector<1x1x64x64xf32>
    %135 = vector.shape_cast %134 : vector<1x1x64x64xf32> to vector<64x64xf32>
    %cst_132 = arith.constant dense<0.000000e+00> : vector<16x64xf32>
    %136 = tpu.matmul %133, %135, %cst_132 {dimension_numbers = #tpu.dot_dimension_numbers<[1], [0], [0], [1], [0, 0, 1, 1], [], []>} : vector<16x64xf32>, vector<64x64xf32>, vector<16x64xf32> -> vector<16x64xf32>
    %137 = arith.addf %130, %136 : vector<16x64xf32>
    %c4_133 = arith.constant 4 : index
    %c0_134 = arith.constant 0 : index
    %c0_135 = arith.constant 0 : index
    %138 = vector.load %arg11[%c4_133, %c0_134, %c0_135] : memref<9x16x16xf32, #tpu.memory_space<vmem>>, vector<1x16x16xf32>
    %139 = vector.shape_cast %138 : vector<1x16x16xf32> to vector<16x16xf32>
    %cst_136 = arith.constant dense<0.000000e+00> : vector<16x64xf32>
    %140 = tpu.matmul %139, %110, %cst_136 {dimension_numbers = #tpu.dot_dimension_numbers<[1], [0], [0], [1], [0, 0, 1, 1], [], []>} : vector<16x16xf32>, vector<16x64xf32>, vector<16x64xf32> -> vector<16x64xf32>
    %c0_137 = arith.constant 0 : index
    %c4_138 = arith.constant 4 : index
    %c0_139 = arith.constant 0 : index
    %c0_140 = arith.constant 0 : index
    %141 = vector.load %arg8[%c0_137, %c4_138, %c0_139, %c0_140] : memref<1x9x64x64xf32, #tpu.memory_space<vmem>>, vector<1x1x64x64xf32>
    %142 = vector.shape_cast %141 : vector<1x1x64x64xf32> to vector<64x64xf32>
    %cst_141 = arith.constant dense<0.000000e+00> : vector<16x64xf32>
    %143 = tpu.matmul %140, %142, %cst_141 {dimension_numbers = #tpu.dot_dimension_numbers<[1], [0], [0], [1], [0, 0, 1, 1], [], []>} : vector<16x64xf32>, vector<64x64xf32>, vector<16x64xf32> -> vector<16x64xf32>
    %144 = arith.addf %137, %143 : vector<16x64xf32>
    %c5_142 = arith.constant 5 : index
    %c0_143 = arith.constant 0 : index
    %c0_144 = arith.constant 0 : index
    %145 = vector.load %arg11[%c5_142, %c0_143, %c0_144] : memref<9x16x16xf32, #tpu.memory_space<vmem>>, vector<1x16x16xf32>
    %146 = vector.shape_cast %145 : vector<1x16x16xf32> to vector<16x16xf32>
    %cst_145 = arith.constant dense<0.000000e+00> : vector<16x64xf32>
    %147 = tpu.matmul %146, %110, %cst_145 {dimension_numbers = #tpu.dot_dimension_numbers<[1], [0], [0], [1], [0, 0, 1, 1], [], []>} : vector<16x16xf32>, vector<16x64xf32>, vector<16x64xf32> -> vector<16x64xf32>
    %c0_146 = arith.constant 0 : index
    %c5_147 = arith.constant 5 : index
    %c0_148 = arith.constant 0 : index
    %c0_149 = arith.constant 0 : index
    %148 = vector.load %arg8[%c0_146, %c5_147, %c0_148, %c0_149] : memref<1x9x64x64xf32, #tpu.memory_space<vmem>>, vector<1x1x64x64xf32>
    %149 = vector.shape_cast %148 : vector<1x1x64x64xf32> to vector<64x64xf32>
    %cst_150 = arith.constant dense<0.000000e+00> : vector<16x64xf32>
    %150 = tpu.matmul %147, %149, %cst_150 {dimension_numbers = #tpu.dot_dimension_numbers<[1], [0], [0], [1], [0, 0, 1, 1], [], []>} : vector<16x64xf32>, vector<64x64xf32>, vector<16x64xf32> -> vector<16x64xf32>
    %151 = arith.addf %144, %150 : vector<16x64xf32>
    %c6_151 = arith.constant 6 : index
    %c0_152 = arith.constant 0 : index
    %c0_153 = arith.constant 0 : index
    %152 = vector.load %arg11[%c6_151, %c0_152, %c0_153] : memref<9x16x16xf32, #tpu.memory_space<vmem>>, vector<1x16x16xf32>
    %153 = vector.shape_cast %152 : vector<1x16x16xf32> to vector<16x16xf32>
    %cst_154 = arith.constant dense<0.000000e+00> : vector<16x64xf32>
    %154 = tpu.matmul %153, %110, %cst_154 {dimension_numbers = #tpu.dot_dimension_numbers<[1], [0], [0], [1], [0, 0, 1, 1], [], []>} : vector<16x16xf32>, vector<16x64xf32>, vector<16x64xf32> -> vector<16x64xf32>
    %c0_155 = arith.constant 0 : index
    %c6_156 = arith.constant 6 : index
    %c0_157 = arith.constant 0 : index
    %c0_158 = arith.constant 0 : index
    %155 = vector.load %arg8[%c0_155, %c6_156, %c0_157, %c0_158] : memref<1x9x64x64xf32, #tpu.memory_space<vmem>>, vector<1x1x64x64xf32>
    %156 = vector.shape_cast %155 : vector<1x1x64x64xf32> to vector<64x64xf32>
    %cst_159 = arith.constant dense<0.000000e+00> : vector<16x64xf32>
    %157 = tpu.matmul %154, %156, %cst_159 {dimension_numbers = #tpu.dot_dimension_numbers<[1], [0], [0], [1], [0, 0, 1, 1], [], []>} : vector<16x64xf32>, vector<64x64xf32>, vector<16x64xf32> -> vector<16x64xf32>
    %158 = arith.addf %151, %157 : vector<16x64xf32>
    %c7_160 = arith.constant 7 : index
    %c0_161 = arith.constant 0 : index
    %c0_162 = arith.constant 0 : index
    %159 = vector.load %arg11[%c7_160, %c0_161, %c0_162] : memref<9x16x16xf32, #tpu.memory_space<vmem>>, vector<1x16x16xf32>
    %160 = vector.shape_cast %159 : vector<1x16x16xf32> to vector<16x16xf32>
    %cst_163 = arith.constant dense<0.000000e+00> : vector<16x64xf32>
    %161 = tpu.matmul %160, %110, %cst_163 {dimension_numbers = #tpu.dot_dimension_numbers<[1], [0], [0], [1], [0, 0, 1, 1], [], []>} : vector<16x16xf32>, vector<16x64xf32>, vector<16x64xf32> -> vector<16x64xf32>
    %c0_164 = arith.constant 0 : index
    %c7_165 = arith.constant 7 : index
    %c0_166 = arith.constant 0 : index
    %c0_167 = arith.constant 0 : index
    %162 = vector.load %arg8[%c0_164, %c7_165, %c0_166, %c0_167] : memref<1x9x64x64xf32, #tpu.memory_space<vmem>>, vector<1x1x64x64xf32>
    %163 = vector.shape_cast %162 : vector<1x1x64x64xf32> to vector<64x64xf32>
    %cst_168 = arith.constant dense<0.000000e+00> : vector<16x64xf32>
    %164 = tpu.matmul %161, %163, %cst_168 {dimension_numbers = #tpu.dot_dimension_numbers<[1], [0], [0], [1], [0, 0, 1, 1], [], []>} : vector<16x64xf32>, vector<64x64xf32>, vector<16x64xf32> -> vector<16x64xf32>
    %165 = arith.addf %158, %164 : vector<16x64xf32>
    %c8_169 = arith.constant 8 : index
    %c0_170 = arith.constant 0 : index
    %c0_171 = arith.constant 0 : index
    %166 = vector.load %arg11[%c8_169, %c0_170, %c0_171] : memref<9x16x16xf32, #tpu.memory_space<vmem>>, vector<1x16x16xf32>
    %167 = vector.shape_cast %166 : vector<1x16x16xf32> to vector<16x16xf32>
    %cst_172 = arith.constant dense<0.000000e+00> : vector<16x64xf32>
    %168 = tpu.matmul %167, %110, %cst_172 {dimension_numbers = #tpu.dot_dimension_numbers<[1], [0], [0], [1], [0, 0, 1, 1], [], []>} : vector<16x16xf32>, vector<16x64xf32>, vector<16x64xf32> -> vector<16x64xf32>
    %c0_173 = arith.constant 0 : index
    %c8_174 = arith.constant 8 : index
    %c0_175 = arith.constant 0 : index
    %c0_176 = arith.constant 0 : index
    %169 = vector.load %arg8[%c0_173, %c8_174, %c0_175, %c0_176] : memref<1x9x64x64xf32, #tpu.memory_space<vmem>>, vector<1x1x64x64xf32>
    %170 = vector.shape_cast %169 : vector<1x1x64x64xf32> to vector<64x64xf32>
    %cst_177 = arith.constant dense<0.000000e+00> : vector<16x64xf32>
    %171 = tpu.matmul %168, %170, %cst_177 {dimension_numbers = #tpu.dot_dimension_numbers<[1], [0], [0], [1], [0, 0, 1, 1], [], []>} : vector<16x64xf32>, vector<64x64xf32>, vector<16x64xf32> -> vector<16x64xf32>
    %172 = arith.addf %165, %171 : vector<16x64xf32>
    %c0_178 = arith.constant 0 : index
    %c0_179 = arith.constant 0 : index
    %c0_180 = arith.constant 0 : index
    %173 = vector.load %arg9[%c0_178, %c0_179, %c0_180] : memref<1x1x64xf32, #tpu.memory_space<vmem>>, vector<1x1x64xf32>
    %174 = vector.shape_cast %173 : vector<1x1x64xf32> to vector<1x64xf32>
    %175 = vector.broadcast %174 : vector<1x64xf32> to vector<16x64xf32>
    %176 = arith.addf %172, %175 : vector<16x64xf32>
    %cst_181 = arith.constant 0.000000e+00 : f32
    %177 = vector.broadcast %cst_181 : f32 to vector<16x64xf32>
    %178 = arith.maximumf %176, %177 : vector<16x64xf32>
    %179 = arith.addf %178, %110 : vector<16x64xf32>
    %180 = arith.index_cast %arg0 : i32 to index
    %c2_182 = arith.constant 2 : index
    %181 = memref.load %arg2[%180, %c2_182] : memref<2x3xf32, #tpu.memory_space<smem>>
    %cst_183 = arith.constant 9.99999997E-7 : f32
    %182 = vector.broadcast %cst_183 : f32 to vector<16x64xf32>
    %183 = arith.maximumf %179, %182 : vector<16x64xf32>
    %184 = math.log %183 : vector<16x64xf32>
    %185 = vector.broadcast %181 : f32 to vector<16x64xf32>
    %186 = arith.mulf %184, %185 : vector<16x64xf32>
    %187 = math.exp %186 : vector<16x64xf32>
    %c0_184 = arith.constant 0 : index
    %c0_185 = arith.constant 0 : index
    %c0_186 = arith.constant 0 : index
    %188 = vector.load %arg14[%c0_184, %c0_185, %c0_186] : memref<2x2x16xf32, #tpu.memory_space<vmem>>, vector<1x2x16xf32>
    %189 = vector.shape_cast %188 : vector<1x2x16xf32> to vector<2x16xf32>
    %cst_187 = arith.constant dense<0.000000e+00> : vector<2x64xf32>
    %190 = tpu.matmul %189, %187, %cst_187 {dimension_numbers = #tpu.dot_dimension_numbers<[1], [0], [0], [1], [0, 0, 1, 1], [], []>} : vector<2x16xf32>, vector<16x64xf32>, vector<2x64xf32> -> vector<2x64xf32>
    %191 = math.log %190 : vector<2x64xf32>
    %192 = vector.broadcast %181 : f32 to vector<2x64xf32>
    %193 = arith.divf %191, %192 : vector<2x64xf32>
    %194 = math.exp %193 : vector<2x64xf32>
    %c1_188 = arith.constant 1 : index
    %c0_189 = arith.constant 0 : index
    %c0_190 = arith.constant 0 : index
    %195 = vector.load %arg14[%c1_188, %c0_189, %c0_190] : memref<2x2x16xf32, #tpu.memory_space<vmem>>, vector<1x2x16xf32>
    %196 = vector.shape_cast %195 : vector<1x2x16xf32> to vector<2x16xf32>
    %cst_191 = arith.constant dense<0.000000e+00> : vector<2x64xf32>
    %197 = tpu.matmul %196, %187, %cst_191 {dimension_numbers = #tpu.dot_dimension_numbers<[1], [0], [0], [1], [0, 0, 1, 1], [], []>} : vector<2x16xf32>, vector<16x64xf32>, vector<2x64xf32> -> vector<2x64xf32>
    %198 = math.log %197 : vector<2x64xf32>
    %199 = vector.broadcast %181 : f32 to vector<2x64xf32>
    %200 = arith.divf %198, %199 : vector<2x64xf32>
    %201 = math.exp %200 : vector<2x64xf32>
    %c0_192 = arith.constant 0 : index
    %c0_193 = arith.constant 0 : index
    %c0_194 = arith.constant 0 : index
    %c0_195 = arith.constant 0 : index
    %202 = vector.load %arg15[%c0_192, %c0_193, %c0_194, %c0_195] : memref<1x2x128x768xf32, #tpu.memory_space<vmem>>, vector<1x1x64x768xf32>
    %203 = vector.shape_cast %202 : vector<1x1x64x768xf32> to vector<64x768xf32>
    %cst_196 = arith.constant dense<0.000000e+00> : vector<2x768xf32>
    %204 = tpu.matmul %194, %203, %cst_196 {dimension_numbers = #tpu.dot_dimension_numbers<[1], [0], [0], [1], [0, 0, 1, 1], [], []>} : vector<2x64xf32>, vector<64x768xf32>, vector<2x768xf32> -> vector<2x768xf32>
    %c0_197 = arith.constant 0 : index
    %c0_198 = arith.constant 0 : index
    %c64 = arith.constant 64 : index
    %c0_199 = arith.constant 0 : index
    %205 = vector.load %arg15[%c0_197, %c0_198, %c64, %c0_199] : memref<1x2x128x768xf32, #tpu.memory_space<vmem>>, vector<1x1x64x768xf32>
    %206 = vector.shape_cast %205 : vector<1x1x64x768xf32> to vector<64x768xf32>
    %cst_200 = arith.constant dense<0.000000e+00> : vector<2x768xf32>
    %207 = tpu.matmul %201, %206, %cst_200 {dimension_numbers = #tpu.dot_dimension_numbers<[1], [0], [0], [1], [0, 0, 1, 1], [], []>} : vector<2x64xf32>, vector<64x768xf32>, vector<2x768xf32> -> vector<2x768xf32>
    %208 = arith.addf %204, %207 : vector<2x768xf32>
    %c0_201 = arith.constant 0 : index
    %c0_202 = arith.constant 0 : index
    %c0_203 = arith.constant 0 : index
    %c0_204 = arith.constant 0 : index
    %209 = vector.load %arg16[%c0_201, %c0_202, %c0_203, %c0_204] : memref<1x2x1x768xf32, #tpu.memory_space<vmem>>, vector<1x1x1x768xf32>
    %210 = vector.shape_cast %209 : vector<1x1x1x768xf32> to vector<1x768xf32>
    %211 = vector.broadcast %210 : vector<1x768xf32> to vector<2x768xf32>
    %212 = arith.addf %208, %211 : vector<2x768xf32>
    %c0_205 = arith.constant 0 : index
    %c0_206 = arith.constant 0 : index
    %c0_207 = arith.constant 0 : index
    %c0_208 = arith.constant 0 : index
    %c0_209 = arith.constant 0 : index
    %213 = vector.load %arg17[%c0_205, %c0_206, %c0_207, %c0_208, %c0_209] : memref<1x1x2x2x768xf32, #tpu.memory_space<vmem>>, vector<1x1x1x2x768xf32>
    %214 = vector.shape_cast %213 : vector<1x1x1x2x768xf32> to vector<2x768xf32>
    %215 = vector.shape_cast %212 : vector<2x768xf32> to vector<1x1x1x2x768xf32>
    tpu.vector_store %arg17[%c0_205, %c0_206, %c0_207, %c0_208, %c0_209], %215 {strides = array<i32>} : memref<1x1x2x2x768xf32, #tpu.memory_space<vmem>>, vector<1x1x1x2x768xf32>,
    %c0_210 = arith.constant 0 : index
    %c1_211 = arith.constant 1 : index
    %c0_212 = arith.constant 0 : index
    %c0_213 = arith.constant 0 : index
    %216 = vector.load %arg15[%c0_210, %c1_211, %c0_212, %c0_213] : memref<1x2x128x768xf32, #tpu.memory_space<vmem>>, vector<1x1x64x768xf32>
    %217 = vector.shape_cast %216 : vector<1x1x64x768xf32> to vector<64x768xf32>
    %cst_214 = arith.constant dense<0.000000e+00> : vector<2x768xf32>
    %218 = tpu.matmul %194, %217, %cst_214 {dimension_numbers = #tpu.dot_dimension_numbers<[1], [0], [0], [1], [0, 0, 1, 1], [], []>} : vector<2x64xf32>, vector<64x768xf32>, vector<2x768xf32> -> vector<2x768xf32>
    %c0_215 = arith.constant 0 : index
    %c1_216 = arith.constant 1 : index
    %c64_217 = arith.constant 64 : index
    %c0_218 = arith.constant 0 : index
    %219 = vector.load %arg15[%c0_215, %c1_216, %c64_217, %c0_218] : memref<1x2x128x768xf32, #tpu.memory_space<vmem>>, vector<1x1x64x768xf32>
    %220 = vector.shape_cast %219 : vector<1x1x64x768xf32> to vector<64x768xf32>
    %cst_219 = arith.constant dense<0.000000e+00> : vector<2x768xf32>
    %221 = tpu.matmul %201, %220, %cst_219 {dimension_numbers = #tpu.dot_dimension_numbers<[1], [0], [0], [1], [0, 0, 1, 1], [], []>} : vector<2x64xf32>, vector<64x768xf32>, vector<2x768xf32> -> vector<2x768xf32>
    %222 = arith.addf %218, %221 : vector<2x768xf32>
    %c0_220 = arith.constant 0 : index
    %c1_221 = arith.constant 1 : index
    %c0_222 = arith.constant 0 : index
    %c0_223 = arith.constant 0 : index
    %223 = vector.load %arg16[%c0_220, %c1_221, %c0_222, %c0_223] : memref<1x2x1x768xf32, #tpu.memory_space<vmem>>, vector<1x1x1x768xf32>
    %224 = vector.shape_cast %223 : vector<1x1x1x768xf32> to vector<1x768xf32>
    %225 = vector.broadcast %224 : vector<1x768xf32> to vector<2x768xf32>
    %226 = arith.addf %222, %225 : vector<2x768xf32>
    %c0_224 = arith.constant 0 : index
    %c0_225 = arith.constant 0 : index
    %c1_226 = arith.constant 1 : index
    %c0_227 = arith.constant 0 : index
    %c0_228 = arith.constant 0 : index
    %227 = vector.load %arg17[%c0_224, %c0_225, %c1_226, %c0_227, %c0_228] : memref<1x1x2x2x768xf32, #tpu.memory_space<vmem>>, vector<1x1x1x2x768xf32>
    %228 = vector.shape_cast %227 : vector<1x1x1x2x768xf32> to vector<2x768xf32>
    %229 = vector.shape_cast %226 : vector<2x768xf32> to vector<1x1x1x2x768xf32>
    tpu.vector_store %arg17[%c0_224, %c0_225, %c1_226, %c0_227, %c0_228], %229 {strides = array<i32>} : memref<1x1x2x2x768xf32, #tpu.memory_space<vmem>>, vector<1x1x1x2x768xf32>,
    return
  }
  func.func @transform_0(%arg0: i32, %arg1: i32) -> (i32, i32) {
    %c0_i32 = arith.constant 0 : i32
    %c0_i32_0 = arith.constant 0 : i32
    %c0_i32_1 = arith.constant 0 : i32
    return %c0_i32, %c0_i32_0 : i32, i32
  }
  func.func @transform_1(%arg0: i32, %arg1: i32) -> (i32, i32, i32, i32) {
    %c0_i32 = arith.constant 0 : i32
    %c0_i32_0 = arith.constant 0 : i32
    %c0_i32_1 = arith.constant 0 : i32
    return %arg0, %arg1, %c0_i32, %c0_i32_0 : i32, i32, i32, i32
  }
  func.func @transform_2(%arg0: i32, %arg1: i32) -> (i32, i32, i32) {
    %c0_i32 = arith.constant 0 : i32
    %c0_i32_0 = arith.constant 0 : i32
    %c0_i32_1 = arith.constant 0 : i32
    return %arg0, %c0_i32, %c0_i32_0 : i32, i32, i32
  }
  func.func @transform_3(%arg0: i32, %arg1: i32) -> (i32, i32, i32) {
    %c0_i32 = arith.constant 0 : i32
    %c0_i32_0 = arith.constant 0 : i32
    %c0_i32_1 = arith.constant 0 : i32
    return %arg0, %c0_i32, %c0_i32_0 : i32, i32, i32
  }
  func.func @transform_4(%arg0: i32, %arg1: i32) -> (i32, i32, i32, i32) {
    %c0_i32 = arith.constant 0 : i32
    %c0_i32_0 = arith.constant 0 : i32
    %c0_i32_1 = arith.constant 0 : i32
    %c0_i32_2 = arith.constant 0 : i32
    return %arg0, %c0_i32, %c0_i32_0, %c0_i32_1 : i32, i32, i32, i32
  }
  func.func @transform_5(%arg0: i32, %arg1: i32) -> (i32, i32, i32) {
    %c0_i32 = arith.constant 0 : i32
    %c0_i32_0 = arith.constant 0 : i32
    %c0_i32_1 = arith.constant 0 : i32
    return %arg0, %c0_i32, %c0_i32_0 : i32, i32, i32
  }
  func.func @transform_6(%arg0: i32, %arg1: i32) -> (i32, i32, i32, i32) {
    %c0_i32 = arith.constant 0 : i32
    %c0_i32_0 = arith.constant 0 : i32
    %c0_i32_1 = arith.constant 0 : i32
    %c0_i32_2 = arith.constant 0 : i32
    return %arg0, %c0_i32, %c0_i32_0, %c0_i32_1 : i32, i32, i32, i32
  }
  func.func @transform_7(%arg0: i32, %arg1: i32) -> (i32, i32, i32) {
    %c0_i32 = arith.constant 0 : i32
    %c0_i32_0 = arith.constant 0 : i32
    %c0_i32_1 = arith.constant 0 : i32
    return %arg0, %c0_i32, %c0_i32_0 : i32, i32, i32
  }
  func.func @transform_8(%arg0: i32, %arg1: i32) -> (i32, i32, i32) {
    %c0_i32 = arith.constant 0 : i32
    %c0_i32_0 = arith.constant 0 : i32
    %c0_i32_1 = arith.constant 0 : i32
    %c0_i32_2 = arith.constant 0 : i32
    return %c0_i32, %c0_i32_0, %c0_i32_1 : i32, i32, i32
  }
  func.func @transform_9(%arg0: i32, %arg1: i32) -> (i32, i32, i32) {
    %c0_i32 = arith.constant 0 : i32
    %c0_i32_0 = arith.constant 0 : i32
    %c0_i32_1 = arith.constant 0 : i32
    %c0_i32_2 = arith.constant 0 : i32
    return %c0_i32, %c0_i32_0, %c0_i32_1 : i32, i32, i32
  }
  func.func @transform_10(%arg0: i32, %arg1: i32) -> (i32, i32) {
    %c0_i32 = arith.constant 0 : i32
    %c0_i32_0 = arith.constant 0 : i32
    %c0_i32_1 = arith.constant 0 : i32
    return %c0_i32, %c0_i32_0 : i32, i32
  }
  func.func @transform_11(%arg0: i32, %arg1: i32) -> (i32, i32) {
    %c0_i32 = arith.constant 0 : i32
    %c0_i32_0 = arith.constant 0 : i32
    %c0_i32_1 = arith.constant 0 : i32
    return %c0_i32, %c0_i32_0 : i32, i32
  }
  func.func @transform_12(%arg0: i32, %arg1: i32) -> (i32, i32, i32) {
    %c0_i32 = arith.constant 0 : i32
    %c0_i32_0 = arith.constant 0 : i32
    %c0_i32_1 = arith.constant 0 : i32
    %c0_i32_2 = arith.constant 0 : i32
    return %c0_i32, %c0_i32_0, %c0_i32_1 : i32, i32, i32
  }
  func.func @transform_13(%arg0: i32, %arg1: i32) -> (i32, i32, i32, i32) {
    %c0_i32 = arith.constant 0 : i32
    %c0_i32_0 = arith.constant 0 : i32
    %c0_i32_1 = arith.constant 0 : i32
    %c0_i32_2 = arith.constant 0 : i32
    return %arg0, %c0_i32, %c0_i32_0, %c0_i32_1 : i32, i32, i32, i32
  }
  func.func @transform_14(%arg0: i32, %arg1: i32) -> (i32, i32, i32, i32) {
    %c0_i32 = arith.constant 0 : i32
    %c0_i32_0 = arith.constant 0 : i32
    %c0_i32_1 = arith.constant 0 : i32
    %c0_i32_2 = arith.constant 0 : i32
    return %arg0, %c0_i32, %c0_i32_0, %c0_i32_1 : i32, i32, i32, i32
  }
  func.func @transform_15(%arg0: i32, %arg1: i32) -> (i32, i32, i32, i32, i32) {
    %c0_i32 = arith.constant 0 : i32
    %c0_i32_0 = arith.constant 0 : i32
    %c0_i32_1 = arith.constant 0 : i32
    %c0_i32_2 = arith.constant 0 : i32
    return %arg0, %arg1, %c0_i32, %c0_i32_0, %c0_i32_1 : i32, i32, i32, i32, i32
  }
}

module attributes {stable_mosaic.version = 11 : i64} {
  func.func @head_kernel(%arg0: i32, %arg1: memref<2x2x2x256xf32, #tpu.memory_space<vmem>>, %arg2: memref<2x2x256x256xf32, #tpu.memory_space<vmem>>, %arg3: memref<2x1x256xf32, #tpu.memory_space<vmem>>, %arg4: memref<256x256xf32, #tpu.memory_space<vmem>>, %arg5: memref<256x256xf32, #tpu.memory_space<vmem>>, %arg6: memref<1x256xf32, #tpu.memory_space<vmem>>, %arg7: memref<256x19xf32, #tpu.memory_space<vmem>>, %arg8: memref<1x19xf32, #tpu.memory_space<vmem>>, %arg9: memref<256x256xf32, #tpu.memory_space<vmem>>, %arg10: memref<256x256xf32, #tpu.memory_space<vmem>>, %arg11: memref<19x256xf32, #tpu.memory_space<vmem>>, %arg12: memref<1x256xf32, #tpu.memory_space<vmem>>, %arg13: memref<256x8xf32, #tpu.memory_space<vmem>>, %arg14: memref<1x8xf32, #tpu.memory_space<vmem>>, %arg15: memref<2x8xf32, #tpu.memory_space<vmem>>) attributes {dimension_semantics = [#tpu.dimension_semantics<arbitrary>], iteration_bounds = array<i64: 1>, scalar_prefetch = 0 : i64, scratch_operands = 0 : i64, tpu.core_type = #tpu.core_type<tc>, window_params = [{pipeline_mode = #tpu.pipeline_mode<synchronous>, transform_indices = @transform_0, window_bounds = array<i64: 2, 2, 2, 256>}, {pipeline_mode = #tpu.pipeline_mode<synchronous>, transform_indices = @transform_1, window_bounds = array<i64: 2, 2, 256, 256>}, {pipeline_mode = #tpu.pipeline_mode<synchronous>, transform_indices = @transform_2, window_bounds = array<i64: 2, 1, 256>}, {pipeline_mode = #tpu.pipeline_mode<synchronous>, transform_indices = @transform_3, window_bounds = array<i64: 256, 256>}, {pipeline_mode = #tpu.pipeline_mode<synchronous>, transform_indices = @transform_4, window_bounds = array<i64: 256, 256>}, {pipeline_mode = #tpu.pipeline_mode<synchronous>, transform_indices = @transform_5, window_bounds = array<i64: 1, 256>}, {pipeline_mode = #tpu.pipeline_mode<synchronous>, transform_indices = @transform_6, window_bounds = array<i64: 256, 19>}, {pipeline_mode = #tpu.pipeline_mode<synchronous>, transform_indices = @transform_7, window_bounds = array<i64: 1, 19>}, {pipeline_mode = #tpu.pipeline_mode<synchronous>, transform_indices = @transform_8, window_bounds = array<i64: 256, 256>}, {pipeline_mode = #tpu.pipeline_mode<synchronous>, transform_indices = @transform_9, window_bounds = array<i64: 256, 256>}, {pipeline_mode = #tpu.pipeline_mode<synchronous>, transform_indices = @transform_10, window_bounds = array<i64: 19, 256>}, {pipeline_mode = #tpu.pipeline_mode<synchronous>, transform_indices = @transform_11, window_bounds = array<i64: 1, 256>}, {pipeline_mode = #tpu.pipeline_mode<synchronous>, transform_indices = @transform_12, window_bounds = array<i64: 256, 8>}, {pipeline_mode = #tpu.pipeline_mode<synchronous>, transform_indices = @transform_13, window_bounds = array<i64: 1, 8>}, {pipeline_mode = #tpu.pipeline_mode<synchronous>, transform_indices = @transform_14, window_bounds = array<i64: 2, 8>}]} {
    %c0 = arith.constant 0 : index
    %c0_0 = arith.constant 0 : index
    %c0_1 = arith.constant 0 : index
    %c0_2 = arith.constant 0 : index
    %0 = vector.load %arg1[%c0, %c0_0, %c0_1, %c0_2] : memref<2x2x2x256xf32, #tpu.memory_space<vmem>>, vector<1x1x2x256xf32>
    %1 = vector.shape_cast %0 : vector<1x1x2x256xf32> to vector<2x256xf32>
    %c0_3 = arith.constant 0 : index
    %c0_4 = arith.constant 0 : index
    %c0_5 = arith.constant 0 : index
    %c0_6 = arith.constant 0 : index
    %2 = vector.load %arg2[%c0_3, %c0_4, %c0_5, %c0_6] : memref<2x2x256x256xf32, #tpu.memory_space<vmem>>, vector<1x1x256x256xf32>
    %3 = vector.shape_cast %2 : vector<1x1x256x256xf32> to vector<256x256xf32>
    %cst = arith.constant dense<0.000000e+00> : vector<2x256xf32>
    %4 = tpu.matmul %1, %3, %cst {dimension_numbers = #tpu.dot_dimension_numbers<[1], [0], [0], [1], [0, 0, 1, 1], [], []>} : vector<2x256xf32>, vector<256x256xf32>, vector<2x256xf32> -> vector<2x256xf32>
    %c0_7 = arith.constant 0 : index
    %c1 = arith.constant 1 : index
    %c0_8 = arith.constant 0 : index
    %c0_9 = arith.constant 0 : index
    %5 = vector.load %arg1[%c0_7, %c1, %c0_8, %c0_9] : memref<2x2x2x256xf32, #tpu.memory_space<vmem>>, vector<1x1x2x256xf32>
    %6 = vector.shape_cast %5 : vector<1x1x2x256xf32> to vector<2x256xf32>
    %c0_10 = arith.constant 0 : index
    %c1_11 = arith.constant 1 : index
    %c0_12 = arith.constant 0 : index
    %c0_13 = arith.constant 0 : index
    %7 = vector.load %arg2[%c0_10, %c1_11, %c0_12, %c0_13] : memref<2x2x256x256xf32, #tpu.memory_space<vmem>>, vector<1x1x256x256xf32>
    %8 = vector.shape_cast %7 : vector<1x1x256x256xf32> to vector<256x256xf32>
    %cst_14 = arith.constant dense<0.000000e+00> : vector<2x256xf32>
    %9 = tpu.matmul %6, %8, %cst_14 {dimension_numbers = #tpu.dot_dimension_numbers<[1], [0], [0], [1], [0, 0, 1, 1], [], []>} : vector<2x256xf32>, vector<256x256xf32>, vector<2x256xf32> -> vector<2x256xf32>
    %10 = arith.addf %4, %9 : vector<2x256xf32>
    %c0_15 = arith.constant 0 : index
    %c0_16 = arith.constant 0 : index
    %c0_17 = arith.constant 0 : index
    %11 = vector.load %arg3[%c0_15, %c0_16, %c0_17] : memref<2x1x256xf32, #tpu.memory_space<vmem>>, vector<1x1x256xf32>
    %12 = vector.shape_cast %11 : vector<1x1x256xf32> to vector<1x256xf32>
    %13 = vector.broadcast %12 : vector<1x256xf32> to vector<2x256xf32>
    %14 = arith.addf %10, %13 : vector<2x256xf32>
    %cst_18 = arith.constant 0.000000e+00 : f32
    %15 = vector.broadcast %cst_18 : f32 to vector<2x256xf32>
    %16 = arith.maximumf %14, %15 : vector<2x256xf32>
    %c1_19 = arith.constant 1 : index
    %c0_20 = arith.constant 0 : index
    %c0_21 = arith.constant 0 : index
    %c0_22 = arith.constant 0 : index
    %17 = vector.load %arg1[%c1_19, %c0_20, %c0_21, %c0_22] : memref<2x2x2x256xf32, #tpu.memory_space<vmem>>, vector<1x1x2x256xf32>
    %18 = vector.shape_cast %17 : vector<1x1x2x256xf32> to vector<2x256xf32>
    %c1_23 = arith.constant 1 : index
    %c0_24 = arith.constant 0 : index
    %c0_25 = arith.constant 0 : index
    %c0_26 = arith.constant 0 : index
    %19 = vector.load %arg2[%c1_23, %c0_24, %c0_25, %c0_26] : memref<2x2x256x256xf32, #tpu.memory_space<vmem>>, vector<1x1x256x256xf32>
    %20 = vector.shape_cast %19 : vector<1x1x256x256xf32> to vector<256x256xf32>
    %cst_27 = arith.constant dense<0.000000e+00> : vector<2x256xf32>
    %21 = tpu.matmul %18, %20, %cst_27 {dimension_numbers = #tpu.dot_dimension_numbers<[1], [0], [0], [1], [0, 0, 1, 1], [], []>} : vector<2x256xf32>, vector<256x256xf32>, vector<2x256xf32> -> vector<2x256xf32>
    %c1_28 = arith.constant 1 : index
    %c1_29 = arith.constant 1 : index
    %c0_30 = arith.constant 0 : index
    %c0_31 = arith.constant 0 : index
    %22 = vector.load %arg1[%c1_28, %c1_29, %c0_30, %c0_31] : memref<2x2x2x256xf32, #tpu.memory_space<vmem>>, vector<1x1x2x256xf32>
    %23 = vector.shape_cast %22 : vector<1x1x2x256xf32> to vector<2x256xf32>
    %c1_32 = arith.constant 1 : index
    %c1_33 = arith.constant 1 : index
    %c0_34 = arith.constant 0 : index
    %c0_35 = arith.constant 0 : index
    %24 = vector.load %arg2[%c1_32, %c1_33, %c0_34, %c0_35] : memref<2x2x256x256xf32, #tpu.memory_space<vmem>>, vector<1x1x256x256xf32>
    %25 = vector.shape_cast %24 : vector<1x1x256x256xf32> to vector<256x256xf32>
    %cst_36 = arith.constant dense<0.000000e+00> : vector<2x256xf32>
    %26 = tpu.matmul %23, %25, %cst_36 {dimension_numbers = #tpu.dot_dimension_numbers<[1], [0], [0], [1], [0, 0, 1, 1], [], []>} : vector<2x256xf32>, vector<256x256xf32>, vector<2x256xf32> -> vector<2x256xf32>
    %27 = arith.addf %21, %26 : vector<2x256xf32>
    %c1_37 = arith.constant 1 : index
    %c0_38 = arith.constant 0 : index
    %c0_39 = arith.constant 0 : index
    %28 = vector.load %arg3[%c1_37, %c0_38, %c0_39] : memref<2x1x256xf32, #tpu.memory_space<vmem>>, vector<1x1x256xf32>
    %29 = vector.shape_cast %28 : vector<1x1x256xf32> to vector<1x256xf32>
    %30 = vector.broadcast %29 : vector<1x256xf32> to vector<2x256xf32>
    %31 = arith.addf %27, %30 : vector<2x256xf32>
    %cst_40 = arith.constant 0.000000e+00 : f32
    %32 = vector.broadcast %cst_40 : f32 to vector<2x256xf32>
    %33 = arith.maximumf %31, %32 : vector<2x256xf32>
    %c0_41 = arith.constant 0 : index
    %c0_42 = arith.constant 0 : index
    %34 = vector.load %arg4[%c0_41, %c0_42] : memref<256x256xf32, #tpu.memory_space<vmem>>, vector<256x256xf32>
    %cst_43 = arith.constant dense<0.000000e+00> : vector<2x256xf32>
    %35 = tpu.matmul %16, %34, %cst_43 {dimension_numbers = #tpu.dot_dimension_numbers<[1], [0], [0], [1], [0, 0, 1, 1], [], []>} : vector<2x256xf32>, vector<256x256xf32>, vector<2x256xf32> -> vector<2x256xf32>
    %c0_44 = arith.constant 0 : index
    %c0_45 = arith.constant 0 : index
    %36 = vector.load %arg5[%c0_44, %c0_45] : memref<256x256xf32, #tpu.memory_space<vmem>>, vector<256x256xf32>
    %cst_46 = arith.constant dense<0.000000e+00> : vector<2x256xf32>
    %37 = tpu.matmul %33, %36, %cst_46 {dimension_numbers = #tpu.dot_dimension_numbers<[1], [0], [0], [1], [0, 0, 1, 1], [], []>} : vector<2x256xf32>, vector<256x256xf32>, vector<2x256xf32> -> vector<2x256xf32>
    %38 = arith.addf %35, %37 : vector<2x256xf32>
    %c0_47 = arith.constant 0 : index
    %c0_48 = arith.constant 0 : index
    %39 = vector.load %arg6[%c0_47, %c0_48] : memref<1x256xf32, #tpu.memory_space<vmem>>, vector<1x256xf32>
    %40 = vector.broadcast %39 : vector<1x256xf32> to vector<2x256xf32>
    %41 = arith.addf %38, %40 : vector<2x256xf32>
    %cst_49 = arith.constant 0.000000e+00 : f32
    %42 = vector.broadcast %cst_49 : f32 to vector<2x256xf32>
    %43 = arith.maximumf %41, %42 : vector<2x256xf32>
    %c0_50 = arith.constant 0 : index
    %c0_51 = arith.constant 0 : index
    %44 = vector.load %arg7[%c0_50, %c0_51] : memref<256x19xf32, #tpu.memory_space<vmem>>, vector<256x19xf32>
    %cst_52 = arith.constant dense<0.000000e+00> : vector<2x19xf32>
    %45 = tpu.matmul %43, %44, %cst_52 {dimension_numbers = #tpu.dot_dimension_numbers<[1], [0], [0], [1], [0, 0, 1, 1], [], []>} : vector<2x256xf32>, vector<256x19xf32>, vector<2x19xf32> -> vector<2x19xf32>
    %c0_53 = arith.constant 0 : index
    %c0_54 = arith.constant 0 : index
    %46 = vector.load %arg8[%c0_53, %c0_54] : memref<1x19xf32, #tpu.memory_space<vmem>>, vector<1x19xf32>
    %47 = vector.broadcast %46 : vector<1x19xf32> to vector<2x19xf32>
    %48 = arith.addf %45, %47 : vector<2x19xf32>
    %49 = arith.negf %48 : vector<2x19xf32>
    %50 = math.exp %49 : vector<2x19xf32>
    %cst_55 = arith.constant 1.000000e+00 : f32
    %51 = vector.broadcast %cst_55 : f32 to vector<2x19xf32>
    %52 = arith.addf %51, %50 : vector<2x19xf32>
    %53 = arith.divf %51, %52 : vector<2x19xf32>
    %c0_56 = arith.constant 0 : index
    %c0_57 = arith.constant 0 : index
    %54 = vector.load %arg9[%c0_56, %c0_57] : memref<256x256xf32, #tpu.memory_space<vmem>>, vector<256x256xf32>
    %cst_58 = arith.constant dense<0.000000e+00> : vector<2x256xf32>
    %55 = tpu.matmul %16, %54, %cst_58 {dimension_numbers = #tpu.dot_dimension_numbers<[1], [0], [0], [1], [0, 0, 1, 1], [], []>} : vector<2x256xf32>, vector<256x256xf32>, vector<2x256xf32> -> vector<2x256xf32>
    %c0_59 = arith.constant 0 : index
    %c0_60 = arith.constant 0 : index
    %56 = vector.load %arg10[%c0_59, %c0_60] : memref<256x256xf32, #tpu.memory_space<vmem>>, vector<256x256xf32>
    %cst_61 = arith.constant dense<0.000000e+00> : vector<2x256xf32>
    %57 = tpu.matmul %33, %56, %cst_61 {dimension_numbers = #tpu.dot_dimension_numbers<[1], [0], [0], [1], [0, 0, 1, 1], [], []>} : vector<2x256xf32>, vector<256x256xf32>, vector<2x256xf32> -> vector<2x256xf32>
    %58 = arith.addf %55, %57 : vector<2x256xf32>
    %c0_62 = arith.constant 0 : index
    %c0_63 = arith.constant 0 : index
    %59 = vector.load %arg11[%c0_62, %c0_63] : memref<19x256xf32, #tpu.memory_space<vmem>>, vector<19x256xf32>
    %cst_64 = arith.constant dense<0.000000e+00> : vector<2x256xf32>
    %60 = tpu.matmul %53, %59, %cst_64 {dimension_numbers = #tpu.dot_dimension_numbers<[1], [0], [0], [1], [0, 0, 1, 1], [], []>} : vector<2x19xf32>, vector<19x256xf32>, vector<2x256xf32> -> vector<2x256xf32>
    %61 = arith.addf %58, %60 : vector<2x256xf32>
    %c0_65 = arith.constant 0 : index
    %c0_66 = arith.constant 0 : index
    %62 = vector.load %arg12[%c0_65, %c0_66] : memref<1x256xf32, #tpu.memory_space<vmem>>, vector<1x256xf32>
    %63 = vector.broadcast %62 : vector<1x256xf32> to vector<2x256xf32>
    %64 = arith.addf %61, %63 : vector<2x256xf32>
    %cst_67 = arith.constant 0.000000e+00 : f32
    %65 = vector.broadcast %cst_67 : f32 to vector<2x256xf32>
    %66 = arith.maximumf %64, %65 : vector<2x256xf32>
    %c0_68 = arith.constant 0 : index
    %c0_69 = arith.constant 0 : index
    %67 = vector.load %arg13[%c0_68, %c0_69] : memref<256x8xf32, #tpu.memory_space<vmem>>, vector<256x8xf32>
    %cst_70 = arith.constant dense<0.000000e+00> : vector<2x8xf32>
    %68 = tpu.matmul %66, %67, %cst_70 {dimension_numbers = #tpu.dot_dimension_numbers<[1], [0], [0], [1], [0, 0, 1, 1], [], []>} : vector<2x256xf32>, vector<256x8xf32>, vector<2x8xf32> -> vector<2x8xf32>
    %c0_71 = arith.constant 0 : index
    %c0_72 = arith.constant 0 : index
    %69 = vector.load %arg14[%c0_71, %c0_72] : memref<1x8xf32, #tpu.memory_space<vmem>>, vector<1x8xf32>
    %70 = vector.broadcast %69 : vector<1x8xf32> to vector<2x8xf32>
    %71 = arith.addf %68, %70 : vector<2x8xf32>
    %72 = arith.negf %71 : vector<2x8xf32>
    %73 = math.exp %72 : vector<2x8xf32>
    %cst_73 = arith.constant 1.000000e+00 : f32
    %74 = vector.broadcast %cst_73 : f32 to vector<2x8xf32>
    %75 = arith.addf %74, %73 : vector<2x8xf32>
    %76 = arith.divf %74, %75 : vector<2x8xf32>
    %c0_74 = arith.constant 0 : index
    %c0_75 = arith.constant 0 : index
    %77 = vector.load %arg15[%c0_74, %c0_75] : memref<2x8xf32, #tpu.memory_space<vmem>>, vector<2x8xf32>
    tpu.vector_store %arg15[%c0_74, %c0_75], %76 {strides = array<i32>} : memref<2x8xf32, #tpu.memory_space<vmem>>, vector<2x8xf32>,
    return
  }
  func.func @transform_0(%arg0: i32) -> (i32, i32, i32, i32) {
    %c0_i32 = arith.constant 0 : i32
    %c0_i32_0 = arith.constant 0 : i32
    %c0_i32_1 = arith.constant 0 : i32
    %c0_i32_2 = arith.constant 0 : i32
    %c0_i32_3 = arith.constant 0 : i32
    return %c0_i32, %c0_i32_0, %c0_i32_1, %c0_i32_2 : i32, i32, i32, i32
  }
  func.func @transform_1(%arg0: i32) -> (i32, i32, i32, i32) {
    %c0_i32 = arith.constant 0 : i32
    %c0_i32_0 = arith.constant 0 : i32
    %c0_i32_1 = arith.constant 0 : i32
    %c0_i32_2 = arith.constant 0 : i32
    %c0_i32_3 = arith.constant 0 : i32
    return %c0_i32, %c0_i32_0, %c0_i32_1, %c0_i32_2 : i32, i32, i32, i32
  }
  func.func @transform_2(%arg0: i32) -> (i32, i32, i32) {
    %c0_i32 = arith.constant 0 : i32
    %c0_i32_0 = arith.constant 0 : i32
    %c0_i32_1 = arith.constant 0 : i32
    %c0_i32_2 = arith.constant 0 : i32
    return %c0_i32, %c0_i32_0, %c0_i32_1 : i32, i32, i32
  }
  func.func @transform_3(%arg0: i32) -> (i32, i32) {
    %c0_i32 = arith.constant 0 : i32
    %c0_i32_0 = arith.constant 0 : i32
    %c0_i32_1 = arith.constant 0 : i32
    return %c0_i32, %c0_i32_0 : i32, i32
  }
  func.func @transform_4(%arg0: i32) -> (i32, i32) {
    %c0_i32 = arith.constant 0 : i32
    %c0_i32_0 = arith.constant 0 : i32
    %c0_i32_1 = arith.constant 0 : i32
    return %c0_i32, %c0_i32_0 : i32, i32
  }
  func.func @transform_5(%arg0: i32) -> (i32, i32) {
    %c0_i32 = arith.constant 0 : i32
    %c0_i32_0 = arith.constant 0 : i32
    %c0_i32_1 = arith.constant 0 : i32
    return %c0_i32, %c0_i32_0 : i32, i32
  }
  func.func @transform_6(%arg0: i32) -> (i32, i32) {
    %c0_i32 = arith.constant 0 : i32
    %c0_i32_0 = arith.constant 0 : i32
    %c0_i32_1 = arith.constant 0 : i32
    return %c0_i32, %c0_i32_0 : i32, i32
  }
  func.func @transform_7(%arg0: i32) -> (i32, i32) {
    %c0_i32 = arith.constant 0 : i32
    %c0_i32_0 = arith.constant 0 : i32
    %c0_i32_1 = arith.constant 0 : i32
    return %c0_i32, %c0_i32_0 : i32, i32
  }
  func.func @transform_8(%arg0: i32) -> (i32, i32) {
    %c0_i32 = arith.constant 0 : i32
    %c0_i32_0 = arith.constant 0 : i32
    %c0_i32_1 = arith.constant 0 : i32
    return %c0_i32, %c0_i32_0 : i32, i32
  }
  func.func @transform_9(%arg0: i32) -> (i32, i32) {
    %c0_i32 = arith.constant 0 : i32
    %c0_i32_0 = arith.constant 0 : i32
    %c0_i32_1 = arith.constant 0 : i32
    return %c0_i32, %c0_i32_0 : i32, i32
  }
  func.func @transform_10(%arg0: i32) -> (i32, i32) {
    %c0_i32 = arith.constant 0 : i32
    %c0_i32_0 = arith.constant 0 : i32
    %c0_i32_1 = arith.constant 0 : i32
    return %c0_i32, %c0_i32_0 : i32, i32
  }
  func.func @transform_11(%arg0: i32) -> (i32, i32) {
    %c0_i32 = arith.constant 0 : i32
    %c0_i32_0 = arith.constant 0 : i32
    %c0_i32_1 = arith.constant 0 : i32
    return %c0_i32, %c0_i32_0 : i32, i32
  }
  func.func @transform_12(%arg0: i32) -> (i32, i32) {
    %c0_i32 = arith.constant 0 : i32
    %c0_i32_0 = arith.constant 0 : i32
    %c0_i32_1 = arith.constant 0 : i32
    return %c0_i32, %c0_i32_0 : i32, i32
  }
  func.func @transform_13(%arg0: i32) -> (i32, i32) {
    %c0_i32 = arith.constant 0 : i32
    %c0_i32_0 = arith.constant 0 : i32
    %c0_i32_1 = arith.constant 0 : i32
    return %c0_i32, %c0_i32_0 : i32, i32
  }
  func.func @transform_14(%arg0: i32) -> (i32, i32) {
    %c0_i32 = arith.constant 0 : i32
    %c0_i32_0 = arith.constant 0 : i32
    %c0_i32_1 = arith.constant 0 : i32
    return %c0_i32, %c0_i32_0 : i32, i32
  }
}

</mosaic_0001>

<bundles_post_ra>
// kernel: hpcp_forward.4
= control target key start
LH: loop header
LB: loop body
LE: loop exit
PB: predicated region body
PF: predicated region fallthrough
CT: control target
= control target key end

     0   :  { %s1938_s12 = smov 0   ;;  %s1940_s13 = smov 0   ;;  %s2752_s0 = inlined_call_operand.vmem [shape: f32[2,2,2,2,768], index: 0, kind: input, shape index: {}]   ;;  %s2753_s1 = inlined_call_operand.vmem [shape: f32[2,2,256,768], index: 1, kind: input, shape index: {}]   ;;  %s2754_s2 = inlined_call_operand.vmem [shape: f32[2,2,1,768], index: 2, kind: input, shape index: {}]   ;;  %s2755_s3 = inlined_call_operand.vmem [shape: f32[2,2,2,256], index: 3, kind: output, shape index: {}]  }
   0x1   :  { %s1942_s14 = smov 0   ;;  %s1944_s15 = smov 0  }
   0x2   :  { %s1946_s16 = smov 0   ;;  %s1948_s17 = smov 0  }
   0x3   :  { %s1950_s18 = smov 0  }
   0x4 LB: > { %s22_s19 = sadd.s32 1, %s1906_s16  ;;  %s25_s20 = sadd.s32 1, %s1910_s17  ;;  %s1914_s18 = sphi %s1950_s18, %s13_s18   ;;  %s1910_s17 = sphi %s1948_s17, %s2839_s17   ;;  %s1906_s16 = sphi %s1946_s16, %s2838_s16   ;;  %s1902_s15 = sphi %s1944_s15, %s2837_s15   ;;  %s1898_s14 = sphi %s1942_s14, %s2836_s14   ;;  %s1894_s13 = sphi %s1940_s13, %s2835_s13   ;;  %s1890_s12 = sphi %s1938_s12, %s2834_s12  }
   0x5   : > { %p23_p0 = scmp.ge.s32.totalorder %s22_s19, 2  ;;  %p41_p1 = scmp.ne.s32.totalorder %s1894_s13, %s1890_s12 }
   0x6   : > { %p42_p2 = scmp.eq.s32.totalorder %s1914_s18, 0  ;;  %s34_s24 = sadd.s32 1, %s1894_s13 }
   0x7   : > { %s2841_s19 = smov (%p23_p0, %s22_s19), 0  ;;  %s2843_s20 = smov (!%p23_p0, %s25_s20), %s1910_s17 }
   0x8   : > { %p43_p3 = por %p42_p2, %p41_p1  ;;  %p27_p4 = scmp.ge.s32.totalorder %s2843_s20, 2 }
   0x9   : > { %s30_s21 = ssub.s32 %s1906_s16, %s2841_s19  ;;  %p1349_p6 = scmp.ge.s32.totalorder %s1914_s18, 4 }
   0xa   : > { %s2845_s20 = smov (%p27_p4, %s2843_s20), 0 }
   0xb   : > { %s29_s22 = ssub.s32 %s1910_s17, %s2845_s20  ;;  %151 = sbr.rel (%p1349_p6) target bundleno = 29 (0x1d), region = 16 }
   0xc   : > { %s31_s23 = sor.u32 %s30_s21, %s29_s22 }
   0xd   : > { %p32_p5 = scmp.eq.s32.totalorder %s31_s23, 0 }
   0xf   : > { %s1989_s25 = scalar_select %p32_p5, %s1894_s13, %s34_s24  }
  0x12   : > { %154 = sbr.rel (!%p43_p3) target bundleno = 29 (0x1d), region = 20  ;;  %s156_s26 = sand.u32 (%p43_p3), 1, %s1894_s13  }
  0x13   : > { %s1755_s27 = smul.u32 (%p43_p3), 6, %s1906_s16 }
  0x14   : > { %s1754_s28 = smul.u32 (%p43_p3), 24, %s156_s26 }
  0x15   : > { %s1756_s29 = smul.u32 (%p43_p3), 24, %s1910_s17 }
  0x16   : > { %s158_s8 = scalar_lea.vmem (%p43_p3), [#allocation2], %s1754_s28 }
  0x17   : > { %s161_s30 = sadd.s32 (%p43_p3), %s1756_s29, %s1755_s27 }
  0x18   : > { %s1350_s4 = sshll.u32 (%p43_p3), %s161_s30, 1 }
  0x19   : > { %s163_s7 = scalar_lea.vmem %s2752_s0, %s1350_s4 }
  0x1a   : > { %v178_v0 = vld [vmem:[%s163_s7] sm:$0xff]  ;;  %v180_v1 = vld [vmem:[%s163_s7 + $0x18] sm:$0xff]  ;;  %v1351_v2 = vld [vmem:[%s163_s7 + $0x8] sm:$0xf] }
  0x1b   : > { %179 = vst [vmem:[%s158_s8] sm:$0xff] %v178_v0  ;;  %181 = vst [vmem:[%s158_s8 + $0xc] sm:$0xff] %v180_v1  ;;  %v1353_v3 = vld [vmem:[%s163_s7 + $0x20] sm:$0xf] }
  0x1c   : > { %1352 = vst [vmem:[%s158_s8 + $0x8] sm:$0xf] %v1351_v2  ;;  %1354 = vst [vmem:[%s158_s8 + $0x14] sm:$0xf] %v1353_v3 }
  0x1d PF: > { %p1355_p7 = scmp.ge.s32.totalorder %s1914_s18, 1  ;;  %p220_p8 = scmp.lt.s32.totalorder %s1914_s18, 5 }
  0x1f   : > { %p221_p9 = pnand %p1355_p7, %p220_p8 }
  0x21   : > { %224 = sbr.rel (%p221_p9) target bundleno = 736 (0x2e0), region = 54 }
  0x28   : > { %p271_p10 = scmp.lt.s32.totalorder %s1902_s15, 1  ;;  %p273_p11 = scmp.lt.s32.totalorder %s1898_s14, 1  ;;  %v2756_v4 = vmov 0.0   ;;  %vm883_vm0 = vcmask 1041409   ;;  %vm1200_vm1 = vcmask 1043459   ;;  %vm1202_vm2 = vcmask 1045509  }
  0x29   : > { %621 = vmatprep.mubr.f32.mxu0 %v2756_v4  ;;  %692 = vmatprep.mubr.f32.mxu1 %v2756_v4  ;;  %s227_s6 = sand.u32 1, %s1890_s12   ;;  %s297_s8 = scvt.s32.f32 %s1898_s14  ;;  %vm1204_vm3 = vcmask 1047559  }
  0x2a   : > { %s2847_s15 = smov (!%p271_p10, %s1902_s15), 1  ;;  %s1757_s7 = smul.u32 24, %s227_s6 }
  0x2b   : > { %s2008_s9 = scalar_select %p273_p11, %s1898_s14, 1 }
  0x2c   : > { %s1759_s10 = smul.u32 384, %s2847_s15  ;;  %s495_s12 = ssub.f32 1.0, %s297_s8 }
  0x2d   : > { %s1758_s11 = smul.u32 192, %s2008_s9  ;;  %s1357_s14 = sshll.u32 %s2008_s9, 1 }
  0x2e   : > { %s1760_s27 = smul.u32 6, %s2008_s9 }
  0x2f   : > { %s277_s21 = sadd.s32 %s1759_s10, %s1758_s11  ;;  %s1761_s28 = smul.u32 12, %s2847_s15 }
  0x30   : > { %s1356_s22 = sshll.u32 %s277_s21, 3  ;;  %s2601_s10 = scalar_lea.vmem [#allocation2], %s1757_s7 }
  0x31   : > { %s2015_s26 = scalar_lea.vmem %s2753_s1, %s1356_s22  ;;  %s286_s29 = sadd.s32 %s1761_s28, %s1760_s27 }
  0x32   : > { %v303_v5 = vld [vmem:[%s2015_s26 + $0x8] sm:$0xff]  ;;  %v309_v6 = vld [vmem:[%s2015_s26 + $0x38] sm:$0xff]  ;;  %v302_v7 = vld [vmem:[%s2015_s26] sm:$0xff]  ;;  %s287_s5 = scalar_lea.vmem %s2754_s2, %s286_s29  ;;  %s1358_s11 = sshll.u32 %s2847_s15, 2 }
  0x33   : > { %v2020_v8 = vpack.c.bf16 %v309_v6, %v303_v5  ;;  %v308_v9 = vld [vmem:[%s2015_s26 + $0x30] sm:$0xff]  ;;  %v315_v10 = vld [vmem:[%s2015_s26 + $0x68] sm:$0xff]  ;;  %v321_v11 = vld [vmem:[%s2015_s26 + $0x98] sm:$0xff]  ;;  %s294_s21 = sadd.s32 %s1358_s11, %s1357_s14 }
  0x34   : > { %v2025_v12 = vpack.c.bf16 %v308_v9, %v302_v7  ;;  %v2027_v13 = vpack.c.bf16 %v321_v11, %v315_v10  ;;  %v314_v14 = vld [vmem:[%s2015_s26 + $0x60] sm:$0xff]  ;;  %v320_v15 = vld [vmem:[%s2015_s26 + $0x90] sm:$0xff]  ;;  %v327_v16 = vld [vmem:[%s2015_s26 + $0xc8] sm:$0xff]  ;;  %s1359_s22 = sshll.u32 %s294_s21, 1 }
  0x35   : > { %1371 = vmatprep.subr.bf16.mxu0 %v2020_v8  ;;  %v333_v17 = vld [vmem:[%s2015_s26 + $0xf8] sm:$0xff]  ;;  %v2035_v18 = vpack.c.bf16 %v320_v15, %v314_v14  ;;  %v326_v20 = vld [vmem:[%s2015_s26 + $0xc0] sm:$0xff]  ;;  %v332_v21 = vld [vmem:[%s2015_s26 + $0xf0] sm:$0xff] }
  0x36   : > { %1373 = vmatpush1.bf16.msra.mxu0 %v2025_v12  ;;  %v2038_v19 = vpack.c.bf16 %v333_v17, %v327_v16  ;;  %v339_v22 = vld [vmem:[%s2015_s26 + $0x128] sm:$0xff]  ;;  %v345_v23 = vld [vmem:[%s2015_s26 + $0x158] sm:$0xff]  ;;  %v2045_v24 = vpack.c.bf16 %v332_v21, %v326_v20  ;;  %v338_v26 = vld [vmem:[%s2015_s26 + $0x120] sm:$0xff] }
  0x37   : > { %1375 = vmatprep.subr.bf16.mxu0 %v2027_v13  ;;  %v2048_v25 = vpack.c.bf16 %v345_v23, %v339_v22  ;;  %v344_v27 = vld [vmem:[%s2015_s26 + $0x150] sm:$0xff]  ;;  %v351_v28 = vld [vmem:[%s2015_s26 + $0x188] sm:$0xff]  ;;  %v357_v29 = vld [vmem:[%s2015_s26 + $0x1b8] sm:$0xff] }
  0x38   : > { %v2055_v30 = vpack.c.bf16 %v344_v27, %v338_v26  ;;  %v2058_v31 = vpack.c.bf16 %v357_v29, %v351_v28  ;;  %v350_v32 = vld [vmem:[%s2015_s26 + $0x180] sm:$0xff]  ;;  %v356_v33 = vld [vmem:[%s2015_s26 + $0x1b0] sm:$0xff]  ;;  %v363_v34 = vld [vmem:[%s2015_s26 + $0x1e8] sm:$0xff] }
  0x39   : > { %v369_v35 = vld [vmem:[%s2015_s26 + $0x218] sm:$0xff]  ;;  %v2065_v36 = vpack.c.bf16 %v356_v33, %v350_v32  ;;  %v362_v37 = vld [vmem:[%s2015_s26 + $0x1e0] sm:$0xff]  ;;  %v368_v40 = vld [vmem:[%s2015_s26 + $0x210] sm:$0xff] }
  0x3a   : > { %1377 = vmatpush1.bf16.msra.mxu0 %v2035_v18  ;;  %v305_v38 = vld [vmem:[%s2015_s26 + $0x18] sm:$0xff]  ;;  %v2070_v39 = vpack.c.bf16 %v369_v35, %v363_v34  ;;  %v375_v41 = vld [vmem:[%s2015_s26 + $0x248] sm:$0xff]  ;;  %v304_v45 = vld [vmem:[%s2015_s26 + $0x10] sm:$0xff]  ;;  %v2085_v50 = vpack.c.bf16 %v368_v40, %v362_v37 }
  0x3b   : > { %1379 = vmatprep.subr.bf16.mxu0 %v2038_v19  ;;  %v311_v42 = vld [vmem:[%s2015_s26 + $0x48] sm:$0xff]  ;;  %v381_v43 = vld [vmem:[%s2015_s26 + $0x278] sm:$0xff]  ;;  %v310_v46 = vld [vmem:[%s2015_s26 + $0x40] sm:$0xff] }
  0x3c   : > { %v2076_v44 = vpack.c.bf16 %v311_v42, %v305_v38  ;;  %v2080_v47 = vpack.c.bf16 %v310_v46, %v304_v45  ;;  %v317_v48 = vld [vmem:[%s2015_s26 + $0x78] sm:$0xff]  ;;  %v323_v49 = vld [vmem:[%s2015_s26 + $0xa8] sm:$0xff]  ;;  %v374_v51 = vld [vmem:[%s2015_s26 + $0x240] sm:$0xff]  ;;  %v2093_v54 = vpack.c.bf16 %v381_v43, %v375_v41 }
  0x3d   : > { %v2089_v52 = vpack.c.bf16 %v323_v49, %v317_v48  ;;  %v316_v53 = vld [vmem:[%s2015_s26 + $0x70] sm:$0xff]  ;;  %v387_v56 = vld [vmem:[%s2015_s26 + $0x2a8] sm:$0xff]  ;;  %v322_v57 = vld [vmem:[%s2015_s26 + $0xa0] sm:$0xff] }
  0x3e   : > { %1381 = vmatpush1.bf16.msra.mxu0 %v2045_v24  ;;  %1435 = vmatprep.subr.bf16.mxu1 %v2076_v44  ;;  %v380_v55 = vld [vmem:[%s2015_s26 + $0x270] sm:$0xff]  ;;  %v393_v58 = vld [vmem:[%s2015_s26 + $0x2d8] sm:$0xff]  ;;  %v2101_v59 = vpack.c.bf16 %v322_v57, %v316_v53  ;;  %v335_v61 = vld [vmem:[%s2015_s26 + $0x108] sm:$0xff] }
  0x3f   : > { %1383 = vmatprep.subr.bf16.mxu0 %v2048_v25  ;;  %1437 = vmatpush1.bf16.msra.mxu1 %v2080_v47  ;;  %v329_v60 = vld [vmem:[%s2015_s26 + $0xd8] sm:$0xff]  ;;  %v328_v63 = vld [vmem:[%s2015_s26 + $0xd0] sm:$0xff]  ;;  %v334_v0 = vld [vmem:[%s2015_s26 + $0x100] sm:$0xff]  ;;  %v2110_v1 = vpack.c.bf16 %v380_v55, %v374_v51  ;;  %v2115_v5 = vpack.c.bf16 %v393_v58, %v387_v56 }
  0x40   : > { %1439 = vmatprep.subr.bf16.mxu1 %v2089_v52  ;;  %v2105_v62 = vpack.c.bf16 %v335_v61, %v329_v60  ;;  %v386_v2 = vld [vmem:[%s2015_s26 + $0x2a0] sm:$0xff]  ;;  %v341_v3 = vld [vmem:[%s2015_s26 + $0x138] sm:$0xff]  ;;  %v392_v6 = vld [vmem:[%s2015_s26 + $0x2d0] sm:$0xff]  ;;  %v2120_v9 = vpack.c.bf16 %v334_v0, %v328_v63 }
  0x41   : > { %v399_v7 = vld [vmem:[%s2015_s26 + $0x308] sm:$0xff]  ;;  %v405_v11 = vld [vmem:[%s2015_s26 + $0x338] sm:$0xff]  ;;  %v340_v15 = vld [vmem:[%s2015_s26 + $0x130] sm:$0xff]  ;;  %v2132_v21 = vpack.c.bf16 %v392_v6, %v386_v2 }
  0x42   : > { %1385 = vmatpush1.bf16.msra.mxu0 %v2055_v30  ;;  %v347_v10 = vld [vmem:[%s2015_s26 + $0x168] sm:$0xff]  ;;  %v346_v16 = vld [vmem:[%s2015_s26 + $0x160] sm:$0xff]  ;;  %v353_v17 = vld [vmem:[%s2015_s26 + $0x198] sm:$0xff]  ;;  %v2135_v22 = vpack.c.bf16 %v405_v11, %v399_v7 }
  0x43   : > { %1387 = vmatprep.subr.bf16.mxu0 %v2058_v31  ;;  %1441 = vmatpush1.bf16.msra.mxu1 %v2101_v59  ;;  %v2125_v14 = vpack.c.bf16 %v347_v10, %v341_v3  ;;  %v359_v20 = vld [vmem:[%s2015_s26 + $0x1c8] sm:$0xff]  ;;  %v398_v23 = vld [vmem:[%s2015_s26 + $0x300] sm:$0xff]  ;;  %v404_v26 = vld [vmem:[%s2015_s26 + $0x330] sm:$0xff]  ;;  %v2141_v28 = vpack.c.bf16 %v346_v16, %v340_v15 }
  0x44   : > { %1443 = vmatprep.subr.bf16.mxu1 %v2105_v62  ;;  %v411_v27 = vld [vmem:[%s2015_s26 + $0x368] sm:$0xff]  ;;  %v417_v29 = vld [vmem:[%s2015_s26 + $0x398] sm:$0xff]  ;;  %v2145_v32 = vpack.c.bf16 %v359_v20, %v353_v17  ;;  %v352_v33 = vld [vmem:[%s2015_s26 + $0x190] sm:$0xff]  ;;  %v2152_v38 = vpack.c.bf16 %v404_v26, %v398_v23 }
  0x45   : > { %v358_v34 = vld [vmem:[%s2015_s26 + $0x1c0] sm:$0xff]  ;;  %v365_v35 = vld [vmem:[%s2015_s26 + $0x1f8] sm:$0xff]  ;;  %v371_v37 = vld [vmem:[%s2015_s26 + $0x228] sm:$0xff]  ;;  %v2155_v40 = vpack.c.bf16 %v417_v29, %v411_v27 }
  0x46   : > { %1389 = vmatpush1.bf16.msra.mxu0 %v2065_v36  ;;  %v410_v41 = vld [vmem:[%s2015_s26 + $0x360] sm:$0xff]  ;;  %v416_v42 = vld [vmem:[%s2015_s26 + $0x390] sm:$0xff]  ;;  %v423_v43 = vld [vmem:[%s2015_s26 + $0x3c8] sm:$0xff]  ;;  %v2161_v45 = vpack.c.bf16 %v358_v34, %v352_v33  ;;  %v2165_v48 = vpack.c.bf16 %v371_v37, %v365_v35 }
  0x47   : > { %1391 = vmatprep.subr.bf16.mxu0 %v2070_v39  ;;  %1445 = vmatpush1.bf16.msra.mxu1 %v2120_v9  ;;  %v429_v46 = vld [vmem:[%s2015_s26 + $0x3f8] sm:$0xff]  ;;  %v364_v49 = vld [vmem:[%s2015_s26 + $0x1f0] sm:$0xff]  ;;  %v370_v51 = vld [vmem:[%s2015_s26 + $0x220] sm:$0xff]  ;;  %v2172_v56 = vpack.c.bf16 %v416_v42, %v410_v41 }
  0x48   : > { %1447 = vmatprep.subr.bf16.mxu1 %v2125_v14  ;;  %v377_v53 = vld [vmem:[%s2015_s26 + $0x258] sm:$0xff]  ;;  %v383_v55 = vld [vmem:[%s2015_s26 + $0x288] sm:$0xff]  ;;  %v2175_v57 = vpack.c.bf16 %v429_v46, %v423_v43  ;;  %v422_v58 = vld [vmem:[%s2015_s26 + $0x3c0] sm:$0xff]  ;;  %v2181_v63 = vpack.c.bf16 %v370_v51, %v364_v49 }
  0x49   : > { %v428_v60 = vld [vmem:[%s2015_s26 + $0x3f0] sm:$0xff]  ;;  %v435_v61 = vld [vmem:[%s2015_s26 + $0x428] sm:$0xff]  ;;  %v441_v0 = vld [vmem:[%s2015_s26 + $0x458] sm:$0xff]  ;;  %v2185_v2 = vpack.c.bf16 %v383_v55, %v377_v53 }
  0x4a   : > { %1393 = vmatpush1.bf16.msra.mxu0 %v2085_v50  ;;  %2784 = vst [vmem:[#allocation3_spill] sm:$0xff] %v2181_v63  ;;  %v376_v3 = vld [vmem:[%s2015_s26 + $0x250] sm:$0xff]  ;;  %v382_v6 = vld [vmem:[%s2015_s26 + $0x280] sm:$0xff]  ;;  %v389_v7 = vld [vmem:[%s2015_s26 + $0x2b8] sm:$0xff]  ;;  %v2192_v11 = vpack.c.bf16 %v428_v60, %v422_v58  ;;  %v2195_v15 = vpack.c.bf16 %v441_v0, %v435_v61 }
  0x4b   : > { %1395 = vmatprep.subr.bf16.mxu0 %v2093_v54  ;;  %1449 = vmatpush1.bf16.msra.mxu1 %v2141_v28  ;;  %2785 = vst [vmem:[#allocation4_spill] sm:$0xff] %v2185_v2  ;;  %v395_v10 = vld [vmem:[%s2015_s26 + $0x2e8] sm:$0xff]  ;;  %v434_v16 = vld [vmem:[%s2015_s26 + $0x420] sm:$0xff]  ;;  %v440_v17 = vld [vmem:[%s2015_s26 + $0x450] sm:$0xff]  ;;  %v2201_v23 = vpack.c.bf16 %v382_v6, %v376_v3 }
  0x4c   : > { %1451 = vmatprep.subr.bf16.mxu1 %v2145_v32  ;;  %v447_v20 = vld [vmem:[%s2015_s26 + $0x488] sm:$0xff]  ;;  %v453_v26 = vld [vmem:[%s2015_s26 + $0x4b8] sm:$0xff]  ;;  %v2205_v27 = vpack.c.bf16 %v395_v10, %v389_v7  ;;  %v388_v29 = vld [vmem:[%s2015_s26 + $0x2b0] sm:$0xff]  ;;  %v2212_v37 = vpack.c.bf16 %v440_v17, %v434_v16 }
  0x4d   : > { %2786 = vst [vmem:[#allocation5_spill] sm:$0xff] %v2201_v23  ;;  %v394_v33 = vld [vmem:[%s2015_s26 + $0x2e0] sm:$0xff]  ;;  %v401_v34 = vld [vmem:[%s2015_s26 + $0x318] sm:$0xff]  ;;  %v407_v35 = vld [vmem:[%s2015_s26 + $0x348] sm:$0xff]  ;;  %v2215_v41 = vpack.c.bf16 %v453_v26, %v447_v20 }
  0x4e   : > { %1397 = vmatpush1.bf16.msra.mxu0 %v2110_v1  ;;  %2787 = vst [vmem:[#allocation6_spill] sm:$0xff] %v2205_v27  ;;  %v446_v42 = vld [vmem:[%s2015_s26 + $0x480] sm:$0xff]  ;;  %v452_v43 = vld [vmem:[%s2015_s26 + $0x4b0] sm:$0xff]  ;;  %v459_v46 = vld [vmem:[%s2015_s26 + $0x4e8] sm:$0xff]  ;;  %v2221_v49 = vpack.c.bf16 %v394_v33, %v388_v29  ;;  %v2225_v53 = vpack.c.bf16 %v407_v35, %v401_v34 }
  0x4f   : > { %1399 = vmatprep.subr.bf16.mxu0 %v2115_v5  ;;  %1453 = vmatpush1.bf16.msra.mxu1 %v2161_v45  ;;  %v465_v51 = vld [vmem:[%s2015_s26 + $0x518] sm:$0xff]  ;;  %v400_v55 = vld [vmem:[%s2015_s26 + $0x310] sm:$0xff]  ;;  %v406_v58 = vld [vmem:[%s2015_s26 + $0x340] sm:$0xff]  ;;  %v2232_v0 = vpack.c.bf16 %v452_v43, %v446_v42 }
  0x50   : > { %1455 = vmatprep.subr.bf16.mxu1 %v2165_v48  ;;  %2788 = vst [vmem:[#allocation7_spill] sm:$0xff] %v2221_v49  ;;  %2789 = vst [vmem:[#allocation8_spill] sm:$0xff] %v2225_v53  ;;  %v413_v60 = vld [vmem:[%s2015_s26 + $0x378] sm:$0xff]  ;;  %v419_v61 = vld [vmem:[%s2015_s26 + $0x3a8] sm:$0xff]  ;;  %v2235_v3 = vpack.c.bf16 %v465_v51, %v459_v46  ;;  %v2241_v16 = vpack.c.bf16 %v406_v58, %v400_v55 }
  0x51   : > { %v458_v6 = vld [vmem:[%s2015_s26 + $0x4e0] sm:$0xff]  ;;  %v464_v7 = vld [vmem:[%s2015_s26 + $0x510] sm:$0xff]  ;;  %v471_v10 = vld [vmem:[%s2015_s26 + $0x548] sm:$0xff]  ;;  %v2245_v20 = vpack.c.bf16 %v419_v61, %v413_v60 }
  0x52   : > { %1401 = vmatpush1.bf16.msra.mxu0 %v2132_v21  ;;  %2790 = vst [vmem:[#allocation9_spill] sm:$0xff] %v2241_v16  ;;  %v477_v17 = vld [vmem:[%s2015_s26 + $0x578] sm:$0xff]  ;;  %v412_v26 = vld [vmem:[%s2015_s26 + $0x370] sm:$0xff]  ;;  %v418_v29 = vld [vmem:[%s2015_s26 + $0x3a0] sm:$0xff]  ;;  %v2252_v35 = vpack.c.bf16 %v464_v7, %v458_v6 }
  0x53   : > { %1403 = vmatprep.subr.bf16.mxu0 %v2135_v22  ;;  %1457 = vmatpush1.bf16.msra.mxu1 %v2181_v63  ;;  %2791 = vst [vmem:[#allocation10_spill] sm:$0xff] %v2245_v20  ;;  %v425_v33 = vld [vmem:[%s2015_s26 + $0x3d8] sm:$0xff]  ;;  %v431_v34 = vld [vmem:[%s2015_s26 + $0x408] sm:$0xff]  ;;  %v2255_v42 = vpack.c.bf16 %v477_v17, %v471_v10  ;;  %v470_v43 = vld [vmem:[%s2015_s26 + $0x540] sm:$0xff]  ;;  %v2261_v55 = vpack.c.bf16 %v418_v29, %v412_v26 }
  0x54   : > { %1459 = vmatprep.subr.bf16.mxu1 %v2185_v2  ;;  %v476_v46 = vld [vmem:[%s2015_s26 + $0x570] sm:$0xff]  ;;  %v483_v51 = vld [vmem:[%s2015_s26 + $0x5a8] sm:$0xff]  ;;  %v489_v58 = vld [vmem:[%s2015_s26 + $0x5d8] sm:$0xff]  ;;  %v2265_v60 = vpack.c.bf16 %v431_v34, %v425_v33 }
  0x55   : > { %2792 = vst [vmem:[#allocation11_spill] sm:$0xff] %v2261_v55  ;;  %v424_v61 = vld [vmem:[%s2015_s26 + $0x3d0] sm:$0xff]  ;;  %v430_v6 = vld [vmem:[%s2015_s26 + $0x400] sm:$0xff]  ;;  %v437_v7 = vld [vmem:[%s2015_s26 + $0x438] sm:$0xff]  ;;  %v2272_v17 = vpack.c.bf16 %v476_v46, %v470_v43  ;;  %v2275_v26 = vpack.c.bf16 %v489_v58, %v483_v51 }
  0x56   : > { %1405 = vmatpush1.bf16.msra.mxu0 %v2152_v38  ;;  %2793 = vst [vmem:[#allocation12_spill] sm:$0xff] %v2265_v60  ;;  %v443_v10 = vld [vmem:[%s2015_s26 + $0x468] sm:$0xff]  ;;  %v482_v29 = vld [vmem:[%s2015_s26 + $0x5a0] sm:$0xff]  ;;  %v488_v33 = vld [vmem:[%s2015_s26 + $0x5d0] sm:$0xff]  ;;  %v2281_v4 = vpack.c.bf16 %v430_v6, %v424_v61 }
  0x57   : > { %1407 = vmatprep.subr.bf16.mxu0 %v2155_v40  ;;  %1461 = vmatpush1.bf16.msra.mxu1 %v2201_v23  ;;  %v307_v34 = vld [vmem:[%s2015_s26 + $0x28] sm:$0xff]  ;;  %v2285_v43 = vpack.c.bf16 %v443_v10, %v437_v7  ;;  %v436_v46 = vld [vmem:[%s2015_s26 + $0x430] sm:$0xff]  ;;  %v442_v51 = vld [vmem:[%s2015_s26 + $0x460] sm:$0xff] }
  0x58   : > { %1463 = vmatprep.subr.bf16.mxu1 %v2205_v27  ;;  %2794 = vst [vmem:[#allocation13_spill] sm:$0xff] %v2281_v4  ;;  %v449_v58 = vld [vmem:[%s2015_s26 + $0x498] sm:$0xff]  ;;  %v306_v6 = vld [vmem:[%s2015_s26 + $0x20] sm:$0xff]  ;;  %v312_v7 = vld [vmem:[%s2015_s26 + $0x50] sm:$0xff] }
  0x59   : > { %2795 = vst [vmem:[#allocation14_spill] sm:$0xff] %v2285_v43  ;;  %v319_v10 = vld [vmem:[%s2015_s26 + $0x88] sm:$0xff]  ;;  %v2312_v27 = vpack.c.bf16 %v312_v7, %v306_v6  ;;  %v460_v6 = vld [vmem:[%s2015_s26 + $0x4f0] sm:$0xff]  ;;  %v466_v7 = vld [vmem:[%s2015_s26 + $0x520] sm:$0xff] }
  0x5a   : > { %1409 = vmatpush1.bf16.msra.mxu0 %v2172_v56  ;;  %v479_v2 = vld [vmem:[%s2015_s26 + $0x588] sm:$0xff] }
  0x5b   : > { %1411 = vmatprep.subr.bf16.mxu0 %v2175_v57  ;;  %1465 = vmatpush1.bf16.msra.mxu1 %v2221_v49  ;;  %v467_v49 = vld [vmem:[%s2015_s26 + $0x528] sm:$0xff]  ;;  %2798 = vst [vmem:[#allocation17_spill] sm:$0xff] %v2312_v27 }
  0x5c   : > { %1467 = vmatprep.subr.bf16.mxu1 %v2225_v53  ;;  %v2292_v53 = vpack.c.bf16 %v488_v33, %v482_v29  ;;  %v448_v33 = vld [vmem:[%s2015_s26 + $0x490] sm:$0xff] }
  0x5e   : > { %1413 = vmatpush1.bf16.msra.mxu0 %v2192_v11 }
  0x5f   : > { %1415 = vmatprep.subr.bf16.mxu0 %v2195_v15  ;;  %1469 = vmatpush1.bf16.msra.mxu1 %v2241_v16  ;;  %v455_v16 = vld [vmem:[%s2015_s26 + $0x4c8] sm:$0xff] }
  0x60   : > { %1471 = vmatprep.subr.bf16.mxu1 %v2245_v20  ;;  %v313_v20 = vld [vmem:[%s2015_s26 + $0x58] sm:$0xff]  ;;  %v2305_v29 = vpack.c.bf16 %v455_v16, %v449_v58  ;;  %v331_v16 = vld [vmem:[%s2015_s26 + $0xe8] sm:$0xff] }
  0x61   : > { %v2295_v61 = vpack.c.bf16 %v313_v20, %v307_v34  ;;  %v454_v20 = vld [vmem:[%s2015_s26 + $0x4c0] sm:$0xff]  ;;  %v461_v34 = vld [vmem:[%s2015_s26 + $0x4f8] sm:$0xff] }
  0x62   : > { %1417 = vmatpush1.bf16.msra.mxu0 %v2212_v37  ;;  %2797 = vst [vmem:[#allocation16_spill] sm:$0xff] %v2305_v29  ;;  %v2321_v58 = vpack.c.bf16 %v454_v20, %v448_v33  ;;  %v2325_v23 = vpack.c.bf16 %v467_v49, %v461_v34  ;;  %v330_v20 = vld [vmem:[%s2015_s26 + $0xe0] sm:$0xff]  ;;  %v336_v34 = vld [vmem:[%s2015_s26 + $0x110] sm:$0xff] }
  0x63   : > { %1419 = vmatprep.subr.bf16.mxu0 %v2215_v41  ;;  %1473 = vmatpush1.bf16.msra.mxu1 %v2261_v55  ;;  %v325_v55 = vld [vmem:[%s2015_s26 + $0xb8] sm:$0xff]  ;;  %v2354_v63 = vpack.c.bf16 %v336_v34, %v330_v20  ;;  %v484_v34 = vld [vmem:[%s2015_s26 + $0x5b0] sm:$0xff] }
  0x64   : > { %1475 = vmatprep.subr.bf16.mxu1 %v2265_v60  ;;  %v2301_v60 = vpack.c.bf16 %v442_v51, %v436_v46  ;;  %v2315_v46 = vpack.c.bf16 %v325_v55, %v319_v10  ;;  %v318_v51 = vld [vmem:[%s2015_s26 + $0x80] sm:$0xff]  ;;  %2800 = vst [vmem:[#allocation19_spill] sm:$0xff] %v2321_v58  ;;  %2801 = vst [vmem:[#allocation20_spill] sm:$0xff] %v2325_v23  ;;  %v2802_v55 = vmov 0.0   ;;  %v473_v10 = vld [vmem:[%s2015_s26 + $0x558] sm:$0xff] }
  0x66   : > { %1421 = vmatpush1.bf16.msra.mxu0 %v2232_v0  ;;  %2796 = vst [vmem:[#allocation15_spill] sm:$0xff] %v2301_v60  ;;  %2799 = vst [vmem:[#allocation18_spill] sm:$0xff] %v2315_v46 }
  0x67   : > { %1423 = vmatprep.subr.bf16.mxu0 %v2235_v3  ;;  %1477 = vmatpush1.bf16.msra.mxu1 %v2281_v4  ;;  %v337_v4 = vld [vmem:[%s2015_s26 + $0x118] sm:$0xff] }
  0x68   : > { %1479 = vmatprep.subr.bf16.mxu1 %v2285_v43  ;;  %v324_v43 = vld [vmem:[%s2015_s26 + $0xb0] sm:$0xff]  ;;  %v2337_v49 = vpack.c.bf16 %v337_v4, %v331_v16  ;;  %v478_v4 = vld [vmem:[%s2015_s26 + $0x580] sm:$0xff]  ;;  %v485_v16 = vld [vmem:[%s2015_s26 + $0x5b8] sm:$0xff] }
  0x69   : > { %v2333_v33 = vpack.c.bf16 %v324_v43, %v318_v51  ;;  %v2347_v43 = vpack.c.bf16 %v479_v2, %v473_v10  ;;  %v472_v51 = vld [vmem:[%s2015_s26 + $0x550] sm:$0xff]  ;;  %v355_v2 = vld [vmem:[%s2015_s26 + $0x1a8] sm:$0xff] }
  0x6a   : > { %1425 = vmatpush1.bf16.msra.mxu0 %v2252_v35  ;;  %2804 = vst [vmem:[#allocation22_spill] sm:$0xff] %v2337_v49  ;;  %v2363_v10 = vpack.c.bf16 %v478_v4, %v472_v51  ;;  %v354_v51 = vld [vmem:[%s2015_s26 + $0x1a0] sm:$0xff]  ;;  %v360_v4 = vld [vmem:[%s2015_s26 + $0x1d0] sm:$0xff] }
  0x6b   : > { %1427 = vmatprep.subr.bf16.mxu0 %v2255_v42  ;;  %1481 = vmatpush1.bf16.msra.mxu1 %v2301_v60  ;;  %2803 = vst [vmem:[#allocation21_spill] sm:$0xff] %v2333_v33  ;;  %v2343_v60 = vpack.c.bf16 %v466_v7, %v460_v6  ;;  %v342_v7 = vld [vmem:[%s2015_s26 + $0x140] sm:$0xff] }
  0x6c   : > { %1483 = vmatprep.subr.bf16.mxu1 %v2305_v29  ;;  %v343_v29 = vld [vmem:[%s2015_s26 + $0x148] sm:$0xff] }
  0x6e   : > { %1429 = vmatpush1.bf16.msra.mxu0 %v2272_v17 }
  0x6f   : > { %1431 = vmatprep.subr.bf16.mxu0 %v2275_v26  ;;  %1485 = vmatpush1.bf16.msra.mxu1 %v2321_v58  ;;  %v361_v58 = vld [vmem:[%s2015_s26 + $0x1d8] sm:$0xff] }
  0x70   : > { %1487 = vmatprep.subr.bf16.mxu1 %v2325_v23  ;;  %v348_v23 = vld [vmem:[%s2015_s26 + $0x170] sm:$0xff] }
  0x72   : > { %1433 = vmatpush1.bf16.msra.mxu0 %v2292_v53 }
  0x73   : > { %1499 = vmatprep.subr.bf16.mxu0 %v2295_v61  ;;  %1489 = vmatpush1.bf16.msra.mxu1 %v2343_v60 }
  0x74   : > { %1491 = vmatprep.subr.bf16.mxu1 %v2347_v43 }
  0x75   : > { %622 = vmatmul.mubr.f32.vlgmr.msra.gmra.mrb[0].mxu0 %v2802_v55 }
  0x76   : > { %1501 = vmatpush1.bf16.msra.mxu0 %v2312_v27  ;;  %763 = vmatprep.mubr.f32.mxu0 %v2802_v55  ;;  %v349_v27 = vld [vmem:[%s2015_s26 + $0x178] sm:$0xff] }
  0x77   : > { %1503 = vmatprep.subr.bf16.mxu0 %v2315_v46  ;;  %v491_v46 = vld [vmem:[%s2015_s26 + $0x5e8] sm:$0xff]  ;;  %v2357_v6 = vpack.c.bf16 %v349_v27, %v343_v29  ;;  %v2372_v27 = vpack.c.bf16 %v348_v23, %v342_v7  ;;  %v2375_v29 = vpack.c.bf16 %v361_v58, %v355_v2  ;;  %1493 = vmatpush1.bf16.msra.mxu1 %v2363_v10  ;;  %v366_v7 = vld [vmem:[%s2015_s26 + $0x200] sm:$0xff]  ;;  %v372_v2 = vld [vmem:[%s2015_s26 + $0x230] sm:$0xff] }
  0x78   : > { %v2367_v20 = vpack.c.bf16 %v491_v46, %v485_v16  ;;  %v367_v16 = vld [vmem:[%s2015_s26 + $0x208] sm:$0xff]  ;;  %v2386_v23 = vpack.c.bf16 %v360_v4, %v354_v51  ;;  %v2398_v51 = vpack.c.bf16 %v372_v2, %v366_v7  ;;  %v378_v4 = vld [vmem:[%s2015_s26 + $0x260] sm:$0xff] }
  0x79   : > { %2805 = vst [vmem:[#allocation23_spill] sm:$0xff] %v2375_v29 }
  0x7a   : > { %1505 = vmatpush1.bf16.msra.mxu0 %v2333_v33  ;;  %v373_v33 = vld [vmem:[%s2015_s26 + $0x238] sm:$0xff]  ;;  %1495 = vmatprep.subr.bf16.mxu1 %v2367_v20 }
  0x7b   : > { %1507 = vmatprep.subr.bf16.mxu0 %v2337_v49  ;;  %v490_v49 = vld [vmem:[%s2015_s26 + $0x5e0] sm:$0xff]  ;;  %v2389_v58 = vpack.c.bf16 %v373_v33, %v367_v16  ;;  %v384_v16 = vld [vmem:[%s2015_s26 + $0x290] sm:$0xff] }
  0x7c   : > { %v2380_v46 = vpack.c.bf16 %v490_v49, %v484_v34  ;;  %v379_v49 = vld [vmem:[%s2015_s26 + $0x268] sm:$0xff]  ;;  %v385_v34 = vld [vmem:[%s2015_s26 + $0x298] sm:$0xff]  ;;  %v2411_v7 = vpack.c.bf16 %v384_v16, %v378_v4  ;;  %v402_v4 = vld [vmem:[%s2015_s26 + $0x320] sm:$0xff] }
  0x7d   : > { %2806 = vst [vmem:[#allocation24_spill] sm:$0xff] %v2389_v58  ;;  %v2402_v33 = vpack.c.bf16 %v385_v34, %v379_v49  ;;  %v390_v49 = vld [vmem:[%s2015_s26 + $0x2c0] sm:$0xff]  ;;  %v396_v34 = vld [vmem:[%s2015_s26 + $0x2f0] sm:$0xff] }
  0x7e   : > { %1509 = vmatpush1.bf16.msra.mxu0 %v2354_v63  ;;  %1497 = vmatpush1.bf16.msra.mxu1 %v2380_v46  ;;  %v408_v16 = vld [vmem:[%s2015_s26 + $0x350] sm:$0xff] }
  0x7f   : > { %1511 = vmatprep.subr.bf16.mxu0 %v2357_v6  ;;  %1563 = vmatprep.subr.bf16.mxu1 %v2020_v8  ;;  %v397_v8 = vld [vmem:[%s2015_s26 + $0x2f8] sm:$0xff] }
  0x81   : > { %693 = vmatmul.mubr.f32.vlgmr.msra.gmra.mrb[0].mxu1 %v2802_v55 }
  0x82   : > { %1513 = vmatpush1.bf16.msra.mxu0 %v2372_v27  ;;  %1565 = vmatpush1.bf16.msra.mxu1 %v2025_v12  ;;  %v403_v12 = vld [vmem:[%s2015_s26 + $0x328] sm:$0xff] }
  0x83   : > { %1515 = vmatprep.subr.bf16.mxu0 %v2375_v29  ;;  %v391_v29 = vld [vmem:[%s2015_s26 + $0x2c8] sm:$0xff]  ;;  %1567 = vmatprep.subr.bf16.mxu1 %v2027_v13  ;;  %v2423_v13 = vpack.c.bf16 %v396_v34, %v390_v49  ;;  %v414_v49 = vld [vmem:[%s2015_s26 + $0x380] sm:$0xff]  ;;  %v420_v34 = vld [vmem:[%s2015_s26 + $0x3b0] sm:$0xff] }
  0x84   : > { %v2414_v2 = vpack.c.bf16 %v397_v8, %v391_v29  ;;  %v421_v8 = vld [vmem:[%s2015_s26 + $0x3b8] sm:$0xff] }
  0x86   : > { %1517 = vmatpush1.bf16.msra.mxu0 %v2386_v23  ;;  %1569 = vmatpush1.bf16.msra.mxu1 %v2035_v18  ;;  %v415_v18 = vld [vmem:[%s2015_s26 + $0x388] sm:$0xff] }
  0x87   : > { %1519 = vmatprep.subr.bf16.mxu0 %v2389_v58  ;;  %v409_v58 = vld [vmem:[%s2015_s26 + $0x358] sm:$0xff]  ;;  %1571 = vmatprep.subr.bf16.mxu1 %v2038_v19  ;;  %v2435_v19 = vpack.c.bf16 %v408_v16, %v402_v4  ;;  %v426_v16 = vld [vmem:[%s2015_s26 + $0x3e0] sm:$0xff] }
  0x88   : > { %v2426_v29 = vpack.c.bf16 %v409_v58, %v403_v12  ;;  %v2438_v58 = vpack.c.bf16 %v421_v8, %v415_v18  ;;  %v433_v12 = vld [vmem:[%s2015_s26 + $0x418] sm:$0xff]  ;;  %v432_v18 = vld [vmem:[%s2015_s26 + $0x410] sm:$0xff] }
  0x89   : > { %v445_v8 = vld [vmem:[%s2015_s26 + $0x478] sm:$0xff] }
  0x8a   : > { %1521 = vmatpush1.bf16.msra.mxu0 %v2398_v51  ;;  %1573 = vmatpush1.bf16.msra.mxu1 %v2045_v24  ;;  %v427_v24 = vld [vmem:[%s2015_s26 + $0x3e8] sm:$0xff] }
  0x8b   : > { %1523 = vmatprep.subr.bf16.mxu0 %v2402_v33  ;;  %1575 = vmatprep.subr.bf16.mxu1 %v2048_v25  ;;  %v2447_v25 = vpack.c.bf16 %v420_v34, %v414_v49  ;;  %v2450_v4 = vpack.c.bf16 %v433_v12, %v427_v24  ;;  %v438_v34 = vld [vmem:[%s2015_s26 + $0x440] sm:$0xff]  ;;  %v444_v24 = vld [vmem:[%s2015_s26 + $0x470] sm:$0xff]  ;;  %v457_v12 = vld [vmem:[%s2015_s26 + $0x4d8] sm:$0xff] }
  0x8e   : > { %1525 = vmatpush1.bf16.msra.mxu0 %v2411_v7  ;;  %1577 = vmatpush1.bf16.msra.mxu1 %v2055_v30  ;;  %v439_v30 = vld [vmem:[%s2015_s26 + $0x448] sm:$0xff] }
  0x8f   : > { %1527 = vmatprep.subr.bf16.mxu0 %v2414_v2  ;;  %1579 = vmatprep.subr.bf16.mxu1 %v2058_v31  ;;  %v2459_v31 = vpack.c.bf16 %v432_v18, %v426_v16  ;;  %v2462_v49 = vpack.c.bf16 %v445_v8, %v439_v30  ;;  %v450_v18 = vld [vmem:[%s2015_s26 + $0x4a0] sm:$0xff]  ;;  %v456_v30 = vld [vmem:[%s2015_s26 + $0x4d0] sm:$0xff]  ;;  %v469_v8 = vld [vmem:[%s2015_s26 + $0x538] sm:$0xff] }
  0x92   : > { %1529 = vmatpush1.bf16.msra.mxu0 %v2423_v13  ;;  %1581 = vmatpush1.bf16.msra.mxu1 %v2065_v36  ;;  %v451_v36 = vld [vmem:[%s2015_s26 + $0x4a8] sm:$0xff] }
  0x93   : > { %1531 = vmatprep.subr.bf16.mxu0 %v2426_v29  ;;  %1583 = vmatprep.subr.bf16.mxu1 %v2070_v39  ;;  %v2471_v39 = vpack.c.bf16 %v444_v24, %v438_v34  ;;  %v2474_v16 = vpack.c.bf16 %v457_v12, %v451_v36  ;;  %v462_v24 = vld [vmem:[%s2015_s26 + $0x500] sm:$0xff]  ;;  %v468_v36 = vld [vmem:[%s2015_s26 + $0x530] sm:$0xff]  ;;  %v481_v12 = vld [vmem:[%s2015_s26 + $0x598] sm:$0xff] }
  0x96   : > { %1533 = vmatpush1.bf16.msra.mxu0 %v2435_v19  ;;  %1585 = vmatpush1.bf16.msra.mxu1 %v2085_v50  ;;  %v463_v50 = vld [vmem:[%s2015_s26 + $0x508] sm:$0xff] }
  0x97   : > { %1535 = vmatprep.subr.bf16.mxu0 %v2438_v58  ;;  %1587 = vmatprep.subr.bf16.mxu1 %v2093_v54  ;;  %v2483_v54 = vpack.c.bf16 %v456_v30, %v450_v18  ;;  %v2486_v34 = vpack.c.bf16 %v469_v8, %v463_v50  ;;  %v474_v30 = vld [vmem:[%s2015_s26 + $0x560] sm:$0xff]  ;;  %v480_v50 = vld [vmem:[%s2015_s26 + $0x590] sm:$0xff]  ;;  %v487_v8 = vld [vmem:[%s2015_s26 + $0x5c8] sm:$0xff] }
  0x99   : > { %2807 = vst [vmem:[#allocation25_spill] sm:$0xff] %v2486_v34 }
  0x9a   : > { %1537 = vmatpush1.bf16.msra.mxu0 %v2447_v25  ;;  %1589 = vmatpush1.bf16.msra.mxu1 %v2110_v1  ;;  %v475_v1 = vld [vmem:[%s2015_s26 + $0x568] sm:$0xff] }
  0x9b   : > { %1539 = vmatprep.subr.bf16.mxu0 %v2450_v4  ;;  %1591 = vmatprep.subr.bf16.mxu1 %v2115_v5  ;;  %v2495_v5 = vpack.c.bf16 %v468_v36, %v462_v24  ;;  %v2498_v18 = vpack.c.bf16 %v481_v12, %v475_v1  ;;  %v486_v36 = vld [vmem:[%s2015_s26 + $0x5c0] sm:$0xff]  ;;  %v501_v1 = vstv %s297_s8 }
  0x9e   : > { %1541 = vmatpush1.bf16.msra.mxu0 %v2459_v31  ;;  %1593 = vmatpush1.bf16.msra.mxu1 %v2132_v21  ;;  %v493_v21 = vld [vmem:[%s2015_s26 + $0x5f8] sm:$0xff] }
  0x9f   : > { %1543 = vmatprep.subr.bf16.mxu0 %v2462_v49  ;;  %1595 = vmatprep.subr.bf16.mxu1 %v2135_v22  ;;  %v2507_v22 = vpack.c.bf16 %v480_v50, %v474_v30  ;;  %v2510_v24 = vpack.c.bf16 %v493_v21, %v487_v8  ;;  %v1917_v30 = vmov 1983009808  }
  0xa0   : > { %v774_v50 = vunpack.c.l.s4 %v1917_v30 }
  0xa2   : > { %1545 = vmatpush1.bf16.msra.mxu0 %v2471_v39  ;;  %1597 = vmatpush1.bf16.msra.mxu1 %v2152_v38 }
  0xa3   : > { %1547 = vmatprep.subr.bf16.mxu0 %v2474_v16  ;;  %1599 = vmatprep.subr.bf16.mxu1 %v2155_v40  ;;  %v2817_v40 = vld [vmem:[#allocation12_spill] sm:$0xff] }
  0xa6   : > { %1549 = vmatpush1.bf16.msra.mxu0 %v2483_v54  ;;  %1601 = vmatpush1.bf16.msra.mxu1 %v2172_v56  ;;  %v2820_v56 = vld [vmem:[#allocation15_spill] sm:$0xff] }
  0xa7   : > { %1551 = vmatprep.subr.bf16.mxu0 %v2486_v34  ;;  %v492_v34 = vld [vmem:[%s2015_s26 + $0x5f0] sm:$0xff]  ;;  %1603 = vmatprep.subr.bf16.mxu1 %v2175_v57  ;;  %v2821_v57 = vld [vmem:[#allocation16_spill] sm:$0xff]  ;;  %s296_s26 = scalar_lea.vmem %s2755_s3, %s1359_s22 }
  0xa8   : > { %v2517_v38 = vpack.c.bf16 %v492_v34, %v486_v36  ;;  %v298_v34 = vld [vmem:[%s2601_s10] sm:$0xff]  ;;  %v300_v36 = vld [vmem:[%s2601_s10 + $0xc] sm:$0xff] }
  0xaa   : > { %1553 = vmatpush1.bf16.msra.mxu0 %v2495_v5  ;;  %1605 = vmatpush1.bf16.msra.mxu1 %v2192_v11  ;;  %v2822_v11 = vld [vmem:[#allocation19_spill] sm:$0xff] }
  0xab   : > { %1555 = vmatprep.subr.bf16.mxu0 %v2498_v18  ;;  %1607 = vmatprep.subr.bf16.mxu1 %v2195_v15  ;;  %v2823_v15 = vld [vmem:[#allocation20_spill] sm:$0xff] }
  0xae   : > { %1557 = vmatpush1.bf16.msra.mxu0 %v2507_v22  ;;  %1609 = vmatpush1.bf16.msra.mxu1 %v2212_v37  ;;  %v527_v37 = vlaneseq }
  0xaf   : > { %1559 = vmatprep.subr.bf16.mxu0 %v2510_v24  ;;  %1611 = vmatprep.subr.bf16.mxu1 %v2215_v41 }
  0xb0   : > { %v2568_v41 = vshrl.u32 %v527_v37, 7 }
  0xb2   : > { %1561 = vmatpush1.bf16.msra.mxu0 %v2517_v38  ;;  %1613 = vmatpush1.bf16.msra.mxu1 %v2232_v0  ;;  %v2576_v0 = vld [vmem:[%s287_s5] sm:$0x3f] }
  0xb3   : > { %1627 = vmatprep.subr.bf16.mxu0 %v2076_v44  ;;  %1615 = vmatprep.subr.bf16.mxu1 %v2235_v3  ;;  %v2808_v44 = vld [vmem:[#allocation3_spill] sm:$0xff]  ;;  %v533_v3 = vsub.s32 1, %v2568_v41 }
  0xb5   : > { %764 = vmatmul.mubr.f32.vlgmr.msra.gmra.mrb[2].mxu0 %v2802_v55 }
  0xb6   : > { %1629 = vmatpush1.bf16.msra.mxu0 %v2080_v47  ;;  %1617 = vmatpush1.bf16.msra.mxu1 %v2252_v35  ;;  %v2809_v47 = vld [vmem:[#allocation4_spill] sm:$0xff] }
  0xb7   : > { %1631 = vmatprep.subr.bf16.mxu0 %v2089_v52  ;;  %1619 = vmatprep.subr.bf16.mxu1 %v2255_v42  ;;  %v2810_v52 = vld [vmem:[#allocation5_spill] sm:$0xff]  ;;  %v2584_v42 = vrot.slane %v2576_v0, %v533_v3 }
  0xba   : > { %1633 = vmatpush1.bf16.msra.mxu0 %v2101_v59  ;;  %1621 = vmatpush1.bf16.msra.mxu1 %v2272_v17  ;;  %v2811_v59 = vld [vmem:[#allocation6_spill] sm:$0xff] }
  0xbb   : > { %1635 = vmatprep.subr.bf16.mxu0 %v2105_v62  ;;  %1623 = vmatprep.subr.bf16.mxu1 %v2275_v26  ;;  %v2812_v62 = vld [vmem:[#allocation7_spill] sm:$0xff] }
  0xbe   : > { %1637 = vmatpush1.bf16.msra.mxu0 %v2120_v9  ;;  %1625 = vmatpush1.bf16.msra.mxu1 %v2292_v53  ;;  %v2813_v9 = vld [vmem:[#allocation8_spill] sm:$0xff]  ;;  %v2574_v53 = vsub.s32 0, %v2568_v41 }
  0xbf   : > { %1639 = vmatprep.subr.bf16.mxu0 %v2125_v14  ;;  %1691 = vmatprep.subr.bf16.mxu1 %v2295_v61  ;;  %v2814_v14 = vld [vmem:[#allocation9_spill] sm:$0xff] }
  0xc0   : > { %v2581_v35 = vrot.slane %v2576_v0, %v2574_v53 }
  0xc2   : > { %1641 = vmatpush1.bf16.msra.mxu0 %v2141_v28  ;;  %v2815_v28 = vld [vmem:[#allocation10_spill] sm:$0xff] }
  0xc3   : > { %1643 = vmatprep.subr.bf16.mxu0 %v2145_v32  ;;  %v2816_v32 = vld [vmem:[#allocation11_spill] sm:$0xff] }
  0xc6   : > { %1645 = vmatpush1.bf16.msra.mxu0 %v2161_v45  ;;  %v2818_v45 = vld [vmem:[#allocation13_spill] sm:$0xff] }
  0xc7   : > { %1647 = vmatprep.subr.bf16.mxu0 %v2165_v48  ;;  %v2819_v48 = vld [vmem:[#allocation14_spill] sm:$0xff] }
  0xca   : > { %1649 = vmatpush1.bf16.msra.mxu0 %v2808_v44 }
  0xcb   : > { %1651 = vmatprep.subr.bf16.mxu0 %v2809_v47  ;;  %v2607_v47 = vmul.f32 %v501_v1, %v298_v34 }
  0xce   : > { %1653 = vmatpush1.bf16.msra.mxu0 %v2810_v52 }
  0xcf   : > { %1655 = vmatprep.subr.bf16.mxu0 %v2811_v59  ;;  %v2609_v59 = vmul.f32 %v501_v1, %v300_v36 }
  0xd2   : > { %1657 = vmatpush1.bf16.msra.mxu0 %v2812_v62  ;;  %v775_v62 = vunpack.c.0.s8 %v774_v50 }
  0xd3   : > { %1659 = vmatprep.subr.bf16.mxu0 %v2813_v9  ;;  %v2783_v9 = vrot.slane %v2607_v47, 7 }
  0xd6   : > { %1661 = vmatpush1.bf16.msra.mxu0 %v2814_v14  ;;  %v496_v14 = vstv %s495_s12 }
  0xd7   : > { %1663 = vmatprep.subr.bf16.mxu0 %v2815_v28  ;;  %v514_v28 = vrot.slane %v2609_v59, 7 }
  0xda   : > { %1665 = vmatpush1.bf16.msra.mxu0 %v2816_v32  ;;  %v2614_v32 = vsub.s32 %v775_v62, %v2568_v41 }
  0xdb   : > { %1667 = vmatprep.subr.bf16.mxu0 %v2817_v40  ;;  %v2616_v40 = vmul.f32 %v496_v14, %v298_v34 }
  0xde   : > { %1669 = vmatpush1.bf16.msra.mxu0 %v2818_v45  ;;  %v511_v45 = vrot.slane %v2783_v9, 2 }
  0xdf   : > { %1671 = vmatprep.subr.bf16.mxu0 %v2819_v48  ;;  %v2620_v48 = vmul.f32 %v496_v14, %v300_v36  ;;  %v299_v36 = vld [vmem:[%s2601_s10 + $0x8] sm:$0xf] }
  0xe2   : > { %1673 = vmatpush1.bf16.msra.mxu0 %v2820_v56  ;;  %v515_v56 = vrot.slane %v514_v28, 2 }
  0xe3   : > { %1675 = vmatprep.subr.bf16.mxu0 %v2821_v57 }
  0xe6   : > { %1677 = vmatpush1.bf16.msra.mxu0 %v2822_v11  ;;  %v522_v11 = vadd.f32 %v511_v45, %v2616_v40  ;;  %v301_v45 = vld [vmem:[%s2601_s10 + $0x14] sm:$0xf] }
  0xe7   : > { %1679 = vmatprep.subr.bf16.mxu0 %v2823_v15  ;;  %v524_v15 = vadd.f32 %v515_v56, %v2620_v48  ;;  %v2631_v56 = vmul.f32 %v501_v1, %v299_v36 }
  0xe9   : > { %v800_v34 = vrot.slane %v524_v15, 4 }
  0xea   : > { %1681 = vmatpush1.bf16.msra.mxu0 %v2343_v60 }
  0xeb   : > { %1683 = vmatprep.subr.bf16.mxu0 %v2347_v43  ;;  %v2590_v43 = vsub.s32 2, %v2568_v41 }
  0xee   : > { %1685 = vmatpush1.bf16.msra.mxu0 %v2363_v10  ;;  %v541_v10 = vsub.s32 3, %v2568_v41 }
  0xef   : > { %1687 = vmatprep.subr.bf16.mxu0 %v2367_v20  ;;  %v2596_v20 = vrot.slane %v2576_v0, %v2590_v43 }
  0xf2   : > { %1689 = vmatpush1.bf16.msra.mxu0 %v2380_v46  ;;  %v2599_v46 = vrot.slane %v2576_v0, %v541_v10 }
 0x148   : > { %v623_v60 = vpop.f32.mrb[0].mxu0 }
 0x149   : > { %v624_v17 = vadd.f32 %v623_v60, %v2581_v35  ;;  %v625_v26 = vpop.f32.mrb[1].mxu0 }
 0x14a   : > { %v626_v61 = vadd.f32 %v625_v26, %v2584_v42 }
 0x14c   : > { %v772_v55 = vcombine.low %v624_v17, %v626_v61  ;;  %v799_v61 = vrot.slane %v522_v11, 4 }
 0x14e   : > { %v779_v57 = vrot.slane %v772_v55, %v2614_v32 }
 0x150   : > { %v780_v37 = vrot.slane %v779_v57, 1  ;;  %v783_v3 = vadd.f32 %v779_v57, %v522_v11  ;;  %v549_v57 = vsub.s32 5, %v2568_v41 }
 0x152   : > { %v784_v60 = vadd.f32 %v780_v37, %v524_v15  ;;  %v1360_v26 = vmul.f32 -1.442695, %v783_v3  ;;  %v2634_v15 = vmul.f32 %v501_v1, %v301_v45  ;;  %v2781_v3 = vrot.slane %v2631_v56, 7 }
 0x154   : > { %v694_v12 = vpop.f32.mrb[0].mxu1  ;;  %v1361_v10 = vmul.f32 -1.442695, %v784_v60  ;;  %1820 = vpow2.f32 %v1360_v26  ;;  %v2641_v60 = vrot.slane %v2576_v0, %v549_v57 }
 0x155   : > { %v695_v8 = vadd.f32 %v694_v12, %v2596_v20  ;;  %v696_v21 = vpop.f32.mrb[1].mxu1 }
 0x156   : > { %v697_v44 = vadd.f32 %v696_v21, %v2599_v46  ;;  %1822 = vpow2.f32 %v1361_v10 }
 0x158   : > { %v805_v52 = vcombine.low %v695_v8, %v697_v44 }
 0x15a   : > { %v812_v17 = vrot.slane %v805_v52, %v2614_v32  ;;  %v545_v52 = vsub.s32 4, %v2568_v41 }
 0x15c   : > { %v813_v12 = vrot.slane %v812_v17, 1  ;;  %v816_v30 = vadd.f32 %v812_v17, %v799_v61  ;;  %v2637_v37 = vrot.slane %v2576_v0, %v545_v52  ;;  %v2782_v61 = vrot.slane %v2634_v15, 7 }
 0x15d   : > { %v2650_v0 = vmul.f32 %v496_v14, %v301_v45 }
 0x15e   : > { %v817_v55 = vadd.f32 %v813_v12, %v800_v34  ;;  %v1362_v50 = vmul.f32 -1.442695, %v816_v30  ;;  %v1821_v21 = vpop.eup %1820  ;;  %v2645_v12 = vmul.f32 %v496_v14, %v299_v36  ;;  %v513_v30 = vrot.slane %v2781_v3, 2 }
 0x15f   : > { %v791_v62 = vadd.f32 1.0, %v1821_v21 }
 0x160   : > { %v1363_v8 = vmul.f32 -1.442695, %v817_v55  ;;  %1824 = vpow2.f32 %v1362_v50  ;;  %v1823_v44 = vpop.eup %1822 }
 0x161   : > { %v792_v11 = vadd.f32 1.0, %v1823_v44  ;;  %v523_v44 = vadd.f32 %v513_v30, %v2645_v12 }
 0x162   : > { %1826 = vpow2.f32 %v1363_v8  ;;  %v517_v8 = vrot.slane %v2782_v61, 2 }
 0x163   : > { %1828 = vrcp.f32 %v791_v62 }
 0x164   : > { %1830 = vrcp.f32 %v792_v11  ;;  %v525_v36 = vadd.f32 %v517_v8, %v2650_v0 }
 0x16a   : > { %v1825_v17 = vpop.eup %1824 }
 0x16b   : > { %v824_v1 = vadd.f32 1.0, %v1825_v17 }
 0x16c   : > { %v1827_v10 = vpop.eup %1826 }
 0x16d   : > { %v825_v50 = vadd.f32 1.0, %v1827_v10  ;;  %1832 = vrcp.f32 %v824_v1  ;;  %v1829_v52 = vpop.eup %1828 }
 0x16e   : > { %v1831_v17 = vpop.eup %1830 }
 0x16f   : > { %1834 = vrcp.f32 %v825_v50 }
 0x177   : > { %v1833_v45 = vpop.eup %1832 }
 0x178   : > { %v853_v3 = vmul.f32 0.0, %v1833_v45 }
 0x188   : > { %v765_v26 = vpop.f32.mrb[2].mxu0 }
 0x189   : > { %v766_v41 = vadd.f32 %v765_v26, %v2637_v37  ;;  %v767_v34 = vpop.f32.mrb[3].mxu0 }
 0x18a   : > { %v768_v55 = vadd.f32 %v767_v34, %v2641_v60  ;;  %v1835_v34 = vpop.eup %1834 }
 0x18b   : > { %v850_v1 = vsub.f32 1.0, %v1835_v34  ;;  %v854_v50 = vmul.f32 0.0, %v1835_v34 }
 0x18c   : > { %v832_v21 = vcombine.low %v766_v41, %v768_v55  ;;  %v849_v41 = vsub.f32 1.0, %v1833_v45 }
 0x18e   : > { %v839_v62 = vrot.slane %v832_v21, %v2614_v32 }
 0x190   : > { %v840_v57 = vrot.slane %v839_v62, 1  ;;  %v843_v11 = vmul.f32 %v1829_v52, %v839_v62 }
 0x192   : > { %v844_v26 = vmul.f32 %v1831_v17, %v840_v57  ;;  %v845_v10 = vadd.f32 %v843_v11, %v523_v44  ;;  %v2825_v11 = vld [vmem:[#allocation18_spill] sm:$0xff] }
 0x193   : > { %v2827_v17 = vld [vmem:[#allocation22_spill] sm:$0xff] }
 0x194   : > { %v846_v14 = vadd.f32 %v844_v26, %v525_v36  ;;  %1836 = vtanh.f32 %v845_v10  ;;  %v2829_v26 = vld [vmem:[#allocation24_spill] sm:$0xff] }
 0x196   : > { %1838 = vtanh.f32 %v846_v14 }
 0x19e   : > { %v1837_v55 = vpop.eup %1836 }
 0x19f   : > { %v851_v30 = vmul.f32 %v1837_v55, %v849_v41 }
 0x1a0   : > { %v1839_v21 = vpop.eup %1838 }
 0x1a1   : > { %v852_v61 = vmul.f32 %v1839_v21, %v850_v1  ;;  %v2657_v9 = vadd.f32 %v853_v3, %v851_v30 }
 0x1a3   : > { %v2659_v8 = vadd.f32 %v854_v50, %v852_v61  ;;  %v874_v44 = vrot.slane %v2657_v9, %v2590_v43  ;;  %v870_v52 = vrot.slane %v2657_v9, %v2574_v53  ;;  %v2824_v61 = vld [vmem:[#allocation17_spill] sm:$0xff] }
 0x1a5   : > { %v882_v62 = vrot.slane %v2659_v8, %v2590_v43  ;;  %v878_v36 = vrot.slane %v2659_v8, %v2574_v53  ;;  %v2826_v43 = vld [vmem:[#allocation21_spill] sm:$0xff]  ;;  %v2828_v53 = vld [vmem:[#allocation23_spill] sm:$0xff] }
 0x1a7   : > { %v885_v57 = vsel %vm883_vm0, %v882_v62, %v874_v44  ;;  %v884_v3 = vsel %vm883_vm0, %v878_v36, %v870_v52  ;;  %v2832_v52 = vrot.slane %v2634_v15, 7 }
 0x1a8   : > { %952 = vmatprep.mubr.f32.mxu1 %v885_v57  ;;  %1023 = vmatprep.mubr.f32.mxu0 %v885_v57 }
 0x1a9   : > { %953 = vmatmul.mubr.f32.vlgmr.msra.gmra.mrb[2].mxu1 %v884_v3  ;;  %1024 = vmatmul.mubr.f32.vlgmr.msra.gmra.mrb[4].mxu0 %v884_v3  ;;  %v864_v36 = vadd.f32 %v2832_v52, %v2650_v0 }
 0x1aa   : > { %1693 = vmatpush1.bf16.msra.mxu1 %v2824_v61  ;;  %1094 = vmatprep.mubr.f32.mxu1 %v885_v57  ;;  %v2833_v61 = vrot.slane %v2631_v56, 7 }
 0x1ab   : > { %1695 = vmatprep.subr.bf16.mxu1 %v2825_v11 }
 0x1ac   : > { %v862_v11 = vadd.f32 %v2833_v61, %v2645_v12 }
 0x1ae   : > { %1697 = vmatpush1.bf16.msra.mxu1 %v2826_v43 }
 0x1af   : > { %1699 = vmatprep.subr.bf16.mxu1 %v2827_v17 }
 0x1b2   : > { %1701 = vmatpush1.bf16.msra.mxu1 %v2354_v63  ;;  %v2830_v63 = vld [vmem:[#allocation25_spill] sm:$0xff] }
 0x1b3   : > { %1703 = vmatprep.subr.bf16.mxu1 %v2357_v6 }
 0x1b6   : > { %1705 = vmatpush1.bf16.msra.mxu1 %v2372_v27 }
 0x1b7   : > { %1707 = vmatprep.subr.bf16.mxu1 %v2828_v53 }
 0x1ba   : > { %1709 = vmatpush1.bf16.msra.mxu1 %v2386_v23  ;;  %v863_v23 = vadd.f32 %v514_v28, %v2620_v48 }
 0x1bb   : > { %1711 = vmatprep.subr.bf16.mxu1 %v2829_v26 }
 0x1be   : > { %1713 = vmatpush1.bf16.msra.mxu1 %v2398_v51 }
 0x1bf   : > { %1715 = vmatprep.subr.bf16.mxu1 %v2402_v33 }
 0x1c2   : > { %1717 = vmatpush1.bf16.msra.mxu1 %v2411_v7 }
 0x1c3   : > { %1719 = vmatprep.subr.bf16.mxu1 %v2414_v2 }
 0x1c6   : > { %1721 = vmatpush1.bf16.msra.mxu1 %v2423_v13  ;;  %v2831_v13 = vrot.slane %v2607_v47, 7  ;;  %v1185_v47 = vrot.slane %v2659_v8, 7 }
 0x1c7   : > { %1723 = vmatprep.subr.bf16.mxu1 %v2426_v29 }
 0x1c8   : > { %v861_v29 = vadd.f32 %v2831_v13, %v2616_v40  ;;  %v1184_v40 = vrot.slane %v2657_v9, 7 }
 0x1ca   : > { %1725 = vmatpush1.bf16.msra.mxu1 %v2435_v19 }
 0x1cb   : > { %1727 = vmatprep.subr.bf16.mxu1 %v2438_v58 }
 0x1ce   : > { %1729 = vmatpush1.bf16.msra.mxu1 %v2447_v25 }
 0x1cf   : > { %1731 = vmatprep.subr.bf16.mxu1 %v2450_v4  ;;  %v1131_v4 = vrot.slane %v863_v23, 4 }
 0x1d2   : > { %1733 = vmatpush1.bf16.msra.mxu1 %v2459_v31 }
 0x1d3   : > { %1735 = vmatprep.subr.bf16.mxu1 %v2462_v49  ;;  %v1130_v49 = vrot.slane %v861_v29, 4 }
 0x1d6   : > { %1737 = vmatpush1.bf16.msra.mxu1 %v2471_v39 }
 0x1d7   : > { %1739 = vmatprep.subr.bf16.mxu1 %v2474_v16 }
 0x1da   : > { %1741 = vmatpush1.bf16.msra.mxu1 %v2483_v54 }
 0x1db   : > { %1743 = vmatprep.subr.bf16.mxu1 %v2830_v63 }
 0x1de   : > { %1745 = vmatpush1.bf16.msra.mxu1 %v2495_v5 }
 0x1df   : > { %1747 = vmatprep.subr.bf16.mxu1 %v2498_v18 }
 0x1e2   : > { %1749 = vmatpush1.bf16.msra.mxu1 %v2507_v22 }
 0x1e3   : > { %1751 = vmatprep.subr.bf16.mxu1 %v2510_v24 }
 0x1e6   : > { %1753 = vmatpush1.bf16.msra.mxu1 %v2517_v38 }
 0x1e9   : > { %1095 = vmatmul.mubr.f32.vlgmr.msra.gmra.mrb[4].mxu1 %v884_v3 }
 0x27c   : > { %v954_v6 = vpop.f32.mrb[2].mxu1  ;;  %v1025_v27 = vpop.f32.mrb[4].mxu0 }
 0x27d   : > { %v955_v51 = vadd.f32 %v954_v6, %v2581_v35  ;;  %v1026_v33 = vadd.f32 %v1025_v27, %v2596_v20  ;;  %v956_v7 = vpop.f32.mrb[3].mxu1  ;;  %v1027_v2 = vpop.f32.mrb[5].mxu0 }
 0x27e   : > { %v957_v19 = vadd.f32 %v956_v7, %v2584_v42  ;;  %v1028_v58 = vadd.f32 %v1027_v2, %v2599_v46 }
 0x280   : > { %v1103_v25 = vcombine.low %v955_v51, %v957_v19  ;;  %v1136_v31 = vcombine.low %v1026_v33, %v1028_v58 }
 0x282   : > { %v1143_v39 = vrot.slane %v1136_v31, %v2614_v32  ;;  %v1110_v42 = vrot.slane %v1103_v25, %v2614_v32 }
 0x284   : > { %v1144_v16 = vrot.slane %v1143_v39, 7  ;;  %v1148_v54 = vadd.f32 %v1143_v39, %v1131_v4  ;;  %v1111_v46 = vrot.slane %v1110_v42, 7  ;;  %v1115_v28 = vadd.f32 %v1110_v42, %v863_v23 }
 0x286   : > { %v1147_v5 = vadd.f32 %v1144_v16, %v1130_v49  ;;  %v1367_v18 = vmul.f32 -1.442695, %v1148_v54  ;;  %v1114_v14 = vadd.f32 %v1111_v46, %v861_v29  ;;  %v1365_v34 = vmul.f32 -1.442695, %v1115_v28 }
 0x288   : > { %v1366_v22 = vmul.f32 -1.442695, %v1147_v5  ;;  %1840 = vpow2.f32 %v1367_v18  ;;  %v1364_v41 = vmul.f32 -1.442695, %v1114_v14 }
 0x28a   : > { %1842 = vpow2.f32 %v1366_v22 }
 0x292   : > { %v1841_v24 = vpop.eup %1840 }
 0x293   : > { %v1156_v38 = vadd.f32 1.0, %v1841_v24 }
 0x294   : > { %v1843_v35 = vpop.eup %1842 }
 0x295   : > { %v1155_v20 = vadd.f32 1.0, %v1843_v35  ;;  %1844 = vrcp.f32 %v1156_v38 }
 0x297   : > { %1846 = vrcp.f32 %v1155_v20 }
 0x298   : > { %1848 = vpow2.f32 %v1365_v34 }
 0x299   : > { %1850 = vpow2.f32 %v1364_v41 }
 0x29f   : > { %v1845_v59 = vpop.eup %1844 }
 0x2a0   : > { %v1189_v48 = vmul.f32 %v1845_v59, %v1185_v47  ;;  %v1181_v63 = vsub.f32 1.0, %v1845_v59 }
 0x2a1   : > { %v1847_v10 = vpop.eup %1846 }
 0x2a2   : > { %v1188_v45 = vmul.f32 %v1847_v10, %v1184_v40  ;;  %v1849_v1 = vpop.eup %1848  ;;  %v1180_v6 = vsub.f32 1.0, %v1847_v10 }
 0x2a3   : > { %v1851_v55 = vpop.eup %1850  ;;  %v1123_v30 = vadd.f32 1.0, %v1849_v1 }
 0x2a4   : > { %v1122_v21 = vadd.f32 1.0, %v1851_v55 }
 0x2a5   : > { %1852 = vrcp.f32 %v1123_v30 }
 0x2a6   : > { %1854 = vrcp.f32 %v1122_v21 }
 0x2af   : > { %v1853_v3 = vpop.eup %1852 }
 0x2bc   : > { %v1096_v50 = vpop.f32.mrb[4].mxu1 }
 0x2bd   : > { %v1097_v8 = vadd.f32 %v1096_v50, %v2637_v37  ;;  %v1098_v44 = vpop.f32.mrb[5].mxu1  ;;  %v1855_v37 = vpop.eup %1854 }
 0x2be   : > { %v1099_v9 = vadd.f32 %v1098_v44, %v2641_v60 }
 0x2c0   : > { %v1163_v62 = vcombine.low %v1097_v8, %v1099_v9 }
 0x2c2   : > { %v1170_v57 = vrot.slane %v1163_v62, %v2614_v32 }
 0x2c4   : > { %v1171_v43 = vrot.slane %v1170_v57, 7  ;;  %v1175_v17 = vmul.f32 %v1853_v3, %v1170_v57 }
 0x2c6   : > { %v1174_v53 = vmul.f32 %v1855_v37, %v1171_v43  ;;  %v1177_v26 = vadd.f32 %v1175_v17, %v864_v36 }
 0x2c8   : > { %v1176_v60 = vadd.f32 %v1174_v53, %v862_v11  ;;  %1856 = vtanh.f32 %v1177_v26 }
 0x2ca   : > { %1858 = vtanh.f32 %v1176_v60 }
 0x2d2   : > { %v1857_v15 = vpop.eup %1856 }
 0x2d3   : > { %v1183_v0 = vmul.f32 %v1857_v15, %v1181_v63 }
 0x2d4   : > { %v1859_v32 = vpop.eup %1858 }
 0x2d5   : > { %v1182_v27 = vmul.f32 %v1859_v32, %v1180_v6  ;;  %v1191_v23 = vadd.f32 %v1189_v48, %v1183_v0 }
 0x2d7   : > { %v1190_v56 = vadd.f32 %v1188_v45, %v1182_v27 }
 0x2d9   : > { %v1194_v12 = vrot.slane %v1190_v56, 1 }
 0x2db   : > { %v1199_v51 = vsel %vm883_vm0, %v1191_v23, %v1194_v12 }
 0x2dc   : > { %v1201_v33 = vsel %vm1200_vm1, %v1191_v23, %v1199_v51 }
 0x2dd   : > { %v1203_v7 = vsel %vm1202_vm2, %v1191_v23, %v1201_v33 }
 0x2de   : > { %v1205_v2 = vsel %vm1204_vm3, %v1191_v23, %v1203_v7 }
 0x2df   : > { %1207 = vst [vmem:[%s296_s26] sm:$0xf] %v1205_v2 }
 0x2e0 PF: > { %s13_s18 = sadd.s32 1, %s1914_s18   ;;  %s2834_s12 = smov %s1894_s13 }
 0x2e1   : > { %p10_p12 = scmp.ge.s32.totalorder %s13_s18, 6   ;;  %s2835_s13 = smov %s1989_s25 }
 0x2e2   : > { %s2836_s14 = smov %s1906_s16  ;;  %s2837_s15 = smov %s1910_s17 }
 0x2e3   : > { %s2838_s16 = smov %s2841_s19  ;;  %s2839_s17 = smov %s2845_s20 }
 0x2e4   :  { %12 = sbr.rel (!%p10_p12) target bundleno = 4 (0x4), region = 105 }

// kernel: hpcp_forward.5
= control target key start
LH: loop header
LB: loop body
LE: loop exit
PB: predicated region body
PF: predicated region fallthrough
CT: control target
= control target key end

     0   :  { %s4418_s0 = inlined_call_operand.vmem [shape: f32[2,2,2,256], index: 0, kind: input, shape index: {}]   ;;  %s4419_s1 = inlined_call_operand.vmem [shape: f32[2,2,256,256], index: 1, kind: input, shape index: {}]   ;;  %s4420_s2 = inlined_call_operand.vmem [shape: f32[2,1,256], index: 2, kind: input, shape index: {}]   ;;  %s4421_s3 = inlined_call_operand.vmem [shape: f32[256,256], index: 3, kind: input, shape index: {}]   ;;  %s4422_s4 = inlined_call_operand.vmem [shape: f32[256,256], index: 4, kind: input, shape index: {}]   ;;  %s4423_s5 = inlined_call_operand.vmem [shape: f32[1,256], index: 5, kind: input, shape index: {}]   ;;  %s4424_s6 = inlined_call_operand.vmem [shape: f32[256,19], index: 6, kind: input, shape index: {}]   ;;  %s4425_s7 = inlined_call_operand.vmem [shape: f32[1,19], index: 7, kind: input, shape index: {}]   ;;  %s4426_s8 = inlined_call_operand.vmem [shape: f32[256,256], index: 8, kind: input, shape index: {}]   ;;  %s4427_s9 = inlined_call_operand.vmem [shape: f32[256,256], index: 9, kind: input, shape index: {}]   ;;  %s4428_s10 = inlined_call_operand.vmem [shape: f32[19,256], index: 10, kind: input, shape index: {}]   ;;  %s4429_s11 = inlined_call_operand.vmem [shape: f32[1,256], index: 11, kind: input, shape index: {}]   ;;  %s4430_s12 = inlined_call_operand.vmem [shape: f32[256,8], index: 12, kind: input, shape index: {}]   ;;  %s4431_s13 = inlined_call_operand.vmem [shape: f32[1,8], index: 13, kind: input, shape index: {}]   ;;  %s4432_s14 = inlined_call_operand.hbm [shape: f32[2,8], index: 14, kind: output, shape index: {}]  }
   0x1   :  { %v1585_v0 = vld [vmem:[%s4419_s1 + $0x208] sm:$0xff]  ;;  %v1587_v1 = vld [vmem:[%s4419_s1 + $0x218] sm:$0xff]  ;;  %v1584_v5 = vld [vmem:[%s4419_s1 + $0x200] sm:$0xff] }
   0x2   :  { %v1717_v2 = vld [vmem:[%s4419_s1 + $0x608] sm:$0xff]  ;;  %v1860_v3 = vpack.c.bf16 %v1587_v1, %v1585_v0  ;;  %v1719_v4 = vld [vmem:[%s4419_s1 + $0x618] sm:$0xff]  ;;  %v1586_v6 = vld [vmem:[%s4419_s1 + $0x210] sm:$0xff] }
   0x3   :  { %v1988_v7 = vpack.c.bf16 %v1719_v4, %v1717_v2  ;;  %v1862_v8 = vpack.c.bf16 %v1586_v6, %v1584_v5  ;;  %v1716_v9 = vld [vmem:[%s4419_s1 + $0x600] sm:$0xff]  ;;  %v1718_v10 = vld [vmem:[%s4419_s1 + $0x610] sm:$0xff]  ;;  %v1589_v11 = vld [vmem:[%s4419_s1 + $0x228] sm:$0xff] }
   0x4   :  { %1861 = vmatprep.subr.bf16.mxu0 %v1860_v3  ;;  %v1990_v12 = vpack.c.bf16 %v1718_v10, %v1716_v9  ;;  %v1591_v13 = vld [vmem:[%s4419_s1 + $0x238] sm:$0xff]  ;;  %v1721_v14 = vld [vmem:[%s4419_s1 + $0x628] sm:$0xff]  ;;  %v1588_v18 = vld [vmem:[%s4419_s1 + $0x220] sm:$0xff] }
   0x5   :  { %v1723_v15 = vld [vmem:[%s4419_s1 + $0x638] sm:$0xff]  ;;  %1989 = vmatprep.subr.bf16.mxu1 %v1988_v7  ;;  %1863 = vmatpush1.bf16.msra.mxu0 %v1862_v8  ;;  %v1864_v16 = vpack.c.bf16 %v1591_v13, %v1589_v11  ;;  %v1590_v19 = vld [vmem:[%s4419_s1 + $0x230] sm:$0xff]  ;;  %v1720_v20 = vld [vmem:[%s4419_s1 + $0x620] sm:$0xff] }
   0x6   :  { %v1992_v17 = vpack.c.bf16 %v1723_v15, %v1721_v14  ;;  %1991 = vmatpush1.bf16.msra.mxu1 %v1990_v12  ;;  %v1866_v21 = vpack.c.bf16 %v1590_v19, %v1588_v18  ;;  %v1722_v22 = vld [vmem:[%s4419_s1 + $0x630] sm:$0xff]  ;;  %v1593_v23 = vld [vmem:[%s4419_s1 + $0x248] sm:$0xff]  ;;  %v1595_v24 = vld [vmem:[%s4419_s1 + $0x258] sm:$0xff] }
   0x7   :  { %1865 = vmatprep.subr.bf16.mxu0 %v1864_v16  ;;  %v1994_v25 = vpack.c.bf16 %v1722_v22, %v1720_v20  ;;  %v1868_v26 = vpack.c.bf16 %v1595_v24, %v1593_v23  ;;  %v1725_v27 = vld [vmem:[%s4419_s1 + $0x648] sm:$0xff]  ;;  %v1727_v28 = vld [vmem:[%s4419_s1 + $0x658] sm:$0xff]  ;;  %v1592_v29 = vld [vmem:[%s4419_s1 + $0x240] sm:$0xff] }
   0x8   :  { %1993 = vmatprep.subr.bf16.mxu1 %v1992_v17  ;;  %v1996_v30 = vpack.c.bf16 %v1727_v28, %v1725_v27  ;;  %v1594_v31 = vld [vmem:[%s4419_s1 + $0x250] sm:$0xff]  ;;  %v1724_v32 = vld [vmem:[%s4419_s1 + $0x640] sm:$0xff]  ;;  %v1597_v35 = vld [vmem:[%s4419_s1 + $0x268] sm:$0xff] }
   0x9   :  { %v1726_v33 = vld [vmem:[%s4419_s1 + $0x650] sm:$0xff]  ;;  %1867 = vmatpush1.bf16.msra.mxu0 %v1866_v21  ;;  %v1870_v34 = vpack.c.bf16 %v1594_v31, %v1592_v29  ;;  %v1599_v36 = vld [vmem:[%s4419_s1 + $0x278] sm:$0xff]  ;;  %v1729_v37 = vld [vmem:[%s4419_s1 + $0x668] sm:$0xff] }
   0xa   :  { %1995 = vmatpush1.bf16.msra.mxu1 %v1994_v25  ;;  %1869 = vmatprep.subr.bf16.mxu0 %v1868_v26  ;;  %v1998_v38 = vpack.c.bf16 %v1726_v33, %v1724_v32  ;;  %v1872_v39 = vpack.c.bf16 %v1599_v36, %v1597_v35  ;;  %v1731_v40 = vld [vmem:[%s4419_s1 + $0x678] sm:$0xff]  ;;  %v1596_v41 = vld [vmem:[%s4419_s1 + $0x260] sm:$0xff]  ;;  %v1598_v42 = vld [vmem:[%s4419_s1 + $0x270] sm:$0xff] }
   0xb   :  { %1997 = vmatprep.subr.bf16.mxu1 %v1996_v30  ;;  %v2000_v43 = vpack.c.bf16 %v1731_v40, %v1729_v37  ;;  %v1728_v44 = vld [vmem:[%s4419_s1 + $0x660] sm:$0xff]  ;;  %v1730_v45 = vld [vmem:[%s4419_s1 + $0x670] sm:$0xff]  ;;  %v1601_v46 = vld [vmem:[%s4419_s1 + $0x288] sm:$0xff]  ;;  %v1874_v50 = vpack.c.bf16 %v1598_v42, %v1596_v41 }
   0xc   :  { %v1603_v47 = vld [vmem:[%s4419_s1 + $0x298] sm:$0xff]  ;;  %v1733_v48 = vld [vmem:[%s4419_s1 + $0x688] sm:$0xff]  ;;  %v2002_v51 = vpack.c.bf16 %v1730_v45, %v1728_v44  ;;  %v1600_v53 = vld [vmem:[%s4419_s1 + $0x280] sm:$0xff] }
   0xd   :  { %v1735_v49 = vld [vmem:[%s4419_s1 + $0x698] sm:$0xff]  ;;  %1871 = vmatpush1.bf16.msra.mxu0 %v1870_v34  ;;  %v1876_v52 = vpack.c.bf16 %v1603_v47, %v1601_v46  ;;  %v1602_v54 = vld [vmem:[%s4419_s1 + $0x290] sm:$0xff]  ;;  %v1732_v55 = vld [vmem:[%s4419_s1 + $0x680] sm:$0xff] }
   0xe   :  { %1999 = vmatpush1.bf16.msra.mxu1 %v1998_v38  ;;  %1873 = vmatprep.subr.bf16.mxu0 %v1872_v39  ;;  %v2004_v56 = vpack.c.bf16 %v1735_v49, %v1733_v48  ;;  %v1734_v57 = vld [vmem:[%s4419_s1 + $0x690] sm:$0xff]  ;;  %v1605_v58 = vld [vmem:[%s4419_s1 + $0x2a8] sm:$0xff]  ;;  %v1607_v59 = vld [vmem:[%s4419_s1 + $0x2b8] sm:$0xff]  ;;  %v1878_v62 = vpack.c.bf16 %v1602_v54, %v1600_v53 }
   0xf   :  { %2001 = vmatprep.subr.bf16.mxu1 %v2000_v43  ;;  %v1737_v60 = vld [vmem:[%s4419_s1 + $0x6a8] sm:$0xff]  ;;  %v1739_v61 = vld [vmem:[%s4419_s1 + $0x6b8] sm:$0xff]  ;;  %v2006_v63 = vpack.c.bf16 %v1734_v57, %v1732_v55  ;;  %v1880_v0 = vpack.c.bf16 %v1607_v59, %v1605_v58  ;;  %v1604_v1 = vld [vmem:[%s4419_s1 + $0x2a0] sm:$0xff] }
  0x10   :  { %v1606_v2 = vld [vmem:[%s4419_s1 + $0x2b0] sm:$0xff]  ;;  %v1736_v3 = vld [vmem:[%s4419_s1 + $0x6a0] sm:$0xff]  ;;  %v2008_v4 = vpack.c.bf16 %v1739_v61, %v1737_v60  ;;  %v1609_v6 = vld [vmem:[%s4419_s1 + $0x2c8] sm:$0xff] }
  0x11   :  { %1875 = vmatpush1.bf16.msra.mxu0 %v1874_v50  ;;  %v1738_v5 = vld [vmem:[%s4419_s1 + $0x6b0] sm:$0xff]  ;;  %v1611_v7 = vld [vmem:[%s4419_s1 + $0x2d8] sm:$0xff]  ;;  %v1741_v8 = vld [vmem:[%s4419_s1 + $0x6c8] sm:$0xff]  ;;  %v1882_v10 = vpack.c.bf16 %v1606_v2, %v1604_v1 }
  0x12   :  { %2003 = vmatpush1.bf16.msra.mxu1 %v2002_v51  ;;  %1877 = vmatprep.subr.bf16.mxu0 %v1876_v52  ;;  %v1743_v9 = vld [vmem:[%s4419_s1 + $0x6d8] sm:$0xff]  ;;  %v2010_v11 = vpack.c.bf16 %v1738_v5, %v1736_v3  ;;  %v1884_v12 = vpack.c.bf16 %v1611_v7, %v1609_v6  ;;  %v1608_v13 = vld [vmem:[%s4419_s1 + $0x2c0] sm:$0xff]  ;;  %v1610_v14 = vld [vmem:[%s4419_s1 + $0x2d0] sm:$0xff] }
  0x13   :  { %2005 = vmatprep.subr.bf16.mxu1 %v2004_v56  ;;  %v1740_v15 = vld [vmem:[%s4419_s1 + $0x6c0] sm:$0xff]  ;;  %v2012_v16 = vpack.c.bf16 %v1743_v9, %v1741_v8  ;;  %v1742_v17 = vld [vmem:[%s4419_s1 + $0x6d0] sm:$0xff]  ;;  %v1613_v18 = vld [vmem:[%s4419_s1 + $0x2e8] sm:$0xff]  ;;  %v1886_v22 = vpack.c.bf16 %v1610_v14, %v1608_v13 }
  0x14   :  { %v1615_v19 = vld [vmem:[%s4419_s1 + $0x2f8] sm:$0xff]  ;;  %v1745_v20 = vld [vmem:[%s4419_s1 + $0x6e8] sm:$0xff]  ;;  %v2014_v23 = vpack.c.bf16 %v1742_v17, %v1740_v15  ;;  %v1612_v25 = vld [vmem:[%s4419_s1 + $0x2e0] sm:$0xff] }
  0x15   :  { %1879 = vmatpush1.bf16.msra.mxu0 %v1878_v62  ;;  %v1747_v21 = vld [vmem:[%s4419_s1 + $0x6f8] sm:$0xff]  ;;  %v1888_v24 = vpack.c.bf16 %v1615_v19, %v1613_v18  ;;  %v1614_v26 = vld [vmem:[%s4419_s1 + $0x2f0] sm:$0xff]  ;;  %v1744_v27 = vld [vmem:[%s4419_s1 + $0x6e0] sm:$0xff] }
  0x16   :  { %2007 = vmatpush1.bf16.msra.mxu1 %v2006_v63  ;;  %1881 = vmatprep.subr.bf16.mxu0 %v1880_v0  ;;  %v2016_v28 = vpack.c.bf16 %v1747_v21, %v1745_v20  ;;  %v1746_v29 = vld [vmem:[%s4419_s1 + $0x6f0] sm:$0xff]  ;;  %v1617_v30 = vld [vmem:[%s4419_s1 + $0x308] sm:$0xff]  ;;  %v1619_v31 = vld [vmem:[%s4419_s1 + $0x318] sm:$0xff]  ;;  %v1890_v34 = vpack.c.bf16 %v1614_v26, %v1612_v25 }
  0x17   :  { %2009 = vmatprep.subr.bf16.mxu1 %v2008_v4  ;;  %v1749_v32 = vld [vmem:[%s4419_s1 + $0x708] sm:$0xff]  ;;  %v1751_v33 = vld [vmem:[%s4419_s1 + $0x718] sm:$0xff]  ;;  %v2018_v35 = vpack.c.bf16 %v1746_v29, %v1744_v27  ;;  %v1892_v36 = vpack.c.bf16 %v1619_v31, %v1617_v30  ;;  %v1616_v37 = vld [vmem:[%s4419_s1 + $0x300] sm:$0xff] }
  0x18   :  { %v1618_v38 = vld [vmem:[%s4419_s1 + $0x310] sm:$0xff]  ;;  %v1748_v39 = vld [vmem:[%s4419_s1 + $0x700] sm:$0xff]  ;;  %v2020_v40 = vpack.c.bf16 %v1751_v33, %v1749_v32  ;;  %v1621_v42 = vld [vmem:[%s4419_s1 + $0x328] sm:$0xff] }
  0x19   :  { %1883 = vmatpush1.bf16.msra.mxu0 %v1882_v10  ;;  %v1750_v41 = vld [vmem:[%s4419_s1 + $0x710] sm:$0xff]  ;;  %v1623_v43 = vld [vmem:[%s4419_s1 + $0x338] sm:$0xff]  ;;  %v1753_v44 = vld [vmem:[%s4419_s1 + $0x728] sm:$0xff]  ;;  %v1894_v46 = vpack.c.bf16 %v1618_v38, %v1616_v37 }
  0x1a   :  { %2011 = vmatpush1.bf16.msra.mxu1 %v2010_v11  ;;  %1885 = vmatprep.subr.bf16.mxu0 %v1884_v12  ;;  %v1755_v45 = vld [vmem:[%s4419_s1 + $0x738] sm:$0xff]  ;;  %v2022_v47 = vpack.c.bf16 %v1750_v41, %v1748_v39  ;;  %v1896_v48 = vpack.c.bf16 %v1623_v43, %v1621_v42  ;;  %v1620_v49 = vld [vmem:[%s4419_s1 + $0x320] sm:$0xff]  ;;  %v1622_v50 = vld [vmem:[%s4419_s1 + $0x330] sm:$0xff] }
  0x1b   :  { %2013 = vmatprep.subr.bf16.mxu1 %v2012_v16  ;;  %v1752_v51 = vld [vmem:[%s4419_s1 + $0x720] sm:$0xff]  ;;  %v2024_v52 = vpack.c.bf16 %v1755_v45, %v1753_v44  ;;  %v1754_v53 = vld [vmem:[%s4419_s1 + $0x730] sm:$0xff]  ;;  %v1625_v54 = vld [vmem:[%s4419_s1 + $0x348] sm:$0xff]  ;;  %v1898_v58 = vpack.c.bf16 %v1622_v50, %v1620_v49 }
  0x1c   :  { %v1627_v55 = vld [vmem:[%s4419_s1 + $0x358] sm:$0xff]  ;;  %v1757_v56 = vld [vmem:[%s4419_s1 + $0x748] sm:$0xff]  ;;  %v2026_v59 = vpack.c.bf16 %v1754_v53, %v1752_v51  ;;  %v1624_v61 = vld [vmem:[%s4419_s1 + $0x340] sm:$0xff] }
  0x1d   :  { %1887 = vmatpush1.bf16.msra.mxu0 %v1886_v22  ;;  %v1759_v57 = vld [vmem:[%s4419_s1 + $0x758] sm:$0xff]  ;;  %v1900_v60 = vpack.c.bf16 %v1627_v55, %v1625_v54  ;;  %v1626_v62 = vld [vmem:[%s4419_s1 + $0x350] sm:$0xff]  ;;  %v1756_v63 = vld [vmem:[%s4419_s1 + $0x740] sm:$0xff] }
  0x1e   :  { %2015 = vmatpush1.bf16.msra.mxu1 %v2014_v23  ;;  %1889 = vmatprep.subr.bf16.mxu0 %v1888_v24  ;;  %v2028_v0 = vpack.c.bf16 %v1759_v57, %v1757_v56  ;;  %v1758_v1 = vld [vmem:[%s4419_s1 + $0x750] sm:$0xff]  ;;  %v1629_v2 = vld [vmem:[%s4419_s1 + $0x368] sm:$0xff]  ;;  %v1631_v3 = vld [vmem:[%s4419_s1 + $0x378] sm:$0xff]  ;;  %v1902_v6 = vpack.c.bf16 %v1626_v62, %v1624_v61 }
  0x1f   :  { %2017 = vmatprep.subr.bf16.mxu1 %v2016_v28  ;;  %v1761_v4 = vld [vmem:[%s4419_s1 + $0x768] sm:$0xff]  ;;  %v1763_v5 = vld [vmem:[%s4419_s1 + $0x778] sm:$0xff]  ;;  %v1628_v7 = vld [vmem:[%s4419_s1 + $0x360] sm:$0xff]  ;;  %v2030_v8 = vpack.c.bf16 %v1758_v1, %v1756_v63  ;;  %v1904_v9 = vpack.c.bf16 %v1631_v3, %v1629_v2 }
  0x20   :  { %v1630_v10 = vld [vmem:[%s4419_s1 + $0x370] sm:$0xff]  ;;  %v1760_v11 = vld [vmem:[%s4419_s1 + $0x760] sm:$0xff]  ;;  %v2032_v13 = vpack.c.bf16 %v1763_v5, %v1761_v4  ;;  %v1633_v14 = vld [vmem:[%s4419_s1 + $0x388] sm:$0xff] }
  0x21   :  { %1891 = vmatpush1.bf16.msra.mxu0 %v1890_v34  ;;  %v1762_v12 = vld [vmem:[%s4419_s1 + $0x770] sm:$0xff]  ;;  %v1635_v15 = vld [vmem:[%s4419_s1 + $0x398] sm:$0xff]  ;;  %v2858_v16 = vld.sshfl [vmem:[%s4418_s0 + $0x4] sm:$0x33 pattern:$0x76325410]  ;;  %v1906_v21 = vpack.c.bf16 %v1630_v10, %v1628_v7 }
  0x22   :  { %2019 = vmatpush1.bf16.msra.mxu1 %v2018_v35  ;;  %1893 = vmatprep.subr.bf16.mxu0 %v1892_v36  ;;  %v1765_v17 = vld [vmem:[%s4419_s1 + $0x788] sm:$0xff]  ;;  %v1767_v18 = vld [vmem:[%s4419_s1 + $0x798] sm:$0xff]  ;;  %v188_v19 = vcombine.high %v2858_v16, %v2858_v16  ;;  %v2034_v23 = vpack.c.bf16 %v1762_v12, %v1760_v11  ;;  %v1908_v24 = vpack.c.bf16 %v1635_v15, %v1633_v14  ;;  %v1632_v25 = vld [vmem:[%s4419_s1 + $0x380] sm:$0xff] }
  0x23   :  { %2021 = vmatprep.subr.bf16.mxu1 %v2020_v40  ;;  %v2871_v20 = vld.sshfl [vmem:[%s4418_s0 + $0xc] sm:$0x33 pattern:$0x76325410]  ;;  %v1634_v26 = vld [vmem:[%s4419_s1 + $0x390] sm:$0xff]  ;;  %v1764_v27 = vld [vmem:[%s4419_s1 + $0x780] sm:$0xff]  ;;  %v2036_v28 = vpack.c.bf16 %v1767_v18, %v1765_v17 }
  0x24   :  { %v502_v22 = vcombine.high %v2871_v20, %v2871_v20  ;;  %v1766_v29 = vld [vmem:[%s4419_s1 + $0x790] sm:$0xff]  ;;  %v1637_v30 = vld [vmem:[%s4419_s1 + $0x3a8] sm:$0xff]  ;;  %v1639_v31 = vld [vmem:[%s4419_s1 + $0x3b8] sm:$0xff]  ;;  %255 = vmatprep.mubr.f32.mxu0 %v188_v19  ;;  %v1910_v34 = vpack.c.bf16 %v1634_v26, %v1632_v25 }
  0x25   :  { %1895 = vmatpush1.bf16.msra.mxu0 %v1894_v46  ;;  %v1769_v32 = vld [vmem:[%s4419_s1 + $0x7a8] sm:$0xff]  ;;  %v1771_v33 = vld [vmem:[%s4419_s1 + $0x7b8] sm:$0xff]  ;;  %v2038_v35 = vpack.c.bf16 %v1766_v29, %v1764_v27  ;;  %v1912_v36 = vpack.c.bf16 %v1639_v31, %v1637_v30  ;;  %v1636_v37 = vld [vmem:[%s4419_s1 + $0x3a0] sm:$0xff] }
  0x26   :  { %2023 = vmatpush1.bf16.msra.mxu1 %v2022_v47  ;;  %1897 = vmatprep.subr.bf16.mxu0 %v1896_v48  ;;  %v1638_v38 = vld [vmem:[%s4419_s1 + $0x3b0] sm:$0xff]  ;;  %v1768_v39 = vld [vmem:[%s4419_s1 + $0x7a0] sm:$0xff]  ;;  %v2040_v40 = vpack.c.bf16 %v1771_v33, %v1769_v32  ;;  %v1641_v42 = vld [vmem:[%s4419_s1 + $0x3c8] sm:$0xff] }
  0x27   :  { %2025 = vmatprep.subr.bf16.mxu1 %v2024_v52  ;;  %569 = vmatprep.mubr.f32.mxu1 %v502_v22  ;;  %v1770_v41 = vld [vmem:[%s4419_s1 + $0x7b0] sm:$0xff]  ;;  %v1643_v43 = vld [vmem:[%s4419_s1 + $0x3d8] sm:$0xff]  ;;  %v1773_v44 = vld [vmem:[%s4419_s1 + $0x7c8] sm:$0xff]  ;;  %v1914_v46 = vpack.c.bf16 %v1638_v38, %v1636_v37 }
  0x28   :  { %v1775_v45 = vld [vmem:[%s4419_s1 + $0x7d8] sm:$0xff]  ;;  %v2042_v47 = vpack.c.bf16 %v1770_v41, %v1768_v39  ;;  %v1916_v48 = vpack.c.bf16 %v1643_v43, %v1641_v42  ;;  %v1640_v49 = vld [vmem:[%s4419_s1 + $0x3c0] sm:$0xff]  ;;  %v1642_v50 = vld [vmem:[%s4419_s1 + $0x3d0] sm:$0xff] }
  0x29   :  { %1899 = vmatpush1.bf16.msra.mxu0 %v1898_v58  ;;  %v1772_v51 = vld [vmem:[%s4419_s1 + $0x7c0] sm:$0xff]  ;;  %v2044_v52 = vpack.c.bf16 %v1775_v45, %v1773_v44  ;;  %v1774_v53 = vld [vmem:[%s4419_s1 + $0x7d0] sm:$0xff]  ;;  %v1645_v54 = vld [vmem:[%s4419_s1 + $0x3e8] sm:$0xff]  ;;  %v1918_v58 = vpack.c.bf16 %v1642_v50, %v1640_v49 }
  0x2a   :  { %2027 = vmatpush1.bf16.msra.mxu1 %v2026_v59  ;;  %1901 = vmatprep.subr.bf16.mxu0 %v1900_v60  ;;  %v1647_v55 = vld [vmem:[%s4419_s1 + $0x3f8] sm:$0xff]  ;;  %v1777_v56 = vld [vmem:[%s4419_s1 + $0x7e8] sm:$0xff]  ;;  %v2046_v59 = vpack.c.bf16 %v1774_v53, %v1772_v51  ;;  %v1644_v61 = vld [vmem:[%s4419_s1 + $0x3e0] sm:$0xff] }
  0x2b   :  { %2029 = vmatprep.subr.bf16.mxu1 %v2028_v0  ;;  %v1779_v57 = vld [vmem:[%s4419_s1 + $0x7f8] sm:$0xff]  ;;  %v1920_v60 = vpack.c.bf16 %v1647_v55, %v1645_v54  ;;  %v1646_v62 = vld [vmem:[%s4419_s1 + $0x3f0] sm:$0xff]  ;;  %v1776_v63 = vld [vmem:[%s4419_s1 + $0x7e0] sm:$0xff] }
  0x2c   :  { %v2048_v0 = vpack.c.bf16 %v1779_v57, %v1777_v56  ;;  %v1778_v1 = vld [vmem:[%s4419_s1 + $0x7f0] sm:$0xff]  ;;  %v50_v2 = vld [vmem:[%s4419_s1 + $0x8] sm:$0xff]  ;;  %v52_v3 = vld [vmem:[%s4419_s1 + $0x18] sm:$0xff] }
  0x2d   :  { %1903 = vmatpush1.bf16.msra.mxu0 %v1902_v6  ;;  %v1652_v4 = vld [vmem:[%s4419_s1 + $0x408] sm:$0xff]  ;;  %v1654_v5 = vld [vmem:[%s4419_s1 + $0x418] sm:$0xff]  ;;  %v1922_v6 = vpack.c.bf16 %v1646_v62, %v1644_v61  ;;  %v2050_v7 = vpack.c.bf16 %v1778_v1, %v1776_v63  ;;  %v51_v10 = vld [vmem:[%s4419_s1 + $0x10] sm:$0xff] }
  0x2e   :  { %2031 = vmatpush1.bf16.msra.mxu1 %v2030_v8  ;;  %1905 = vmatprep.subr.bf16.mxu0 %v1904_v9  ;;  %v1924_v8 = vpack.c.bf16 %v52_v3, %v50_v2  ;;  %v49_v9 = vld [vmem:[%s4419_s1] sm:$0xff]  ;;  %v2052_v12 = vpack.c.bf16 %v1654_v5, %v1652_v4  ;;  %v54_v14 = vld [vmem:[%s4419_s1 + $0x28] sm:$0xff]  ;;  %v56_v15 = vld [vmem:[%s4419_s1 + $0x38] sm:$0xff] }
  0x2f   :  { %2033 = vmatprep.subr.bf16.mxu1 %v2032_v13  ;;  %v1651_v11 = vld [vmem:[%s4419_s1 + $0x400] sm:$0xff]  ;;  %v1653_v13 = vld [vmem:[%s4419_s1 + $0x410] sm:$0xff]  ;;  %v1656_v17 = vld [vmem:[%s4419_s1 + $0x428] sm:$0xff]  ;;  %v1926_v19 = vpack.c.bf16 %v51_v10, %v49_v9  ;;  %v1928_v22 = vpack.c.bf16 %v56_v15, %v54_v14 }
  0x30   :  { %v1658_v18 = vld [vmem:[%s4419_s1 + $0x438] sm:$0xff]  ;;  %v1655_v25 = vld [vmem:[%s4419_s1 + $0x420] sm:$0xff]  ;;  %v1657_v27 = vld [vmem:[%s4419_s1 + $0x430] sm:$0xff] }
  0x31   :  { %1907 = vmatpush1.bf16.msra.mxu0 %v1906_v21  ;;  %v2054_v21 = vpack.c.bf16 %v1653_v13, %v1651_v11  ;;  %v2056_v26 = vpack.c.bf16 %v1658_v18, %v1656_v17  ;;  %v60_v29 = vld [vmem:[%s4419_s1 + $0x58] sm:$0xff]  ;;  %v1660_v30 = vld [vmem:[%s4419_s1 + $0x448] sm:$0xff]  ;;  %v2058_v33 = vpack.c.bf16 %v1657_v27, %v1655_v25  ;;  %v61_v45 = vld [vmem:[%s4419_s1 + $0x60] sm:$0xff] }
  0x32   :  { %2035 = vmatpush1.bf16.msra.mxu1 %v2034_v23  ;;  %1909 = vmatprep.subr.bf16.mxu0 %v1908_v24  ;;  %v53_v23 = vld [vmem:[%s4419_s1 + $0x20] sm:$0xff]  ;;  %v55_v24 = vld [vmem:[%s4419_s1 + $0x30] sm:$0xff]  ;;  %v1662_v31 = vld [vmem:[%s4419_s1 + $0x458] sm:$0xff] }
  0x33   :  { %2037 = vmatprep.subr.bf16.mxu1 %v2036_v28  ;;  %v58_v28 = vld [vmem:[%s4419_s1 + $0x48] sm:$0xff]  ;;  %v1930_v32 = vpack.c.bf16 %v55_v24, %v53_v23  ;;  %v2060_v37 = vpack.c.bf16 %v1662_v31, %v1660_v30  ;;  %v64_v39 = vld [vmem:[%s4419_s1 + $0x78] sm:$0xff]  ;;  %v1665_v49 = vld [vmem:[%s4419_s1 + $0x470] sm:$0xff] }
  0x34   :  { %v62_v38 = vld [vmem:[%s4419_s1 + $0x68] sm:$0xff]  ;;  %v1666_v41 = vld [vmem:[%s4419_s1 + $0x478] sm:$0xff]  ;;  %v65_v57 = vld [vmem:[%s4419_s1 + $0x80] sm:$0xff] }
  0x35   :  { %1911 = vmatpush1.bf16.msra.mxu0 %v1910_v34  ;;  %v1932_v34 = vpack.c.bf16 %v60_v29, %v58_v28  ;;  %v1936_v44 = vpack.c.bf16 %v64_v39, %v62_v38  ;;  %v66_v50 = vld [vmem:[%s4419_s1 + $0x88] sm:$0xff]  ;;  %v68_v51 = vld [vmem:[%s4419_s1 + $0x98] sm:$0xff]  ;;  %v1669_v61 = vld [vmem:[%s4419_s1 + $0x490] sm:$0xff] }
  0x36   :  { %2039 = vmatpush1.bf16.msra.mxu1 %v2038_v35  ;;  %1913 = vmatprep.subr.bf16.mxu0 %v1912_v36  ;;  %v59_v35 = vld [vmem:[%s4419_s1 + $0x50] sm:$0xff]  ;;  %v1659_v36 = vld [vmem:[%s4419_s1 + $0x440] sm:$0xff]  ;;  %v1670_v53 = vld [vmem:[%s4419_s1 + $0x498] sm:$0xff]  ;;  %v1940_v56 = vpack.c.bf16 %v68_v51, %v66_v50 }
  0x37   :  { %2041 = vmatprep.subr.bf16.mxu1 %v2040_v40  ;;  %v1664_v40 = vld [vmem:[%s4419_s1 + $0x468] sm:$0xff]  ;;  %v72_v63 = vld [vmem:[%s4419_s1 + $0xb8] sm:$0xff]  ;;  %v69_v5 = vld [vmem:[%s4419_s1 + $0xa0] sm:$0xff] }
  0x38   :  { %v70_v62 = vld [vmem:[%s4419_s1 + $0xa8] sm:$0xff]  ;;  %v1674_v1 = vld [vmem:[%s4419_s1 + $0x4b8] sm:$0xff]  ;;  %v1673_v9 = vld [vmem:[%s4419_s1 + $0x4b0] sm:$0xff] }
  0x39   :  { %1915 = vmatpush1.bf16.msra.mxu0 %v1914_v46  ;;  %v63_v46 = vld [vmem:[%s4419_s1 + $0x70] sm:$0xff]  ;;  %v1944_v4 = vpack.c.bf16 %v72_v63, %v70_v62  ;;  %v74_v10 = vld [vmem:[%s4419_s1 + $0xc8] sm:$0xff]  ;;  %v76_v11 = vld [vmem:[%s4419_s1 + $0xd8] sm:$0xff] }
  0x3a   :  { %2043 = vmatpush1.bf16.msra.mxu1 %v2042_v47  ;;  %1917 = vmatprep.subr.bf16.mxu0 %v1916_v48  ;;  %v1663_v47 = vld [vmem:[%s4419_s1 + $0x460] sm:$0xff]  ;;  %v2064_v48 = vpack.c.bf16 %v1666_v41, %v1664_v40  ;;  %v1938_v54 = vpack.c.bf16 %v63_v46, %v61_v45  ;;  %v1678_v13 = vld [vmem:[%s4419_s1 + $0x4d8] sm:$0xff]  ;;  %v1948_v18 = vpack.c.bf16 %v76_v11, %v74_v10  ;;  %v78_v24 = vld [vmem:[%s4419_s1 + $0xe8] sm:$0xff] }
  0x3b   :  { %2045 = vmatprep.subr.bf16.mxu1 %v2044_v52  ;;  %v1668_v52 = vld [vmem:[%s4419_s1 + $0x488] sm:$0xff]  ;;  %v2066_v55 = vpack.c.bf16 %v1665_v49, %v1663_v47  ;;  %v73_v15 = vld [vmem:[%s4419_s1 + $0xc0] sm:$0xff]  ;;  %v80_v25 = vld [vmem:[%s4419_s1 + $0xf8] sm:$0xff] }
  0x3c   :  { %v1680_v27 = vld [vmem:[%s4419_s1 + $0x4e8] sm:$0xff]  ;;  %v1682_v28 = vld [vmem:[%s4419_s1 + $0x4f8] sm:$0xff]  ;;  %v81_v45 = vld [vmem:[%s4419_s1 + $0x100] sm:$0xff] }
  0x3d   :  { %1919 = vmatpush1.bf16.msra.mxu0 %v1918_v58  ;;  %v67_v58 = vld [vmem:[%s4419_s1 + $0x90] sm:$0xff]  ;;  %v3151_v30 = vld.sshfl [vmem:[%s4418_s0 + $0x8] sm:$0x33 pattern:$0x76325410]  ;;  %v84_v39 = vld [vmem:[%s4419_s1 + $0x118] sm:$0xff] }
  0x3e   :  { %2047 = vmatpush1.bf16.msra.mxu1 %v2046_v59  ;;  %1921 = vmatprep.subr.bf16.mxu0 %v1920_v60  ;;  %v1667_v59 = vld [vmem:[%s4419_s1 + $0x480] sm:$0xff]  ;;  %v2068_v60 = vpack.c.bf16 %v1670_v53, %v1668_v52  ;;  %v1942_v2 = vpack.c.bf16 %v67_v58, %v65_v57  ;;  %v82_v38 = vld [vmem:[%s4419_s1 + $0x108] sm:$0xff]  ;;  %v1686_v41 = vld [vmem:[%s4419_s1 + $0x518] sm:$0xff] }
  0x3f   :  { %2049 = vmatprep.subr.bf16.mxu1 %v2048_v0  ;;  %v1672_v0 = vld [vmem:[%s4419_s1 + $0x4a8] sm:$0xff]  ;;  %v2070_v3 = vpack.c.bf16 %v1669_v61, %v1667_v59  ;;  %v83_v46 = vld [vmem:[%s4419_s1 + $0x110] sm:$0xff]  ;;  %v1683_v47 = vld [vmem:[%s4419_s1 + $0x500] sm:$0xff] }
  0x40   :  { %v1684_v40 = vld [vmem:[%s4419_s1 + $0x508] sm:$0xff]  ;;  %v1685_v49 = vld [vmem:[%s4419_s1 + $0x510] sm:$0xff]  ;;  %v88_v51 = vld [vmem:[%s4419_s1 + $0x138] sm:$0xff] }
  0x41   :  { %1923 = vmatpush1.bf16.msra.mxu0 %v1922_v6  ;;  %v71_v6 = vld [vmem:[%s4419_s1 + $0xb0] sm:$0xff]  ;;  %v86_v50 = vld [vmem:[%s4419_s1 + $0x128] sm:$0xff]  ;;  %v1690_v53 = vld [vmem:[%s4419_s1 + $0x538] sm:$0xff] }
  0x42   :  { %2051 = vmatpush1.bf16.msra.mxu1 %v2050_v7  ;;  %1925 = vmatprep.subr.bf16.mxu0 %v1924_v8  ;;  %v1671_v7 = vld [vmem:[%s4419_s1 + $0x4a0] sm:$0xff]  ;;  %v2072_v8 = vpack.c.bf16 %v1674_v1, %v1672_v0  ;;  %v1946_v14 = vpack.c.bf16 %v71_v6, %v69_v5  ;;  %v1688_v52 = vld [vmem:[%s4419_s1 + $0x528] sm:$0xff]  ;;  %v87_v58 = vld [vmem:[%s4419_s1 + $0x130] sm:$0xff] }
  0x43   :  { %2053 = vmatprep.subr.bf16.mxu1 %v2052_v12  ;;  %v1676_v12 = vld [vmem:[%s4419_s1 + $0x4c8] sm:$0xff]  ;;  %v2074_v17 = vpack.c.bf16 %v1673_v9, %v1671_v7  ;;  %v85_v57 = vld [vmem:[%s4419_s1 + $0x120] sm:$0xff]  ;;  %v1689_v61 = vld [vmem:[%s4419_s1 + $0x530] sm:$0xff] }
  0x44   :  { %256 = vmatmul.mubr.f32.vlgmr.msra.gmra.mrb[0].mxu0 %v2858_v16  ;;  %v57_v16 = vld [vmem:[%s4419_s1 + $0x40] sm:$0xff]  ;;  %v2076_v23 = vpack.c.bf16 %v1678_v13, %v1676_v12  ;;  %v90_v62 = vld [vmem:[%s4419_s1 + $0x148] sm:$0xff]  ;;  %v92_v63 = vld [vmem:[%s4419_s1 + $0x158] sm:$0xff] }
  0x45   :  { %1927 = vmatpush1.bf16.msra.mxu0 %v1926_v19  ;;  %570 = vmatmul.mubr.f32.vlgmr.msra.gmra.mrb[0].mxu1 %v2871_v20  ;;  %v1661_v20 = vld [vmem:[%s4419_s1 + $0x450] sm:$0xff]  ;;  %v1934_v42 = vpack.c.bf16 %v59_v35, %v57_v16  ;;  %v77_v16 = vld [vmem:[%s4419_s1 + $0xe0] sm:$0xff]  ;;  %v1692_v0 = vld [vmem:[%s4419_s1 + $0x548] sm:$0xff] }
  0x46   :  { %2055 = vmatpush1.bf16.msra.mxu1 %v2054_v21  ;;  %1929 = vmatprep.subr.bf16.mxu0 %v1928_v22  ;;  %v2062_v43 = vpack.c.bf16 %v1661_v20, %v1659_v36  ;;  %v75_v19 = vld [vmem:[%s4419_s1 + $0xd0] sm:$0xff]  ;;  %v1675_v21 = vld [vmem:[%s4419_s1 + $0x4c0] sm:$0xff]  ;;  %v1694_v1 = vld [vmem:[%s4419_s1 + $0x558] sm:$0xff] }
  0x47   :  { %2057 = vmatprep.subr.bf16.mxu1 %v2056_v26  ;;  %v1677_v22 = vld [vmem:[%s4419_s1 + $0x4d0] sm:$0xff]  ;;  %v3138_v26 = vld.sshfl [vmem:[%s4418_s0] sm:$0x33 pattern:$0x76325410]  ;;  %v1950_v31 = vpack.c.bf16 %v75_v19, %v73_v15  ;;  %v94_v10 = vld [vmem:[%s4419_s1 + $0x168] sm:$0xff] }
  0x48   :  { %v270_v29 = vcombine.high %v3138_v26, %v3138_v26  ;;  %v79_v35 = vld [vmem:[%s4419_s1 + $0xf0] sm:$0xff]  ;;  %v1679_v36 = vld [vmem:[%s4419_s1 + $0x4e0] sm:$0xff]  ;;  %v96_v11 = vld [vmem:[%s4419_s1 + $0x178] sm:$0xff] }
  0x49   :  { %1931 = vmatpush1.bf16.msra.mxu0 %v1930_v32  ;;  %v584_v32 = vcombine.high %v3151_v30, %v3151_v30  ;;  %v1681_v20 = vld [vmem:[%s4419_s1 + $0x4f0] sm:$0xff]  ;;  %v1687_v59 = vld [vmem:[%s4419_s1 + $0x520] sm:$0xff]  ;;  %v1696_v12 = vld [vmem:[%s4419_s1 + $0x568] sm:$0xff] }
  0x4a   :  { %2059 = vmatpush1.bf16.msra.mxu1 %v2058_v33  ;;  %1933 = vmatprep.subr.bf16.mxu0 %v1932_v34  ;;  %v2078_v33 = vpack.c.bf16 %v1677_v22, %v1675_v21  ;;  %v1952_v34 = vpack.c.bf16 %v80_v25, %v78_v24  ;;  %v89_v5 = vld [vmem:[%s4419_s1 + $0x140] sm:$0xff]  ;;  %v91_v6 = vld [vmem:[%s4419_s1 + $0x150] sm:$0xff]  ;;  %v1698_v13 = vld [vmem:[%s4419_s1 + $0x578] sm:$0xff] }
  0x4b   :  { %2061 = vmatprep.subr.bf16.mxu1 %v2060_v37  ;;  %v2080_v37 = vpack.c.bf16 %v1682_v28, %v1680_v27  ;;  %337 = vmatprep.mubr.f32.mxu0 %v270_v29  ;;  %v1691_v7 = vld [vmem:[%s4419_s1 + $0x540] sm:$0xff]  ;;  %v1693_v9 = vld [vmem:[%s4419_s1 + $0x550] sm:$0xff]  ;;  %v98_v24 = vld [vmem:[%s4419_s1 + $0x188] sm:$0xff] }
  0x4c   :  { %651 = vmatprep.mubr.f32.mxu1 %v584_v32  ;;  %v93_v15 = vld [vmem:[%s4419_s1 + $0x160] sm:$0xff]  ;;  %v95_v19 = vld [vmem:[%s4419_s1 + $0x170] sm:$0xff]  ;;  %v100_v25 = vld [vmem:[%s4419_s1 + $0x198] sm:$0xff] }
  0x4d   :  { %1935 = vmatpush1.bf16.msra.mxu0 %v1934_v42  ;;  %v1954_v42 = vpack.c.bf16 %v79_v35, %v77_v16  ;;  %v1695_v21 = vld [vmem:[%s4419_s1 + $0x560] sm:$0xff]  ;;  %v1697_v22 = vld [vmem:[%s4419_s1 + $0x570] sm:$0xff] }
  0x4e   :  { %2063 = vmatpush1.bf16.msra.mxu1 %v2062_v43  ;;  %1937 = vmatprep.subr.bf16.mxu0 %v1936_v44  ;;  %v2082_v43 = vpack.c.bf16 %v1681_v20, %v1679_v36  ;;  %v1956_v44 = vpack.c.bf16 %v84_v39, %v82_v38 }
  0x4f   :  { %2065 = vmatprep.subr.bf16.mxu1 %v2064_v48  ;;  %v2084_v48 = vpack.c.bf16 %v1686_v41, %v1684_v40 }
  0x51   :  { %1939 = vmatpush1.bf16.msra.mxu0 %v1938_v54  ;;  %v1958_v54 = vpack.c.bf16 %v83_v46, %v81_v45 }
  0x52   :  { %2067 = vmatpush1.bf16.msra.mxu1 %v2066_v55  ;;  %1941 = vmatprep.subr.bf16.mxu0 %v1940_v56  ;;  %v2086_v55 = vpack.c.bf16 %v1685_v49, %v1683_v47  ;;  %v1960_v56 = vpack.c.bf16 %v88_v51, %v86_v50 }
  0x53   :  { %2069 = vmatprep.subr.bf16.mxu1 %v2068_v60  ;;  %v2088_v60 = vpack.c.bf16 %v1690_v53, %v1688_v52 }
  0x55   :  { %1943 = vmatpush1.bf16.msra.mxu0 %v1942_v2  ;;  %v1962_v2 = vpack.c.bf16 %v87_v58, %v85_v57 }
  0x56   :  { %2071 = vmatpush1.bf16.msra.mxu1 %v2070_v3  ;;  %1945 = vmatprep.subr.bf16.mxu0 %v1944_v4  ;;  %v2090_v3 = vpack.c.bf16 %v1689_v61, %v1687_v59  ;;  %v1964_v4 = vpack.c.bf16 %v92_v63, %v90_v62 }
  0x57   :  { %2073 = vmatprep.subr.bf16.mxu1 %v2072_v8  ;;  %v2092_v8 = vpack.c.bf16 %v1694_v1, %v1692_v0 }
  0x59   :  { %1947 = vmatpush1.bf16.msra.mxu0 %v1946_v14  ;;  %v1966_v14 = vpack.c.bf16 %v91_v6, %v89_v5 }
  0x5a   :  { %2075 = vmatpush1.bf16.msra.mxu1 %v2074_v17  ;;  %1949 = vmatprep.subr.bf16.mxu0 %v1948_v18  ;;  %v2094_v17 = vpack.c.bf16 %v1693_v9, %v1691_v7  ;;  %v1968_v18 = vpack.c.bf16 %v96_v11, %v94_v10 }
  0x5b   :  { %2077 = vmatprep.subr.bf16.mxu1 %v2076_v23  ;;  %v2096_v23 = vpack.c.bf16 %v1698_v13, %v1696_v12 }
  0x5d   :  { %1951 = vmatpush1.bf16.msra.mxu0 %v1950_v31 }
  0x5e   :  { %2079 = vmatpush1.bf16.msra.mxu1 %v2078_v33  ;;  %1953 = vmatprep.subr.bf16.mxu0 %v1952_v34 }
  0x5f   :  { %2081 = vmatprep.subr.bf16.mxu1 %v2080_v37 }
  0x61   :  { %1955 = vmatpush1.bf16.msra.mxu0 %v1954_v42 }
  0x62   :  { %2083 = vmatpush1.bf16.msra.mxu1 %v2082_v43  ;;  %1957 = vmatprep.subr.bf16.mxu0 %v1956_v44 }
  0x63   :  { %2085 = vmatprep.subr.bf16.mxu1 %v2084_v48 }
  0x65   :  { %1959 = vmatpush1.bf16.msra.mxu0 %v1958_v54 }
  0x66   :  { %2087 = vmatpush1.bf16.msra.mxu1 %v2086_v55  ;;  %1961 = vmatprep.subr.bf16.mxu0 %v1960_v56 }
  0x67   :  { %2089 = vmatprep.subr.bf16.mxu1 %v2088_v60 }
  0x69   :  { %1963 = vmatpush1.bf16.msra.mxu0 %v1962_v2 }
  0x6a   :  { %2091 = vmatpush1.bf16.msra.mxu1 %v2090_v3  ;;  %1965 = vmatprep.subr.bf16.mxu0 %v1964_v4 }
  0x6b   :  { %2093 = vmatprep.subr.bf16.mxu1 %v2092_v8 }
  0x6c   :  { %19 = vsyncpa [#allocation3], 0  ;;  %v1700_v27 = vld [vmem:[%s4419_s1 + $0x588] sm:$0xff]  ;;  %v1702_v28 = vld [vmem:[%s4419_s1 + $0x598] sm:$0xff]  ;;  %v1970_v29 = vpack.c.bf16 %v95_v19, %v93_v15  ;;  %v2098_v31 = vpack.c.bf16 %v1697_v22, %v1695_v21  ;;  %v1972_v32 = vpack.c.bf16 %v100_v25, %v98_v24  ;;  %vm1356_vm0 = vcmask 1042432  }
  0x6d   :  { %1967 = vmatpush1.bf16.msra.mxu0 %v1966_v14  ;;  %v97_v33 = vld [vmem:[%s4419_s1 + $0x180] sm:$0xff]  ;;  %v99_v34 = vld [vmem:[%s4419_s1 + $0x190] sm:$0xff]  ;;  %v2100_v35 = vpack.c.bf16 %v1702_v28, %v1700_v27  ;;  %v102_v37 = vld [vmem:[%s4419_s1 + $0x1a8] sm:$0xff]  ;;  %vm1352_vm1 = vcmask 154624   ;;  %vm1567_vm2 = vcmask 58368  }
  0x6e   :  { %2095 = vmatpush1.bf16.msra.mxu1 %v2094_v17  ;;  %1969 = vmatprep.subr.bf16.mxu0 %v1968_v18  ;;  %v1699_v16 = vld [vmem:[%s4419_s1 + $0x580] sm:$0xff]  ;;  %v1701_v36 = vld [vmem:[%s4419_s1 + $0x590] sm:$0xff]  ;;  %v104_v20 = vld [vmem:[%s4419_s1 + $0x1b8] sm:$0xff]  ;;  %v1974_v40 = vpack.c.bf16 %v99_v34, %v97_v33 }
  0x6f   :  { %2097 = vmatprep.subr.bf16.mxu1 %v2096_v23  ;;  %v1704_v38 = vld [vmem:[%s4419_s1 + $0x5a8] sm:$0xff]  ;;  %v1706_v39 = vld [vmem:[%s4419_s1 + $0x5b8] sm:$0xff]  ;;  %v2102_v41 = vpack.c.bf16 %v1701_v36, %v1699_v16  ;;  %v1976_v42 = vpack.c.bf16 %v104_v20, %v102_v37  ;;  %v101_v43 = vld [vmem:[%s4419_s1 + $0x1a0] sm:$0xff] }
  0x70   :  { %v103_v44 = vld [vmem:[%s4419_s1 + $0x1b0] sm:$0xff]  ;;  %v1703_v45 = vld [vmem:[%s4419_s1 + $0x5a0] sm:$0xff]  ;;  %v2104_v46 = vpack.c.bf16 %v1706_v39, %v1704_v38  ;;  %v106_v48 = vld [vmem:[%s4419_s1 + $0x1c8] sm:$0xff] }
  0x71   :  { %1971 = vmatpush1.bf16.msra.mxu0 %v1970_v29  ;;  %v1705_v47 = vld [vmem:[%s4419_s1 + $0x5b0] sm:$0xff]  ;;  %v108_v49 = vld [vmem:[%s4419_s1 + $0x1d8] sm:$0xff]  ;;  %v1708_v50 = vld [vmem:[%s4419_s1 + $0x5c8] sm:$0xff]  ;;  %v1978_v52 = vpack.c.bf16 %v103_v44, %v101_v43 }
  0x72   :  { %2099 = vmatpush1.bf16.msra.mxu1 %v2098_v31  ;;  %1973 = vmatprep.subr.bf16.mxu0 %v1972_v32  ;;  %v1710_v51 = vld [vmem:[%s4419_s1 + $0x5d8] sm:$0xff]  ;;  %v2106_v53 = vpack.c.bf16 %v1705_v47, %v1703_v45  ;;  %v1980_v54 = vpack.c.bf16 %v108_v49, %v106_v48  ;;  %v105_v55 = vld [vmem:[%s4419_s1 + $0x1c0] sm:$0xff]  ;;  %v107_v56 = vld [vmem:[%s4419_s1 + $0x1d0] sm:$0xff] }
  0x73   :  { %2101 = vmatprep.subr.bf16.mxu1 %v2100_v35  ;;  %v1707_v57 = vld [vmem:[%s4419_s1 + $0x5c0] sm:$0xff]  ;;  %v2108_v58 = vpack.c.bf16 %v1710_v51, %v1708_v50  ;;  %v1709_v59 = vld [vmem:[%s4419_s1 + $0x5d0] sm:$0xff]  ;;  %v110_v60 = vld [vmem:[%s4419_s1 + $0x1e8] sm:$0xff]  ;;  %v1982_v0 = vpack.c.bf16 %v107_v56, %v105_v55 }
  0x74   :  { %v112_v61 = vld [vmem:[%s4419_s1 + $0x1f8] sm:$0xff]  ;;  %v1712_v62 = vld [vmem:[%s4419_s1 + $0x5e8] sm:$0xff]  ;;  %v2110_v1 = vpack.c.bf16 %v1709_v59, %v1707_v57  ;;  %v109_v3 = vld [vmem:[%s4419_s1 + $0x1e0] sm:$0xff] }
  0x75   :  { %1975 = vmatpush1.bf16.msra.mxu0 %v1974_v40  ;;  %v1714_v63 = vld [vmem:[%s4419_s1 + $0x5f8] sm:$0xff]  ;;  %v1984_v2 = vpack.c.bf16 %v112_v61, %v110_v60  ;;  %v111_v4 = vld [vmem:[%s4419_s1 + $0x1f0] sm:$0xff]  ;;  %v1711_v5 = vld [vmem:[%s4419_s1 + $0x5e0] sm:$0xff] }
  0x76   :  { %2103 = vmatpush1.bf16.msra.mxu1 %v2102_v41  ;;  %1977 = vmatprep.subr.bf16.mxu0 %v1976_v42  ;;  %v2112_v6 = vpack.c.bf16 %v1714_v63, %v1712_v62  ;;  %v1713_v7 = vld [vmem:[%s4419_s1 + $0x5f0] sm:$0xff]  ;;  %v740_v8 = vld [vmem:[%s4422_s4 + $0x8] sm:$0xff]  ;;  %v742_v9 = vld [vmem:[%s4422_s4 + $0x18] sm:$0xff]  ;;  %v1986_v10 = vpack.c.bf16 %v111_v4, %v109_v3 }
  0x77   :  { %2105 = vmatprep.subr.bf16.mxu1 %v2104_v46  ;;  %v2114_v11 = vpack.c.bf16 %v1713_v7, %v1711_v5  ;;  %v2116_v12 = vpack.c.bf16 %v742_v9, %v740_v8  ;;  %v739_v13 = vld [vmem:[%s4422_s4] sm:$0xff]  ;;  %v741_v14 = vld [vmem:[%s4422_s4 + $0x10] sm:$0xff]  ;;  %v744_v15 = vld [vmem:[%s4422_s4 + $0x28] sm:$0xff] }
  0x78   :  { %v746_v17 = vld [vmem:[%s4422_s4 + $0x38] sm:$0xff]  ;;  %v2118_v18 = vpack.c.bf16 %v741_v14, %v739_v13  ;;  %v743_v21 = vld [vmem:[%s4422_s4 + $0x20] sm:$0xff]  ;;  %v745_v22 = vld [vmem:[%s4422_s4 + $0x30] sm:$0xff] }
  0x79   :  { %1979 = vmatpush1.bf16.msra.mxu0 %v1978_v52  ;;  %v2120_v19 = vpack.c.bf16 %v746_v17, %v744_v15  ;;  %v748_v23 = vld [vmem:[%s4422_s4 + $0x48] sm:$0xff]  ;;  %v750_v24 = vld [vmem:[%s4422_s4 + $0x58] sm:$0xff]  ;;  %v2122_v25 = vpack.c.bf16 %v745_v22, %v743_v21  ;;  %v747_v28 = vld [vmem:[%s4422_s4 + $0x40] sm:$0xff] }
  0x7a   :  { %2107 = vmatpush1.bf16.msra.mxu1 %v2106_v53  ;;  %1981 = vmatprep.subr.bf16.mxu0 %v1980_v54  ;;  %v2124_v27 = vpack.c.bf16 %v750_v24, %v748_v23  ;;  %v749_v29 = vld [vmem:[%s4422_s4 + $0x50] sm:$0xff]  ;;  %v752_v31 = vld [vmem:[%s4422_s4 + $0x68] sm:$0xff]  ;;  %v751_v33 = vld [vmem:[%s4422_s4 + $0x60] sm:$0xff] }
  0x7b   :  { %2109 = vmatprep.subr.bf16.mxu1 %v2108_v58  ;;  %v753_v34 = vld [vmem:[%s4422_s4 + $0x70] sm:$0xff]  ;;  %v756_v16 = vld [vmem:[%s4422_s4 + $0x88] sm:$0xff]  ;;  %v758_v35 = vld [vmem:[%s4422_s4 + $0x98] sm:$0xff] }
  0x7c   :  { %v2130_v36 = vpack.c.bf16 %v753_v34, %v751_v33  ;;  %v2132_v37 = vpack.c.bf16 %v758_v35, %v756_v16  ;;  %v755_v20 = vld [vmem:[%s4422_s4 + $0x80] sm:$0xff]  ;;  %v757_v38 = vld [vmem:[%s4422_s4 + $0x90] sm:$0xff]  ;;  %v760_v39 = vld [vmem:[%s4422_s4 + $0xa8] sm:$0xff] }
  0x7d   :  { %1983 = vmatpush1.bf16.msra.mxu0 %v1982_v0  ;;  %v762_v40 = vld [vmem:[%s4422_s4 + $0xb8] sm:$0xff]  ;;  %v2134_v41 = vpack.c.bf16 %v757_v38, %v755_v20  ;;  %v759_v43 = vld [vmem:[%s4422_s4 + $0xa0] sm:$0xff]  ;;  %v761_v44 = vld [vmem:[%s4422_s4 + $0xb0] sm:$0xff] }
  0x7e   :  { %2111 = vmatpush1.bf16.msra.mxu1 %v2110_v1  ;;  %1985 = vmatprep.subr.bf16.mxu0 %v1984_v2  ;;  %v2136_v42 = vpack.c.bf16 %v762_v40, %v760_v39  ;;  %v764_v45 = vld [vmem:[%s4422_s4 + $0xc8] sm:$0xff]  ;;  %v766_v46 = vld [vmem:[%s4422_s4 + $0xd8] sm:$0xff]  ;;  %v2138_v47 = vpack.c.bf16 %v761_v44, %v759_v43  ;;  %v763_v49 = vld [vmem:[%s4422_s4 + $0xc0] sm:$0xff] }
  0x7f   :  { %2113 = vmatprep.subr.bf16.mxu1 %v2112_v6  ;;  %v2140_v48 = vpack.c.bf16 %v766_v46, %v764_v45  ;;  %v765_v50 = vld [vmem:[%s4422_s4 + $0xd0] sm:$0xff]  ;;  %v768_v51 = vld [vmem:[%s4422_s4 + $0xe8] sm:$0xff]  ;;  %v770_v52 = vld [vmem:[%s4422_s4 + $0xf8] sm:$0xff] }
  0x80   :  { %v2142_v53 = vpack.c.bf16 %v765_v50, %v763_v49  ;;  %v2144_v54 = vpack.c.bf16 %v770_v52, %v768_v51  ;;  %v767_v55 = vld [vmem:[%s4422_s4 + $0xe0] sm:$0xff]  ;;  %v769_v56 = vld [vmem:[%s4422_s4 + $0xf0] sm:$0xff]  ;;  %v772_v57 = vld [vmem:[%s4422_s4 + $0x108] sm:$0xff] }
  0x81   :  { %1987 = vmatpush1.bf16.msra.mxu0 %v1986_v10  ;;  %v774_v58 = vld [vmem:[%s4422_s4 + $0x118] sm:$0xff]  ;;  %v2146_v59 = vpack.c.bf16 %v769_v56, %v767_v55  ;;  %v771_v61 = vld [vmem:[%s4422_s4 + $0x100] sm:$0xff]  ;;  %v773_v62 = vld [vmem:[%s4422_s4 + $0x110] sm:$0xff] }
  0x82   :  { %2115 = vmatpush1.bf16.msra.mxu1 %v2114_v11  ;;  %2117 = vmatprep.subr.bf16.mxu0 %v2116_v12  ;;  %v2148_v60 = vpack.c.bf16 %v774_v58, %v772_v57  ;;  %v776_v63 = vld [vmem:[%s4422_s4 + $0x128] sm:$0xff]  ;;  %v778_v0 = vld [vmem:[%s4422_s4 + $0x138] sm:$0xff]  ;;  %v2150_v1 = vpack.c.bf16 %v773_v62, %v771_v61  ;;  %v775_v3 = vld [vmem:[%s4422_s4 + $0x120] sm:$0xff] }
  0x83   :  { %v2152_v2 = vpack.c.bf16 %v778_v0, %v776_v63  ;;  %v777_v4 = vld [vmem:[%s4422_s4 + $0x130] sm:$0xff]  ;;  %v780_v5 = vld [vmem:[%s4422_s4 + $0x148] sm:$0xff]  ;;  %v782_v6 = vld [vmem:[%s4422_s4 + $0x158] sm:$0xff] }
  0x84   :  { %338 = vmatmul.mubr.f32.vlgmr.msra.gmra.mrb[0].mxu0 %v3138_v26  ;;  %v754_v26 = vld [vmem:[%s4422_s4 + $0x78] sm:$0xff]  ;;  %v2154_v7 = vpack.c.bf16 %v777_v4, %v775_v3  ;;  %v2156_v8 = vpack.c.bf16 %v782_v6, %v780_v5  ;;  %v779_v9 = vld [vmem:[%s4422_s4 + $0x140] sm:$0xff]  ;;  %v781_v10 = vld [vmem:[%s4422_s4 + $0x150] sm:$0xff] }
  0x85   :  { %652 = vmatmul.mubr.f32.vlgmr.msra.gmra.mrb[0].mxu1 %v3151_v30  ;;  %2119 = vmatpush1.bf16.msra.mxu0 %v2118_v18  ;;  %v2126_v30 = vpack.c.bf16 %v749_v29, %v747_v28  ;;  %v2128_v32 = vpack.c.bf16 %v754_v26, %v752_v31  ;;  %v784_v11 = vld [vmem:[%s4422_s4 + $0x168] sm:$0xff]  ;;  %v786_v12 = vld [vmem:[%s4422_s4 + $0x178] sm:$0xff]  ;;  %v2158_v13 = vpack.c.bf16 %v781_v10, %v779_v9  ;;  %v783_v15 = vld [vmem:[%s4422_s4 + $0x160] sm:$0xff] }
  0x86   :  { %2121 = vmatprep.subr.bf16.mxu0 %v2120_v19  ;;  %v2160_v14 = vpack.c.bf16 %v786_v12, %v784_v11  ;;  %v785_v17 = vld [vmem:[%s4422_s4 + $0x170] sm:$0xff]  ;;  %v788_v18 = vld [vmem:[%s4422_s4 + $0x188] sm:$0xff]  ;;  %v790_v19 = vld [vmem:[%s4422_s4 + $0x198] sm:$0xff] }
  0x87   :  { %v2162_v21 = vpack.c.bf16 %v785_v17, %v783_v15  ;;  %v2164_v22 = vpack.c.bf16 %v790_v19, %v788_v18  ;;  %v787_v23 = vld [vmem:[%s4422_s4 + $0x180] sm:$0xff]  ;;  %v789_v24 = vld [vmem:[%s4422_s4 + $0x190] sm:$0xff]  ;;  %v802_v20 = vld [vmem:[%s4422_s4 + $0x1f8] sm:$0xff] }
  0x88   :  { %v2166_v28 = vpack.c.bf16 %v789_v24, %v787_v23  ;;  %v791_v31 = vld [vmem:[%s4422_s4 + $0x1a0] sm:$0xff]  ;;  %v793_v26 = vld [vmem:[%s4422_s4 + $0x1b0] sm:$0xff]  ;;  %v678_v43 = vld [vmem:[%s4421_s3 + $0x18] sm:$0xff] }
  0x89   :  { %2123 = vmatpush1.bf16.msra.mxu0 %v2122_v25  ;;  %v792_v25 = vld [vmem:[%s4422_s4 + $0x1a8] sm:$0xff]  ;;  %v2170_v33 = vpack.c.bf16 %v793_v26, %v791_v31  ;;  %v795_v16 = vld [vmem:[%s4422_s4 + $0x1c0] sm:$0xff]  ;;  %v797_v35 = vld [vmem:[%s4422_s4 + $0x1d0] sm:$0xff] }
  0x8a   :  { %2125 = vmatprep.subr.bf16.mxu0 %v2124_v27  ;;  %v794_v27 = vld [vmem:[%s4422_s4 + $0x1b8] sm:$0xff]  ;;  %v799_v39 = vld [vmem:[%s4422_s4 + $0x1e0] sm:$0xff]  ;;  %v801_v40 = vld [vmem:[%s4422_s4 + $0x1f0] sm:$0xff] }
  0x8b   :  { %v2168_v29 = vpack.c.bf16 %v794_v27, %v792_v25  ;;  %v977_v45 = vld [vmem:[%s4424_s6 + $0x80] sm:$0xff]  ;;  %v978_v46 = vld [vmem:[%s4424_s6 + $0x88] sm:$0xff]  ;;  %v979_v50 = vld [vmem:[%s4424_s6 + $0x90] sm:$0xff]  ;;  %v346_v25 = vlaneseq }
  0x8c   :  { %v962_v49 = vld [vmem:[%s4424_s6 + $0x8] sm:$0xff]  ;;  %v980_v51 = vld [vmem:[%s4424_s6 + $0x98] sm:$0xff]  ;;  %v981_v56 = vld [vmem:[%s4424_s6 + $0xa0] sm:$0xff] }
  0x8d   :  { %2127 = vmatpush1.bf16.msra.mxu0 %v2126_v30  ;;  %v796_v30 = vld [vmem:[%s4422_s4 + $0x1c8] sm:$0xff]  ;;  %v964_v55 = vld [vmem:[%s4424_s6 + $0x18] sm:$0xff]  ;;  %v983_v62 = vld [vmem:[%s4424_s6 + $0xb0] sm:$0xff]  ;;  %v347_v27 = vshrl.u32 %v346_v25, 7 }
  0x8e   :  { %2129 = vmatprep.subr.bf16.mxu0 %v2128_v32  ;;  %v798_v32 = vld [vmem:[%s4422_s4 + $0x1d8] sm:$0xff]  ;;  %v982_v57 = vld [vmem:[%s4424_s6 + $0xa8] sm:$0xff]  ;;  %v985_v4 = vld [vmem:[%s4424_s6 + $0xc0] sm:$0xff] }
  0x8f   :  { %v2172_v34 = vpack.c.bf16 %v798_v32, %v796_v30  ;;  %v966_v61 = vld [vmem:[%s4424_s6 + $0x28] sm:$0xff]  ;;  %v984_v63 = vld [vmem:[%s4424_s6 + $0xb8] sm:$0xff]  ;;  %v987_v10 = vld [vmem:[%s4424_s6 + $0xd0] sm:$0xff]  ;;  %v3648_v31 = vsub.s32 1, %v347_v27 }
  0x90   :  { %v968_v3 = vld [vmem:[%s4424_s6 + $0x38] sm:$0xff]  ;;  %v986_v5 = vld [vmem:[%s4424_s6 + $0xc8] sm:$0xff]  ;;  %v989_v17 = vld [vmem:[%s4424_s6 + $0xe0] sm:$0xff] }
  0x91   :  { %2131 = vmatpush1.bf16.msra.mxu0 %v2130_v36  ;;  %v2174_v36 = vpack.c.bf16 %v797_v35, %v795_v16  ;;  %v970_v9 = vld [vmem:[%s4424_s6 + $0x48] sm:$0xff]  ;;  %v988_v11 = vld [vmem:[%s4424_s6 + $0xd8] sm:$0xff]  ;;  %v3653_v26 = vld [vmem:[%s4420_s2] sm:$0x3] }
  0x92   :  { %2133 = vmatprep.subr.bf16.mxu0 %v2132_v37  ;;  %v800_v37 = vld [vmem:[%s4422_s4 + $0x1e8] sm:$0xff]  ;;  %v972_v15 = vld [vmem:[%s4424_s6 + $0x58] sm:$0xff]  ;;  %v353_v32 = vrot.slane %v3653_v26, %v3648_v31 }
  0x93   :  { %v2176_v38 = vpack.c.bf16 %v802_v20, %v800_v37  ;;  %v990_v18 = vld [vmem:[%s4424_s6 + $0xe8] sm:$0xff]  ;;  %v675_v20 = vld [vmem:[%s4421_s3] sm:$0xff]  ;;  %v710_v25 = vld [vmem:[%s4421_s3 + $0x118] sm:$0xff] }
  0x94   :  { %v974_v23 = vld [vmem:[%s4424_s6 + $0x68] sm:$0xff] }
  0x95   :  { %2135 = vmatpush1.bf16.msra.mxu0 %v2134_v41  ;;  %v2178_v41 = vpack.c.bf16 %v801_v40, %v799_v39 }
  0x96   :  { %2137 = vmatprep.subr.bf16.mxu0 %v2136_v42  ;;  %v676_v42 = vld [vmem:[%s4421_s3 + $0x8] sm:$0xff] }
  0x97   :  { %v2180_v44 = vpack.c.bf16 %v678_v43, %v676_v42  ;;  %v682_v42 = vld [vmem:[%s4421_s3 + $0x38] sm:$0xff] }
  0x99   :  { %2139 = vmatpush1.bf16.msra.mxu0 %v2138_v47  ;;  %v961_v47 = vld [vmem:[%s4424_s6] sm:$0xff] }
  0x9a   :  { %2141 = vmatprep.subr.bf16.mxu0 %v2140_v48  ;;  %v2244_v48 = vpack.c.bf16 %v978_v46, %v977_v45  ;;  %v2246_v52 = vpack.c.bf16 %v962_v49, %v961_v47  ;;  %v679_v47 = vld [vmem:[%s4421_s3 + $0x20] sm:$0xff] }
  0x9c   :  { %2245 = vmatprep.subr.bf16.mxu1 %v2244_v48  ;;  %v681_v48 = vld [vmem:[%s4421_s3 + $0x30] sm:$0xff] }
  0x9d   :  { %2143 = vmatpush1.bf16.msra.mxu0 %v2142_v53  ;;  %v2248_v53 = vpack.c.bf16 %v980_v51, %v979_v50  ;;  %2247 = vmatpush3.bf16.msra.mxu1 %v2246_v52  ;;  %v684_v50 = vld [vmem:[%s4421_s3 + $0x48] sm:$0xff]  ;;  %v686_v51 = vld [vmem:[%s4421_s3 + $0x58] sm:$0xff]  ;;  %v2186_v52 = vpack.c.bf16 %v681_v48, %v679_v47  ;;  %v715_v47 = vld [vmem:[%s4421_s3 + $0x140] sm:$0xff] }
  0x9e   :  { %2145 = vmatprep.subr.bf16.mxu0 %v2144_v54  ;;  %v963_v54 = vld [vmem:[%s4424_s6 + $0x10] sm:$0xff] }
  0x9f   :  { %v2250_v58 = vpack.c.bf16 %v964_v55, %v963_v54  ;;  %2249 = vmatprep.subr.bf16.mxu1 %v2248_v53  ;;  %v2188_v53 = vpack.c.bf16 %v686_v51, %v684_v50  ;;  %v683_v54 = vld [vmem:[%s4421_s3 + $0x40] sm:$0xff]  ;;  %v685_v55 = vld [vmem:[%s4421_s3 + $0x50] sm:$0xff]  ;;  %v720_v50 = vld [vmem:[%s4421_s3 + $0x168] sm:$0xff] }
  0xa0   :  { %v717_v48 = vld [vmem:[%s4421_s3 + $0x150] sm:$0xff]  ;;  %v722_v51 = vld [vmem:[%s4421_s3 + $0x178] sm:$0xff] }
  0xa1   :  { %2147 = vmatpush1.bf16.msra.mxu0 %v2146_v59  ;;  %v2252_v59 = vpack.c.bf16 %v982_v57, %v981_v56  ;;  %2251 = vmatpush3.bf16.msra.mxu1 %v2250_v58  ;;  %v688_v56 = vld [vmem:[%s4421_s3 + $0x68] sm:$0xff]  ;;  %v690_v57 = vld [vmem:[%s4421_s3 + $0x78] sm:$0xff]  ;;  %v2190_v58 = vpack.c.bf16 %v685_v55, %v683_v54  ;;  %v719_v54 = vld [vmem:[%s4421_s3 + $0x160] sm:$0xff] }
  0xa2   :  { %2149 = vmatprep.subr.bf16.mxu0 %v2148_v60  ;;  %v965_v60 = vld [vmem:[%s4424_s6 + $0x20] sm:$0xff]  ;;  %v721_v55 = vld [vmem:[%s4421_s3 + $0x170] sm:$0xff] }
  0xa3   :  { %v2254_v0 = vpack.c.bf16 %v966_v61, %v965_v60  ;;  %2253 = vmatprep.subr.bf16.mxu1 %v2252_v59  ;;  %v2192_v59 = vpack.c.bf16 %v690_v57, %v688_v56  ;;  %v687_v60 = vld [vmem:[%s4421_s3 + $0x60] sm:$0xff]  ;;  %v689_v61 = vld [vmem:[%s4421_s3 + $0x70] sm:$0xff]  ;;  %v724_v56 = vld [vmem:[%s4421_s3 + $0x188] sm:$0xff] }
  0xa4   :  { %v726_v57 = vld [vmem:[%s4421_s3 + $0x198] sm:$0xff] }
  0xa5   :  { %2151 = vmatpush1.bf16.msra.mxu0 %v2150_v1  ;;  %v2256_v1 = vpack.c.bf16 %v984_v63, %v983_v62  ;;  %2255 = vmatpush3.bf16.msra.mxu1 %v2254_v0  ;;  %v692_v62 = vld [vmem:[%s4421_s3 + $0x88] sm:$0xff]  ;;  %v694_v63 = vld [vmem:[%s4421_s3 + $0x98] sm:$0xff]  ;;  %v2194_v0 = vpack.c.bf16 %v689_v61, %v687_v60  ;;  %v723_v60 = vld [vmem:[%s4421_s3 + $0x180] sm:$0xff] }
  0xa6   :  { %2153 = vmatprep.subr.bf16.mxu0 %v2152_v2  ;;  %v967_v2 = vld [vmem:[%s4424_s6 + $0x30] sm:$0xff] }
  0xa7   :  { %v2258_v6 = vpack.c.bf16 %v968_v3, %v967_v2  ;;  %2257 = vmatprep.subr.bf16.mxu1 %v2256_v1  ;;  %v2196_v1 = vpack.c.bf16 %v694_v63, %v692_v62  ;;  %v691_v2 = vld [vmem:[%s4421_s3 + $0x80] sm:$0xff]  ;;  %v693_v3 = vld [vmem:[%s4421_s3 + $0x90] sm:$0xff]  ;;  %v728_v62 = vld [vmem:[%s4421_s3 + $0x1a8] sm:$0xff] }
  0xa8   :  { %v725_v61 = vld [vmem:[%s4421_s3 + $0x190] sm:$0xff]  ;;  %v730_v63 = vld [vmem:[%s4421_s3 + $0x1b8] sm:$0xff] }
  0xa9   :  { %2155 = vmatpush1.bf16.msra.mxu0 %v2154_v7  ;;  %v2260_v7 = vpack.c.bf16 %v986_v5, %v985_v4  ;;  %2259 = vmatpush3.bf16.msra.mxu1 %v2258_v6  ;;  %v696_v4 = vld [vmem:[%s4421_s3 + $0xa8] sm:$0xff]  ;;  %v698_v5 = vld [vmem:[%s4421_s3 + $0xb8] sm:$0xff]  ;;  %v2198_v6 = vpack.c.bf16 %v693_v3, %v691_v2  ;;  %v727_v2 = vld [vmem:[%s4421_s3 + $0x1a0] sm:$0xff] }
  0xaa   :  { %2157 = vmatprep.subr.bf16.mxu0 %v2156_v8  ;;  %v969_v8 = vld [vmem:[%s4424_s6 + $0x40] sm:$0xff]  ;;  %v729_v3 = vld [vmem:[%s4421_s3 + $0x1b0] sm:$0xff] }
  0xab   :  { %v2262_v12 = vpack.c.bf16 %v970_v9, %v969_v8  ;;  %2261 = vmatprep.subr.bf16.mxu1 %v2260_v7  ;;  %v2200_v7 = vpack.c.bf16 %v698_v5, %v696_v4  ;;  %v695_v8 = vld [vmem:[%s4421_s3 + $0xa0] sm:$0xff]  ;;  %v697_v9 = vld [vmem:[%s4421_s3 + $0xb0] sm:$0xff]  ;;  %v732_v4 = vld [vmem:[%s4421_s3 + $0x1c8] sm:$0xff] }
  0xac   :  { %v734_v5 = vld [vmem:[%s4421_s3 + $0x1d8] sm:$0xff] }
  0xad   :  { %2159 = vmatpush1.bf16.msra.mxu0 %v2158_v13  ;;  %v2264_v13 = vpack.c.bf16 %v988_v11, %v987_v10  ;;  %2263 = vmatpush3.bf16.msra.mxu1 %v2262_v12  ;;  %v700_v10 = vld [vmem:[%s4421_s3 + $0xc8] sm:$0xff]  ;;  %v702_v11 = vld [vmem:[%s4421_s3 + $0xd8] sm:$0xff]  ;;  %v2202_v12 = vpack.c.bf16 %v697_v9, %v695_v8  ;;  %v731_v8 = vld [vmem:[%s4421_s3 + $0x1c0] sm:$0xff] }
  0xae   :  { %2161 = vmatprep.subr.bf16.mxu0 %v2160_v14  ;;  %v971_v14 = vld [vmem:[%s4424_s6 + $0x50] sm:$0xff] }
  0xaf   :  { %v2266_v19 = vpack.c.bf16 %v972_v15, %v971_v14  ;;  %2265 = vmatprep.subr.bf16.mxu1 %v2264_v13  ;;  %v2204_v13 = vpack.c.bf16 %v702_v11, %v700_v10  ;;  %v699_v14 = vld [vmem:[%s4421_s3 + $0xc0] sm:$0xff]  ;;  %v701_v15 = vld [vmem:[%s4421_s3 + $0xd0] sm:$0xff]  ;;  %v736_v10 = vld [vmem:[%s4421_s3 + $0x1e8] sm:$0xff] }
  0xb0   :  { %v733_v9 = vld [vmem:[%s4421_s3 + $0x1d0] sm:$0xff]  ;;  %v738_v11 = vld [vmem:[%s4421_s3 + $0x1f8] sm:$0xff] }
  0xb1   :  { %2163 = vmatpush1.bf16.msra.mxu0 %v2162_v21  ;;  %v2268_v21 = vpack.c.bf16 %v990_v18, %v989_v17  ;;  %2267 = vmatpush3.bf16.msra.mxu1 %v2266_v19  ;;  %v704_v17 = vld [vmem:[%s4421_s3 + $0xe8] sm:$0xff]  ;;  %v706_v18 = vld [vmem:[%s4421_s3 + $0xf8] sm:$0xff]  ;;  %v2206_v19 = vpack.c.bf16 %v701_v15, %v699_v14  ;;  %v2240_v14 = vpack.c.bf16 %v738_v11, %v736_v10  ;;  %v735_v15 = vld [vmem:[%s4421_s3 + $0x1e0] sm:$0xff] }
  0xb2   :  { %2165 = vmatprep.subr.bf16.mxu0 %v2164_v22  ;;  %v973_v22 = vld [vmem:[%s4424_s6 + $0x60] sm:$0xff]  ;;  %v1162_v11 = vld [vmem:[%s4427_s9 + $0xb0] sm:$0xff] }
  0xb3   :  { %v2270_v24 = vpack.c.bf16 %v974_v23, %v973_v22  ;;  %2269 = vmatprep.subr.bf16.mxu1 %v2268_v21  ;;  %v2208_v21 = vpack.c.bf16 %v706_v18, %v704_v17  ;;  %v703_v22 = vld [vmem:[%s4421_s3 + $0xe0] sm:$0xff]  ;;  %v705_v23 = vld [vmem:[%s4421_s3 + $0xf0] sm:$0xff] }
  0xb4   :  { %v737_v17 = vld [vmem:[%s4421_s3 + $0x1f0] sm:$0xff]  ;;  %v1160_v10 = vld [vmem:[%s4427_s9 + $0xa0] sm:$0xff] }
  0xb5   :  { %2167 = vmatpush1.bf16.msra.mxu0 %v2166_v28  ;;  %2271 = vmatpush3.bf16.msra.mxu1 %v2270_v24  ;;  %v3643_v28 = vsub.s32 0, %v347_v27  ;;  %v708_v24 = vld [vmem:[%s4421_s3 + $0x108] sm:$0xff]  ;;  %v2210_v27 = vpack.c.bf16 %v705_v23, %v703_v22  ;;  %v2242_v18 = vpack.c.bf16 %v737_v17, %v735_v15  ;;  %v992_v22 = vld [vmem:[%s4424_s6 + $0xf8] sm:$0xff]  ;;  %v1164_v17 = vld [vmem:[%s4427_s9 + $0xc0] sm:$0xff] }
  0xb6   :  { %2169 = vmatprep.subr.bf16.mxu0 %v2168_v29  ;;  %v1782_v29 = vld [vmem:[%s4420_s2 + $0x2] sm:$0x3] }
  0xb7   :  { %v664_v30 = vrot.slane %v1782_v29, %v3643_v28 }
  0xb9   :  { %2171 = vmatpush1.bf16.msra.mxu0 %v2170_v33  ;;  %v668_v33 = vrot.slane %v1782_v29, %v3648_v31  ;;  %v2212_v29 = vpack.c.bf16 %v710_v25, %v708_v24  ;;  %v976_v24 = vld [vmem:[%s4424_s6 + $0x78] sm:$0xff] }
  0xba   :  { %2173 = vmatprep.subr.bf16.mxu0 %v2172_v34 }
  0xbd   :  { %2175 = vmatpush1.bf16.msra.mxu0 %v2174_v36 }
  0xbe   :  { %2177 = vmatprep.subr.bf16.mxu0 %v2176_v38  ;;  %v677_v38 = vld [vmem:[%s4421_s3 + $0x10] sm:$0xff] }
  0xc1   :  { %2179 = vmatpush1.bf16.msra.mxu0 %v2178_v41  ;;  %v680_v41 = vld [vmem:[%s4421_s3 + $0x28] sm:$0xff] }
  0xc2   :  { %2181 = vmatprep.subr.bf16.mxu0 %v2180_v44  ;;  %v2182_v44 = vpack.c.bf16 %v677_v38, %v675_v20  ;;  %v2184_v46 = vpack.c.bf16 %v682_v42, %v680_v41  ;;  %v711_v20 = vld [vmem:[%s4421_s3 + $0x120] sm:$0xff]  ;;  %v713_v38 = vld [vmem:[%s4421_s3 + $0x130] sm:$0xff]  ;;  %v716_v41 = vld [vmem:[%s4421_s3 + $0x148] sm:$0xff] }
  0xc3   :  { %v718_v42 = vld [vmem:[%s4421_s3 + $0x158] sm:$0xff] }
 0x157   :  { %v3659_v34 = vpop.f32.mrb[0].mxu0 }
 0x158   :  { %v653_v16 = vpop.f32.mrb[0].mxu1  ;;  %v341_v35 = vpop.f32.mrb[1].mxu0 }
 0x159   :  { %v3661_v36 = vadd.f32 %v664_v30, %v653_v16  ;;  %v655_v37 = vpop.f32.mrb[1].mxu1  ;;  %v3669_v39 = vadd.f32 %v353_v32, %v341_v35  ;;  %v707_v30 = vld [vmem:[%s4421_s3 + $0x100] sm:$0xff]  ;;  %v709_v32 = vld [vmem:[%s4421_s3 + $0x110] sm:$0xff]  ;;  %v714_v16 = vld [vmem:[%s4421_s3 + $0x138] sm:$0xff] }
 0x15a   :  { %v3671_v40 = vadd.f32 %v668_v33, %v655_v37  ;;  %v712_v33 = vld [vmem:[%s4421_s3 + $0x128] sm:$0xff]  ;;  %v2214_v35 = vpack.c.bf16 %v709_v32, %v707_v30  ;;  %v945_v32 = vld [vmem:[%s4423_s5] sm:$0x3] }
 0x15b   :  { %v673_v45 = vmax.f32 %v3661_v36, 0.0  ;;  %v359_v49 = vmax.f32 %v3669_v39, 0.0  ;;  %v2216_v37 = vpack.c.bf16 %v714_v16, %v712_v33  ;;  %v950_v33 = vrot.slane %v945_v32, %v3643_v28  ;;  %v1089_v36 = vld [vmem:[%s4426_s8 + $0x68] sm:$0xff]  ;;  %v1091_v39 = vld [vmem:[%s4426_s8 + $0x78] sm:$0xff] }
 0x15c   :  { %v674_v43 = vmax.f32 %v3671_v40, 0.0  ;;  %v954_v16 = vrot.slane %v945_v32, %v3648_v31  ;;  %v1155_v40 = vld [vmem:[%s4427_s9 + $0x78] sm:$0xff] }
 0x15e   :  { %867 = vmatprep.mubr.f32.mxu0 %v674_v43 }
 0x15f   :  { %868 = vmatmul.mubr.f32.vlgmr.msra.gmra.mrb[2].mxu0 %v673_v45 }
 0x160   :  { %2183 = vmatpush1.bf16.msra.mxu0 %v2182_v44  ;;  %938 = vmatprep.mubr.f32.mxu0 %v359_v49  ;;  %v2218_v44 = vpack.c.bf16 %v713_v38, %v711_v20  ;;  %v1140_v38 = vld [vmem:[%s4427_s9] sm:$0xff] }
 0x161   :  { %2185 = vmatprep.subr.bf16.mxu0 %v2184_v46  ;;  %v2220_v46 = vpack.c.bf16 %v718_v42, %v716_v41  ;;  %v1142_v41 = vld [vmem:[%s4427_s9 + $0x10] sm:$0xff] }
 0x164   :  { %2187 = vmatpush1.bf16.msra.mxu0 %v2186_v52  ;;  %v2222_v52 = vpack.c.bf16 %v717_v48, %v715_v47  ;;  %v2278_v48 = vpack.c.bf16 %v1142_v41, %v1140_v38  ;;  %v1176_v41 = vld [vmem:[%s4427_s9 + $0x120] sm:$0xff] }
 0x165   :  { %2189 = vmatprep.subr.bf16.mxu0 %v2188_v53  ;;  %v2224_v53 = vpack.c.bf16 %v722_v51, %v720_v50 }
 0x168   :  { %2191 = vmatpush1.bf16.msra.mxu0 %v2190_v58  ;;  %v2226_v58 = vpack.c.bf16 %v721_v55, %v719_v54  ;;  %v1149_v54 = vld [vmem:[%s4427_s9 + $0x48] sm:$0xff]  ;;  %v1151_v55 = vld [vmem:[%s4427_s9 + $0x58] sm:$0xff] }
 0x169   :  { %2193 = vmatprep.subr.bf16.mxu0 %v2192_v59  ;;  %v2228_v59 = vpack.c.bf16 %v726_v57, %v724_v56  ;;  %v2284_v57 = vpack.c.bf16 %v1151_v55, %v1149_v54 }
 0x16c   :  { %2195 = vmatpush1.bf16.msra.mxu0 %v2194_v0  ;;  %v2230_v0 = vpack.c.bf16 %v725_v61, %v723_v60  ;;  %v1153_v60 = vld [vmem:[%s4427_s9 + $0x68] sm:$0xff] }
 0x16d   :  { %2197 = vmatprep.subr.bf16.mxu0 %v2196_v1  ;;  %v2232_v1 = vpack.c.bf16 %v730_v63, %v728_v62  ;;  %v2288_v61 = vpack.c.bf16 %v1155_v40, %v1153_v60  ;;  %v1152_v62 = vld [vmem:[%s4427_s9 + $0x60] sm:$0xff]  ;;  %v1154_v63 = vld [vmem:[%s4427_s9 + $0x70] sm:$0xff] }
 0x170   :  { %2199 = vmatpush1.bf16.msra.mxu0 %v2198_v6  ;;  %v2234_v6 = vpack.c.bf16 %v729_v3, %v727_v2  ;;  %v2290_v2 = vpack.c.bf16 %v1154_v63, %v1152_v62  ;;  %v1193_v62 = vld [vmem:[%s4427_s9 + $0x1a8] sm:$0xff]  ;;  %v1195_v63 = vld [vmem:[%s4427_s9 + $0x1b8] sm:$0xff] }
 0x171   :  { %2201 = vmatprep.subr.bf16.mxu0 %v2200_v7  ;;  %v2236_v7 = vpack.c.bf16 %v734_v5, %v732_v4  ;;  %v1156_v4 = vld [vmem:[%s4427_s9 + $0x80] sm:$0xff]  ;;  %v1158_v5 = vld [vmem:[%s4427_s9 + $0x90] sm:$0xff] }
 0x174   :  { %2203 = vmatpush1.bf16.msra.mxu0 %v2202_v12  ;;  %v2238_v12 = vpack.c.bf16 %v733_v9, %v731_v8  ;;  %v2294_v8 = vpack.c.bf16 %v1158_v5, %v1156_v4  ;;  %v1197_v4 = vld [vmem:[%s4427_s9 + $0x1c8] sm:$0xff]  ;;  %v1199_v5 = vld [vmem:[%s4427_s9 + $0x1d8] sm:$0xff] }
 0x175   :  { %2205 = vmatprep.subr.bf16.mxu0 %v2204_v13  ;;  %v349_v13 = vrot.slane %v3653_v26, %v3643_v28  ;;  %v991_v26 = vld [vmem:[%s4424_s6 + $0xf0] sm:$0xff] }
 0x176   :  { %v2272_v23 = vpack.c.bf16 %v992_v22, %v991_v26  ;;  %v1169_v26 = vld [vmem:[%s4427_s9 + $0xe8] sm:$0xff]  ;;  %v1171_v22 = vld [vmem:[%s4427_s9 + $0xf8] sm:$0xff] }
 0x178   :  { %2207 = vmatpush1.bf16.msra.mxu0 %v2206_v19  ;;  %v3865_v19 = vadd.f32 %v349_v13, %v3659_v34  ;;  %v975_v34 = vld [vmem:[%s4424_s6 + $0x70] sm:$0xff]  ;;  %2273 = vmatprep.subr.bf16.mxu1 %v2272_v23  ;;  %v1167_v13 = vld [vmem:[%s4427_s9 + $0xd8] sm:$0xff] }
 0x179   :  { %2209 = vmatprep.subr.bf16.mxu0 %v2208_v21  ;;  %v2274_v25 = vpack.c.bf16 %v976_v24, %v975_v34  ;;  %v2304_v34 = vpack.c.bf16 %v1171_v22, %v1169_v26  ;;  %v1168_v24 = vld [vmem:[%s4427_s9 + $0xe0] sm:$0xff] }
 0x17a   :  { %v358_v21 = vmax.f32 %v3865_v19, 0.0  ;;  %v1479_v19 = vld [vmem:[%s4430_s12 + $0xd8] sm:$0xff] }
 0x17b   :  { %2275 = vmatpush3.bf16.msra.mxu1 %v2274_v25  ;;  %v1170_v25 = vld [vmem:[%s4427_s9 + $0xf0] sm:$0xff] }
 0x17c   :  { %2211 = vmatpush1.bf16.msra.mxu0 %v2210_v27  ;;  %v1141_v27 = vld [vmem:[%s4427_s9 + $0x8] sm:$0xff] }
 0x17d   :  { %2213 = vmatprep.subr.bf16.mxu0 %v2212_v29  ;;  %v1143_v29 = vld [vmem:[%s4427_s9 + $0x18] sm:$0xff] }
 0x17e   :  { %v2276_v30 = vpack.c.bf16 %v1143_v29, %v1141_v27  ;;  %v1173_v27 = vld [vmem:[%s4427_s9 + $0x108] sm:$0xff]  ;;  %v1175_v29 = vld [vmem:[%s4427_s9 + $0x118] sm:$0xff] }
 0x17f   :  { %v2308_v32 = vpack.c.bf16 %v1175_v29, %v1173_v27 }
 0x180   :  { %2215 = vmatpush1.bf16.msra.mxu0 %v2214_v35  ;;  %2277 = vmatprep.subr.bf16.mxu1 %v2276_v30  ;;  %v2306_v30 = vpack.c.bf16 %v1170_v25, %v1168_v24  ;;  %v1081_v24 = vld [vmem:[%s4426_s8 + $0x28] sm:$0xff]  ;;  %v1083_v25 = vld [vmem:[%s4426_s8 + $0x38] sm:$0xff] }
 0x181   :  { %2217 = vmatprep.subr.bf16.mxu0 %v2216_v37  ;;  %v2344_v29 = vpack.c.bf16 %v1083_v25, %v1081_v24  ;;  %v1121_v24 = vld [vmem:[%s4426_s8 + $0x168] sm:$0xff]  ;;  %v1123_v25 = vld [vmem:[%s4426_s8 + $0x178] sm:$0xff] }
 0x184   :  { %2219 = vmatpush1.bf16.msra.mxu0 %v2218_v44  ;;  %v1145_v44 = vld [vmem:[%s4427_s9 + $0x28] sm:$0xff] }
 0x185   :  { %2221 = vmatprep.subr.bf16.mxu0 %v2220_v46  ;;  %v1147_v46 = vld [vmem:[%s4427_s9 + $0x38] sm:$0xff] }
 0x186   :  { %v2280_v51 = vpack.c.bf16 %v1147_v46, %v1145_v44  ;;  %v1181_v44 = vld [vmem:[%s4427_s9 + $0x148] sm:$0xff]  ;;  %v1183_v46 = vld [vmem:[%s4427_s9 + $0x158] sm:$0xff] }
 0x188   :  { %2223 = vmatpush1.bf16.msra.mxu0 %v2222_v52  ;;  %v1144_v52 = vld [vmem:[%s4427_s9 + $0x20] sm:$0xff] }
 0x189   :  { %2225 = vmatprep.subr.bf16.mxu0 %v2224_v53  ;;  %v1146_v53 = vld [vmem:[%s4427_s9 + $0x30] sm:$0xff] }
 0x18a   :  { %v2282_v56 = vpack.c.bf16 %v1146_v53, %v1144_v52  ;;  %v1185_v52 = vld [vmem:[%s4427_s9 + $0x168] sm:$0xff]  ;;  %v1187_v53 = vld [vmem:[%s4427_s9 + $0x178] sm:$0xff] }
 0x18b   :  { %v2320_v55 = vpack.c.bf16 %v1187_v53, %v1185_v52  ;;  %v1097_v52 = vld [vmem:[%s4426_s8 + $0xa8] sm:$0xff]  ;;  %v1099_v53 = vld [vmem:[%s4426_s8 + $0xb8] sm:$0xff] }
 0x18c   :  { %2227 = vmatpush1.bf16.msra.mxu0 %v2226_v58  ;;  %v1148_v58 = vld [vmem:[%s4427_s9 + $0x40] sm:$0xff] }
 0x18d   :  { %2229 = vmatprep.subr.bf16.mxu0 %v2228_v59  ;;  %v1150_v59 = vld [vmem:[%s4427_s9 + $0x50] sm:$0xff] }
 0x190   :  { %2231 = vmatpush1.bf16.msra.mxu0 %v2230_v0  ;;  %v1157_v0 = vld [vmem:[%s4427_s9 + $0x88] sm:$0xff] }
 0x191   :  { %2233 = vmatprep.subr.bf16.mxu0 %v2232_v1  ;;  %v1159_v1 = vld [vmem:[%s4427_s9 + $0x98] sm:$0xff] }
 0x192   :  { %v2292_v3 = vpack.c.bf16 %v1159_v1, %v1157_v0  ;;  %v2328_v1 = vpack.c.bf16 %v1195_v63, %v1193_v62  ;;  %v1105_v62 = vld [vmem:[%s4426_s8 + $0xe8] sm:$0xff]  ;;  %v1107_v63 = vld [vmem:[%s4426_s8 + $0xf8] sm:$0xff] }
 0x194   :  { %2235 = vmatpush1.bf16.msra.mxu0 %v2234_v6  ;;  %v1161_v6 = vld [vmem:[%s4427_s9 + $0xa8] sm:$0xff] }
 0x195   :  { %2237 = vmatprep.subr.bf16.mxu0 %v2236_v7  ;;  %v1163_v7 = vld [vmem:[%s4427_s9 + $0xb8] sm:$0xff] }
 0x196   :  { %v2296_v9 = vpack.c.bf16 %v1163_v7, %v1161_v6  ;;  %v2332_v7 = vpack.c.bf16 %v1199_v5, %v1197_v4  ;;  %v1109_v4 = vld [vmem:[%s4426_s8 + $0x108] sm:$0xff]  ;;  %v1111_v5 = vld [vmem:[%s4426_s8 + $0x118] sm:$0xff] }
 0x198   :  { %2239 = vmatpush1.bf16.msra.mxu0 %v2238_v12  ;;  %v1165_v12 = vld [vmem:[%s4427_s9 + $0xc8] sm:$0xff] }
 0x199   :  { %2241 = vmatprep.subr.bf16.mxu0 %v2240_v14  ;;  %v2298_v14 = vpack.c.bf16 %v1162_v11, %v1160_v10  ;;  %v2300_v15 = vpack.c.bf16 %v1167_v13, %v1165_v12  ;;  %v1201_v10 = vld [vmem:[%s4427_s9 + $0x1e8] sm:$0xff]  ;;  %v1203_v11 = vld [vmem:[%s4427_s9 + $0x1f8] sm:$0xff] }
 0x19a   :  { %v2336_v13 = vpack.c.bf16 %v1203_v11, %v1201_v10  ;;  %v1113_v10 = vld [vmem:[%s4426_s8 + $0x128] sm:$0xff]  ;;  %v1115_v11 = vld [vmem:[%s4426_s8 + $0x138] sm:$0xff] }
 0x19c   :  { %2243 = vmatpush1.bf16.msra.mxu0 %v2242_v18  ;;  %v1166_v18 = vld [vmem:[%s4427_s9 + $0xd0] sm:$0xff] }
 0x19d   :  { %v2302_v23 = vpack.c.bf16 %v1166_v18, %v1164_v17  ;;  %v1077_v17 = vld [vmem:[%s4426_s8 + $0x8] sm:$0xff]  ;;  %v1079_v18 = vld [vmem:[%s4426_s8 + $0x18] sm:$0xff] }
 0x19e   :  { %v2340_v22 = vpack.c.bf16 %v1079_v18, %v1077_v17  ;;  %v1117_v17 = vld [vmem:[%s4426_s8 + $0x148] sm:$0xff]  ;;  %v1119_v18 = vld [vmem:[%s4426_s8 + $0x158] sm:$0xff] }
 0x19f   :  { %939 = vmatmul.mubr.f32.vlgmr.msra.gmra.mrb[2].mxu0 %v358_v21 }
 0x272   :  { %v940_v35 = vpop.f32.mrb[2].mxu0 }
 0x273   :  { %v957_v37 = vadd.f32 %v950_v33, %v940_v35  ;;  %v942_v20 = vpop.f32.mrb[3].mxu0  ;;  %v1172_v33 = vld [vmem:[%s4427_s9 + $0x100] sm:$0xff]  ;;  %v1177_v35 = vld [vmem:[%s4427_s9 + $0x128] sm:$0xff] }
 0x274   :  { %v958_v42 = vadd.f32 %v954_v16, %v942_v20  ;;  %v1174_v16 = vld [vmem:[%s4427_s9 + $0x110] sm:$0xff] }
 0x275   :  { %v959_v50 = vmax.f32 %v957_v37, 0.0  ;;  %v1179_v37 = vld [vmem:[%s4427_s9 + $0x138] sm:$0xff]  ;;  %v2310_v20 = vpack.c.bf16 %v1174_v16, %v1172_v33  ;;  %v1085_v33 = vld [vmem:[%s4426_s8 + $0x48] sm:$0xff] }
 0x276   :  { %v960_v47 = vmax.f32 %v958_v42, 0.0  ;;  %v2312_v38 = vpack.c.bf16 %v1179_v37, %v1177_v35  ;;  %v1178_v42 = vld [vmem:[%s4427_s9 + $0x130] sm:$0xff]  ;;  %v1087_v16 = vld [vmem:[%s4426_s8 + $0x58] sm:$0xff] }
 0x277   :  { %v2348_v37 = vpack.c.bf16 %v1087_v16, %v1085_v33  ;;  %v1125_v33 = vld [vmem:[%s4426_s8 + $0x188] sm:$0xff]  ;;  %v1127_v16 = vld [vmem:[%s4426_s8 + $0x198] sm:$0xff] }
 0x278   :  { %1064 = vmatprep.mubr.f32.mxu1 %v960_v47  ;;  %v2314_v47 = vpack.c.bf16 %v1178_v42, %v1176_v41  ;;  %v1088_v41 = vld [vmem:[%s4426_s8 + $0x60] sm:$0xff]  ;;  %v1090_v42 = vld [vmem:[%s4426_s8 + $0x70] sm:$0xff] }
 0x279   :  { %1065 = vmatmul.mubr.f32.vlgmr.msra.gmra.mrb[2].mxu1 %v959_v50  ;;  %v1180_v50 = vld [vmem:[%s4427_s9 + $0x140] sm:$0xff] }
 0x27a   :  { %2279 = vmatpush1.bf16.msra.mxu1 %v2278_v48  ;;  %1268 = vmatprep.mubr.f32.mxu1 %v674_v43  ;;  %v2286_v43 = vpack.c.bf16 %v1150_v59, %v1148_v58  ;;  %v2316_v48 = vpack.c.bf16 %v1183_v46, %v1181_v44  ;;  %v1189_v58 = vld [vmem:[%s4427_s9 + $0x188] sm:$0xff]  ;;  %v1191_v59 = vld [vmem:[%s4427_s9 + $0x198] sm:$0xff] }
 0x27b   :  { %2281 = vmatprep.subr.bf16.mxu1 %v2280_v51  ;;  %v1182_v51 = vld [vmem:[%s4427_s9 + $0x150] sm:$0xff]  ;;  %v2324_v40 = vpack.c.bf16 %v1191_v59, %v1189_v58  ;;  %v1093_v44 = vld [vmem:[%s4426_s8 + $0x88] sm:$0xff]  ;;  %v1095_v46 = vld [vmem:[%s4426_s8 + $0x98] sm:$0xff] }
 0x27c   :  { %v2318_v54 = vpack.c.bf16 %v1182_v51, %v1180_v50  ;;  %v1092_v50 = vld [vmem:[%s4426_s8 + $0x80] sm:$0xff]  ;;  %v1094_v51 = vld [vmem:[%s4426_s8 + $0x90] sm:$0xff]  ;;  %v1101_v58 = vld [vmem:[%s4426_s8 + $0xc8] sm:$0xff] }
 0x27d   :  { %v1103_v59 = vld [vmem:[%s4426_s8 + $0xd8] sm:$0xff] }
 0x27e   :  { %2283 = vmatpush1.bf16.msra.mxu1 %v2282_v56  ;;  %v1184_v56 = vld [vmem:[%s4427_s9 + $0x160] sm:$0xff] }
 0x27f   :  { %2285 = vmatprep.subr.bf16.mxu1 %v2284_v57  ;;  %v1186_v57 = vld [vmem:[%s4427_s9 + $0x170] sm:$0xff] }
 0x280   :  { %v2322_v60 = vpack.c.bf16 %v1186_v57, %v1184_v56  ;;  %v1096_v56 = vld [vmem:[%s4426_s8 + $0xa0] sm:$0xff]  ;;  %v1098_v57 = vld [vmem:[%s4426_s8 + $0xb0] sm:$0xff] }
 0x282   :  { %2287 = vmatpush1.bf16.msra.mxu1 %v2286_v43  ;;  %v1188_v43 = vld [vmem:[%s4427_s9 + $0x180] sm:$0xff] }
 0x283   :  { %2289 = vmatprep.subr.bf16.mxu1 %v2288_v61  ;;  %v1190_v61 = vld [vmem:[%s4427_s9 + $0x190] sm:$0xff] }
 0x284   :  { %v2326_v0 = vpack.c.bf16 %v1190_v61, %v1188_v43  ;;  %v1100_v43 = vld [vmem:[%s4426_s8 + $0xc0] sm:$0xff]  ;;  %v1102_v61 = vld [vmem:[%s4426_s8 + $0xd0] sm:$0xff] }
 0x286   :  { %2291 = vmatpush1.bf16.msra.mxu1 %v2290_v2  ;;  %v1192_v2 = vld [vmem:[%s4427_s9 + $0x1a0] sm:$0xff] }
 0x287   :  { %2293 = vmatprep.subr.bf16.mxu1 %v2292_v3  ;;  %v1194_v3 = vld [vmem:[%s4427_s9 + $0x1b0] sm:$0xff] }
 0x288   :  { %v2330_v6 = vpack.c.bf16 %v1194_v3, %v1192_v2  ;;  %v1104_v2 = vld [vmem:[%s4426_s8 + $0xe0] sm:$0xff]  ;;  %v1106_v3 = vld [vmem:[%s4426_s8 + $0xf0] sm:$0xff] }
 0x28a   :  { %2295 = vmatpush1.bf16.msra.mxu1 %v2294_v8  ;;  %v1196_v8 = vld [vmem:[%s4427_s9 + $0x1c0] sm:$0xff] }
 0x28b   :  { %2297 = vmatprep.subr.bf16.mxu1 %v2296_v9  ;;  %v1198_v9 = vld [vmem:[%s4427_s9 + $0x1d0] sm:$0xff] }
 0x28c   :  { %v2334_v12 = vpack.c.bf16 %v1198_v9, %v1196_v8  ;;  %v1108_v8 = vld [vmem:[%s4426_s8 + $0x100] sm:$0xff]  ;;  %v1110_v9 = vld [vmem:[%s4426_s8 + $0x110] sm:$0xff] }
 0x28e   :  { %2299 = vmatpush1.bf16.msra.mxu1 %v2298_v14  ;;  %v1200_v14 = vld [vmem:[%s4427_s9 + $0x1e0] sm:$0xff] }
 0x28f   :  { %2301 = vmatprep.subr.bf16.mxu1 %v2300_v15  ;;  %v1202_v15 = vld [vmem:[%s4427_s9 + $0x1f0] sm:$0xff] }
 0x290   :  { %v2338_v26 = vpack.c.bf16 %v1202_v15, %v1200_v14  ;;  %v1112_v14 = vld [vmem:[%s4426_s8 + $0x120] sm:$0xff]  ;;  %v1114_v15 = vld [vmem:[%s4426_s8 + $0x130] sm:$0xff] }
 0x292   :  { %2303 = vmatpush1.bf16.msra.mxu1 %v2302_v23  ;;  %v1076_v23 = vld [vmem:[%s4426_s8] sm:$0xff] }
 0x293   :  { %2305 = vmatprep.subr.bf16.mxu1 %v2304_v34  ;;  %v1078_v34 = vld [vmem:[%s4426_s8 + $0x10] sm:$0xff] }
 0x294   :  { %v2342_v27 = vpack.c.bf16 %v1078_v34, %v1076_v23  ;;  %v1116_v23 = vld [vmem:[%s4426_s8 + $0x140] sm:$0xff]  ;;  %v1118_v34 = vld [vmem:[%s4426_s8 + $0x150] sm:$0xff] }
 0x296   :  { %2307 = vmatpush1.bf16.msra.mxu1 %v2306_v30  ;;  %v1080_v30 = vld [vmem:[%s4426_s8 + $0x20] sm:$0xff] }
 0x297   :  { %2309 = vmatprep.subr.bf16.mxu1 %v2308_v32  ;;  %v1082_v32 = vld [vmem:[%s4426_s8 + $0x30] sm:$0xff] }
 0x298   :  { %v2346_v35 = vpack.c.bf16 %v1082_v32, %v1080_v30  ;;  %v1120_v30 = vld [vmem:[%s4426_s8 + $0x160] sm:$0xff]  ;;  %v1122_v32 = vld [vmem:[%s4426_s8 + $0x170] sm:$0xff] }
 0x29a   :  { %2311 = vmatpush1.bf16.msra.mxu1 %v2310_v20  ;;  %v1084_v20 = vld [vmem:[%s4426_s8 + $0x40] sm:$0xff] }
 0x29b   :  { %2313 = vmatprep.subr.bf16.mxu1 %v2312_v38  ;;  %v1086_v38 = vld [vmem:[%s4426_s8 + $0x50] sm:$0xff] }
 0x29e   :  { %2315 = vmatpush1.bf16.msra.mxu1 %v2314_v47  ;;  %v2354_v47 = vpack.c.bf16 %v1090_v42, %v1088_v41  ;;  %v1128_v41 = vld [vmem:[%s4426_s8 + $0x1a0] sm:$0xff]  ;;  %v1130_v42 = vld [vmem:[%s4426_s8 + $0x1b0] sm:$0xff] }
 0x29f   :  { %2317 = vmatprep.subr.bf16.mxu1 %v2316_v48  ;;  %v2356_v48 = vpack.c.bf16 %v1095_v46, %v1093_v44  ;;  %v1133_v44 = vld [vmem:[%s4426_s8 + $0x1c8] sm:$0xff]  ;;  %v1135_v46 = vld [vmem:[%s4426_s8 + $0x1d8] sm:$0xff] }
 0x2a2   :  { %2319 = vmatpush1.bf16.msra.mxu1 %v2318_v54  ;;  %v2358_v54 = vpack.c.bf16 %v1094_v51, %v1092_v50  ;;  %v2396_v50 = vpack.c.bf16 %v1135_v46, %v1133_v44  ;;  %v1134_v51 = vld [vmem:[%s4426_s8 + $0x1d0] sm:$0xff]  ;;  %v1783_v44 = vld [vmem:[%s4425_s7] ss:$0 sm:$0xff] }
 0x2a3   :  { %2321 = vmatprep.subr.bf16.mxu1 %v2320_v55  ;;  %v2360_v55 = vpack.c.bf16 %v1099_v53, %v1097_v52  ;;  %v1137_v52 = vld [vmem:[%s4426_s8 + $0x1e8] sm:$0xff]  ;;  %v1139_v53 = vld [vmem:[%s4426_s8 + $0x1f8] sm:$0xff] }
 0x2a6   :  { %2323 = vmatpush1.bf16.msra.mxu1 %v2322_v60  ;;  %v2362_v60 = vpack.c.bf16 %v1098_v57, %v1096_v56  ;;  %v1452_v56 = vld [vmem:[%s4430_s12] sm:$0xff] }
 0x2a7   :  { %2325 = vmatprep.subr.bf16.mxu1 %v2324_v40  ;;  %v2364_v40 = vpack.c.bf16 %v1103_v59, %v1101_v58  ;;  %v1453_v58 = vld [vmem:[%s4430_s12 + $0x8] sm:$0xff]  ;;  %v1470_v59 = vld [vmem:[%s4430_s12 + $0x90] sm:$0xff] }
 0x2aa   :  { %2327 = vmatpush1.bf16.msra.mxu1 %v2326_v0  ;;  %v2366_v0 = vpack.c.bf16 %v1102_v61, %v1100_v43  ;;  %v2410_v43 = vpack.c.bf16 %v1453_v58, %v1452_v56  ;;  %v1483_v58 = vld [vmem:[%s4430_s12 + $0xf8] sm:$0xff] }
 0x2ab   :  { %2329 = vmatprep.subr.bf16.mxu1 %v2328_v1  ;;  %v2368_v1 = vpack.c.bf16 %v1107_v63, %v1105_v62  ;;  %v1454_v62 = vld [vmem:[%s4430_s12 + $0x10] sm:$0xff]  ;;  %v1455_v63 = vld [vmem:[%s4430_s12 + $0x18] sm:$0xff] }
 0x2ae   :  { %2331 = vmatpush1.bf16.msra.mxu1 %v2330_v6  ;;  %v2370_v6 = vpack.c.bf16 %v1106_v3, %v1104_v2  ;;  %v1136_v2 = vld [vmem:[%s4426_s8 + $0x1e0] sm:$0xff]  ;;  %v1138_v3 = vld [vmem:[%s4426_s8 + $0x1f0] sm:$0xff] }
 0x2af   :  { %2333 = vmatprep.subr.bf16.mxu1 %v2332_v7  ;;  %v2372_v7 = vpack.c.bf16 %v1111_v5, %v1109_v4  ;;  %v1473_v4 = vld [vmem:[%s4430_s12 + $0xa8] sm:$0xff] }
 0x2b0   :  { %v1347_v5 = vld [vmem:[%s4428_s10 + $0x8] sm:$0xff] }
 0x2b2   :  { %2335 = vmatpush1.bf16.msra.mxu1 %v2334_v12  ;;  %v2374_v12 = vpack.c.bf16 %v1110_v9, %v1108_v8  ;;  %v1456_v9 = vld [vmem:[%s4430_s12 + $0x20] sm:$0xff] }
 0x2b3   :  { %2337 = vmatprep.subr.bf16.mxu1 %v2336_v13  ;;  %v2376_v13 = vpack.c.bf16 %v1115_v11, %v1113_v10  ;;  %v1457_v10 = vld [vmem:[%s4430_s12 + $0x28] sm:$0xff]  ;;  %v2402_v11 = vpack.c.bf16 %v1138_v3, %v1136_v2 }
 0x2b6   :  { %2339 = vmatpush1.bf16.msra.mxu1 %v2338_v26  ;;  %v2378_v26 = vpack.c.bf16 %v1114_v15, %v1112_v14  ;;  %v1346_v15 = vld [vmem:[%s4428_s10] sm:$0xff] }
 0x2b7   :  { %2341 = vmatprep.subr.bf16.mxu1 %v2340_v22  ;;  %v2380_v22 = vpack.c.bf16 %v1119_v18, %v1117_v17  ;;  %v1348_v17 = vld [vmem:[%s4428_s10 + $0x10] sm:$0xff]  ;;  %v2418_v18 = vpack.c.bf16 %v1457_v10, %v1456_v9 }
 0x2b9   :  { %1269 = vmatmul.mubr.f32.vlgmr.msra.gmra.mrb[4].mxu1 %v673_v45  ;;  %v2350_v45 = vpack.c.bf16 %v1086_v38, %v1084_v20  ;;  %v1124_v20 = vld [vmem:[%s4426_s8 + $0x180] sm:$0xff]  ;;  %v1126_v38 = vld [vmem:[%s4426_s8 + $0x190] sm:$0xff] }
 0x2ba   :  { %2343 = vmatpush1.bf16.msra.mxu1 %v2342_v27  ;;  %1339 = vmatprep.mubr.f32.mxu1 %v359_v49  ;;  %v2352_v49 = vpack.c.bf16 %v1091_v39, %v1089_v36  ;;  %v2382_v27 = vpack.c.bf16 %v1118_v34, %v1116_v23  ;;  %v1129_v36 = vld [vmem:[%s4426_s8 + $0x1a8] sm:$0xff]  ;;  %v1131_v39 = vld [vmem:[%s4426_s8 + $0x1b8] sm:$0xff]  ;;  %v2406_v34 = vpack.c.bf16 %v1348_v17, %v1346_v15 }
 0x2bb   :  { %2345 = vmatprep.subr.bf16.mxu1 %v2344_v29  ;;  %v2384_v29 = vpack.c.bf16 %v1123_v25, %v1121_v24  ;;  %v1459_v23 = vld [vmem:[%s4430_s12 + $0x38] sm:$0xff]  ;;  %v1476_v24 = vld [vmem:[%s4430_s12 + $0xc0] sm:$0xff]  ;;  %v1477_v25 = vld [vmem:[%s4430_s12 + $0xc8] sm:$0xff] }
 0x2be   :  { %2347 = vmatpush1.bf16.msra.mxu1 %v2346_v35  ;;  %v2386_v35 = vpack.c.bf16 %v1122_v32, %v1120_v30  ;;  %v2424_v30 = vpack.c.bf16 %v1477_v25, %v1476_v24  ;;  %v1460_v32 = vld [vmem:[%s4430_s12 + $0x40] sm:$0xff] }
 0x2bf   :  { %2349 = vmatprep.subr.bf16.mxu1 %v2348_v37  ;;  %v2388_v37 = vpack.c.bf16 %v1127_v16, %v1125_v33  ;;  %v1461_v33 = vld [vmem:[%s4430_s12 + $0x48] sm:$0xff]  ;;  %v2484_v16 = vmov 0.0  }
 0x2c2   :  { %2351 = vmatpush1.bf16.msra.mxu1 %v2350_v45  ;;  %v2390_v45 = vpack.c.bf16 %v1126_v38, %v1124_v20  ;;  %v1462_v38 = vld [vmem:[%s4430_s12 + $0x50] sm:$0xff] }
 0x2c3   :  { %2353 = vmatprep.subr.bf16.mxu1 %v2352_v49  ;;  %v2392_v49 = vpack.c.bf16 %v1131_v39, %v1129_v36  ;;  %v1463_v36 = vld [vmem:[%s4430_s12 + $0x58] sm:$0xff]  ;;  %v1480_v39 = vld [vmem:[%s4430_s12 + $0xe0] sm:$0xff] }
 0x2c6   :  { %2355 = vmatpush1.bf16.msra.mxu1 %v2354_v47  ;;  %v2394_v47 = vpack.c.bf16 %v1130_v42, %v1128_v41 }
 0x2c7   :  { %2357 = vmatprep.subr.bf16.mxu1 %v2356_v48  ;;  %v1132_v48 = vld [vmem:[%s4426_s8 + $0x1c0] sm:$0xff] }
 0x2ca   :  { %2359 = vmatpush1.bf16.msra.mxu1 %v2358_v54  ;;  %v1468_v54 = vld [vmem:[%s4430_s12 + $0x80] sm:$0xff] }
 0x2cb   :  { %2361 = vmatprep.subr.bf16.mxu1 %v2360_v55  ;;  %v1469_v55 = vld [vmem:[%s4430_s12 + $0x88] sm:$0xff] }
 0x2cc   :  { %v2408_v57 = vpack.c.bf16 %v1469_v55, %v1468_v54  ;;  %v1464_v54 = vld [vmem:[%s4430_s12 + $0x60] sm:$0xff]  ;;  %v1465_v55 = vld [vmem:[%s4430_s12 + $0x68] sm:$0xff] }
 0x2cd   :  { %v2434_v56 = vpack.c.bf16 %v1465_v55, %v1464_v54 }
 0x2ce   :  { %2363 = vmatpush1.bf16.msra.mxu1 %v2362_v60  ;;  %v1471_v60 = vld [vmem:[%s4430_s12 + $0x98] sm:$0xff]  ;;  %2409 = vmatprep.subr.bf16.mxu0 %v2408_v57  ;;  %v1482_v57 = vld [vmem:[%s4430_s12 + $0xf0] sm:$0xff] }
 0x2cf   :  { %2365 = vmatprep.subr.bf16.mxu1 %v2364_v40  ;;  %v2398_v40 = vpack.c.bf16 %v1134_v51, %v1132_v48  ;;  %v2412_v61 = vpack.c.bf16 %v1471_v60, %v1470_v59  ;;  %2411 = vmatpush3.bf16.msra.mxu0 %v2410_v43  ;;  %v2436_v59 = vpack.c.bf16 %v1483_v58, %v1482_v57  ;;  %v1466_v60 = vld [vmem:[%s4430_s12 + $0x70] sm:$0xff] }
 0x2d1   :  { %2413 = vmatprep.subr.bf16.mxu0 %v2412_v61  ;;  %v1436_v61 = vld [vmem:[%s4429_s11] sm:$0x3]  ;;  %s2485_s11 = smov [#allocation2]  }
 0x2d2   :  { %2367 = vmatpush1.bf16.msra.mxu1 %v2366_v0  ;;  %v1472_v0 = vld [vmem:[%s4430_s12 + $0xa0] sm:$0xff]  ;;  %s1575_s16 = sshll.u32 %s2485_s11, 4  ;;  %s1576_s16 = int_to_ptr.vmem [resolvable:$true] %s1575_s16 }
 0x2d3   :  { %2369 = vmatprep.subr.bf16.mxu1 %v2368_v1  ;;  %v2400_v1 = vpack.c.bf16 %v1139_v53, %v1137_v52  ;;  %v2416_v8 = vpack.c.bf16 %v1473_v4, %v1472_v0  ;;  %s2460_s17 = scalar_lea.vmem %s1576_s16, 32  ;;  %p2465_p1 = scmp.lt.s32.totalorder %s1576_s16, %s1576_s16 }
 0x2d4   :  { %p2461_p0 = scmp.ne.s32.totalorder %s1576_s16, %s2460_s17  ;;  %p2466_p2 = scmp.lt.s32.totalorder %s2460_s17, %s2460_s17 }
 0x2d6   :  { %2371 = vmatpush1.bf16.msra.mxu1 %v2370_v6  ;;  %v1349_v6 = vld [vmem:[%s4428_s10 + $0x18] sm:$0xff]  ;;  %p2467_p3 = por %p2466_p2, %p2465_p1 }
 0x2d7   :  { %2373 = vmatprep.subr.bf16.mxu1 %v2372_v7  ;;  %v2414_v7 = vpack.c.bf16 %v1455_v63, %v1454_v62  ;;  %v2404_v14 = vpack.c.bf16 %v1349_v6, %v1347_v5  ;;  %v1441_v62 = vrot.slane %v1436_v61, %v3643_v28  ;;  %v1445_v63 = vrot.slane %v1436_v61, %v3648_v31 }
 0x2d8   :  { %p2468_p4 = pnand %p2467_p3, %p2461_p0 }
 0x2d9   :  { %2415 = vmatpush3.bf16.msra.mxu0 %v2414_v7  ;;  %v1788_v7 = vld [vmem:[%s4431_s13] ss:$0 sm:$0xff] }
 0x2da   :  { %2375 = vmatpush1.bf16.msra.mxu1 %v2374_v12  ;;  %v1474_v12 = vld [vmem:[%s4430_s12 + $0xb0] sm:$0xff]  ;;  %2417 = vmatprep.subr.bf16.mxu0 %v2416_v8 }
 0x2db   :  { %2377 = vmatprep.subr.bf16.mxu1 %v2376_v13  ;;  %v1475_v13 = vld [vmem:[%s4430_s12 + $0xb8] sm:$0xff] }
 0x2dd   :  { %2419 = vmatpush3.bf16.msra.mxu0 %v2418_v18 }
 0x2de   :  { %2379 = vmatpush1.bf16.msra.mxu1 %v2378_v26  ;;  %v2420_v26 = vpack.c.bf16 %v1475_v13, %v1474_v12 }
 0x2df   :  { %2381 = vmatprep.subr.bf16.mxu1 %v2380_v22  ;;  %v1458_v22 = vld [vmem:[%s4430_s12 + $0x30] sm:$0xff] }
 0x2e0   :  { %2421 = vmatprep.subr.bf16.mxu0 %v2420_v26 }
 0x2e2   :  { %2383 = vmatpush1.bf16.msra.mxu1 %v2382_v27  ;;  %v1351_v27 = vld [vmem:[%s4428_s10 + $0x28] sm:$0x7] }
 0x2e3   :  { %2385 = vmatprep.subr.bf16.mxu1 %v2384_v29  ;;  %v2422_v29 = vpack.c.bf16 %v1459_v23, %v1458_v22 }
 0x2e5   :  { %2423 = vmatpush3.bf16.msra.mxu0 %v2422_v29 }
 0x2e6   :  { %2387 = vmatpush1.bf16.msra.mxu1 %v2386_v35  ;;  %v1478_v35 = vld [vmem:[%s4430_s12 + $0xd0] sm:$0xff]  ;;  %2425 = vmatprep.subr.bf16.mxu0 %v2424_v30 }
 0x2e7   :  { %2389 = vmatprep.subr.bf16.mxu1 %v2388_v37  ;;  %v2426_v37 = vpack.c.bf16 %v1461_v33, %v1460_v32  ;;  %v2428_v20 = vpack.c.bf16 %v1479_v19, %v1478_v35 }
 0x2e9   :  { %2427 = vmatpush3.bf16.msra.mxu0 %v2426_v37 }
 0x2ea   :  { %2391 = vmatpush1.bf16.msra.mxu1 %v2390_v45  ;;  %v1481_v45 = vld [vmem:[%s4430_s12 + $0xe8] sm:$0xff]  ;;  %2429 = vmatprep.subr.bf16.mxu0 %v2428_v20 }
 0x2eb   :  { %2393 = vmatprep.subr.bf16.mxu1 %v2392_v49  ;;  %v2430_v49 = vpack.c.bf16 %v1463_v36, %v1462_v38  ;;  %v2432_v41 = vpack.c.bf16 %v1481_v45, %v1480_v39 }
 0x2ed   :  { %2431 = vmatpush3.bf16.msra.mxu0 %v2430_v49 }
 0x2ee   :  { %2395 = vmatpush1.bf16.msra.mxu1 %v2394_v47  ;;  %2433 = vmatprep.subr.bf16.mxu0 %v2432_v41 }
 0x2ef   :  { %2397 = vmatprep.subr.bf16.mxu1 %v2396_v50 }
 0x2f1   :  { %2435 = vmatpush3.bf16.msra.mxu0 %v2434_v56 }
 0x2f2   :  { %2399 = vmatpush1.bf16.msra.mxu1 %v2398_v40  ;;  %v1467_v40 = vld [vmem:[%s4430_s12 + $0x78] sm:$0xff]  ;;  %2437 = vmatprep.subr.bf16.mxu0 %v2436_v59 }
 0x2f3   :  { %2401 = vmatprep.subr.bf16.mxu1 %v2400_v1  ;;  %v2438_v43 = vpack.c.bf16 %v1467_v40, %v1466_v60 }
 0x2f5   :  { %2439 = vmatpush3.bf16.msra.mxu0 %v2438_v43 }
 0x2f6   :  { %2403 = vmatpush1.bf16.msra.mxu1 %v2402_v11 }
 0x2f7   :  { %2405 = vmatprep.subr.bf16.mxu1 %v2404_v14 }
 0x2f9   :  { %1340 = vmatmul.mubr.f32.vlgmr.msra.gmra.mrb[4].mxu1 %v358_v21  ;;  %v1350_v21 = vld [vmem:[%s4428_s10 + $0x20] sm:$0x7] }
 0x2fa   :  { %2407 = vmatpush1.bf16.msra.mxu1 %v2406_v34  ;;  %1427 = vmatprep.mubr.f32.mxu1 %v2484_v16 }
 0x2fb   :  { %1785 = vmatprep.subr.msk.mxu1 %vm1356_vm0, %v1351_v27 }
 0x2fe   :  { %1786 = vmatpush1.msk.msra.mxu1 %vm1356_vm0, %v1350_v21 }
 0x34c   :  { %v1822_v42 = vpop.f32.mrb[2].mxu1 }
 0x34d   :  { %v1823_v46 = vpop.f32.mrb[3].mxu1 }
 0x34e   :  { %v1824_v47 = vadd.f32 %v1823_v46, %v1822_v42 }
 0x350   :  { %v1067_v48 = vadd.f32 %v1824_v47, %v1783_v44 }
 0x352   :  { %v1784_v50 = vmul.f32 -1.442695, %v1067_v48 }
 0x354   :  { %2452 = vpow2.f32 %v1784_v50 }
 0x35e   :  { %v2453_v51 = vpop.eup %2452 }
 0x35f   :  { %v1073_v52 = vadd.f32 1.0, %v2453_v51 }
 0x361   :  { %2454 = vrcp.f32 %v1073_v52 }
 0x36b   :  { %v2455_v53 = vpop.eup %2454 }
 0x36c   :  { %1787 = vmatmul.mubr.msk.f32.vlgmr.msra.gmra.mrb[4].mxu1 %vm1352_vm1, %v2455_v53 }
 0x43f   :  { %v1429_v0 = vpop.f32.mrb[4].mxu1 }
 0x440   :  { %v1448_v1 = vadd.f32 %v1441_v62, %v1429_v0  ;;  %v1431_v2 = vpop.f32.mrb[5].mxu1 }
 0x441   :  { %v1449_v3 = vadd.f32 %v1445_v63, %v1431_v2 }
 0x442   :  { %v1450_v5 = vmax.f32 %v1448_v1, 0.0 }
 0x443   :  { %v1451_v4 = vmax.f32 %v1449_v3, 0.0 }
 0x445   :  { %1555 = vmatprep.mubr.f32.mxu0 %v1451_v4 }
 0x446   :  { %1556 = vmatmul.mubr.f32.vlgmr.msra.gmra.mrb[4].mxu0 %v1450_v5 }
 0x519   :  { %v1857_v6 = vpop.f32.mrb[4].mxu0 }
 0x51a   :  { %v1858_v8 = vpop.f32.mrb[5].mxu0 }
 0x51b   :  { %v1859_v9 = vadd.f32 %v1858_v8, %v1857_v6 }
 0x51d   :  { %v1558_v10 = vadd.f32 %v1859_v9, %v1788_v7 }
 0x51f   :  { %v1789_v11 = vmul.f32 -1.442695, %v1558_v10 }
 0x521   :  { %2456 = vpow2.f32 %v1789_v11 }
 0x52b   :  { %v2457_v28 = vpop.eup %2456 }
 0x52c   :  { %v1564_v31 = vadd.f32 1.0, %v2457_v28 }
 0x52e   :  { %2458 = vrcp.f32 %v1564_v31 }
 0x538   :  { %v2459_v12 = vpop.eup %2458 }
 0x539   :  { %1568 = vst.msk [vmem:[#allocation2] sm:$0x3] %vm1567_vm2, %v2459_v12 }
 0x53a   :  { %2471 = shalt.err (!%p2468_p4)
}
 0x53b   :  { %s2472_s6 = scalar_lea.hbm %s4432_s14, 32 }
 0x53c   :  { %p2473_p5 = scmp.ne.s32.totalorder %s4432_s14, %s2472_s6  ;;  %p2476_p6 = scmp.lt.u32.totalorder %s2472_s6, %s4432_s14 }
 0x53e   :  { %p2478_p7 = pnand %p2476_p6, %p2473_p5 }
 0x540   :  { %2481 = shalt.err (!%p2478_p7)
}
 0x541   :  { %1578 = dma.vmem_to_hbm [thread:$0]  %s1576_s16, 32, %s4432_s14, [#allocation3]  }
 0x542   :  { %2482 = dma.done.wait [#allocation3], 32  }
 0x543   :  { %2483 = vsyncadd [#allocation3], 4294967264 }
 0x544   :  { %1582 = vsyncpa [#allocation3], 1 }

// kernel: hpcp_forward.3
= control target key start
LH: loop header
LB: loop body
LE: loop exit
PB: predicated region body
PF: predicated region fallthrough
CT: control target
= control target key end

     0   :  { %s12092_s0 = inlined_call_operand.vmem [shape: f32[2,3], index: 0, kind: input, shape index: {}]   ;;  %s12093_s1 = inlined_call_operand.vmem [shape: f32[2,2,256,9], index: 1, kind: input, shape index: {}]   ;;  %s12094_s2 = inlined_call_operand.vmem [shape: f32[2,9,64], index: 2, kind: input, shape index: {}]   ;;  %s12095_s3 = inlined_call_operand.vmem [shape: f32[2,1,64], index: 3, kind: input, shape index: {}]   ;;  %s12096_s4 = inlined_call_operand.vmem [shape: f32[2,9,64,64], index: 4, kind: input, shape index: {}]   ;;  %s12097_s5 = inlined_call_operand.vmem [shape: f32[2,1,64], index: 5, kind: input, shape index: {}]   ;;  %s12098_s6 = inlined_call_operand.vmem [shape: f32[2,9,64,64], index: 6, kind: input, shape index: {}]   ;;  %s12099_s7 = inlined_call_operand.vmem [shape: f32[2,1,64], index: 7, kind: input, shape index: {}]   ;;  %s12100_s8 = inlined_call_operand.vmem [shape: f32[9,64,64], index: 8, kind: input, shape index: {}]   ;;  %s12101_s9 = inlined_call_operand.vmem [shape: f32[9,16,16], index: 9, kind: input, shape index: {}]   ;;  %s12102_s10 = inlined_call_operand.vmem [shape: f32[64,256], index: 10, kind: input, shape index: {}]   ;;  %s12103_s11 = inlined_call_operand.vmem [shape: f32[16,64], index: 11, kind: input, shape index: {}]   ;;  %s12104_s12 = inlined_call_operand.vmem [shape: f32[2,2,16], index: 12, kind: input, shape index: {}]   ;;  %s12105_s13 = inlined_call_operand.vmem [shape: f32[2,2,128,768], index: 13, kind: input, shape index: {}]   ;;  %s12106_s14 = inlined_call_operand.vmem [shape: f32[2,2,1,768], index: 14, kind: input, shape index: {}]   ;;  %s12107_s15 = inlined_call_operand.vmem [shape: f32[2,2,2,2,768], index: 15, kind: output, shape index: {}]  }
   0x1   :  { %12109 = sst [smem:[#allocation8_spill]] %s12092_s0 }
   0x2   :  { %20 = vsyncpa [#allocation3], 0  ;;  %s10625_s18 = smov 0   ;;  %s10627_s19 = smov 0  }
   0x3   :  { %s10629_s20 = smov 0   ;;  %s10631_s21 = smov 0  }
   0x4   :  { %s10633_s22 = smov 0  }
   0x5 LB: > { %12110 = sst [smem:[#allocation5_spill]] %s10532_s21  ;;  %s7476_s23 = sadd.s32 4294967295, %s10536_s22   ;;  %s10536_s22 = sphi %s10633_s22, %s26_s22   ;;  %s10532_s21 = sphi %s10631_s21, %s12118_s21   ;;  %s10528_s20 = sphi %s10629_s20, %s12120_s20   ;;  %s10524_s19 = sphi %s10627_s19, %s12116_s19   ;;  %s10520_s18 = sphi %s10625_s18, %s12119_s18  }
   0x6   : > { %s35_s24 = sadd.s32 1, %s10528_s20  ;;  %s38_s25 = sadd.s32 1, %s10532_s21 }
   0x7   : > { %p36_p0 = scmp.ge.s32.totalorder %s35_s24, 2  ;;  %p7478_p1 = scmp.ge.s32.totalorder %s10536_s22, 1 }
   0x8   : > { %p433_p2 = scmp.lt.s32.totalorder %s10536_s22, 5  ;;  %p10662_p5 = scmp.eq.s32.totalorder %s7476_s23, 0 }
   0x9   : > { %s12122_s24 = smov (%p36_p0, %s35_s24), 0  ;;  %s12124_s25 = smov (!%p36_p0, %s38_s25), %s10532_s21 }
   0xa   : > { %12111 = sst [smem:[#allocation6_spill]] %s12122_s24  ;;  %p10658_p3 = pnand %p7478_p1, %p433_p2 }
   0xb   : > { %p40_p4 = scmp.ge.s32.totalorder %s12124_s25, 2  ;;  %s12114_s0 = sld [smem:[#allocation8_spill]] }
   0xc   : > { %p10202_p6 = pneg %p10658_p3 }
   0xd   : > { %s12126_s25 = smov (%p40_p4, %s12124_s25), 0 }
   0xe   : > { %12115 = sst [smem:[#allocation7_spill]] %s12126_s25  ;;  %p10203_p7 = pnand %p10662_p5, %p10202_p6 }
  0x10   : > { %p10481_p9 = pneg %p10203_p7 }
  0x11   : > { %s446_s30 = sshll.u32 %s12114_s0, 4  ;;  %s447_s30 = int_to_ptr.vmem [resolvable:$true] %s446_s30 }
  0x12   : > { %s10479_s16 = scalar_lea.vmem %s447_s30, 32  ;;  %p10487_p12 = scmp.lt.s32.totalorder %s447_s30, %s447_s30 }
  0x13   : > { %p10480_p8 = scmp.ne.s32.totalorder %s447_s30, %s10479_s16  ;;  %p10488_p13 = scmp.lt.s32.totalorder %s10479_s16, %s10479_s16 }
  0x15   : > { %p10482_p10 = pnand %p10481_p9, %p10480_p8  ;;  %p10489_p0 = por %p10488_p13, %p10487_p12 }
  0x17   : > { %p10483_p11 = pneg %p10482_p10 }
  0x19   : > { %p10490_p1 = pnand %p10489_p0, %p10483_p11 }
  0x1b   : > { %10493 = shalt.err (!%p10490_p1)
}
  0x1c   : > { %s10538_s17 = smov [#allocation2]   ;;  %543 = sbr.rel (%p10658_p3) target bundleno = 2873 (0xb39), region = 80 }
  0x1d   : > { %10205 = dma.vmem_to_smem (!%p10203_p7), %s447_s30, 32, %s10538_s17, [#allocation3]  }
  0x23   : > { %10515 = dma.done.wait (%p10662_p5), [#allocation3], 32  }
  0x24   : > { %10517 = vsyncadd (%p10662_p5), [#allocation3], 4294967264 }
  0x25   : > { %549 = sfence }
  0x26   : > { %p633_p2 = scmp.lt.s32.totalorder %s10524_s19, 1  ;;  %p635_p4 = scmp.lt.s32.totalorder %s10520_s18, 1  ;;  %v10539_v0 = vmov 0   ;;  %vm822_vm0 = vcmask 1040384   ;;  %vm10540_vm1 = vmmov 1   ;;  %vm725_vm3 = vcmask 72704  }
  0x27   : > { %10256 = vset.pattern.permute.xlu1 %v10539_v0  ;;  %10255 = vset.pattern.permute.xlu0 %v10539_v0  ;;  %vm9382_vm2 = vmpackc.low %vm822_vm0, %vm10540_vm1  ;;  %v1244_v49 = vld [vmem:[%s12102_s10 + $0x8] sm:$0xff]  ;;  %vm1608_vm4 = vcmask 523264   ;;  %vm4317_vm5 = vcmask 130048   ;;  %vm10542_vm6 = vmmov 0  }
  0x28   : > { %s10684_s23 = scalar_select %p633_p2, %s10524_s19, 1  ;;  %1518 = vmatprep.mubr.f32.mxu1 %v1244_v49 }
  0x29   : > { %s12128_s18 = smov (!%p635_p4, %s10520_s18), 1 }
  0x2a   : > { %s7484_s26 = sshll.u32 %s10684_s23, 6  ;;  %s8036_s27 = sshll.u32 %s10684_s23, 4 }
  0x2b   : > { %s7483_s28 = sshll.u32 %s12128_s18, 5  ;;  %s646_s16 = scalar_lea.vmem %s12094_s2, %s8036_s27 }
  0x2c   : > { %s639_s17 = sadd.s32 %s7484_s26, %s7483_s28  ;;  %v716_v1 = vld [vmem:[%s646_s16] sm:$0xff]  ;;  %v717_v2 = vld [vmem:[%s646_s16 + $0x8] sm:$0x1]  ;;  %s649_s26 = scalar_lea.vmem %s12095_s3, %s10684_s23 }
  0x2d   : > { %s7485_s0 = sshll.u32 %s639_s17, 3  ;;  %v9381_v3 = vpack.c.bf16 %v717_v2, %v716_v1  ;;  %v10791_v55 = vld [vmem:[%s649_s26] ss:$0 sm:$0xff]  ;;  %s10806_s27 = sshll.u32 %s10524_s19, 7 }
  0x2e   : > { %s10698_s21 = scalar_lea.vmem %s12093_s1, %s7485_s0  ;;  %s1260_s28 = sld [smem:[#allocation2 + %s10806_s27]] }
  0x2f   : > { %9383 = vmatprep.subr.msk.bf16.mxu0 %vm9382_vm2, %v9381_v3  ;;  %v684_v4 = vld [vmem:[%s10698_s21] sm:$0xff]  ;;  %v685_v5 = vld [vmem:[%s10698_s21 + $0x8] sm:$0xff]  ;;  %v686_v6 = vld [vmem:[%s10698_s21 + $0x10] sm:$0xff]  ;;  %s10193_s29 = smul.u32 576, %s10684_s23  ;;  %s657_s16 = scalar_lea.vmem %s12097_s5, %s10684_s23 }
  0x30   : > { %9386 = vmatpush3.bf16.msk.msra.mxu0 %vm9382_vm2, %v9381_v3  ;;  %8562 = vmatprep.mubr.msk.f32.mxu0 %vm725_vm3, %v684_v4  ;;  %v687_v7 = vld [vmem:[%s10698_s21 + $0x18] sm:$0xff]  ;;  %v700_v8 = vld [vmem:[%s10698_s21 + $0x80] sm:$0xff]  ;;  %v689_v10 = vld [vmem:[%s10698_s21 + $0x28] sm:$0xff]  ;;  %s4172_s0 = sadd.s32 1, %s10806_s27  ;;  %s665_s25 = scalar_lea.vmem %s12099_s7, %s10684_s23 }
  0x31   : > { %1084 = vperm.xlu1 %10256, %v684_v4   ;;  %v688_v9 = vld [vmem:[%s10698_s21 + $0x20] sm:$0xff]  ;;  %1148 = vperm.xlu0 %10255, %v700_v8   ;;  %v701_v11 = vld [vmem:[%s10698_s21 + $0x88] sm:$0xff]  ;;  %v703_v12 = vld [vmem:[%s10698_s21 + $0x98] sm:$0xff]  ;;  %s11058_s17 = scalar_lea.vmem %s12096_s4, %s10193_s29  ;;  %s11588_s30 = scalar_lea.vmem %s12098_s6, %s10193_s29 }
  0x32   : > { %v690_v13 = vld [vmem:[%s10698_s21 + $0x30] sm:$0xff]  ;;  %v691_v14 = vld [vmem:[%s10698_s21 + $0x38] sm:$0xff]  ;;  %v692_v16 = vld [vmem:[%s10698_s21 + $0x40] sm:$0xff]  ;;  %s5907_s26 = sadd.s32 2, %s10806_s27  ;;  %s10195_s24 = smul.u32 12, %s10684_s23 }
  0x33   : > { %8563 = vmatmul.mubr.msk.f32.vlgmr.msra.gmra.mrb[0].mxu0 %vm725_vm3, %v685_v5  ;;  %v702_v15 = vld [vmem:[%s10698_s21 + $0x90] sm:$0xff]  ;;  %v693_v17 = vld [vmem:[%s10698_s21 + $0x48] sm:$0xff]  ;;  %v695_v20 = vld [vmem:[%s10698_s21 + $0x58] sm:$0xff]  ;;  %s10196_s27 = smul.u32 12, %s12128_s18 }
  0x34   : > { %8565 = vmatprep.mubr.msk.f32.mxu0 %vm725_vm3, %v686_v6  ;;  %v705_v18 = vld [vmem:[%s10698_s21 + $0xa8] sm:$0xff]  ;;  %v694_v19 = vld [vmem:[%s10698_s21 + $0x50] sm:$0xff]  ;;  %v704_v21 = vld [vmem:[%s10698_s21 + $0xa0] sm:$0xff] }
  0x35   : > { %1088 = vperm.xlu1 %10256, %v685_v5   ;;  %1152 = vperm.xlu0 %10255, %v701_v11   ;;  %v696_v22 = vld [vmem:[%s10698_s21 + $0x60] sm:$0xff]  ;;  %v697_v23 = vld [vmem:[%s10698_s21 + $0x68] sm:$0xff]  ;;  %v707_v24 = vld [vmem:[%s10698_s21 + $0xb8] sm:$0xff] }
  0x36   : > { %v698_v25 = vld [vmem:[%s10698_s21 + $0x70] sm:$0xff]  ;;  %v699_v26 = vld [vmem:[%s10698_s21 + $0x78] sm:$0xff]  ;;  %v709_v28 = vld [vmem:[%s10698_s21 + $0xc8] sm:$0xff] }
  0x37   : > { %8566 = vmatmul.mubr.msk.f32.gmra.mrb[2].mxu0 %vm725_vm3, %v687_v7  ;;  %v706_v27 = vld [vmem:[%s10698_s21 + $0xb0] sm:$0xff]  ;;  %v708_v29 = vld [vmem:[%s10698_s21 + $0xc0] sm:$0xff]  ;;  %v711_v30 = vld [vmem:[%s10698_s21 + $0xd8] sm:$0xff] }
  0x38   : > { %8568 = vmatprep.mubr.msk.f32.mxu0 %vm725_vm3, %v688_v9  ;;  %v710_v31 = vld [vmem:[%s10698_s21 + $0xd0] sm:$0xff]  ;;  %v713_v32 = vld [vmem:[%s10698_s21 + $0xe8] sm:$0xff]  ;;  %v712_v33 = vld [vmem:[%s10698_s21 + $0xe0] sm:$0xff] }
  0x39   : > { %1160 = vperm.xlu1 %10256, %v703_v12   ;;  %1156 = vperm.xlu0 %10255, %v702_v15   ;;  %v715_v34 = vld [vmem:[%s10698_s21 + $0xf8] sm:$0xff]  ;;  %v714_v35 = vld [vmem:[%s10698_s21 + $0xf0] sm:$0xff]  ;;  %s4173_s21 = sld [smem:[#allocation2 + %s4172_s0]] }
  0x3b   : > { %8569 = vmatmul.mubr.msk.f32.gmra.mrb[4].mxu0 %vm725_vm3, %v689_v10 }
  0x3c   : > { %8571 = vmatprep.mubr.msk.f32.mxu0 %vm725_vm3, %v690_v13 }
  0x3d   : > { %1096 = vperm.xlu1 %10256, %v687_v7   ;;  %1092 = vperm.xlu0 %10255, %v686_v6  }
  0x3f   : > { %8572 = vmatmul.mubr.msk.f32.gmra.mrb[6].mxu0 %vm725_vm3, %v691_v14 }
  0x40   : > { %8574 = vmatprep.mubr.msk.f32.mxu0 %vm725_vm3, %v692_v16 }
  0x41   : > { %1168 = vperm.xlu1 %10256, %v705_v18   ;;  %1164 = vperm.xlu0 %10255, %v704_v21  }
  0x43   : > { %8575 = vmatmul.mubr.msk.f32.gmra.mrb[8].mxu0 %vm725_vm3, %v693_v17 }
  0x44   : > { %8577 = vmatprep.mubr.msk.f32.mxu0 %vm725_vm3, %v694_v19 }
  0x45   : > { %1104 = vperm.xlu1 %10256, %v689_v10   ;;  %1100 = vperm.xlu0 %10255, %v688_v9  }
  0x47   : > { %8578 = vmatmul.mubr.msk.f32.gmra.mrb[10].mxu0 %vm725_vm3, %v695_v20 }
  0x48   : > { %8580 = vmatprep.mubr.msk.f32.mxu0 %vm725_vm3, %v696_v22 }
  0x49   : > { %1176 = vperm.xlu1 %10256, %v707_v24   ;;  %1172 = vperm.xlu0 %10255, %v706_v27  }
  0x4b   : > { %8581 = vmatmul.mubr.msk.f32.gmra.mrb[12].mxu0 %vm725_vm3, %v697_v23 }
  0x4c   : > { %8583 = vmatprep.mubr.msk.f32.mxu0 %vm725_vm3, %v698_v25 }
  0x4d   : > { %1112 = vperm.xlu1 %10256, %v691_v14   ;;  %1108 = vperm.xlu0 %10255, %v690_v13  }
  0x4f   : > { %8584 = vmatmul.mubr.msk.f32.gmra.mrb[14].mxu0 %vm725_vm3, %v699_v26 }
  0x50   : > { %8586 = vmatprep.mubr.msk.f32.mxu0 %vm725_vm3, %v700_v8 }
  0x51   : > { %1184 = vperm.xlu1 %10256, %v709_v28   ;;  %1180 = vperm.xlu0 %10255, %v708_v29  }
  0x53   : > { %8587 = vmatmul.mubr.msk.f32.gmra.mrb[16].mxu0 %vm725_vm3, %v701_v11 }
  0x54   : > { %8589 = vmatprep.mubr.msk.f32.mxu0 %vm725_vm3, %v702_v15 }
  0x55   : > { %1120 = vperm.xlu1 %10256, %v693_v17   ;;  %1116 = vperm.xlu0 %10255, %v692_v16  }
  0x57   : > { %8590 = vmatmul.mubr.msk.f32.gmra.mrb[18].mxu0 %vm725_vm3, %v703_v12 }
  0x58   : > { %8592 = vmatprep.mubr.msk.f32.mxu0 %vm725_vm3, %v704_v21 }
  0x59   : > { %1192 = vperm.xlu1 %10256, %v711_v30   ;;  %1188 = vperm.xlu0 %10255, %v710_v31  }
  0x5b   : > { %8593 = vmatmul.mubr.msk.f32.gmra.mrb[20].mxu0 %vm725_vm3, %v705_v18 }
  0x5c   : > { %8595 = vmatprep.mubr.msk.f32.mxu0 %vm725_vm3, %v706_v27 }
  0x5d   : > { %1128 = vperm.xlu1 %10256, %v695_v20   ;;  %1124 = vperm.xlu0 %10255, %v694_v19  }
  0x5f   : > { %8596 = vmatmul.mubr.msk.f32.gmra.mrb[22].mxu0 %vm725_vm3, %v707_v24 }
  0x60   : > { %8598 = vmatprep.mubr.msk.f32.mxu0 %vm725_vm3, %v708_v29 }
  0x61   : > { %1200 = vperm.xlu1 %10256, %v713_v32   ;;  %1196 = vperm.xlu0 %10255, %v712_v33  }
  0x63   : > { %8599 = vmatmul.mubr.msk.f32.gmra.mrb[24].mxu0 %vm725_vm3, %v709_v28 }
  0x64   : > { %8601 = vmatprep.mubr.msk.f32.mxu0 %vm725_vm3, %v710_v31 }
  0x65   : > { %1136 = vperm.xlu1 %10256, %v697_v23   ;;  %1132 = vperm.xlu0 %10255, %v696_v22  }
  0x67   : > { %8602 = vmatmul.mubr.msk.f32.gmra.mrb[26].mxu0 %vm725_vm3, %v711_v30 }
  0x68   : > { %8604 = vmatprep.mubr.msk.f32.mxu0 %vm725_vm3, %v712_v33 }
  0x69   : > { %1208 = vperm.xlu1 %10256, %v715_v34   ;;  %1204 = vperm.xlu0 %10255, %v714_v35  }
  0x6b   : > { %8605 = vmatmul.mubr.msk.f32.gmra.mrb[28].mxu0 %vm725_vm3, %v713_v32 }
  0x6c   : > { %8607 = vmatprep.mubr.msk.f32.mxu0 %vm725_vm3, %v714_v35 }
  0x6d   : > { %1144 = vperm.xlu1 %10256, %v699_v26   ;;  %1140 = vperm.xlu0 %10255, %v698_v25  }
  0x6f   : > { %8608 = vmatmul.mubr.msk.f32.gmra.mrb[30].mxu0 %vm725_vm3, %v715_v34 }
  0xb0   : > { %v1085_v36 = vpop.permute.xlu1 %1084  ;;  %v10764_v37 = vpop.permute.xlu0 %1148 }
  0xb4   : > { %v1089_v38 = vpop.permute.xlu1 %1088  ;;  %v10766_v39 = vpop.permute.xlu0 %1152 }
  0xb8   : > { %v10768_v40 = vpop.permute.xlu1 %1160  ;;  %v10770_v41 = vpop.permute.xlu0 %1156 }
  0xbc   : > { %v1097_v42 = vpop.permute.xlu1 %1096  ;;  %v1093_v43 = vpop.permute.xlu0 %1092 }
  0xc0   : > { %v10772_v44 = vpop.permute.xlu1 %1168  ;;  %v10774_v45 = vpop.permute.xlu0 %1164 }
  0xc4   : > { %v1105_v46 = vpop.permute.xlu1 %1104  ;;  %v1101_v47 = vpop.permute.xlu0 %1100 }
  0xc8   : > { %v10776_v48 = vpop.permute.xlu1 %1176  ;;  %v10781_v50 = vpop.permute.xlu0 %1172 }
  0xcc   : > { %v1113_v51 = vpop.permute.xlu1 %1112  ;;  %v1109_v52 = vpop.permute.xlu0 %1108 }
  0xd0   : > { %v10783_v53 = vpop.permute.xlu1 %1184  ;;  %v10785_v54 = vpop.permute.xlu0 %1180 }
  0xd4   : > { %v10793_v56 = vpop.permute.xlu1 %1120  ;;  %v10795_v57 = vpop.permute.xlu0 %1116 }
  0xd8   : > { %v10799_v1 = vpop.permute.xlu1 %1192  ;;  %v10802_v5 = vpop.permute.xlu0 %1188 }
  0xdc   : > { %v1129_v18 = vpop.permute.xlu1 %1128  ;;  %v10811_v21 = vpop.permute.xlu0 %1124 }
  0xe0   : > { %v10815_v35 = vpop.permute.xlu1 %1200 }
 0x106   : > { %v8564_v58 = vpop.f32.mrb[0].mxu0 }
 0x107   : > { %v898_v59 = vadd.f32 %v8564_v58, %v10791_v55  ;;  %v892_v60 = vpop.f32.mrb[1].mxu0  ;;  %v10821_v58 = vstv %s1260_s28  ;;  %s10197_s28 = smul.u32 24, %s10684_s23 }
 0x108   : > { %v893_v61 = vadd.f32 %v10791_v55, %v892_v60 }
 0x109   : > { %v1052_v62 = vmax.f32 %v898_v59, 0.0  ;;  %s681_s19 = sadd.s32 %s10197_s28, %s10196_s27 }
 0x10a   : > { %v1051_v63 = vmax.f32 %v893_v61, 0.0  ;;  %v8567_v0 = vpop.f32.mrb[2].mxu0  ;;  %s7491_s29 = sshll.u32 %s681_s19, 1 }
 0x10b   : > { %v1212_v2 = vadd.f32 %v1089_v38, %v1052_v62  ;;  %v908_v3 = vadd.f32 %v8567_v0, %v10791_v55  ;;  %v902_v4 = vpop.f32.mrb[3].mxu0 }
 0x10c   : > { %v1211_v6 = vadd.f32 %v1085_v36, %v1051_v63  ;;  %v903_v7 = vadd.f32 %v10791_v55, %v902_v4 }
 0x10d   : > { %v1262_v8 = vmax.f32 %v1212_v2, 1e-06  ;;  %v1054_v9 = vmax.f32 %v908_v3, 0.0 }
 0x10e   : > { %v1261_v10 = vmax.f32 %v1211_v6, 1e-06  ;;  %v1053_v11 = vmax.f32 %v903_v7, 0.0  ;;  %v8570_v12 = vpop.f32.mrb[4].mxu0 }
 0x10f   : > { %10257 = vlog2.f32 %v1262_v8  ;;  %v1214_v13 = vadd.f32 %v1097_v42, %v1054_v9  ;;  %v918_v14 = vadd.f32 %v8570_v12, %v10791_v55  ;;  %v912_v15 = vpop.f32.mrb[5].mxu0 }
 0x110   : > { %10259 = vlog2.f32 %v1261_v10  ;;  %v1213_v16 = vadd.f32 %v1093_v43, %v1053_v11  ;;  %v913_v17 = vadd.f32 %v10791_v55, %v912_v15  ;;  %v10818_v43 = vpop.permute.xlu0 %1196  ;;  %v1137_v10 = vpop.permute.xlu1 %1136 }
 0x111   : > { %v1264_v19 = vmax.f32 %v1214_v13, 1e-06  ;;  %v1056_v20 = vmax.f32 %v918_v14, 0.0 }
 0x112   : > { %v1263_v22 = vmax.f32 %v1213_v16, 1e-06  ;;  %v1055_v23 = vmax.f32 %v913_v17, 0.0  ;;  %v8573_v24 = vpop.f32.mrb[6].mxu0 }
 0x113   : > { %10261 = vlog2.f32 %v1264_v19  ;;  %v1216_v25 = vadd.f32 %v1105_v46, %v1056_v20  ;;  %v928_v26 = vadd.f32 %v8573_v24, %v10791_v55  ;;  %v922_v27 = vpop.f32.mrb[7].mxu0 }
 0x114   : > { %10263 = vlog2.f32 %v1263_v22  ;;  %v1215_v28 = vadd.f32 %v1101_v47, %v1055_v23  ;;  %v923_v29 = vadd.f32 %v10791_v55, %v922_v27  ;;  %v1133_v15 = vpop.permute.xlu0 %1132 }
 0x115   : > { %v1266_v30 = vmax.f32 %v1216_v25, 1e-06  ;;  %v1058_v31 = vmax.f32 %v928_v26, 0.0 }
 0x116   : > { %v1265_v32 = vmax.f32 %v1215_v28, 1e-06  ;;  %v1057_v33 = vmax.f32 %v923_v29, 0.0  ;;  %v8576_v34 = vpop.f32.mrb[8].mxu0 }
 0x117   : > { %10265 = vlog2.f32 %v1266_v30  ;;  %v1218_v36 = vadd.f32 %v1113_v51, %v1058_v31  ;;  %v938_v38 = vadd.f32 %v8576_v34, %v10791_v55  ;;  %v932_v42 = vpop.f32.mrb[9].mxu0 }
 0x118   : > { %10267 = vlog2.f32 %v1265_v32  ;;  %v1217_v46 = vadd.f32 %v1109_v52, %v1057_v33  ;;  %v933_v47 = vadd.f32 %v10791_v55, %v932_v42 }
 0x119   : > { %v10258_v49 = vpop.eup %10257  ;;  %v1268_v59 = vmax.f32 %v1218_v36, 1e-06  ;;  %v1060_v60 = vmax.f32 %v938_v38, 0.0  ;;  %v10834_v36 = vpop.permute.xlu1 %1208 }
 0x11a   : > { %v10260_v61 = vpop.eup %10259  ;;  %v1296_v62 = vmul.f32 0.6931472, %v10258_v49  ;;  %v1267_v63 = vmax.f32 %v1217_v46, 1e-06  ;;  %v1059_v0 = vmax.f32 %v933_v47, 0.0  ;;  %v8579_v2 = vpop.f32.mrb[10].mxu0 }
 0x11b   : > { %v1294_v51 = vmul.f32 0.6931472, %v10260_v61  ;;  %10269 = vlog2.f32 %v1268_v59  ;;  %v1220_v3 = vadd.f32 %v10793_v56, %v1060_v60  ;;  %v948_v4 = vadd.f32 %v8579_v2, %v10791_v55  ;;  %v942_v6 = vpop.f32.mrb[11].mxu0  ;;  %v10836_v49 = vpop.permute.xlu0 %1204 }
 0x11c   : > { %v1359_v52 = vmul.f32 %v10821_v58, %v1296_v62  ;;  %10271 = vlog2.f32 %v1267_v63  ;;  %v1219_v7 = vadd.f32 %v10795_v57, %v1059_v0  ;;  %v943_v8 = vadd.f32 %v10791_v55, %v942_v6 }
 0x11d   : > { %v10262_v9 = vpop.eup %10261  ;;  %v1358_v11 = vmul.f32 %v10821_v58, %v1294_v51  ;;  %v1270_v12 = vmax.f32 %v1220_v3, 1e-06  ;;  %v1062_v13 = vmax.f32 %v948_v4, 0.0 }
 0x11e   : > { %v10264_v14 = vpop.eup %10263  ;;  %v1392_v16 = vmul.f32 1.442695, %v1359_v52  ;;  %v1300_v56 = vmul.f32 0.6931472, %v10262_v9  ;;  %v1269_v17 = vmax.f32 %v1219_v7, 1e-06 }
 0x11f   : > { %v1390_v19 = vmul.f32 1.442695, %v1358_v11  ;;  %v1298_v20 = vmul.f32 0.6931472, %v10264_v14  ;;  %10273 = vlog2.f32 %v1270_v12  ;;  %v1222_v22 = vadd.f32 %v1129_v18, %v1062_v13  ;;  %v8582_v23 = vpop.f32.mrb[12].mxu0 }
 0x120   : > { %10275 = vpow2.f32 %v1392_v16  ;;  %v1361_v57 = vmul.f32 %v10821_v58, %v1300_v56  ;;  %v1061_v24 = vmax.f32 %v943_v8, 0.0  ;;  %v958_v25 = vadd.f32 %v8582_v23, %v10791_v55  ;;  %v952_v26 = vpop.f32.mrb[13].mxu0  ;;  %v1145_v16 = vpop.permute.xlu1 %1144 }
 0x121   : > { %v10266_v27 = vpop.eup %10265  ;;  %10277 = vpow2.f32 %v1390_v19  ;;  %v1360_v28 = vmul.f32 %v10821_v58, %v1298_v20  ;;  %v1272_v29 = vmax.f32 %v1222_v22, 1e-06  ;;  %v953_v30 = vadd.f32 %v10791_v55, %v952_v26  ;;  %v1141_v20 = vpop.permute.xlu0 %1140 }
 0x122   : > { %v10268_v31 = vpop.eup %10267  ;;  %v1396_v32 = vmul.f32 1.442695, %v1361_v57  ;;  %v1304_v33 = vmul.f32 0.6931472, %v10266_v27  ;;  %10279 = vlog2.f32 %v1269_v17  ;;  %v1221_v18 = vadd.f32 %v10811_v21, %v1061_v24  ;;  %v8585_v34 = vpop.f32.mrb[14].mxu0 }
 0x123   : > { %v1394_v38 = vmul.f32 1.442695, %v1360_v28  ;;  %v1302_v42 = vmul.f32 0.6931472, %v10268_v31  ;;  %10281 = vlog2.f32 %v1272_v29  ;;  %v1064_v46 = vmax.f32 %v958_v25, 0.0  ;;  %v962_v47 = vpop.f32.mrb[15].mxu0 }
 0x124   : > { %10283 = vpow2.f32 %v1396_v32  ;;  %v1363_v59 = vmul.f32 %v10821_v58, %v1304_v33  ;;  %v1271_v60 = vmax.f32 %v1221_v18, 1e-06  ;;  %v1063_v61 = vmax.f32 %v953_v30, 0.0 }
 0x125   : > { %v10270_v62 = vpop.eup %10269  ;;  %10285 = vpow2.f32 %v1394_v38  ;;  %v1362_v63 = vmul.f32 %v10821_v58, %v1302_v42  ;;  %v1224_v21 = vadd.f32 %v1137_v10, %v1064_v46  ;;  %v968_v0 = vadd.f32 %v8585_v34, %v10791_v55 }
 0x126   : > { %v10272_v2 = vpop.eup %10271  ;;  %v1400_v51 = vmul.f32 1.442695, %v1363_v59  ;;  %v1308_v3 = vmul.f32 0.6931472, %v10270_v62  ;;  %10287 = vlog2.f32 %v1271_v60  ;;  %v1223_v4 = vadd.f32 %v1133_v15, %v1063_v61  ;;  %v8588_v6 = vpop.f32.mrb[16].mxu0 }
 0x127   : > { %v1398_v52 = vmul.f32 1.442695, %v1362_v63  ;;  %v1306_v7 = vmul.f32 0.6931472, %v10272_v2  ;;  %v1274_v8 = vmax.f32 %v1224_v21, 1e-06  ;;  %v963_v9 = vadd.f32 %v10791_v55, %v962_v47 }
 0x128   : > { %10289 = vpow2.f32 %v1400_v51  ;;  %v1365_v11 = vmul.f32 %v10821_v58, %v1308_v3  ;;  %v1273_v12 = vmax.f32 %v1223_v4, 1e-06  ;;  %v1066_v13 = vmax.f32 %v968_v0, 0.0  ;;  %v972_v14 = vpop.f32.mrb[17].mxu0 }
 0x129   : > { %v10274_v10 = vpop.eup %10273  ;;  %10291 = vpow2.f32 %v1398_v52  ;;  %v1364_v56 = vmul.f32 %v10821_v58, %v1306_v7  ;;  %v1065_v17 = vmax.f32 %v963_v9, 0.0  ;;  %v978_v15 = vadd.f32 %v8588_v6, %v10791_v55 }
 0x12a   : > { %v10845_v19 = vpop.eup %10275  ;;  %v1404_v22 = vmul.f32 1.442695, %v1365_v11  ;;  %v1312_v23 = vmul.f32 0.6931472, %v10274_v10  ;;  %10293 = vlog2.f32 %v1274_v8  ;;  %v1226_v57 = vadd.f32 %v1145_v16, %v1066_v13  ;;  %v8591_v24 = vpop.f32.mrb[18].mxu0 }
 0x12b   : > { %v10847_v25 = vpop.eup %10277  ;;  %v1402_v26 = vmul.f32 1.442695, %v1364_v56  ;;  %10295 = vlog2.f32 %v1273_v12  ;;  %v1225_v27 = vadd.f32 %v1141_v20, %v1065_v17  ;;  %v1068_v28 = vmax.f32 %v978_v15, 0.0  ;;  %v982_v29 = vpop.f32.mrb[19].mxu0 }
 0x12c   : > { %v10280_v30 = vpop.eup %10279  ;;  %10297 = vpow2.f32 %v1404_v22  ;;  %v1367_v31 = vmul.f32 %v10821_v58, %v1312_v23  ;;  %v1276_v32 = vmax.f32 %v1226_v57, 1e-06  ;;  %v973_v33 = vadd.f32 %v10791_v55, %v972_v14 }
 0x12d   : > { %v10282_v18 = vpop.eup %10281  ;;  %10299 = vpow2.f32 %v1402_v26  ;;  %v1310_v34 = vmul.f32 0.6931472, %v10280_v30  ;;  %v1275_v38 = vmax.f32 %v1225_v27, 1e-06  ;;  %v1228_v42 = vadd.f32 %v10766_v39, %v1068_v28 }
 0x12e   : > { %v10852_v46 = vpop.eup %10283  ;;  %v1408_v47 = vmul.f32 1.442695, %v1367_v31  ;;  %v1316_v59 = vmul.f32 0.6931472, %v10282_v18  ;;  %10301 = vlog2.f32 %v1276_v32  ;;  %v1067_v60 = vmax.f32 %v973_v33, 0.0  ;;  %v8594_v61 = vpop.f32.mrb[20].mxu0 }
 0x12f   : > { %v10854_v62 = vpop.eup %10285  ;;  %v1366_v63 = vmul.f32 %v10821_v58, %v1310_v34  ;;  %10303 = vlog2.f32 %v1275_v38  ;;  %v1278_v21 = vmax.f32 %v1228_v42, 1e-06  ;;  %v988_v0 = vadd.f32 %v8591_v24, %v10791_v55  ;;  %v992_v2 = vpop.f32.mrb[21].mxu0 }
 0x130   : > { %v10288_v51 = vpop.eup %10287  ;;  %10305 = vpow2.f32 %v1408_v47  ;;  %v1369_v39 = vmul.f32 %v10821_v58, %v1316_v59  ;;  %v1227_v3 = vadd.f32 %v10764_v37, %v1067_v60  ;;  %v983_v4 = vadd.f32 %v10791_v55, %v982_v29 }
 0x131   : > { %v1406_v6 = vmul.f32 1.442695, %v1366_v63  ;;  %v1314_v52 = vmul.f32 0.6931472, %v10288_v51  ;;  %10307 = vlog2.f32 %v1278_v21  ;;  %v1070_v7 = vmax.f32 %v988_v0, 0.0 }
 0x132   : > { %v10861_v8 = vpop.eup %10289  ;;  %v1412_v9 = vmul.f32 1.442695, %v1369_v39  ;;  %v1277_v11 = vmax.f32 %v1227_v3, 1e-06  ;;  %v1069_v12 = vmax.f32 %v983_v4, 0.0  ;;  %v998_v13 = vadd.f32 %v8594_v61, %v10791_v55  ;;  %v8597_v14 = vpop.f32.mrb[22].mxu0 }
 0x133   : > { %v10864_v10 = vpop.eup %10291  ;;  %10309 = vpow2.f32 %v1406_v6  ;;  %v1368_v16 = vmul.f32 %v10821_v58, %v1314_v52  ;;  %v1230_v37 = vadd.f32 %v10768_v40, %v1070_v7  ;;  %v993_v56 = vadd.f32 %v10791_v55, %v992_v2  ;;  %v1002_v17 = vpop.f32.mrb[23].mxu0 }
 0x134   : > { %v10294_v15 = vpop.eup %10293  ;;  %10311 = vpow2.f32 %v1412_v9  ;;  %v1229_v20 = vadd.f32 %v10770_v41, %v1069_v12  ;;  %v1072_v22 = vmax.f32 %v998_v13, 0.0  ;;  %v1008_v23 = vadd.f32 %v8597_v14, %v10791_v55 }
 0x135   : > { %v10296_v57 = vpop.eup %10295  ;;  %v1410_v24 = vmul.f32 1.442695, %v1368_v16  ;;  %v1320_v26 = vmul.f32 0.6931472, %v10294_v15  ;;  %10313 = vlog2.f32 %v1277_v11  ;;  %v1280_v27 = vmax.f32 %v1230_v37, 1e-06 }
 0x136   : > { %v10871_v28 = vpop.eup %10297  ;;  %v1318_v29 = vmul.f32 0.6931472, %v10296_v57  ;;  %v1279_v30 = vmax.f32 %v1229_v20, 1e-06  ;;  %v1232_v40 = vadd.f32 %v10772_v44, %v1072_v22  ;;  %v1071_v31 = vmax.f32 %v993_v56, 0.0  ;;  %v8600_v32 = vpop.f32.mrb[24].mxu0 }
 0x137   : > { %v10874_v33 = vpop.eup %10299  ;;  %10315 = vpow2.f32 %v1410_v24  ;;  %v1371_v41 = vmul.f32 %v10821_v58, %v1320_v26  ;;  %v1074_v18 = vmax.f32 %v1008_v23, 0.0  ;;  %v1003_v34 = vadd.f32 %v10791_v55, %v1002_v17  ;;  %v1012_v38 = vpop.f32.mrb[25].mxu0 }
 0x138   : > { %v10302_v42 = vpop.eup %10301  ;;  %v1370_v47 = vmul.f32 %v10821_v58, %v1318_v29  ;;  %10317 = vlog2.f32 %v1280_v27  ;;  %v1282_v59 = vmax.f32 %v1232_v40, 1e-06  ;;  %v1231_v60 = vadd.f32 %v10774_v45, %v1071_v31 }
 0x139   : > { %v10304_v61 = vpop.eup %10303  ;;  %v1416_v44 = vmul.f32 1.442695, %v1371_v41  ;;  %v1324_v63 = vmul.f32 0.6931472, %v10302_v42  ;;  %10319 = vlog2.f32 %v1279_v30  ;;  %v1234_v21 = vadd.f32 %v10776_v48, %v1074_v18 }
 0x13a   : > { %v10881_v0 = vpop.eup %10305  ;;  %v1414_v2 = vmul.f32 1.442695, %v1370_v47  ;;  %v1322_v51 = vmul.f32 0.6931472, %v10304_v61  ;;  %10321 = vlog2.f32 %v1282_v59  ;;  %v1281_v39 = vmax.f32 %v1231_v60, 1e-06 }
 0x13b   : > { %v10308_v3 = vpop.eup %10307  ;;  %10323 = vpow2.f32 %v1416_v44  ;;  %v1373_v4 = vmul.f32 %v10821_v58, %v1324_v63  ;;  %v1284_v6 = vmax.f32 %v1234_v21, 1e-06  ;;  %v1073_v52 = vmax.f32 %v1003_v34, 0.0  ;;  %v8603_v7 = vpop.f32.mrb[26].mxu0 }
 0x13c   : > { %10325 = vpow2.f32 %v1414_v2  ;;  %v1372_v45 = vmul.f32 %v10821_v58, %v1322_v51  ;;  %v1328_v9 = vmul.f32 0.6931472, %v10308_v3  ;;  %v1018_v11 = vadd.f32 %v8600_v32, %v10791_v55  ;;  %v1022_v48 = vpop.f32.mrb[27].mxu0 }
 0x13d   : > { %v10886_v12 = vpop.eup %10309  ;;  %v1420_v13 = vmul.f32 1.442695, %v1373_v4  ;;  %10327 = vlog2.f32 %v1281_v39  ;;  %v1233_v14 = vadd.f32 %v10781_v50, %v1073_v52  ;;  %v1013_v16 = vadd.f32 %v10791_v55, %v1012_v38 }
 0x13e   : > { %v10890_v37 = vpop.eup %10311  ;;  %v1418_v56 = vmul.f32 1.442695, %v1372_v45  ;;  %v1375_v17 = vmul.f32 %v10821_v58, %v1328_v9  ;;  %10329 = vlog2.f32 %v1284_v6  ;;  %v1076_v15 = vmax.f32 %v1018_v11, 0.0  ;;  %v8606_v20 = vpop.f32.mrb[28].mxu0 }
 0x13f   : > { %v10314_v22 = vpop.eup %10313  ;;  %10331 = vpow2.f32 %v1420_v13  ;;  %v1283_v23 = vmax.f32 %v1233_v14, 1e-06  ;;  %v1075_v57 = vmax.f32 %v1013_v16, 0.0  ;;  %v1028_v24 = vadd.f32 %v8603_v7, %v10791_v55  ;;  %v1032_v26 = vpop.f32.mrb[29].mxu0 }
 0x140   : > { %10333 = vpow2.f32 %v1418_v56  ;;  %v1424_v27 = vmul.f32 1.442695, %v1375_v17  ;;  %v1326_v50 = vmul.f32 0.6931472, %v10314_v22  ;;  %v1236_v29 = vadd.f32 %v10783_v53, %v1076_v15 }
 0x141   : > { %v10895_v30 = vpop.eup %10315  ;;  %10335 = vlog2.f32 %v1283_v23  ;;  %v1235_v40 = vadd.f32 %v10785_v54, %v1075_v57  ;;  %v1078_v31 = vmax.f32 %v1028_v24, 0.0  ;;  %v1023_v32 = vadd.f32 %v10791_v55, %v1022_v48 }
 0x142   : > { %v10318_v41 = vpop.eup %10317  ;;  %10337 = vpow2.f32 %v1424_v27  ;;  %v1374_v18 = vmul.f32 %v10821_v58, %v1326_v50  ;;  %v1286_v34 = vmax.f32 %v1236_v29, 1e-06  ;;  %v1038_v38 = vadd.f32 %v8606_v20, %v10791_v55  ;;  %v8609_v42 = vpop.f32.mrb[30].mxu0 }
 0x143   : > { %v10320_v47 = vpop.eup %10319  ;;  %v1332_v59 = vmul.f32 0.6931472, %v10318_v41  ;;  %v1285_v60 = vmax.f32 %v1235_v40, 1e-06  ;;  %v1238_v53 = vadd.f32 %v10799_v1, %v1078_v31  ;;  %v1077_v61 = vmax.f32 %v1023_v32, 0.0  ;;  %v1042_v44 = vpop.f32.mrb[31].mxu0 }
 0x144   : > { %v10322_v63 = vpop.eup %10321  ;;  %v1422_v54 = vmul.f32 1.442695, %v1374_v18  ;;  %v1330_v21 = vmul.f32 0.6931472, %v10320_v47  ;;  %10339 = vlog2.f32 %v1286_v34  ;;  %v1080_v2 = vmax.f32 %v1038_v38, 0.0 }
 0x145   : > { %v10902_v51 = vpop.eup %10323  ;;  %v1377_v39 = vmul.f32 %v10821_v58, %v1332_v59  ;;  %v1336_v3 = vmul.f32 0.6931472, %v10322_v63  ;;  %10341 = vlog2.f32 %v1285_v60  ;;  %v1288_v4 = vmax.f32 %v1238_v53, 1e-06 }
 0x146   : > { %v10905_v6 = vpop.eup %10325  ;;  %10343 = vpow2.f32 %v1422_v54  ;;  %v1376_v52 = vmul.f32 %v10821_v58, %v1330_v21  ;;  %v1237_v1 = vadd.f32 %v10802_v5, %v1077_v61  ;;  %v1240_v7 = vadd.f32 %v10815_v35, %v1080_v2 }
 0x147   : > { %v10328_v45 = vpop.eup %10327  ;;  %v1428_v9 = vmul.f32 1.442695, %v1377_v39  ;;  %v1379_v11 = vmul.f32 %v10821_v58, %v1336_v3  ;;  %10345 = vlog2.f32 %v1288_v4  ;;  %v1033_v48 = vadd.f32 %v10791_v55, %v1032_v26 }
 0x148   : > { %v10330_v13 = vpop.eup %10329  ;;  %v1426_v14 = vmul.f32 1.442695, %v1376_v52  ;;  %v1334_v16 = vmul.f32 0.6931472, %v10328_v45  ;;  %v1287_v56 = vmax.f32 %v1237_v1, 1e-06  ;;  %v1048_v17 = vadd.f32 %v8609_v42, %v10791_v55 }
 0x149   : > { %v10913_v15 = vpop.eup %10331  ;;  %10347 = vpow2.f32 %v1428_v9  ;;  %v1432_v20 = vmul.f32 1.442695, %v1379_v11  ;;  %v1340_v5 = vmul.f32 0.6931472, %v10330_v13  ;;  %v1290_v22 = vmax.f32 %v1240_v7, 1e-06 }
 0x14a   : > { %v10915_v35 = vpop.eup %10333  ;;  %10349 = vpow2.f32 %v1426_v14  ;;  %v1378_v23 = vmul.f32 %v10821_v58, %v1334_v16  ;;  %v1079_v57 = vmax.f32 %v1033_v48, 0.0  ;;  %v1082_v24 = vmax.f32 %v1048_v17, 0.0 }
 0x14b   : > { %v10336_v26 = vpop.eup %10335  ;;  %10351 = vpow2.f32 %v1432_v20  ;;  %v1381_v27 = vmul.f32 %v10821_v58, %v1340_v5  ;;  %v1043_v50 = vadd.f32 %v10791_v55, %v1042_v44  ;;  %v9389_v29 = vpack.c.bf16 %v10845_v19, %v10847_v25 }
 0x14c   : > { %v10338_v40 = vpop.eup %10337  ;;  %v1430_v31 = vmul.f32 1.442695, %v1378_v23  ;;  %v1338_v32 = vmul.f32 0.6931472, %v10336_v26  ;;  %10353 = vlog2.f32 %v1287_v56  ;;  %v1239_v41 = vadd.f32 %v10818_v43, %v1079_v57 }
 0x14d   : > { %v1436_v18 = vmul.f32 1.442695, %v1381_v27  ;;  %10355 = vlog2.f32 %v1290_v22  ;;  %v1242_v34 = vadd.f32 %v10834_v36, %v1082_v24  ;;  %v1081_v38 = vmax.f32 %v1043_v50, 0.0 }
 0x14e   : > { %v10340_v42 = vpop.eup %10339  ;;  %10357 = vpow2.f32 %v1430_v31  ;;  %v1380_v47 = vmul.f32 %v10821_v58, %v1338_v32  ;;  %v1289_v59 = vmax.f32 %v1239_v41, 1e-06  ;;  %v9393_v55 = vpack.c.bf16 %v10852_v46, %v10854_v62 }
 0x14f   : > { %v10342_v19 = vpop.eup %10341  ;;  %10359 = vpow2.f32 %v1436_v18  ;;  %v1344_v25 = vmul.f32 0.6931472, %v10340_v42  ;;  %v1292_v60 = vmax.f32 %v1242_v34, 1e-06  ;;  %v1241_v53 = vadd.f32 %v10836_v49, %v1081_v38 }
 0x150   : > { %v10344_v43 = vpop.eup %10343  ;;  %v1434_v61 = vmul.f32 1.442695, %v1380_v47  ;;  %v1342_v44 = vmul.f32 0.6931472, %v10342_v19  ;;  %10361 = vlog2.f32 %v1289_v59  ;;  %v9397_v36 = vpack.c.bf16 %v10861_v8, %v10864_v10 }
 0x151   : > { %v10346_v63 = vpop.eup %10345  ;;  %v1383_v54 = vmul.f32 %v10821_v58, %v1344_v25  ;;  %10363 = vlog2.f32 %v1292_v60  ;;  %v1291_v21 = vmax.f32 %v1241_v53, 1e-06  ;;  %v9387_v2 = vpack.c.bf16 %v10338_v40, %v10344_v43  ;;  %v1243_v25 = vld [vmem:[%s12102_s10] sm:$0xff]  ;;  %v1246_v60 = vld [vmem:[%s12102_s10 + $0x18] sm:$0xff]  ;;  %v1245_v53 = vld [vmem:[%s12102_s10 + $0x10] sm:$0xff] }
 0x152   : > { %10365 = vpow2.f32 %v1434_v61  ;;  %v1382_v46 = vmul.f32 %v10821_v58, %v1342_v44  ;;  %v1348_v62 = vmul.f32 0.6931472, %v10346_v63  ;;  %v9401_v49 = vpack.c.bf16 %v10871_v28, %v10874_v33  ;;  %v1248_v43 = vld [vmem:[%s12102_s10 + $0x28] sm:$0xff]  ;;  %v1247_v61 = vld [vmem:[%s12102_s10 + $0x20] sm:$0xff]  ;;  %v1250_v44 = vld [vmem:[%s12102_s10 + $0x38] sm:$0xff] }
 0x153   : > { %v10348_v39 = vpop.eup %10347  ;;  %v1440_v3 = vmul.f32 1.442695, %v1383_v54  ;;  %10367 = vlog2.f32 %v1291_v21  ;;  %9388 = vmatprep.subr.bf16.mxu1 %v9387_v2  ;;  %v9405_v8 = vpack.c.bf16 %v10881_v0, %v10886_v12  ;;  %v9409_v10 = vpack.c.bf16 %v10890_v37, %v10895_v30  ;;  %v1252_v63 = vld [vmem:[%s12102_s10 + $0x48] sm:$0xff]  ;;  %v1251_v54 = vld [vmem:[%s12102_s10 + $0x40] sm:$0xff]  ;;  %v1254_v21 = vld [vmem:[%s12102_s10 + $0x58] sm:$0xff] }
 0x154   : > { %v10350_v4 = vpop.eup %10349  ;;  %v1438_v52 = vmul.f32 1.442695, %v1382_v46  ;;  %v1385_v1 = vmul.f32 %v10821_v58, %v1348_v62  ;;  %9390 = vmatpush3.bf16.msra.mxu1 %v9389_v29  ;;  %v9413_v7 = vpack.c.bf16 %v10902_v51, %v10905_v6  ;;  %v9417_v28 = vpack.c.bf16 %v10913_v15, %v10915_v35  ;;  %v1253_v2 = vld [vmem:[%s12102_s10 + $0x50] sm:$0xff]  ;;  %v1256_v46 = vld [vmem:[%s12102_s10 + $0x68] sm:$0xff]  ;;  %v1255_v62 = vld [vmem:[%s12102_s10 + $0x60] sm:$0xff] }
 0x155   : > { %v10352_v33 = vpop.eup %10351  ;;  %10369 = vpow2.f32 %v1440_v3  ;;  %v9391_v45 = vpack.c.bf16 %v10348_v39, %v10350_v4  ;;  %v1257_v39 = vld [vmem:[%s12102_s10 + $0x70] sm:$0xff]  ;;  %v7535_v3 = vld [vmem:[%s12100_s8 + $0x40] sm:$0xff] }
 0x156   : > { %v10354_v9 = vpop.eup %10353  ;;  %10371 = vpow2.f32 %v1438_v52  ;;  %v1444_v12 = vmul.f32 1.442695, %v1385_v1  ;;  %8654 = vmatprep.mubr.msk.f32.mxu0 %vm1608_vm4, %v7535_v3 }
 0x157   : > { %v10356_v0 = vpop.eup %10355  ;;  %v1346_v11 = vmul.f32 0.6931472, %v10354_v9  ;;  %9392 = vmatprep.subr.bf16.mxu1 %v9391_v45 }
 0x158   : > { %v10358_v37 = vpop.eup %10357  ;;  %v1352_v30 = vmul.f32 0.6931472, %v10356_v0  ;;  %9394 = vmatpush3.bf16.msra.mxu1 %v9393_v55  ;;  %10373 = vpow2.f32 %v1444_v12 }
 0x159   : > { %v10360_v48 = vpop.eup %10359  ;;  %v1384_v13 = vmul.f32 %v10821_v58, %v1346_v11  ;;  %v9395_v14 = vpack.c.bf16 %v10352_v33, %v10358_v37 }
 0x15a   : > { %v10362_v51 = vpop.eup %10361  ;;  %v1387_v6 = vmul.f32 %v10821_v58, %v1352_v30 }
 0x15b   : > { %v10364_v16 = vpop.eup %10363  ;;  %v1442_v56 = vmul.f32 1.442695, %v1384_v13  ;;  %v1350_v17 = vmul.f32 0.6931472, %v10362_v51  ;;  %9396 = vmatprep.subr.bf16.mxu1 %v9395_v14 }
 0x15c   : > { %v10366_v15 = vpop.eup %10365  ;;  %v1448_v20 = vmul.f32 1.442695, %v1387_v6  ;;  %v1356_v5 = vmul.f32 0.6931472, %v10364_v16  ;;  %9398 = vmatpush3.bf16.msra.mxu1 %v9397_v36  ;;  %v1249_v36 = vld [vmem:[%s12102_s10 + $0x30] sm:$0xff] }
 0x15d   : > { %v10368_v22 = vpop.eup %10367  ;;  %10375 = vpow2.f32 %v1442_v56  ;;  %v1386_v35 = vmul.f32 %v10821_v58, %v1350_v17  ;;  %v9399_v23 = vpack.c.bf16 %v10360_v48, %v10366_v15 }
 0x15e   : > { %v1389_v57 = vmul.f32 %v10821_v58, %v1356_v5  ;;  %v1354_v24 = vmul.f32 0.6931472, %v10368_v22  ;;  %10377 = vpow2.f32 %v1448_v20 }
 0x15f   : > { %v10370_v26 = vpop.eup %10369  ;;  %v1446_v27 = vmul.f32 1.442695, %v1386_v35  ;;  %9400 = vmatprep.subr.bf16.mxu1 %v9399_v23 }
 0x160   : > { %v10372_v50 = vpop.eup %10371  ;;  %v1452_v29 = vmul.f32 1.442695, %v1389_v57  ;;  %v1388_v40 = vmul.f32 %v10821_v58, %v1354_v24  ;;  %9402 = vmatpush3.bf16.msra.mxu1 %v9401_v49  ;;  %v1258_v49 = vld [vmem:[%s12102_s10 + $0x78] sm:$0xff] }
 0x161   : > { %10379 = vpow2.f32 %v1446_v27  ;;  %v9403_v31 = vpack.c.bf16 %v10370_v26, %v10372_v50 }
 0x162   : > { %10381 = vpow2.f32 %v1452_v29  ;;  %v1450_v32 = vmul.f32 1.442695, %v1388_v40  ;;  %v10374_v41 = vpop.eup %10373 }
 0x163   : > { %9404 = vmatprep.subr.bf16.mxu1 %v9403_v31 }
 0x164   : > { %10383 = vpow2.f32 %v1450_v32  ;;  %9406 = vmatpush3.bf16.msra.mxu1 %v9405_v8  ;;  %v1600_v8 = vld [vmem:[%s12100_s8] sm:$0xff] }
 0x165   : > { %10385 = vrcp.f32 %v10821_v58 }
 0x167   : > { %v10376_v18 = vpop.eup %10375 }
 0x168   : > { %v9407_v34 = vpack.c.bf16 %v10374_v41, %v10376_v18  ;;  %v10378_v38 = vpop.eup %10377 }
 0x16a   : > { %9408 = vmatprep.subr.bf16.mxu1 %v9407_v34 }
 0x16b   : > { %v10380_v42 = vpop.eup %10379  ;;  %9410 = vmatpush3.bf16.msra.mxu1 %v9409_v10 }
 0x16c   : > { %v10382_v47 = vpop.eup %10381  ;;  %v9411_v59 = vpack.c.bf16 %v10378_v38, %v10380_v42 }
 0x16e   : > { %v10384_v55 = vpop.eup %10383  ;;  %9412 = vmatprep.subr.bf16.mxu1 %v9411_v59 }
 0x16f   : > { %9414 = vmatpush3.bf16.msra.mxu1 %v9413_v7  ;;  %v9415_v19 = vpack.c.bf16 %v10382_v47, %v10384_v55  ;;  %v11002_v12 = vpop.eup %10385 }
 0x171   : > { %9416 = vmatprep.subr.bf16.mxu1 %v9415_v19 }
 0x173   : > { %9418 = vmatpush3.bf16.msra.mxu1 %v9417_v28 }
 0x176   : > { %1519 = vmatmul.mubr.f32.vlgmr.msra.gmra.mrb[0].mxu1 %v1243_v25 }
 0x177   : > { %1523 = vmatprep.mubr.f32.mxu1 %v1246_v60 }
 0x17a   : > { %1524 = vmatmul.mubr.f32.gmra.mrb[2].mxu1 %v1245_v53 }
 0x17b   : > { %1528 = vmatprep.mubr.f32.mxu1 %v1248_v43 }
 0x17e   : > { %1529 = vmatmul.mubr.f32.gmra.mrb[4].mxu1 %v1247_v61 }
 0x17f   : > { %1533 = vmatprep.mubr.f32.mxu1 %v1250_v44 }
 0x182   : > { %1534 = vmatmul.mubr.f32.gmra.mrb[6].mxu1 %v1249_v36 }
 0x183   : > { %1538 = vmatprep.mubr.f32.mxu1 %v1252_v63 }
 0x186   : > { %1539 = vmatmul.mubr.f32.gmra.mrb[8].mxu1 %v1251_v54 }
 0x187   : > { %1543 = vmatprep.mubr.f32.mxu1 %v1254_v21 }
 0x18a   : > { %1544 = vmatmul.mubr.f32.gmra.mrb[10].mxu1 %v1253_v2 }
 0x18b   : > { %1548 = vmatprep.mubr.f32.mxu1 %v1256_v46 }
 0x18e   : > { %1549 = vmatmul.mubr.f32.gmra.mrb[12].mxu1 %v1255_v62 }
 0x18f   : > { %1553 = vmatprep.mubr.f32.mxu1 %v1258_v49 }
 0x192   : > { %1554 = vmatmul.mubr.f32.gmra.mrb[14].mxu1 %v1257_v39 }
 0x193   : > { %8626 = vmatprep.mubr.msk.f32.mxu1 %vm1608_vm4, %v1600_v8 }
 0x249   : > { %v8104_v10 = vpop.f32.mrb[0].mxu1 }
 0x24a   : > { %v8105_v4 = vpop.f32.mrb[1].mxu1 }
 0x24b   : > { %v8106_v52 = vadd.f32 %v8105_v4, %v8104_v10 }
 0x24d   : > { %10387 = vlog2.f32 %v8106_v52  ;;  %v8107_v1 = vpop.f32.mrb[2].mxu1 }
 0x24e   : > { %v8108_v7 = vpop.f32.mrb[3].mxu1 }
 0x24f   : > { %v8109_v28 = vadd.f32 %v8108_v7, %v8107_v1 }
 0x251   : > { %10389 = vlog2.f32 %v8109_v28  ;;  %v8110_v33 = vpop.f32.mrb[4].mxu1  ;;  %v7551_v28 = vld [vmem:[%s11058_s17 + $0x40] sm:$0xff] }
 0x252   : > { %v8111_v45 = vpop.f32.mrb[5].mxu1 }
 0x253   : > { %v8112_v9 = vadd.f32 %v8111_v45, %v8110_v33  ;;  %v7552_v33 = vld [vmem:[%s11058_s17 + $0x48] sm:$0xff] }
 0x254   : > { %v7536_v45 = vld [vmem:[%s12100_s8 + $0x48] sm:$0xff] }
 0x255   : > { %10391 = vlog2.f32 %v8112_v9  ;;  %v8113_v0 = vpop.f32.mrb[6].mxu1  ;;  %v1601_v9 = vld [vmem:[%s12100_s8 + $0x8] sm:$0xff] }
 0x256   : > { %v8114_v11 = vpop.f32.mrb[7].mxu1 }
 0x257   : > { %v10388_v37 = vpop.eup %10387  ;;  %v8115_v30 = vadd.f32 %v8114_v11, %v8113_v0  ;;  %v9451_v0 = vpack.c.bf16 %v7552_v33, %v7551_v28  ;;  %v1602_v11 = vld [vmem:[%s12100_s8 + $0x10] sm:$0xff]  ;;  %v7674_v33 = vld [vmem:[%s12100_s8 + $0x158] sm:$0xff] }
 0x258   : > { %v1560_v48 = vmul.f32 0.6931472, %v10388_v37  ;;  %v7553_v37 = vld [vmem:[%s11058_s17 + $0x50] sm:$0xff] }
 0x259   : > { %10393 = vlog2.f32 %v8115_v30  ;;  %v8116_v13 = vpop.f32.mrb[8].mxu1  ;;  %v7554_v30 = vld [vmem:[%s11058_s17 + $0x58] sm:$0xff]  ;;  %v7673_v28 = vld [vmem:[%s12100_s8 + $0x150] sm:$0xff] }
 0x25a   : > { %v1576_v58 = vmul.f32 %v11002_v12, %v1560_v48  ;;  %v8117_v14 = vpop.f32.mrb[9].mxu1  ;;  %v7538_v48 = vld [vmem:[%s12100_s8 + $0x58] sm:$0xff] }
 0x25b   : > { %v10390_v51 = vpop.eup %10389  ;;  %v8118_v6 = vadd.f32 %v8117_v14, %v8116_v13  ;;  %v1603_v13 = vld [vmem:[%s12100_s8 + $0x18] sm:$0xff]  ;;  %v1604_v14 = vld [vmem:[%s12100_s8 + $0x20] sm:$0xff] }
 0x25c   : > { %v1584_v16 = vmul.f32 1.442695, %v1576_v58  ;;  %v1562_v56 = vmul.f32 0.6931472, %v10390_v51  ;;  %v7539_v58 = vld [vmem:[%s12100_s8 + $0x60] sm:$0xff]  ;;  %v9455_v51 = vpack.c.bf16 %v7554_v30, %v7553_v37  ;;  %v7704_v37 = vld [vmem:[%s12100_s8 + $0x188] sm:$0xff] }
 0x25d   : > { %10395 = vlog2.f32 %v8118_v6  ;;  %v8119_v17 = vpop.f32.mrb[10].mxu1  ;;  %v7540_v6 = vld [vmem:[%s12100_s8 + $0x68] sm:$0xff]  ;;  %v7705_v30 = vld [vmem:[%s12100_s8 + $0x190] sm:$0xff] }
 0x25e   : > { %v1577_v15 = vmul.f32 %v11002_v12, %v1562_v56  ;;  %v8120_v20 = vpop.f32.mrb[11].mxu1  ;;  %10397 = vpow2.f32 %v1584_v16  ;;  %v1605_v16 = vld [vmem:[%s12100_s8 + $0x28] sm:$0xff]  ;;  %v7541_v56 = vld [vmem:[%s12100_s8 + $0x70] sm:$0xff] }
 0x25f   : > { %v10392_v5 = vpop.eup %10391  ;;  %v8121_v22 = vadd.f32 %v8120_v20, %v8119_v17  ;;  %v1606_v17 = vld [vmem:[%s12100_s8 + $0x30] sm:$0xff]  ;;  %v7556_v20 = vld [vmem:[%s11058_s17 + $0x68] sm:$0xff] }
 0x260   : > { %v1586_v35 = vmul.f32 1.442695, %v1577_v15  ;;  %v1564_v23 = vmul.f32 0.6931472, %v10392_v5  ;;  %v7555_v15 = vld [vmem:[%s11058_s17 + $0x60] sm:$0xff]  ;;  %v7542_v5 = vld [vmem:[%s12100_s8 + $0x78] sm:$0xff] }
 0x261   : > { %10399 = vlog2.f32 %v8121_v22  ;;  %v8122_v57 = vpop.f32.mrb[12].mxu1  ;;  %v1607_v22 = vld [vmem:[%s12100_s8 + $0x38] sm:$0xff] }
 0x262   : > { %10401 = vpow2.f32 %v1586_v35  ;;  %v1578_v24 = vmul.f32 %v11002_v12, %v1564_v23  ;;  %v8123_v26 = vpop.f32.mrb[13].mxu1  ;;  %v7557_v35 = vld [vmem:[%s11058_s17 + $0x70] sm:$0xff]  ;;  %v7558_v23 = vld [vmem:[%s11058_s17 + $0x78] sm:$0xff] }
 0x263   : > { %v10394_v27 = vpop.eup %10393  ;;  %v8124_v50 = vadd.f32 %v8123_v26, %v8122_v57  ;;  %v7575_v57 = vld [vmem:[%s12100_s8 + $0x80] sm:$0xff]  ;;  %v9463_v26 = vpack.c.bf16 %v7558_v23, %v7557_v35  ;;  %v7741_v35 = vld [vmem:[%s12100_s8 + $0x1f0] sm:$0xff] }
 0x264   : > { %v1588_v29 = vmul.f32 1.442695, %v1578_v24  ;;  %v1566_v40 = vmul.f32 0.6931472, %v10394_v27  ;;  %v9459_v24 = vpack.c.bf16 %v7556_v20, %v7555_v15  ;;  %v7576_v27 = vld [vmem:[%s12100_s8 + $0x88] sm:$0xff]  ;;  %v7737_v20 = vld [vmem:[%s12100_s8 + $0x1d0] sm:$0xff] }
 0x265   : > { %10403 = vlog2.f32 %v8124_v50  ;;  %v8125_v31 = vpop.f32.mrb[14].mxu1  ;;  %v7577_v50 = vld [vmem:[%s12100_s8 + $0x90] sm:$0xff]  ;;  %v7736_v15 = vld [vmem:[%s12100_s8 + $0x1c8] sm:$0xff]  ;;  %v7767_v23 = vld [vmem:[%s12100_s8 + $0x200] sm:$0xff] }
 0x266   : > { %v1579_v32 = vmul.f32 %v11002_v12, %v1566_v40  ;;  %v8126_v41 = vpop.f32.mrb[15].mxu1  ;;  %10405 = vpow2.f32 %v1588_v29  ;;  %v7578_v29 = vld [vmem:[%s12100_s8 + $0x98] sm:$0xff]  ;;  %v7579_v40 = vld [vmem:[%s12100_s8 + $0xa0] sm:$0xff] }
 0x267   : > { %v10396_v18 = vpop.eup %10395  ;;  %v8127_v34 = vadd.f32 %v8126_v41, %v8125_v31  ;;  %v7580_v31 = vld [vmem:[%s12100_s8 + $0xa8] sm:$0xff]  ;;  %v7582_v41 = vld [vmem:[%s12100_s8 + $0xb8] sm:$0xff] }
 0x268   : > { %v1590_v38 = vmul.f32 1.442695, %v1579_v32  ;;  %v1568_v42 = vmul.f32 0.6931472, %v10396_v18  ;;  %v11008_v47 = vpop.eup %10397  ;;  %v7581_v32 = vld [vmem:[%s12100_s8 + $0xb0] sm:$0xff]  ;;  %v7607_v18 = vld [vmem:[%s12100_s8 + $0xc0] sm:$0xff] }
 0x269   : > { %10407 = vlog2.f32 %v8127_v34  ;;  %v7608_v34 = vld [vmem:[%s12100_s8 + $0xc8] sm:$0xff] }
 0x26a   : > { %10409 = vpow2.f32 %v1590_v38  ;;  %v1580_v59 = vmul.f32 %v11002_v12, %v1568_v42  ;;  %v7609_v38 = vld [vmem:[%s12100_s8 + $0xd0] sm:$0xff]  ;;  %v7610_v42 = vld [vmem:[%s12100_s8 + $0xd8] sm:$0xff] }
 0x26b   : > { %v10400_v55 = vpop.eup %10399 }
 0x26c   : > { %v11011_v19 = vpop.eup %10401  ;;  %v1570_v25 = vmul.f32 0.6931472, %v10400_v55  ;;  %v1592_v53 = vmul.f32 1.442695, %v1580_v59  ;;  %v7611_v59 = vld [vmem:[%s12100_s8 + $0xe0] sm:$0xff]  ;;  %v7612_v55 = vld [vmem:[%s12100_s8 + $0xe8] sm:$0xff] }
 0x26d   : > { %v11015_v60 = vpack.c.bf16 %v11011_v19, %v11008_v47 }
 0x26e   : > { %v1581_v43 = vmul.f32 %v11002_v12, %v1570_v25  ;;  %10411 = vpow2.f32 %v1592_v53  ;;  %v7613_v25 = vld [vmem:[%s12100_s8 + $0xf0] sm:$0xff]  ;;  %v7614_v53 = vld [vmem:[%s12100_s8 + $0xf8] sm:$0xff] }
 0x26f   : > { %v10404_v61 = vpop.eup %10403  ;;  %9420 = vmatprep.subr.bf16.mxu1 %v11015_v60  ;;  %9436 = vmatprep.subr.bf16.mxu0 %v11015_v60 }
 0x270   : > { %v1594_v44 = vmul.f32 1.442695, %v1581_v43  ;;  %v1572_v36 = vmul.f32 0.6931472, %v10404_v61  ;;  %9422 = vmatpush3.bf16.msra.mxu1 %v11015_v60  ;;  %9438 = vmatpush3.bf16.msra.mxu0 %v11015_v60  ;;  %v11022_v63 = vpop.eup %10405  ;;  %v7639_v43 = vld [vmem:[%s12100_s8 + $0x100] sm:$0xff]  ;;  %v7640_v61 = vld [vmem:[%s12100_s8 + $0x108] sm:$0xff] }
 0x272   : > { %10413 = vpow2.f32 %v1594_v44  ;;  %v1582_v54 = vmul.f32 %v11002_v12, %v1572_v36  ;;  %v7641_v44 = vld [vmem:[%s12100_s8 + $0x110] sm:$0xff]  ;;  %v7642_v36 = vld [vmem:[%s12100_s8 + $0x118] sm:$0xff] }
 0x273   : > { %v10408_v21 = vpop.eup %10407 }
 0x274   : > { %v11025_v2 = vpop.eup %10409  ;;  %v1574_v46 = vmul.f32 0.6931472, %v10408_v21  ;;  %v1596_v49 = vmul.f32 1.442695, %v1582_v54  ;;  %v7643_v54 = vld [vmem:[%s12100_s8 + $0x120] sm:$0xff]  ;;  %v7644_v21 = vld [vmem:[%s12100_s8 + $0x128] sm:$0xff] }
 0x275   : > { %v11029_v62 = vpack.c.bf16 %v11025_v2, %v11022_v63 }
 0x276   : > { %v1583_v39 = vmul.f32 %v11002_v12, %v1574_v46  ;;  %10415 = vpow2.f32 %v1596_v49  ;;  %v7537_v12 = vld [vmem:[%s12100_s8 + $0x50] sm:$0xff]  ;;  %v7646_v49 = vld [vmem:[%s12100_s8 + $0x138] sm:$0xff] }
 0x277   : > { %9424 = vmatprep.subr.bf16.mxu1 %v11029_v62  ;;  %9440 = vmatprep.subr.bf16.mxu0 %v11029_v62  ;;  %v7645_v46 = vld [vmem:[%s12100_s8 + $0x130] sm:$0xff] }
 0x278   : > { %v1598_v3 = vmul.f32 1.442695, %v1583_v39  ;;  %9426 = vmatpush3.bf16.msra.mxu1 %v11029_v62  ;;  %9442 = vmatpush3.bf16.msra.mxu0 %v11029_v62  ;;  %v11036_v8 = vpop.eup %10411  ;;  %v7671_v39 = vld [vmem:[%s12100_s8 + $0x140] sm:$0xff] }
 0x27a   : > { %10417 = vpow2.f32 %v1598_v3  ;;  %v7672_v3 = vld [vmem:[%s12100_s8 + $0x148] sm:$0xff] }
 0x27c   : > { %v11038_v10 = vpop.eup %10413 }
 0x27d   : > { %v11042_v4 = vpack.c.bf16 %v11038_v10, %v11036_v8 }
 0x27f   : > { %9444 = vmatprep.subr.bf16.mxu0 %v11042_v4  ;;  %9428 = vmatprep.subr.bf16.mxu1 %v11042_v4 }
 0x280   : > { %9446 = vmatpush3.bf16.msra.mxu0 %v11042_v4  ;;  %9430 = vmatpush3.bf16.msra.mxu1 %v11042_v4  ;;  %v11049_v52 = vpop.eup %10415 }
 0x284   : > { %v11051_v1 = vpop.eup %10417 }
 0x285   : > { %v11062_v7 = vpack.c.bf16 %v11051_v1, %v11049_v52 }
 0x287   : > { %9448 = vmatprep.subr.bf16.mxu0 %v11062_v7  ;;  %9432 = vmatprep.subr.bf16.mxu1 %v11062_v7 }
 0x288   : > { %9450 = vmatpush3.bf16.msra.mxu0 %v11062_v7  ;;  %9434 = vmatpush3.bf16.msra.mxu1 %v11062_v7 }
 0x289   : > { %9484 = vmatprep.subr.bf16.mxu0 %v11015_v60  ;;  %9452 = vmatprep.subr.bf16.mxu1 %v9451_v0 }
 0x28b   : > { %8655 = vmatmul.mubr.msk.f32.vlgmr.msra.gmra.mrb[32].mxu0 %vm1608_vm4, %v7536_v45  ;;  %8627 = vmatmul.mubr.msk.f32.vlgmr.msra.gmra.mrb[16].mxu1 %vm1608_vm4, %v1601_v9  ;;  %v7675_v45 = vld [vmem:[%s12100_s8 + $0x160] sm:$0xff]  ;;  %v7676_v9 = vld [vmem:[%s12100_s8 + $0x168] sm:$0xff] }
 0x28c   : > { %9486 = vmatpush3.bf16.msra.mxu0 %v11015_v60  ;;  %8657 = vmatprep.mubr.msk.f32.mxu0 %vm1608_vm4, %v7537_v12  ;;  %v7678_v12 = vld [vmem:[%s12100_s8 + $0x178] sm:$0xff] }
 0x28d   : > { %9488 = vmatprep.subr.bf16.mxu0 %v11029_v62  ;;  %8629 = vmatprep.mubr.msk.f32.mxu1 %vm1608_vm4, %v1602_v11  ;;  %v7703_v11 = vld [vmem:[%s12100_s8 + $0x180] sm:$0xff] }
 0x28e   : > { %9454 = vmatpush3.bf16.msra.mxu1 %v9451_v0  ;;  %v7677_v0 = vld [vmem:[%s12100_s8 + $0x170] sm:$0xff] }
 0x28f   : > { %8658 = vmatmul.mubr.msk.f32.gmra.mrb[34].mxu0 %vm1608_vm4, %v7538_v48  ;;  %8630 = vmatmul.mubr.msk.f32.gmra.mrb[18].mxu1 %vm1608_vm4, %v1603_v13  ;;  %v7706_v48 = vld [vmem:[%s12100_s8 + $0x198] sm:$0xff]  ;;  %v7707_v13 = vld [vmem:[%s12100_s8 + $0x1a0] sm:$0xff] }
 0x290   : > { %9490 = vmatpush3.bf16.msra.mxu0 %v11029_v62  ;;  %8660 = vmatprep.mubr.msk.f32.mxu0 %vm1608_vm4, %v7539_v58  ;;  %v7708_v58 = vld [vmem:[%s12100_s8 + $0x1a8] sm:$0xff] }
 0x291   : > { %9492 = vmatprep.subr.bf16.mxu0 %v11042_v4  ;;  %8632 = vmatprep.mubr.msk.f32.mxu1 %vm1608_vm4, %v1604_v14  ;;  %v7709_v14 = vld [vmem:[%s12100_s8 + $0x1b0] sm:$0xff] }
 0x292   : > { %9456 = vmatprep.subr.bf16.mxu1 %v9455_v51 }
 0x293   : > { %8661 = vmatmul.mubr.msk.f32.gmra.mrb[36].mxu0 %vm1608_vm4, %v7540_v6  ;;  %8633 = vmatmul.mubr.msk.f32.gmra.mrb[20].mxu1 %vm1608_vm4, %v1605_v16  ;;  %v1739_v6 = vld [vmem:[%s11058_s17 + $0x8] sm:$0xff] }
 0x294   : > { %9494 = vmatpush3.bf16.msra.mxu0 %v11042_v4  ;;  %8663 = vmatprep.mubr.msk.f32.mxu0 %vm1608_vm4, %v7541_v56  ;;  %v7710_v56 = vld [vmem:[%s12100_s8 + $0x1b8] sm:$0xff] }
 0x295   : > { %9496 = vmatprep.subr.bf16.mxu0 %v11062_v7  ;;  %8635 = vmatprep.mubr.msk.f32.mxu1 %vm1608_vm4, %v1606_v17  ;;  %v7735_v17 = vld [vmem:[%s12100_s8 + $0x1c0] sm:$0xff] }
 0x296   : > { %9458 = vmatpush3.bf16.msra.mxu1 %v9455_v51  ;;  %v1738_v51 = vld [vmem:[%s11058_s17] sm:$0xff] }
 0x297   : > { %8664 = vmatmul.mubr.msk.f32.gmra.mrb[38].mxu0 %vm1608_vm4, %v7542_v5  ;;  %8636 = vmatmul.mubr.msk.f32.gmra.mrb[22].mxu1 %vm1608_vm4, %v1607_v22  ;;  %v9467_v16 = vpack.c.bf16 %v1739_v6, %v1738_v51  ;;  %v7738_v5 = vld [vmem:[%s12100_s8 + $0x1d8] sm:$0xff]  ;;  %v7739_v22 = vld [vmem:[%s12100_s8 + $0x1e0] sm:$0xff] }
 0x298   : > { %9498 = vmatpush3.bf16.msra.mxu0 %v11062_v7  ;;  %8738 = vmatprep.mubr.msk.f32.mxu0 %vm1608_vm4, %v7575_v57  ;;  %v7769_v57 = vld [vmem:[%s12100_s8 + $0x210] sm:$0xff] }
 0x299   : > { %9516 = vmatprep.subr.bf16.mxu0 %v11015_v60  ;;  %9460 = vmatprep.subr.bf16.mxu1 %v9459_v24 }
 0x29a   : > { %9462 = vmatpush3.bf16.msra.mxu1 %v9459_v24  ;;  %v7771_v24 = vld [vmem:[%s12100_s8 + $0x220] sm:$0xff] }
 0x29b   : > { %8739 = vmatmul.mubr.msk.f32.vlgmr.msra.gmra.mrb[40].mxu0 %vm1608_vm4, %v7576_v27  ;;  %9464 = vmatprep.subr.bf16.mxu1 %v9463_v26  ;;  %v7773_v27 = vld [vmem:[%s12100_s8 + $0x230] sm:$0xff] }
 0x29c   : > { %9518 = vmatpush3.bf16.msra.mxu0 %v11015_v60  ;;  %8741 = vmatprep.mubr.msk.f32.mxu0 %vm1608_vm4, %v7577_v50  ;;  %v7774_v50 = vld [vmem:[%s12100_s8 + $0x238] sm:$0xff] }
 0x29d   : > { %9520 = vmatprep.subr.bf16.mxu0 %v11029_v62 }
 0x29e   : > { %9466 = vmatpush3.bf16.msra.mxu1 %v9463_v26  ;;  %v7772_v26 = vld [vmem:[%s12100_s8 + $0x228] sm:$0xff] }
 0x29f   : > { %8742 = vmatmul.mubr.msk.f32.gmra.mrb[42].mxu0 %vm1608_vm4, %v7578_v29  ;;  %9468 = vmatprep.subr.bf16.mxu1 %v9467_v16  ;;  %v1740_v29 = vld [vmem:[%s11058_s17 + $0x10] sm:$0xff] }
 0x2a0   : > { %9522 = vmatpush3.bf16.msra.mxu0 %v11029_v62  ;;  %8744 = vmatprep.mubr.msk.f32.mxu0 %vm1608_vm4, %v7579_v40  ;;  %v1741_v40 = vld [vmem:[%s11058_s17 + $0x18] sm:$0xff] }
 0x2a1   : > { %9524 = vmatprep.subr.bf16.mxu0 %v11042_v4 }
 0x2a3   : > { %8745 = vmatmul.mubr.msk.f32.gmra.mrb[44].mxu0 %vm1608_vm4, %v7580_v31 }
 0x2a4   : > { %9526 = vmatpush3.bf16.msra.mxu0 %v11042_v4  ;;  %8747 = vmatprep.mubr.msk.f32.mxu0 %vm1608_vm4, %v7581_v32 }
 0x2a5   : > { %9528 = vmatprep.subr.bf16.mxu0 %v11062_v7 }
 0x2a7   : > { %8748 = vmatmul.mubr.msk.f32.gmra.mrb[46].mxu0 %vm1608_vm4, %v7582_v41 }
 0x2a8   : > { %9530 = vmatpush3.bf16.msra.mxu0 %v11062_v7  ;;  %8794 = vmatprep.mubr.msk.f32.mxu0 %vm1608_vm4, %v7607_v18  ;;  %v9471_v18 = vpack.c.bf16 %v1741_v40, %v1740_v29 }
 0x2a9   : > { %9548 = vmatprep.subr.bf16.mxu0 %v11015_v60 }
 0x2ab   : > { %8795 = vmatmul.mubr.msk.f32.vlgmr.msra.gmra.mrb[48].mxu0 %vm1608_vm4, %v7608_v34 }
 0x2ac   : > { %9550 = vmatpush3.bf16.msra.mxu0 %v11015_v60  ;;  %8797 = vmatprep.mubr.msk.f32.mxu0 %vm1608_vm4, %v7609_v38  ;;  %v1742_v38 = vld [vmem:[%s11058_s17 + $0x20] sm:$0xff] }
 0x2ad   : > { %9552 = vmatprep.subr.bf16.mxu0 %v11029_v62 }
 0x2af   : > { %8798 = vmatmul.mubr.msk.f32.gmra.mrb[50].mxu0 %vm1608_vm4, %v7610_v42  ;;  %v1743_v42 = vld [vmem:[%s11058_s17 + $0x28] sm:$0xff] }
 0x2b0   : > { %9554 = vmatpush3.bf16.msra.mxu0 %v11029_v62  ;;  %8800 = vmatprep.mubr.msk.f32.mxu0 %vm1608_vm4, %v7611_v59 }
 0x2b1   : > { %9556 = vmatprep.subr.bf16.mxu0 %v11042_v4 }
 0x2b3   : > { %8801 = vmatmul.mubr.msk.f32.gmra.mrb[52].mxu0 %vm1608_vm4, %v7612_v55 }
 0x2b4   : > { %9558 = vmatpush3.bf16.msra.mxu0 %v11042_v4  ;;  %8803 = vmatprep.mubr.msk.f32.mxu0 %vm1608_vm4, %v7613_v25 }
 0x2b5   : > { %9560 = vmatprep.subr.bf16.mxu0 %v11062_v7 }
 0x2b7   : > { %8804 = vmatmul.mubr.msk.f32.gmra.mrb[54].mxu0 %vm1608_vm4, %v7614_v53  ;;  %v9475_v53 = vpack.c.bf16 %v1743_v42, %v1742_v38  ;;  %v7655_v38 = vld [vmem:[%s11058_s17 + $0x100] sm:$0xff]  ;;  %v7656_v42 = vld [vmem:[%s11058_s17 + $0x108] sm:$0xff] }
 0x2b8   : > { %9562 = vmatpush3.bf16.msra.mxu0 %v11062_v7  ;;  %8850 = vmatprep.mubr.msk.f32.mxu0 %vm1608_vm4, %v7639_v43 }
 0x2b9   : > { %9580 = vmatprep.subr.bf16.mxu0 %v11015_v60 }
 0x2bb   : > { %8851 = vmatmul.mubr.msk.f32.vlgmr.msra.gmra.mrb[56].mxu0 %vm1608_vm4, %v7640_v61  ;;  %v1744_v61 = vld [vmem:[%s11058_s17 + $0x30] sm:$0xff] }
 0x2bc   : > { %9582 = vmatpush3.bf16.msra.mxu0 %v11015_v60  ;;  %8853 = vmatprep.mubr.msk.f32.mxu0 %vm1608_vm4, %v7641_v44  ;;  %v1745_v44 = vld [vmem:[%s11058_s17 + $0x38] sm:$0xff] }
 0x2bd   : > { %9584 = vmatprep.subr.bf16.mxu0 %v11029_v62 }
 0x2bf   : > { %8854 = vmatmul.mubr.msk.f32.gmra.mrb[58].mxu0 %vm1608_vm4, %v7642_v36 }
 0x2c0   : > { %9586 = vmatpush3.bf16.msra.mxu0 %v11029_v62  ;;  %8856 = vmatprep.mubr.msk.f32.mxu0 %vm1608_vm4, %v7643_v54 }
 0x2c1   : > { %9588 = vmatprep.subr.bf16.mxu0 %v11042_v4 }
 0x2c3   : > { %8857 = vmatmul.mubr.msk.f32.gmra.mrb[60].mxu0 %vm1608_vm4, %v7644_v21 }
 0x2c4   : > { %9590 = vmatpush3.bf16.msra.mxu0 %v11042_v4  ;;  %8859 = vmatprep.mubr.msk.f32.mxu0 %vm1608_vm4, %v7645_v46  ;;  %v9479_v46 = vpack.c.bf16 %v1745_v44, %v1744_v61 }
 0x2c5   : > { %9592 = vmatprep.subr.bf16.mxu0 %v11062_v7 }
 0x2c7   : > { %8860 = vmatmul.mubr.msk.f32.gmra.mrb[62].mxu0 %vm1608_vm4, %v7646_v49 }
 0x2c8   : > { %9594 = vmatpush3.bf16.msra.mxu0 %v11062_v7  ;;  %8906 = vmatprep.mubr.msk.f32.mxu0 %vm1608_vm4, %v7671_v39  ;;  %v7591_v39 = vld [vmem:[%s11058_s17 + $0x80] sm:$0xff] }
 0x2c9   : > { %9612 = vmatprep.subr.bf16.mxu0 %v11015_v60 }
 0x2cb   : > { %8907 = vmatmul.mubr.msk.f32.vlgmr.msra.gmra.mrb[64].mxu0 %vm1608_vm4, %v7672_v3  ;;  %v7592_v3 = vld [vmem:[%s11058_s17 + $0x88] sm:$0xff] }
 0x2cc   : > { %9614 = vmatpush3.bf16.msra.mxu0 %v11015_v60  ;;  %8909 = vmatprep.mubr.msk.f32.mxu0 %vm1608_vm4, %v7673_v28 }
 0x2cd   : > { %9616 = vmatprep.subr.bf16.mxu0 %v11029_v62 }
 0x2cf   : > { %8910 = vmatmul.mubr.msk.f32.gmra.mrb[66].mxu0 %vm1608_vm4, %v7674_v33 }
 0x2d0   : > { %9618 = vmatpush3.bf16.msra.mxu0 %v11029_v62  ;;  %8912 = vmatprep.mubr.msk.f32.mxu0 %vm1608_vm4, %v7675_v45 }
 0x2d1   : > { %9620 = vmatprep.subr.bf16.mxu0 %v11042_v4 }
 0x2d3   : > { %8913 = vmatmul.mubr.msk.f32.gmra.mrb[68].mxu0 %vm1608_vm4, %v7676_v9  ;;  %v9499_v9 = vpack.c.bf16 %v7592_v3, %v7591_v39  ;;  %v7661_v3 = vld [vmem:[%s11058_s17 + $0x130] sm:$0xff] }
 0x2d4   : > { %9622 = vmatpush3.bf16.msra.mxu0 %v11042_v4  ;;  %8915 = vmatprep.mubr.msk.f32.mxu0 %vm1608_vm4, %v7677_v0 }
 0x2d5   : > { %9624 = vmatprep.subr.bf16.mxu0 %v11062_v7 }
 0x2d7   : > { %8916 = vmatmul.mubr.msk.f32.gmra.mrb[70].mxu0 %vm1608_vm4, %v7678_v12  ;;  %v7593_v12 = vld [vmem:[%s11058_s17 + $0x90] sm:$0xff] }
 0x2d8   : > { %9626 = vmatpush3.bf16.msra.mxu0 %v11062_v7  ;;  %8962 = vmatprep.mubr.msk.f32.mxu0 %vm1608_vm4, %v7703_v11  ;;  %v7594_v11 = vld [vmem:[%s11058_s17 + $0x98] sm:$0xff] }
 0x2d9   : > { %9644 = vmatprep.subr.bf16.mxu0 %v11015_v60 }
 0x2db   : > { %8963 = vmatmul.mubr.msk.f32.vlgmr.msra.gmra.mrb[72].mxu0 %vm1608_vm4, %v7704_v37 }
 0x2dc   : > { %9646 = vmatpush3.bf16.msra.mxu0 %v11015_v60  ;;  %8965 = vmatprep.mubr.msk.f32.mxu0 %vm1608_vm4, %v7705_v30  ;;  %v9503_v30 = vpack.c.bf16 %v7594_v11, %v7593_v12  ;;  %v7688_v12 = vld [vmem:[%s11058_s17 + $0x148] sm:$0xff] }
 0x2dd   : > { %9648 = vmatprep.subr.bf16.mxu0 %v11029_v62 }
 0x2df   : > { %8966 = vmatmul.mubr.msk.f32.gmra.mrb[74].mxu0 %vm1608_vm4, %v7706_v48 }
 0x2e0   : > { %9650 = vmatpush3.bf16.msra.mxu0 %v11029_v62  ;;  %8968 = vmatprep.mubr.msk.f32.mxu0 %vm1608_vm4, %v7707_v13  ;;  %v7595_v13 = vld [vmem:[%s11058_s17 + $0xa0] sm:$0xff] }
 0x2e1   : > { %9652 = vmatprep.subr.bf16.mxu0 %v11042_v4 }
 0x2e3   : > { %8969 = vmatmul.mubr.msk.f32.gmra.mrb[76].mxu0 %vm1608_vm4, %v7708_v58  ;;  %v7596_v58 = vld [vmem:[%s11058_s17 + $0xa8] sm:$0xff] }
 0x2e4   : > { %9654 = vmatpush3.bf16.msra.mxu0 %v11042_v4  ;;  %8971 = vmatprep.mubr.msk.f32.mxu0 %vm1608_vm4, %v7709_v14  ;;  %v9507_v51 = vpack.c.bf16 %v7596_v58, %v7595_v13  ;;  %v7690_v13 = vld [vmem:[%s11058_s17 + $0x158] sm:$0xff] }
 0x2e5   : > { %9656 = vmatprep.subr.bf16.mxu0 %v11062_v7 }
 0x2e7   : > { %8972 = vmatmul.mubr.msk.f32.gmra.mrb[78].mxu0 %vm1608_vm4, %v7710_v56  ;;  %v7598_v56 = vld [vmem:[%s11058_s17 + $0xb8] sm:$0xff] }
 0x2e8   : > { %9658 = vmatpush3.bf16.msra.mxu0 %v11062_v7  ;;  %9018 = vmatprep.mubr.msk.f32.mxu0 %vm1608_vm4, %v7735_v17 }
 0x2e9   : > { %9676 = vmatprep.subr.bf16.mxu0 %v11015_v60 }
 0x2eb   : > { %9019 = vmatmul.mubr.msk.f32.vlgmr.msra.gmra.mrb[80].mxu0 %vm1608_vm4, %v7736_v15 }
 0x2ec   : > { %9678 = vmatpush3.bf16.msra.mxu0 %v11015_v60  ;;  %9021 = vmatprep.mubr.msk.f32.mxu0 %vm1608_vm4, %v7737_v20  ;;  %v7740_v60 = vld [vmem:[%s12100_s8 + $0x1e8] sm:$0xff] }
 0x2ed   : > { %9680 = vmatprep.subr.bf16.mxu0 %v11029_v62 }
 0x2ef   : > { %9022 = vmatmul.mubr.msk.f32.gmra.mrb[82].mxu0 %vm1608_vm4, %v7738_v5  ;;  %v7623_v5 = vld [vmem:[%s11058_s17 + $0xc0] sm:$0xff] }
 0x2f0   : > { %9682 = vmatpush3.bf16.msra.mxu0 %v11029_v62  ;;  %9024 = vmatprep.mubr.msk.f32.mxu0 %vm1608_vm4, %v7739_v22  ;;  %v7742_v62 = vld [vmem:[%s12100_s8 + $0x1f8] sm:$0xff]  ;;  %v7624_v22 = vld [vmem:[%s11058_s17 + $0xc8] sm:$0xff] }
 0x2f1   : > { %9684 = vmatprep.subr.bf16.mxu0 %v11042_v4 }
 0x2f3   : > { %9025 = vmatmul.mubr.msk.f32.gmra.mrb[84].mxu0 %vm1608_vm4, %v7740_v60 }
 0x2f4   : > { %9686 = vmatpush3.bf16.msra.mxu0 %v11042_v4  ;;  %9027 = vmatprep.mubr.msk.f32.mxu0 %vm1608_vm4, %v7741_v35  ;;  %v7768_v4 = vld [vmem:[%s12100_s8 + $0x208] sm:$0xff]  ;;  %v9531_v35 = vpack.c.bf16 %v7624_v22, %v7623_v5  ;;  %v7694_v5 = vld [vmem:[%s11058_s17 + $0x178] sm:$0xff] }
 0x2f5   : > { %9688 = vmatprep.subr.bf16.mxu0 %v11062_v7 }
 0x2f7   : > { %9028 = vmatmul.mubr.msk.f32.gmra.mrb[86].mxu0 %vm1608_vm4, %v7742_v62 }
 0x2f8   : > { %9690 = vmatpush3.bf16.msra.mxu0 %v11062_v7  ;;  %9074 = vmatprep.mubr.msk.f32.mxu0 %vm1608_vm4, %v7767_v23  ;;  %v7770_v7 = vld [vmem:[%s12100_s8 + $0x218] sm:$0xff]  ;;  %v7625_v23 = vld [vmem:[%s11058_s17 + $0xd0] sm:$0xff] }
 0x2fb   : > { %9075 = vmatmul.mubr.msk.f32.vlgmr.msra.gmra.mrb[88].mxu0 %vm1608_vm4, %v7768_v4  ;;  %v7626_v4 = vld [vmem:[%s11058_s17 + $0xd8] sm:$0xff] }
 0x2fc   : > { %9077 = vmatprep.mubr.msk.f32.mxu0 %vm1608_vm4, %v7769_v57 }
 0x2ff   : > { %9078 = vmatmul.mubr.msk.f32.gmra.mrb[90].mxu0 %vm1608_vm4, %v7770_v7  ;;  %v9535_v7 = vpack.c.bf16 %v7626_v4, %v7625_v23  ;;  %v7720_v23 = vld [vmem:[%s11058_s17 + $0x188] sm:$0xff] }
 0x300   : > { %9080 = vmatprep.mubr.msk.f32.mxu0 %vm1608_vm4, %v7771_v24 }
 0x303   : > { %9081 = vmatmul.mubr.msk.f32.gmra.mrb[92].mxu0 %vm1608_vm4, %v7772_v26  ;;  %v7627_v26 = vld [vmem:[%s11058_s17 + $0xe0] sm:$0xff] }
 0x304   : > { %9083 = vmatprep.mubr.msk.f32.mxu0 %vm1608_vm4, %v7773_v27  ;;  %v7628_v27 = vld [vmem:[%s11058_s17 + $0xe8] sm:$0xff] }
 0x305   : > { %v9539_v29 = vpack.c.bf16 %v7628_v27, %v7627_v26  ;;  %v7722_v26 = vld [vmem:[%s11058_s17 + $0x198] sm:$0xff] }
 0x307   : > { %9084 = vmatmul.mubr.msk.f32.gmra.mrb[94].mxu0 %vm1608_vm4, %v7774_v50 }
 0x35e   : > { %v8656_v31 = vpop.f32.mrb[32].mxu0  ;;  %v8628_v32 = vpop.f32.mrb[16].mxu1 }
 0x35f   : > { %v1845_v41 = vpop.f32.mrb[33].mxu0  ;;  %v1699_v34 = vpop.f32.mrb[17].mxu1 }
 0x360   : > { %8682 = vmatprep.mubr.msk.f32.mxu1 %vm1608_vm4, %v1845_v41 }
 0x361   : > { %8683 = vmatmul.mubr.msk.f32.vlgmr.msra.gmra.mrb[24].mxu1 %vm1608_vm4, %v8656_v31  ;;  %v7629_v31 = vld [vmem:[%s11058_s17 + $0xf0] sm:$0xff] }
 0x362   : > { %v8659_v59 = vpop.f32.mrb[34].mxu0  ;;  %9470 = vmatpush3.bf16.msra.mxu1 %v9467_v16  ;;  %v8631_v55 = vpop.f32.mrb[18].mxu1  ;;  %v7597_v16 = vld [vmem:[%s11058_s17 + $0xb0] sm:$0xff] }
 0x363   : > { %v1855_v25 = vpop.f32.mrb[35].mxu0  ;;  %9472 = vmatprep.subr.bf16.mxu1 %v9471_v18  ;;  %v1709_v43 = vpop.f32.mrb[19].mxu1  ;;  %v9511_v15 = vpack.c.bf16 %v7598_v56, %v7597_v16  ;;  %v7692_v16 = vld [vmem:[%s11058_s17 + $0x168] sm:$0xff] }
 0x364   : > { %8685 = vmatprep.mubr.msk.f32.mxu1 %vm1608_vm4, %v1855_v25 }
 0x365   : > { %8686 = vmatmul.mubr.msk.f32.gmra.mrb[26].mxu1 %vm1608_vm4, %v8659_v59 }
 0x366   : > { %v8662_v36 = vpop.f32.mrb[36].mxu0  ;;  %9474 = vmatpush3.bf16.msra.mxu1 %v9471_v18  ;;  %v8634_v54 = vpop.f32.mrb[20].mxu1 }
 0x367   : > { %v1865_v21 = vpop.f32.mrb[37].mxu0  ;;  %9476 = vmatprep.subr.bf16.mxu1 %v9475_v53  ;;  %v1719_v49 = vpop.f32.mrb[21].mxu1 }
 0x368   : > { %8688 = vmatprep.mubr.msk.f32.mxu1 %vm1608_vm4, %v1865_v21  ;;  %v7660_v21 = vld [vmem:[%s11058_s17 + $0x128] sm:$0xff] }
 0x369   : > { %8689 = vmatmul.mubr.msk.f32.gmra.mrb[28].mxu1 %vm1608_vm4, %v8662_v36 }
 0x36a   : > { %v8665_v28 = vpop.f32.mrb[38].mxu0  ;;  %9478 = vmatpush3.bf16.msra.mxu1 %v9475_v53  ;;  %v8637_v33 = vpop.f32.mrb[22].mxu1  ;;  %v7657_v53 = vld [vmem:[%s11058_s17 + $0x110] sm:$0xff] }
 0x36b   : > { %v1875_v45 = vpop.f32.mrb[39].mxu0  ;;  %9480 = vmatprep.subr.bf16.mxu1 %v9479_v46  ;;  %v1729_v0 = vpop.f32.mrb[23].mxu1 }
 0x36c   : > { %8691 = vmatprep.mubr.msk.f32.mxu1 %vm1608_vm4, %v1875_v45 }
 0x36d   : > { %8692 = vmatmul.mubr.msk.f32.gmra.mrb[30].mxu1 %vm1608_vm4, %v8665_v28  ;;  %v7662_v28 = vld [vmem:[%s11058_s17 + $0x138] sm:$0xff] }
 0x36e   : > { %9482 = vmatpush3.bf16.msra.mxu1 %v9479_v46  ;;  %8710 = vmatprep.mubr.msk.f32.mxu1 %vm1608_vm4, %v1699_v34  ;;  %v8740_v37 = vpop.f32.mrb[40].mxu0  ;;  %v9575_v45 = vpack.c.bf16 %v7662_v28, %v7661_v3  ;;  %v7756_v3 = vld [vmem:[%s11058_s17 + $0x1e8] sm:$0xff] }
 0x36f   : > { %9500 = vmatprep.subr.bf16.mxu1 %v9499_v9  ;;  %v2250_v48 = vpop.f32.mrb[41].mxu0 }
 0x371   : > { %8711 = vmatmul.mubr.msk.f32.vlgmr.msra.gmra.mrb[24].mxu1 %vm1608_vm4, %v8628_v32  ;;  %v7630_v32 = vld [vmem:[%s11058_s17 + $0xf8] sm:$0xff] }
 0x372   : > { %9502 = vmatpush3.bf16.msra.mxu1 %v9499_v9  ;;  %8713 = vmatprep.mubr.msk.f32.mxu1 %vm1608_vm4, %v1709_v43  ;;  %v8743_v14 = vpop.f32.mrb[42].mxu0  ;;  %v9543_v18 = vpack.c.bf16 %v7630_v32, %v7629_v31  ;;  %v7658_v43 = vld [vmem:[%s11058_s17 + $0x118] sm:$0xff]  ;;  %v7724_v31 = vld [vmem:[%s11058_s17 + $0x1a8] sm:$0xff] }
 0x373   : > { %9504 = vmatprep.subr.bf16.mxu1 %v9503_v30  ;;  %v2260_v6 = vpop.f32.mrb[43].mxu0  ;;  %v9567_v44 = vpack.c.bf16 %v7658_v43, %v7657_v53  ;;  %v7752_v53 = vld [vmem:[%s11058_s17 + $0x1c8] sm:$0xff] }
 0x375   : > { %8714 = vmatmul.mubr.msk.f32.gmra.mrb[26].mxu1 %vm1608_vm4, %v8631_v55  ;;  %v9563_v55 = vpack.c.bf16 %v7656_v42, %v7655_v38  ;;  %v7726_v38 = vld [vmem:[%s11058_s17 + $0x1b8] sm:$0xff] }
 0x376   : > { %9506 = vmatpush3.bf16.msra.mxu1 %v9503_v30  ;;  %8716 = vmatprep.mubr.msk.f32.mxu1 %vm1608_vm4, %v1719_v49  ;;  %v8746_v17 = vpop.f32.mrb[44].mxu0 }
 0x377   : > { %9508 = vmatprep.subr.bf16.mxu1 %v9507_v51  ;;  %v2270_v20 = vpop.f32.mrb[45].mxu0 }
 0x379   : > { %8717 = vmatmul.mubr.msk.f32.gmra.mrb[28].mxu1 %vm1608_vm4, %v8634_v54  ;;  %v7659_v54 = vld [vmem:[%s11058_s17 + $0x120] sm:$0xff] }
 0x37a   : > { %9510 = vmatpush3.bf16.msra.mxu1 %v9507_v51  ;;  %8719 = vmatprep.mubr.msk.f32.mxu1 %vm1608_vm4, %v1729_v0  ;;  %v8749_v60 = vpop.f32.mrb[46].mxu0  ;;  %v9571_v49 = vpack.c.bf16 %v7660_v21, %v7659_v54  ;;  %v7687_v0 = vld [vmem:[%s11058_s17 + $0x140] sm:$0xff]  ;;  %v7754_v54 = vld [vmem:[%s11058_s17 + $0x1d8] sm:$0xff] }
 0x37b   : > { %9512 = vmatprep.subr.bf16.mxu1 %v9511_v15  ;;  %v2280_v62 = vpop.f32.mrb[47].mxu0 }
 0x37d   : > { %8720 = vmatmul.mubr.msk.f32.gmra.mrb[30].mxu1 %vm1608_vm4, %v8637_v33 }
 0x37e   : > { %9514 = vmatpush3.bf16.msra.mxu1 %v9511_v15  ;;  %8766 = vmatprep.mubr.msk.f32.mxu1 %vm1608_vm4, %v2250_v48  ;;  %v8796_v57 = vpop.f32.mrb[48].mxu0  ;;  %v7689_v48 = vld [vmem:[%s11058_s17 + $0x150] sm:$0xff] }
 0x37f   : > { %9532 = vmatprep.subr.bf16.mxu1 %v9531_v35  ;;  %v2534_v24 = vpop.f32.mrb[49].mxu0 }
 0x381   : > { %8767 = vmatmul.mubr.msk.f32.vlgmr.msra.gmra.mrb[24].mxu1 %vm1608_vm4, %v8740_v37  ;;  %v9595_v37 = vpack.c.bf16 %v7688_v12, %v7687_v0  ;;  %v7758_v0 = vld [vmem:[%s11058_s17 + $0x1f8] sm:$0xff] }
 0x382   : > { %9534 = vmatpush3.bf16.msra.mxu1 %v9531_v35  ;;  %8769 = vmatprep.mubr.msk.f32.mxu1 %vm1608_vm4, %v2260_v6  ;;  %v8799_v50 = vpop.f32.mrb[50].mxu0  ;;  %v7691_v6 = vld [vmem:[%s11058_s17 + $0x160] sm:$0xff] }
 0x383   : > { %9536 = vmatprep.subr.bf16.mxu1 %v9535_v7  ;;  %v2544_v40 = vpop.f32.mrb[51].mxu0 }
 0x385   : > { %8770 = vmatmul.mubr.msk.f32.gmra.mrb[26].mxu1 %vm1608_vm4, %v8743_v14  ;;  %v9599_v14 = vpack.c.bf16 %v7690_v13, %v7689_v48  ;;  %v7784_v48 = vld [vmem:[%s11058_s17 + $0x208] sm:$0xff] }
 0x386   : > { %9538 = vmatpush3.bf16.msra.mxu1 %v9535_v7  ;;  %8772 = vmatprep.mubr.msk.f32.mxu1 %vm1608_vm4, %v2270_v20  ;;  %v8802_v41 = vpop.f32.mrb[52].mxu0  ;;  %v7693_v20 = vld [vmem:[%s11058_s17 + $0x170] sm:$0xff] }
 0x387   : > { %9540 = vmatprep.subr.bf16.mxu1 %v9539_v29  ;;  %v2554_v34 = vpop.f32.mrb[53].mxu0 }
 0x389   : > { %8773 = vmatmul.mubr.msk.f32.gmra.mrb[28].mxu1 %vm1608_vm4, %v8746_v17  ;;  %v9603_v17 = vpack.c.bf16 %v7692_v16, %v7691_v6  ;;  %v7786_v6 = vld [vmem:[%s11058_s17 + $0x218] sm:$0xff] }
 0x38a   : > { %9542 = vmatpush3.bf16.msra.mxu1 %v9539_v29  ;;  %8775 = vmatprep.mubr.msk.f32.mxu1 %vm1608_vm4, %v2280_v62  ;;  %v8805_v59 = vpop.f32.mrb[54].mxu0  ;;  %v7719_v62 = vld [vmem:[%s11058_s17 + $0x180] sm:$0xff] }
 0x38b   : > { %9544 = vmatprep.subr.bf16.mxu1 %v9543_v18  ;;  %v2564_v25 = vpop.f32.mrb[55].mxu0 }
 0x38d   : > { %8776 = vmatmul.mubr.msk.f32.gmra.mrb[30].mxu1 %vm1608_vm4, %v8749_v60  ;;  %v9607_v60 = vpack.c.bf16 %v7694_v5, %v7693_v20  ;;  %v7788_v20 = vld [vmem:[%s11058_s17 + $0x228] sm:$0xff] }
 0x38e   : > { %9546 = vmatpush3.bf16.msra.mxu1 %v9543_v18  ;;  %8822 = vmatprep.mubr.msk.f32.mxu1 %vm1608_vm4, %v2534_v24  ;;  %v8852_v61 = vpop.f32.mrb[56].mxu0  ;;  %v7721_v24 = vld [vmem:[%s11058_s17 + $0x190] sm:$0xff] }
 0x38f   : > { %9564 = vmatprep.subr.bf16.mxu1 %v9563_v55  ;;  %v2818_v36 = vpop.f32.mrb[57].mxu0 }
 0x391   : > { %8823 = vmatmul.mubr.msk.f32.vlgmr.msra.gmra.mrb[24].mxu1 %vm1608_vm4, %v8796_v57  ;;  %v9627_v57 = vpack.c.bf16 %v7720_v23, %v7719_v62  ;;  %v7790_v62 = vld [vmem:[%s11058_s17 + $0x238] sm:$0xff] }
 0x392   : > { %9566 = vmatpush3.bf16.msra.mxu1 %v9563_v55  ;;  %8825 = vmatprep.mubr.msk.f32.mxu1 %vm1608_vm4, %v2544_v40  ;;  %v8855_v46 = vpop.f32.mrb[58].mxu0  ;;  %v7723_v40 = vld [vmem:[%s11058_s17 + $0x1a0] sm:$0xff] }
 0x393   : > { %9568 = vmatprep.subr.bf16.mxu1 %v9567_v44  ;;  %v2828_v39 = vpop.f32.mrb[59].mxu0 }
 0x395   : > { %8826 = vmatmul.mubr.msk.f32.gmra.mrb[26].mxu1 %vm1608_vm4, %v8799_v50  ;;  %v9631_v50 = vpack.c.bf16 %v7722_v26, %v7721_v24  ;;  %v4170_v26 = vld [vmem:[%s12103_s11] sm:$0xff] }
 0x396   : > { %9570 = vmatpush3.bf16.msra.mxu1 %v9567_v44  ;;  %8828 = vmatprep.mubr.msk.f32.mxu1 %vm1608_vm4, %v2554_v34  ;;  %v8858_v33 = vpop.f32.mrb[60].mxu0  ;;  %v7725_v34 = vld [vmem:[%s11058_s17 + $0x1b0] sm:$0xff] }
 0x397   : > { %9572 = vmatprep.subr.bf16.mxu1 %v9571_v49  ;;  %v2838_v9 = vpop.f32.mrb[61].mxu0  ;;  %9130 = vmatprep.mubr.msk.f32.mxu0 %vm1608_vm4, %v4170_v26 }
 0x399   : > { %8829 = vmatmul.mubr.msk.f32.gmra.mrb[28].mxu1 %vm1608_vm4, %v8802_v41  ;;  %v9635_v41 = vpack.c.bf16 %v7724_v31, %v7723_v40 }
 0x39a   : > { %9574 = vmatpush3.bf16.msra.mxu1 %v9571_v49  ;;  %8831 = vmatprep.mubr.msk.f32.mxu1 %vm1608_vm4, %v2564_v25  ;;  %v8861_v11 = vpop.f32.mrb[62].mxu0  ;;  %v7751_v25 = vld [vmem:[%s11058_s17 + $0x1c0] sm:$0xff] }
 0x39b   : > { %9576 = vmatprep.subr.bf16.mxu1 %v9575_v45  ;;  %v2848_v30 = vpop.f32.mrb[63].mxu0 }
 0x39d   : > { %8832 = vmatmul.mubr.msk.f32.gmra.mrb[30].mxu1 %vm1608_vm4, %v8805_v59  ;;  %v9639_v59 = vpack.c.bf16 %v7726_v38, %v7725_v34 }
 0x39e   : > { %9578 = vmatpush3.bf16.msra.mxu1 %v9575_v45  ;;  %8878 = vmatprep.mubr.msk.f32.mxu1 %vm1608_vm4, %v2818_v36  ;;  %v8908_v58 = vpop.f32.mrb[64].mxu0  ;;  %v7753_v36 = vld [vmem:[%s11058_s17 + $0x1d0] sm:$0xff] }
 0x39f   : > { %9596 = vmatprep.subr.bf16.mxu1 %v9595_v37  ;;  %v3102_v51 = vpop.f32.mrb[65].mxu0 }
 0x3a1   : > { %8879 = vmatmul.mubr.msk.f32.vlgmr.msra.gmra.mrb[24].mxu1 %vm1608_vm4, %v8852_v61  ;;  %v9659_v61 = vpack.c.bf16 %v7752_v53, %v7751_v25 }
 0x3a2   : > { %9598 = vmatpush3.bf16.msra.mxu1 %v9595_v37  ;;  %8881 = vmatprep.mubr.msk.f32.mxu1 %vm1608_vm4, %v2828_v39  ;;  %v8911_v56 = vpop.f32.mrb[66].mxu0  ;;  %v7755_v39 = vld [vmem:[%s11058_s17 + $0x1e0] sm:$0xff] }
 0x3a3   : > { %9600 = vmatprep.subr.bf16.mxu1 %v9599_v14  ;;  %v3112_v15 = vpop.f32.mrb[67].mxu0 }
 0x3a5   : > { %8882 = vmatmul.mubr.msk.f32.gmra.mrb[26].mxu1 %vm1608_vm4, %v8855_v46  ;;  %v9663_v46 = vpack.c.bf16 %v7754_v54, %v7753_v36 }
 0x3a6   : > { %9602 = vmatpush3.bf16.msra.mxu1 %v9599_v14  ;;  %8884 = vmatprep.mubr.msk.f32.mxu1 %vm1608_vm4, %v2838_v9  ;;  %v8914_v22 = vpop.f32.mrb[68].mxu0  ;;  %v7757_v9 = vld [vmem:[%s11058_s17 + $0x1f0] sm:$0xff] }
 0x3a7   : > { %9604 = vmatprep.subr.bf16.mxu1 %v9603_v17  ;;  %v3122_v35 = vpop.f32.mrb[69].mxu0 }
 0x3a9   : > { %8885 = vmatmul.mubr.msk.f32.gmra.mrb[28].mxu1 %vm1608_vm4, %v8858_v33  ;;  %v9667_v33 = vpack.c.bf16 %v7756_v3, %v7755_v39 }
 0x3aa   : > { %9606 = vmatpush3.bf16.msra.mxu1 %v9603_v17  ;;  %8887 = vmatprep.mubr.msk.f32.mxu1 %vm1608_vm4, %v2848_v30  ;;  %v8917_v4 = vpop.f32.mrb[70].mxu0  ;;  %v7783_v30 = vld [vmem:[%s11058_s17 + $0x200] sm:$0xff] }
 0x3ab   : > { %9608 = vmatprep.subr.bf16.mxu1 %v9607_v60  ;;  %v3132_v7 = vpop.f32.mrb[71].mxu0 }
 0x3ad   : > { %8888 = vmatmul.mubr.msk.f32.gmra.mrb[30].mxu1 %vm1608_vm4, %v8861_v11  ;;  %v9671_v11 = vpack.c.bf16 %v7758_v0, %v7757_v9 }
 0x3ae   : > { %9610 = vmatpush3.bf16.msra.mxu1 %v9607_v60  ;;  %8934 = vmatprep.mubr.msk.f32.mxu1 %vm1608_vm4, %v3102_v51  ;;  %v8964_v27 = vpop.f32.mrb[72].mxu0  ;;  %v7785_v51 = vld [vmem:[%s11058_s17 + $0x210] sm:$0xff] }
 0x3af   : > { %9628 = vmatprep.subr.bf16.mxu1 %v9627_v57  ;;  %v3386_v29 = vpop.f32.mrb[73].mxu0 }
 0x3b1   : > { %8935 = vmatmul.mubr.msk.f32.vlgmr.msra.gmra.mrb[24].mxu1 %vm1608_vm4, %v8908_v58  ;;  %v9691_v58 = vpack.c.bf16 %v7784_v48, %v7783_v30 }
 0x3b2   : > { %9630 = vmatpush3.bf16.msra.mxu1 %v9627_v57  ;;  %8937 = vmatprep.mubr.msk.f32.mxu1 %vm1608_vm4, %v3112_v15  ;;  %v8967_v32 = vpop.f32.mrb[74].mxu0  ;;  %v7787_v15 = vld [vmem:[%s11058_s17 + $0x220] sm:$0xff] }
 0x3b3   : > { %9632 = vmatprep.subr.bf16.mxu1 %v9631_v50  ;;  %v3396_v18 = vpop.f32.mrb[75].mxu0 }
 0x3b5   : > { %8938 = vmatmul.mubr.msk.f32.gmra.mrb[26].mxu1 %vm1608_vm4, %v8911_v56  ;;  %v9695_v56 = vpack.c.bf16 %v7786_v6, %v7785_v51 }
 0x3b6   : > { %9634 = vmatpush3.bf16.msra.mxu1 %v9631_v50  ;;  %8940 = vmatprep.mubr.msk.f32.mxu1 %vm1608_vm4, %v3122_v35  ;;  %v8970_v42 = vpop.f32.mrb[76].mxu0  ;;  %v7789_v35 = vld [vmem:[%s11058_s17 + $0x230] sm:$0xff]  ;;  %s5908_s17 = sld [smem:[#allocation2 + %s5907_s26]] }
 0x3b7   : > { %9636 = vmatprep.subr.bf16.mxu1 %v9635_v41  ;;  %v3406_v55 = vpop.f32.mrb[77].mxu0 }
 0x3b9   : > { %8941 = vmatmul.mubr.msk.f32.gmra.mrb[28].mxu1 %vm1608_vm4, %v8914_v22  ;;  %v9699_v22 = vpack.c.bf16 %v7788_v20, %v7787_v15 }
 0x3ba   : > { %9638 = vmatpush3.bf16.msra.mxu1 %v9635_v41  ;;  %8943 = vmatprep.mubr.msk.f32.mxu1 %vm1608_vm4, %v3132_v7  ;;  %v8973_v43 = vpop.f32.mrb[78].mxu0 }
 0x3bb   : > { %9640 = vmatprep.subr.bf16.mxu1 %v9639_v59  ;;  %v3416_v44 = vpop.f32.mrb[79].mxu0 }
 0x3bd   : > { %8944 = vmatmul.mubr.msk.f32.gmra.mrb[30].mxu1 %vm1608_vm4, %v8917_v4  ;;  %v9703_v4 = vpack.c.bf16 %v7790_v62, %v7789_v35 }
 0x3be   : > { %9642 = vmatpush3.bf16.msra.mxu1 %v9639_v59  ;;  %8990 = vmatprep.mubr.msk.f32.mxu1 %vm1608_vm4, %v3386_v29  ;;  %v9020_v21 = vpop.f32.mrb[80].mxu0 }
 0x3bf   : > { %9660 = vmatprep.subr.bf16.mxu1 %v9659_v61  ;;  %v3670_v49 = vpop.f32.mrb[81].mxu0 }
 0x3c1   : > { %8991 = vmatmul.mubr.msk.f32.vlgmr.msra.gmra.mrb[24].mxu1 %vm1608_vm4, %v8964_v27  ;;  %v7799_v27 = vld [vmem:[%s657_s16] ss:$0 sm:$0xff]  ;;  %s10194_s16 = smul.u32 1536, %s10684_s23  ;;  %s12071_s23 = scalar_lea.vmem %s12107_s15, %s7491_s29 }
 0x3c2   : > { %9662 = vmatpush3.bf16.msra.mxu1 %v9659_v61  ;;  %8993 = vmatprep.mubr.msk.f32.mxu1 %vm1608_vm4, %v3396_v18  ;;  %v9023_v28 = vpop.f32.mrb[82].mxu0 }
 0x3c3   : > { %9664 = vmatprep.subr.bf16.mxu1 %v9663_v46  ;;  %v3680_v45 = vpop.f32.mrb[83].mxu0 }
 0x3c5   : > { %8994 = vmatmul.mubr.msk.f32.gmra.mrb[26].mxu1 %vm1608_vm4, %v8967_v32 }
 0x3c6   : > { %9666 = vmatpush3.bf16.msra.mxu1 %v9663_v46  ;;  %8996 = vmatprep.mubr.msk.f32.mxu1 %vm1608_vm4, %v3406_v55  ;;  %v9026_v12 = vpop.f32.mrb[84].mxu0 }
 0x3c7   : > { %9668 = vmatprep.subr.bf16.mxu1 %v9667_v33  ;;  %v3690_v37 = vpop.f32.mrb[85].mxu0 }
 0x3c9   : > { %8997 = vmatmul.mubr.msk.f32.gmra.mrb[28].mxu1 %vm1608_vm4, %v8970_v42 }
 0x3ca   : > { %9670 = vmatpush3.bf16.msra.mxu1 %v9667_v33  ;;  %8999 = vmatprep.mubr.msk.f32.mxu1 %vm1608_vm4, %v3416_v44  ;;  %v9029_v13 = vpop.f32.mrb[86].mxu0 }
 0x3cb   : > { %9672 = vmatprep.subr.bf16.mxu1 %v9671_v11  ;;  %v3700_v14 = vpop.f32.mrb[87].mxu0 }
 0x3cd   : > { %9000 = vmatmul.mubr.msk.f32.gmra.mrb[30].mxu1 %vm1608_vm4, %v8973_v43 }
 0x3ce   : > { %9674 = vmatpush3.bf16.msra.mxu1 %v9671_v11  ;;  %9046 = vmatprep.mubr.msk.f32.mxu1 %vm1608_vm4, %v3670_v49  ;;  %v9076_v16 = vpop.f32.mrb[88].mxu0 }
 0x3cf   : > { %9692 = vmatprep.subr.bf16.mxu1 %v9691_v58  ;;  %v3954_v17 = vpop.f32.mrb[89].mxu0 }
 0x3d1   : > { %9047 = vmatmul.mubr.msk.f32.vlgmr.msra.gmra.mrb[24].mxu1 %vm1608_vm4, %v9020_v21 }
 0x3d2   : > { %9694 = vmatpush3.bf16.msra.mxu1 %v9691_v58  ;;  %9049 = vmatprep.mubr.msk.f32.mxu1 %vm1608_vm4, %v3680_v45  ;;  %v9079_v5 = vpop.f32.mrb[90].mxu0  ;;  %v11565_v58 = vstv %s4173_s21 }
 0x3d3   : > { %9696 = vmatprep.subr.bf16.mxu1 %v9695_v56  ;;  %v3964_v60 = vpop.f32.mrb[91].mxu0 }
 0x3d5   : > { %9050 = vmatmul.mubr.msk.f32.gmra.mrb[26].mxu1 %vm1608_vm4, %v9023_v28 }
 0x3d6   : > { %9698 = vmatpush3.bf16.msra.mxu1 %v9695_v56  ;;  %9052 = vmatprep.mubr.msk.f32.mxu1 %vm1608_vm4, %v3690_v37  ;;  %v9082_v23 = vpop.f32.mrb[92].mxu0 }
 0x3d7   : > { %9700 = vmatprep.subr.bf16.mxu1 %v9699_v22  ;;  %v3974_v57 = vpop.f32.mrb[93].mxu0 }
 0x3d9   : > { %9053 = vmatmul.mubr.msk.f32.gmra.mrb[28].mxu1 %vm1608_vm4, %v9026_v12 }
 0x3da   : > { %9702 = vmatpush3.bf16.msra.mxu1 %v9699_v22  ;;  %9055 = vmatprep.mubr.msk.f32.mxu1 %vm1608_vm4, %v3700_v14  ;;  %v9085_v7 = vpop.f32.mrb[94].mxu0 }
 0x3db   : > { %9704 = vmatprep.subr.bf16.mxu1 %v9703_v4  ;;  %v3984_v24 = vpop.f32.mrb[95].mxu0 }
 0x3dd   : > { %9056 = vmatmul.mubr.msk.f32.gmra.mrb[30].mxu1 %vm1608_vm4, %v9029_v13 }
 0x3de   : > { %9706 = vmatpush3.bf16.msra.mxu1 %v9703_v4  ;;  %9102 = vmatprep.mubr.msk.f32.mxu1 %vm1608_vm4, %v3954_v17 }
 0x3e1   : > { %9103 = vmatmul.mubr.msk.f32.vlgmr.msra.gmra.mrb[24].mxu1 %vm1608_vm4, %v9076_v16 }
 0x3e2   : > { %9105 = vmatprep.mubr.msk.f32.mxu1 %vm1608_vm4, %v3964_v60 }
 0x3e5   : > { %9106 = vmatmul.mubr.msk.f32.gmra.mrb[26].mxu1 %vm1608_vm4, %v9079_v5 }
 0x3e6   : > { %9108 = vmatprep.mubr.msk.f32.mxu1 %vm1608_vm4, %v3974_v57 }
 0x3e9   : > { %9109 = vmatmul.mubr.msk.f32.gmra.mrb[28].mxu1 %vm1608_vm4, %v9082_v23 }
 0x3ea   : > { %9111 = vmatprep.mubr.msk.f32.mxu1 %vm1608_vm4, %v3984_v24 }
 0x3ed   : > { %9112 = vmatmul.mubr.msk.f32.gmra.mrb[30].mxu1 %vm1608_vm4, %v9085_v7 }
 0x4b4   : > { %v9104_v50 = vpop.f32.mrb[24].mxu1 }
 0x4b5   : > { %v4147_v29 = vadd.f32 %v9104_v50, %v7799_v27  ;;  %v4092_v40 = vpop.f32.mrb[25].mxu1 }
 0x4b6   : > { %v4146_v31 = vadd.f32 %v7799_v27, %v4092_v40 }
 0x4b7   : > { %v4155_v32 = vmax.f32 %v4147_v29, 0.0 }
 0x4b8   : > { %v4154_v41 = vmax.f32 %v4146_v31, 0.0  ;;  %v9107_v18 = vpop.f32.mrb[26].mxu1 }
 0x4b9   : > { %v4163_v34 = vadd.f32 %v11011_v19, %v4155_v32  ;;  %v4149_v38 = vadd.f32 %v9107_v18, %v7799_v27  ;;  %v4102_v42 = vpop.f32.mrb[27].mxu1 }
 0x4ba   : > { %v4162_v59 = vadd.f32 %v11008_v47, %v4154_v41  ;;  %v4148_v55 = vadd.f32 %v7799_v27, %v4102_v42 }
 0x4bb   : > { %v4175_v25 = vmax.f32 %v4163_v34, 1e-06  ;;  %v4157_v53 = vmax.f32 %v4149_v38, 0.0 }
 0x4bc   : > { %v4174_v43 = vmax.f32 %v4162_v59, 1e-06  ;;  %v4156_v61 = vmax.f32 %v4148_v55, 0.0  ;;  %v9110_v44 = vpop.f32.mrb[28].mxu1 }
 0x4bd   : > { %10419 = vlog2.f32 %v4175_v25  ;;  %v4165_v36 = vadd.f32 %v11025_v2, %v4157_v53  ;;  %v4151_v54 = vadd.f32 %v9110_v44, %v7799_v27  ;;  %v4112_v21 = vpop.f32.mrb[29].mxu1 }
 0x4be   : > { %10421 = vlog2.f32 %v4174_v43  ;;  %v4164_v46 = vadd.f32 %v11022_v63, %v4156_v61  ;;  %v4150_v19 = vadd.f32 %v7799_v27, %v4112_v21 }
 0x4bf   : > { %v4177_v49 = vmax.f32 %v4165_v36, 1e-06  ;;  %v4159_v39 = vmax.f32 %v4151_v54, 0.0 }
 0x4c0   : > { %v4176_v47 = vmax.f32 %v4164_v46, 1e-06  ;;  %v4158_v3 = vmax.f32 %v4150_v19, 0.0  ;;  %v9113_v28 = vpop.f32.mrb[30].mxu1  ;;  %v4171_v19 = vld [vmem:[%s12103_s11 + $0x8] sm:$0xff] }
 0x4c1   : > { %10423 = vlog2.f32 %v4177_v49  ;;  %v4167_v33 = vadd.f32 %v11038_v10, %v4159_v39  ;;  %v4153_v45 = vadd.f32 %v9113_v28, %v7799_v27  ;;  %v4122_v9 = vpop.f32.mrb[31].mxu1  ;;  %v4315_v49 = vld [vmem:[%s12101_s9] sm:$0xff]  ;;  %v7810_v28 = vld [vmem:[%s11588_s30 + $0x50] sm:$0xff] }
 0x4c2   : > { %10425 = vlog2.f32 %v4176_v47  ;;  %v4166_v2 = vadd.f32 %v11036_v8, %v4158_v3  ;;  %v4152_v0 = vadd.f32 %v7799_v27, %v4122_v9  ;;  %v7808_v39 = vld [vmem:[%s11588_s30 + $0x40] sm:$0xff]  ;;  %v7809_v47 = vld [vmem:[%s11588_s30 + $0x48] sm:$0xff] }
 0x4c3   : > { %v4179_v12 = vmax.f32 %v4167_v33, 1e-06  ;;  %v4161_v11 = vmax.f32 %v4153_v45, 0.0  ;;  %v9731_v3 = vpack.c.bf16 %v7809_v47, %v7808_v39  ;;  %v7811_v33 = vld [vmem:[%s11588_s30 + $0x58] sm:$0xff]  ;;  %v7812_v45 = vld [vmem:[%s11588_s30 + $0x60] sm:$0xff]  ;;  %v7890_v39 = vld [vmem:[%s12101_s9 + $0x70] sm:$0xff] }
 0x4c4   : > { %v4178_v37 = vmax.f32 %v4166_v2, 1e-06  ;;  %v4160_v63 = vmax.f32 %v4152_v0, 0.0  ;;  %v9735_v9 = vpack.c.bf16 %v7811_v33, %v7810_v28  ;;  %v7813_v2 = vld [vmem:[%s11588_s30 + $0x68] sm:$0xff]  ;;  %v7891_v47 = vld [vmem:[%s12101_s9 + $0x78] sm:$0xff]  ;;  %v7830_v33 = vld [vmem:[%s11588_s30 + $0xb0] sm:$0xff] }
 0x4c5   : > { %10427 = vlog2.f32 %v4179_v12  ;;  %v4169_v30 = vadd.f32 %v11051_v1, %v4161_v11  ;;  %9732 = vmatprep.subr.bf16.mxu1 %v9731_v3  ;;  %v9739_v0 = vpack.c.bf16 %v7813_v2, %v7812_v45  ;;  %v7814_v12 = vld [vmem:[%s11588_s30 + $0x70] sm:$0xff]  ;;  %v7815_v11 = vld [vmem:[%s11588_s30 + $0x78] sm:$0xff]  ;;  %v7905_v28 = vld [vmem:[%s12101_s9 + $0x88] sm:$0xff] }
 0x4c6   : > { %10429 = vlog2.f32 %v4178_v37  ;;  %v4168_v48 = vadd.f32 %v11049_v52, %v4160_v63  ;;  %9734 = vmatpush3.bf16.msra.mxu1 %v9731_v3  ;;  %v9743_v37 = vpack.c.bf16 %v7815_v11, %v7814_v12  ;;  %v7904_v3 = vld [vmem:[%s12101_s9 + $0x80] sm:$0xff]  ;;  %v7831_v45 = vld [vmem:[%s11588_s30 + $0xb8] sm:$0xff] }
 0x4c7   : > { %v10420_v13 = vpop.eup %10419  ;;  %v4181_v10 = vmax.f32 %v4169_v30, 1e-06  ;;  %9736 = vmatprep.subr.bf16.mxu1 %v9735_v9  ;;  %v7838_v2 = vld [vmem:[%s11588_s30 + $0xc0] sm:$0xff] }
 0x4c8   : > { %v10422_v14 = vpop.eup %10421  ;;  %v4185_v51 = vmul.f32 0.6931472, %v10420_v13  ;;  %v4180_v6 = vmax.f32 %v4168_v48, 1e-06 }
 0x4c9   : > { %v4183_v16 = vmul.f32 0.6931472, %v10422_v14  ;;  %10431 = vlog2.f32 %v4181_v10 }
 0x4ca   : > { %v4200_v8 = vmul.f32 %v11565_v58, %v4185_v51  ;;  %10433 = vlog2.f32 %v4180_v6  ;;  %9738 = vmatpush3.bf16.msra.mxu1 %v9735_v9  ;;  %v9779_v9 = vpack.c.bf16 %v7831_v45, %v7830_v33  ;;  %v7885_v33 = vld [vmem:[%s11588_s30 + $0x1a8] sm:$0xff] }
 0x4cb   : > { %v10424_v56 = vpop.eup %10423  ;;  %v4199_v17 = vmul.f32 %v11565_v58, %v4183_v16  ;;  %9740 = vmatprep.subr.bf16.mxu1 %v9739_v0 }
 0x4cc   : > { %v10426_v15 = vpop.eup %10425  ;;  %v4209_v1 = vmul.f32 1.442695, %v4200_v8  ;;  %v4189_v20 = vmul.f32 0.6931472, %v10424_v56 }
 0x4cd   : > { %v4207_v5 = vmul.f32 1.442695, %v4199_v17  ;;  %v4187_v52 = vmul.f32 0.6931472, %v10426_v15 }
 0x4ce   : > { %10435 = vpow2.f32 %v4209_v1  ;;  %v4202_v22 = vmul.f32 %v11565_v58, %v4189_v20  ;;  %9742 = vmatpush3.bf16.msra.mxu1 %v9739_v0  ;;  %v4316_v1 = vld [vmem:[%s12101_s9 + $0x8] sm:$0xff]  ;;  %v7804_v20 = vld [vmem:[%s12101_s9 + $0x10] sm:$0xff] }
 0x4cf   : > { %v10428_v60 = vpop.eup %10427  ;;  %10437 = vpow2.f32 %v4207_v5  ;;  %v4201_v35 = vmul.f32 %v11565_v58, %v4187_v52  ;;  %9744 = vmatprep.subr.bf16.mxu1 %v9743_v37  ;;  %v7805_v5 = vld [vmem:[%s12101_s9 + $0x18] sm:$0xff]  ;;  %v4399_v52 = vld [vmem:[%s11588_s30] sm:$0xff]  ;;  %v7839_v0 = vld [vmem:[%s11588_s30 + $0xc8] sm:$0xff] }
 0x4d0   : > { %v10430_v62 = vpop.eup %10429  ;;  %v4213_v23 = vmul.f32 1.442695, %v4202_v22  ;;  %v4193_v4 = vmul.f32 0.6931472, %v10428_v60  ;;  %v4400_v22 = vld [vmem:[%s11588_s30 + $0x8] sm:$0xff]  ;;  %v9787_v12 = vpack.c.bf16 %v7839_v0, %v7838_v2  ;;  %v7887_v2 = vld [vmem:[%s11588_s30 + $0x1b8] sm:$0xff] }
 0x4d1   : > { %v4211_v57 = vmul.f32 1.442695, %v4201_v35  ;;  %v4191_v7 = vmul.f32 0.6931472, %v10430_v62  ;;  %v9747_v60 = vpack.c.bf16 %v4400_v22, %v4399_v52  ;;  %v4401_v35 = vld [vmem:[%s11588_s30 + $0x10] sm:$0xff]  ;;  %v4402_v62 = vld [vmem:[%s11588_s30 + $0x18] sm:$0xff] }
 0x4d2   : > { %10439 = vpow2.f32 %v4213_v23  ;;  %v4204_v24 = vmul.f32 %v11565_v58, %v4193_v4  ;;  %9746 = vmatpush3.bf16.msra.mxu1 %v9743_v37  ;;  %v9751_v23 = vpack.c.bf16 %v4402_v62, %v4401_v35  ;;  %v4403_v4 = vld [vmem:[%s11588_s30 + $0x20] sm:$0xff]  ;;  %v7853_v22 = vld [vmem:[%s11588_s30 + $0x108] sm:$0xff] }
 0x4d3   : > { %v10432_v26 = vpop.eup %10431  ;;  %10441 = vpow2.f32 %v4211_v57  ;;  %v4203_v27 = vmul.f32 %v11565_v58, %v4191_v7  ;;  %v4404_v57 = vld [vmem:[%s11588_s30 + $0x28] sm:$0xff]  ;;  %v7852_v52 = vld [vmem:[%s11588_s30 + $0x100] sm:$0xff] }
 0x4d4   : > { %v10434_v50 = vpop.eup %10433  ;;  %v4217_v29 = vmul.f32 1.442695, %v4204_v24  ;;  %v4197_v40 = vmul.f32 0.6931472, %v10432_v26  ;;  %v9755_v7 = vpack.c.bf16 %v4404_v57, %v4403_v4  ;;  %v4405_v24 = vld [vmem:[%s11588_s30 + $0x30] sm:$0xff]  ;;  %v4406_v26 = vld [vmem:[%s11588_s30 + $0x38] sm:$0xff]  ;;  %v9807_v35 = vpack.c.bf16 %v7853_v22, %v7852_v52 }
 0x4d5   : > { %v4215_v31 = vmul.f32 1.442695, %v4203_v27  ;;  %v4195_v32 = vmul.f32 0.6931472, %v10434_v50  ;;  %v9759_v27 = vpack.c.bf16 %v4406_v26, %v4405_v24  ;;  %v7824_v50 = vld [vmem:[%s11588_s30 + $0x80] sm:$0xff]  ;;  %v7855_v4 = vld [vmem:[%s11588_s30 + $0x118] sm:$0xff] }
 0x4d6   : > { %10443 = vpow2.f32 %v4217_v29  ;;  %v4206_v41 = vmul.f32 %v11565_v58, %v4197_v40  ;;  %v7825_v29 = vld [vmem:[%s11588_s30 + $0x88] sm:$0xff]  ;;  %v7856_v26 = vld [vmem:[%s11588_s30 + $0x120] sm:$0xff]  ;;  %v7911_v52 = vld [vmem:[%s11588_s30 + $0x218] sm:$0xff] }
 0x4d7   : > { %10445 = vpow2.f32 %v4215_v31  ;;  %v4205_v18 = vmul.f32 %v11565_v58, %v4195_v32  ;;  %v9767_v40 = vpack.c.bf16 %v7825_v29, %v7824_v50  ;;  %v7826_v31 = vld [vmem:[%s11588_s30 + $0x90] sm:$0xff]  ;;  %v7827_v32 = vld [vmem:[%s11588_s30 + $0x98] sm:$0xff] }
 0x4d8   : > { %v10436_v34 = vpop.eup %10435  ;;  %v4221_v38 = vmul.f32 1.442695, %v4206_v41 }
 0x4d9   : > { %v10438_v42 = vpop.eup %10437  ;;  %v4219_v59 = vmul.f32 1.442695, %v4205_v18 }
 0x4da   : > { %10447 = vpow2.f32 %v4221_v38  ;;  %v9707_v55 = vpack.c.bf16 %v10436_v34, %v10438_v42  ;;  %v9771_v34 = vpack.c.bf16 %v7827_v32, %v7826_v31  ;;  %v7828_v38 = vld [vmem:[%s11588_s30 + $0xa0] sm:$0xff]  ;;  %v7829_v42 = vld [vmem:[%s11588_s30 + $0xa8] sm:$0xff]  ;;  %v7858_v31 = vld [vmem:[%s11588_s30 + $0x130] sm:$0xff] }
 0x4db   : > { %10449 = vpow2.f32 %v4219_v59  ;;  %v7859_v32 = vld [vmem:[%s11588_s30 + $0x138] sm:$0xff] }
 0x4dc   : > { %v10440_v25 = vpop.eup %10439  ;;  %9708 = vmatprep.subr.bf16.mxu0 %v9707_v55  ;;  %10451 = vrcp.f32 %v11565_v58 }
 0x4dd   : > { %v10442_v53 = vpop.eup %10441  ;;  %9710 = vmatpush3.bf16.msra.mxu0 %v9707_v55 }
 0x4de   : > { %v9711_v43 = vpack.c.bf16 %v10440_v25, %v10442_v53  ;;  %v7820_v25 = vld [vmem:[%s12101_s9 + $0x20] sm:$0xff]  ;;  %v9775_v53 = vpack.c.bf16 %v7829_v42, %v7828_v38  ;;  %v7867_v42 = vld [vmem:[%s11588_s30 + $0x148] sm:$0xff] }
 0x4df   : > { %v7866_v38 = vld [vmem:[%s11588_s30 + $0x140] sm:$0xff] }
 0x4e0   : > { %v10444_v61 = vpop.eup %10443  ;;  %9712 = vmatprep.subr.bf16.mxu0 %v9711_v43 }
 0x4e1   : > { %v10446_v44 = vpop.eup %10445  ;;  %9714 = vmatpush3.bf16.msra.mxu0 %v9711_v43  ;;  %v7821_v43 = vld [vmem:[%s12101_s9 + $0x28] sm:$0xff] }
 0x4e2   : > { %v9715_v36 = vpack.c.bf16 %v10444_v61, %v10446_v44  ;;  %v7834_v61 = vld [vmem:[%s12101_s9 + $0x30] sm:$0xff]  ;;  %v7835_v44 = vld [vmem:[%s12101_s9 + $0x38] sm:$0xff] }
 0x4e4   : > { %v10448_v54 = vpop.eup %10447  ;;  %9716 = vmatprep.subr.bf16.mxu0 %v9715_v36 }
 0x4e5   : > { %v10450_v21 = vpop.eup %10449  ;;  %9718 = vmatpush3.bf16.msra.mxu0 %v9715_v36  ;;  %v7848_v36 = vld [vmem:[%s12101_s9 + $0x40] sm:$0xff] }
 0x4e6   : > { %v9719_v46 = vpack.c.bf16 %v10448_v54, %v10450_v21  ;;  %v10452_v48 = vpop.eup %10451  ;;  %v7849_v54 = vld [vmem:[%s12101_s9 + $0x48] sm:$0xff]  ;;  %v7862_v21 = vld [vmem:[%s12101_s9 + $0x50] sm:$0xff] }
 0x4e8   : > { %9720 = vmatprep.subr.bf16.mxu0 %v9719_v46 }
 0x4e9   : > { %9722 = vmatpush3.bf16.msra.mxu0 %v9719_v46  ;;  %v7863_v46 = vld [vmem:[%s12101_s9 + $0x58] sm:$0xff] }
 0x4ec   : > { %9131 = vmatmul.mubr.msk.f32.vlgmr.msra.gmra.mrb[96].mxu0 %vm1608_vm4, %v4171_v19  ;;  %v7876_v19 = vld [vmem:[%s12101_s9 + $0x60] sm:$0xff] }
 0x4ed   : > { %9137 = vmatprep.mubr.msk.f32.mxu0 %vm4317_vm5, %v4315_v49  ;;  %v7877_v49 = vld [vmem:[%s12101_s9 + $0x68] sm:$0xff] }
 0x5bf   : > { %v9132_v63 = vpop.f32.mrb[96].mxu0 }
 0x5c0   : > { %10453 = vlog2.f32 %v9132_v63  ;;  %v4295_v30 = vpop.f32.mrb[97].mxu0  ;;  %v7840_v63 = vld [vmem:[%s11588_s30 + $0xd0] sm:$0xff] }
 0x5c1   : > { %10455 = vlog2.f32 %v4295_v30  ;;  %v7841_v30 = vld [vmem:[%s11588_s30 + $0xd8] sm:$0xff] }
 0x5ca   : > { %v10454_v13 = vpop.eup %10453 }
 0x5cb   : > { %v10456_v10 = vpop.eup %10455  ;;  %v4307_v14 = vmul.f32 0.6931472, %v10454_v13 }
 0x5cc   : > { %v4305_v51 = vmul.f32 0.6931472, %v10456_v10  ;;  %v9791_v10 = vpack.c.bf16 %v7841_v30, %v7840_v63  ;;  %v7895_v63 = vld [vmem:[%s11588_s30 + $0x1c8] sm:$0xff] }
 0x5cd   : > { %v4310_v6 = vmul.f32 %v10452_v48, %v4307_v14  ;;  %v7842_v14 = vld [vmem:[%s11588_s30 + $0xe0] sm:$0xff] }
 0x5ce   : > { %v4309_v16 = vmul.f32 %v10452_v48, %v4305_v51  ;;  %v7843_v51 = vld [vmem:[%s11588_s30 + $0xe8] sm:$0xff] }
 0x5cf   : > { %v4313_v8 = vmul.f32 1.442695, %v4310_v6 }
 0x5d0   : > { %v4311_v56 = vmul.f32 1.442695, %v4309_v16  ;;  %v9795_v16 = vpack.c.bf16 %v7843_v51, %v7842_v14  ;;  %v7898_v14 = vld [vmem:[%s11588_s30 + $0x1e0] sm:$0xff]  ;;  %v7899_v51 = vld [vmem:[%s11588_s30 + $0x1e8] sm:$0xff] }
 0x5d1   : > { %10457 = vpow2.f32 %v4313_v8 }
 0x5d2   : > { %10459 = vpow2.f32 %v4311_v56  ;;  %v7844_v56 = vld [vmem:[%s11588_s30 + $0xf0] sm:$0xff] }
 0x5db   : > { %v11599_v17 = vpop.eup %10457 }
 0x5dc   : > { %v11601_v15 = vpop.eup %10459 }
 0x5dd   : > { %v11605_v58 = vpack.c.bf16 %v11599_v17, %v11601_v15 }
 0x5df   : > { %9724 = vmatprep.subr.bf16.mxu0 %v11605_v58  ;;  %9764 = vmatprep.subr.bf16.mxu1 %v11605_v58 }
 0x5e0   : > { %9726 = vmatpush3.bf16.msra.mxu0 %v11605_v58 }
 0x5e1   : > { %9728 = vmatprep.subr.bf16.mxu0 %v11605_v58 }
 0x5e3   : > { %9138 = vmatmul.mubr.msk.f32.vlgmr.msra.gmra.mrb[98].mxu0 %vm4317_vm5, %v4316_v1 }
 0x5e4   : > { %9730 = vmatpush3.bf16.msra.mxu0 %v11605_v58  ;;  %9144 = vmatprep.mubr.msk.f32.mxu0 %vm4317_vm5, %v7804_v20 }
 0x5e5   : > { %9748 = vmatprep.subr.bf16.mxu0 %v9747_v60 }
 0x5e7   : > { %9145 = vmatmul.mubr.msk.f32.vlgmr.msra.gmra.mrb[100].mxu0 %vm4317_vm5, %v7805_v5 }
 0x5e8   : > { %9750 = vmatpush3.bf16.msra.mxu0 %v9747_v60 }
 0x5e9   : > { %9752 = vmatprep.subr.bf16.mxu0 %v9751_v23 }
 0x5ec   : > { %9754 = vmatpush3.bf16.msra.mxu0 %v9751_v23  ;;  %v7854_v23 = vld [vmem:[%s11588_s30 + $0x110] sm:$0xff] }
 0x5ed   : > { %9756 = vmatprep.subr.bf16.mxu0 %v9755_v7 }
 0x5f0   : > { %9758 = vmatpush3.bf16.msra.mxu0 %v9755_v7  ;;  %v9811_v7 = vpack.c.bf16 %v7855_v4, %v7854_v23  ;;  %v7914_v23 = vld [vmem:[%s11588_s30 + $0x230] sm:$0xff]  ;;  %v7915_v4 = vld [vmem:[%s11588_s30 + $0x238] sm:$0xff] }
 0x5f1   : > { %9760 = vmatprep.subr.bf16.mxu0 %v9759_v27 }
 0x5f4   : > { %9762 = vmatpush3.bf16.msra.mxu0 %v9759_v27  ;;  %v7857_v27 = vld [vmem:[%s11588_s30 + $0x128] sm:$0xff] }
 0x5f5   : > { %9768 = vmatprep.subr.bf16.mxu0 %v9767_v40  ;;  %v9815_v29 = vpack.c.bf16 %v7857_v27, %v7856_v26  ;;  %v7918_v27 = vld [vmem:[%s665_s25] ss:$0 sm:$0xff] }
 0x6b6   : > { %v9139_v41 = vpop.f32.mrb[98].mxu0 }
 0x6b7   : > { %v4390_v18 = vpop.f32.mrb[99].mxu0 }
 0x6b8   : > { %9182 = vmatprep.mubr.msk.f32.mxu0 %vm1608_vm4, %v4390_v18  ;;  %v9819_v18 = vpack.c.bf16 %v7859_v32, %v7858_v31 }
 0x6b9   : > { %9183 = vmatmul.mubr.msk.f32.vlgmr.msra.gmra.mrb[102].mxu0 %vm1608_vm4, %v9139_v41 }
 0x6ba   : > { %v9146_v59 = vpop.f32.mrb[100].mxu0  ;;  %9770 = vmatpush3.bf16.msra.mxu0 %v9767_v40 }
 0x6bb   : > { %v4482_v55 = vpop.f32.mrb[101].mxu0  ;;  %9772 = vmatprep.subr.bf16.mxu0 %v9771_v34 }
 0x6bc   : > { %9163 = vmatprep.mubr.msk.f32.mxu1 %vm1608_vm4, %v4482_v55  ;;  %v7868_v55 = vld [vmem:[%s11588_s30 + $0x150] sm:$0xff] }
 0x6bd   : > { %9164 = vmatmul.mubr.msk.f32.vlgmr.msra.gmra.mrb[32].mxu1 %vm1608_vm4, %v9146_v59  ;;  %v9827_v59 = vpack.c.bf16 %v7867_v42, %v7866_v38 }
 0x6be   : > { %9766 = vmatpush3.bf16.msra.mxu1 %v11605_v58  ;;  %9189 = vmatprep.mubr.msk.f32.mxu1 %vm4317_vm5, %v7820_v25  ;;  %v7869_v25 = vld [vmem:[%s11588_s30 + $0x158] sm:$0xff] }
 0x6bf   : > { %9784 = vmatprep.subr.bf16.mxu1 %v11605_v58  ;;  %9774 = vmatpush3.bf16.msra.mxu0 %v9771_v34 }
 0x6c0   : > { %9776 = vmatprep.subr.bf16.mxu0 %v9775_v53 }
 0x6c1   : > { %9190 = vmatmul.mubr.msk.f32.vlgmr.msra.gmra.mrb[34].mxu1 %vm4317_vm5, %v7821_v43  ;;  %v7870_v43 = vld [vmem:[%s11588_s30 + $0x160] sm:$0xff] }
 0x6c2   : > { %9786 = vmatpush3.bf16.msra.mxu1 %v11605_v58  ;;  %9215 = vmatprep.mubr.msk.f32.mxu1 %vm4317_vm5, %v7834_v61  ;;  %v7871_v61 = vld [vmem:[%s11588_s30 + $0x168] sm:$0xff] }
 0x6c3   : > { %9804 = vmatprep.subr.bf16.mxu1 %v11605_v58  ;;  %9778 = vmatpush3.bf16.msra.mxu0 %v9775_v53  ;;  %v9831_v53 = vpack.c.bf16 %v7869_v25, %v7868_v55  ;;  %v11806_v25 = vstv %s5908_s17  ;;  %s674_s17 = scalar_lea.vmem %s12106_s14, %s10195_s24 }
 0x6c4   : > { %9780 = vmatprep.subr.bf16.mxu0 %v9779_v9 }
 0x6c5   : > { %9216 = vmatmul.mubr.msk.f32.vlgmr.msra.gmra.mrb[36].mxu1 %vm4317_vm5, %v7835_v44  ;;  %v9835_v44 = vpack.c.bf16 %v7871_v61, %v7870_v43 }
 0x6c6   : > { %9806 = vmatpush3.bf16.msra.mxu1 %v11605_v58  ;;  %9241 = vmatprep.mubr.msk.f32.mxu1 %vm4317_vm5, %v7848_v36  ;;  %v7872_v36 = vld [vmem:[%s11588_s30 + $0x170] sm:$0xff] }
 0x6c7   : > { %9824 = vmatprep.subr.bf16.mxu1 %v11605_v58  ;;  %9782 = vmatpush3.bf16.msra.mxu0 %v9779_v9  ;;  %v7886_v9 = vld [vmem:[%s11588_s30 + $0x1b0] sm:$0xff] }
 0x6c8   : > { %9788 = vmatprep.subr.bf16.mxu0 %v9787_v12  ;;  %v9859_v0 = vpack.c.bf16 %v7887_v2, %v7886_v9 }
 0x6c9   : > { %9242 = vmatmul.mubr.msk.f32.vlgmr.msra.gmra.mrb[38].mxu1 %vm4317_vm5, %v7849_v54  ;;  %v7873_v54 = vld [vmem:[%s11588_s30 + $0x178] sm:$0xff] }
 0x6ca   : > { %9826 = vmatpush3.bf16.msra.mxu1 %v11605_v58  ;;  %9267 = vmatprep.mubr.msk.f32.mxu1 %vm4317_vm5, %v7862_v21  ;;  %v9839_v21 = vpack.c.bf16 %v7873_v54, %v7872_v36 }
 0x6cb   : > { %9844 = vmatprep.subr.bf16.mxu1 %v11605_v58 }
 0x6cd   : > { %9268 = vmatmul.mubr.msk.f32.vlgmr.msra.gmra.mrb[40].mxu1 %vm4317_vm5, %v7863_v46  ;;  %v7880_v46 = vld [vmem:[%s11588_s30 + $0x180] sm:$0xff] }
 0x6ce   : > { %9846 = vmatpush3.bf16.msra.mxu1 %v11605_v58  ;;  %9293 = vmatprep.mubr.msk.f32.mxu1 %vm4317_vm5, %v7876_v19  ;;  %v7881_v19 = vld [vmem:[%s11588_s30 + $0x188] sm:$0xff] }
 0x6cf   : > { %9864 = vmatprep.subr.bf16.mxu1 %v11605_v58 }
 0x6d1   : > { %9294 = vmatmul.mubr.msk.f32.vlgmr.msra.gmra.mrb[42].mxu1 %vm4317_vm5, %v7877_v49  ;;  %v9847_v49 = vpack.c.bf16 %v7881_v19, %v7880_v46  ;;  %v7920_v46 = vld [vmem:[%s12104_s12 + $0x2] sm:$0x3] }
 0x6d2   : > { %9866 = vmatpush3.bf16.msra.mxu1 %v11605_v58  ;;  %9319 = vmatprep.mubr.msk.f32.mxu1 %vm4317_vm5, %v7890_v39  ;;  %v7882_v39 = vld [vmem:[%s11588_s30 + $0x190] sm:$0xff] }
 0x6d3   : > { %9884 = vmatprep.subr.bf16.mxu1 %v11605_v58 }
 0x6d5   : > { %9320 = vmatmul.mubr.msk.f32.vlgmr.msra.gmra.mrb[44].mxu1 %vm4317_vm5, %v7891_v47  ;;  %v7883_v47 = vld [vmem:[%s11588_s30 + $0x198] sm:$0xff] }
 0x6d6   : > { %9886 = vmatpush3.bf16.msra.mxu1 %v11605_v58  ;;  %9345 = vmatprep.mubr.msk.f32.mxu1 %vm4317_vm5, %v7904_v3  ;;  %v7845_v58 = vld [vmem:[%s11588_s30 + $0xf8] sm:$0xff]  ;;  %v9851_v3 = vpack.c.bf16 %v7883_v47, %v7882_v39 }
 0x6d7   : > { %v9799_v20 = vpack.c.bf16 %v7845_v58, %v7844_v56  ;;  %v7908_v58 = vld [vmem:[%s11588_s30 + $0x200] sm:$0xff] }
 0x6d9   : > { %9346 = vmatmul.mubr.msk.f32.vlgmr.msra.gmra.mrb[46].mxu1 %vm4317_vm5, %v7905_v28  ;;  %v7884_v28 = vld [vmem:[%s11588_s30 + $0x1a0] sm:$0xff] }
 0x6da   : > { %v9855_v45 = vpack.c.bf16 %v7885_v33, %v7884_v28 }
 0x790   : > { %v11715_v11 = vpop.f32.mrb[32].mxu1 }
 0x791   : > { %v11717_v37 = vpop.f32.mrb[33].mxu1 }
 0x794   : > { %v9191_v48 = vpop.f32.mrb[34].mxu1 }
 0x795   : > { %v4737_v13 = vpop.f32.mrb[35].mxu1 }
 0x796   : > { %9208 = vmatprep.mubr.msk.f32.mxu0 %vm1608_vm4, %v4737_v13  ;;  %v7897_v13 = vld [vmem:[%s11588_s30 + $0x1d8] sm:$0xff] }
 0x797   : > { %9209 = vmatmul.mubr.msk.f32.vlgmr.msra.gmra.mrb[102].mxu0 %vm1608_vm4, %v9191_v48  ;;  %v7896_v48 = vld [vmem:[%s11588_s30 + $0x1d0] sm:$0xff] }
 0x798   : > { %9790 = vmatpush3.bf16.msra.mxu0 %v9787_v12  ;;  %v9217_v6 = vpop.f32.mrb[36].mxu1  ;;  %v7894_v12 = vld [vmem:[%s11588_s30 + $0x1c0] sm:$0xff] }
 0x799   : > { %9792 = vmatprep.subr.bf16.mxu0 %v9791_v10  ;;  %v4913_v8 = vpop.f32.mrb[37].mxu1  ;;  %v9867_v30 = vpack.c.bf16 %v7895_v63, %v7894_v12 }
 0x79a   : > { %9234 = vmatprep.mubr.msk.f32.mxu0 %vm1608_vm4, %v4913_v8  ;;  %v7901_v8 = vld [vmem:[%s11588_s30 + $0x1f8] sm:$0xff] }
 0x79c   : > { %9794 = vmatpush3.bf16.msra.mxu0 %v9791_v10  ;;  %v9243_v1 = vpop.f32.mrb[38].mxu1  ;;  %v9871_v10 = vpack.c.bf16 %v7897_v13, %v7896_v48 }
 0x79d   : > { %9796 = vmatprep.subr.bf16.mxu0 %v9795_v16  ;;  %v5089_v5 = vpop.f32.mrb[39].mxu1 }
 0x7a0   : > { %9798 = vmatpush3.bf16.msra.mxu0 %v9795_v16  ;;  %v9269_v60 = vpop.f32.mrb[40].mxu1  ;;  %v7900_v16 = vld [vmem:[%s11588_s30 + $0x1f0] sm:$0xff] }
 0x7a1   : > { %9800 = vmatprep.subr.bf16.mxu0 %v9799_v20  ;;  %v5265_v62 = vpop.f32.mrb[41].mxu1  ;;  %v9879_v56 = vpack.c.bf16 %v7901_v8, %v7900_v16 }
 0x7a4   : > { %9802 = vmatpush3.bf16.msra.mxu0 %v9799_v20  ;;  %v11732_v57 = vpop.f32.mrb[42].mxu1 }
 0x7a5   : > { %9808 = vmatprep.subr.bf16.mxu0 %v9807_v35  ;;  %v5441_v24 = vpop.f32.mrb[43].mxu1 }
 0x7a7   : > { %9235 = vmatmul.mubr.msk.f32.vlgmr.msra.gmra.mrb[102].mxu0 %vm1608_vm4, %v9217_v6  ;;  %v9875_v6 = vpack.c.bf16 %v7899_v51, %v7898_v14 }
 0x7a8   : > { %9810 = vmatpush3.bf16.msra.mxu0 %v9807_v35  ;;  %9260 = vmatprep.mubr.msk.f32.mxu0 %vm1608_vm4, %v5089_v5  ;;  %v11738_v50 = vpop.f32.mrb[44].mxu1  ;;  %v7910_v5 = vld [vmem:[%s11588_s30 + $0x210] sm:$0xff]  ;;  %v7913_v35 = vld [vmem:[%s11588_s30 + $0x228] sm:$0xff] }
 0x7a9   : > { %9812 = vmatprep.subr.bf16.mxu0 %v9811_v7  ;;  %v11740_v40 = vpop.f32.mrb[45].mxu1  ;;  %v9891_v22 = vpack.c.bf16 %v7911_v52, %v7910_v5 }
 0x7ac   : > { %9814 = vmatpush3.bf16.msra.mxu0 %v9811_v7  ;;  %v11744_v41 = vpop.f32.mrb[46].mxu1  ;;  %v10541_v7 = vmov 0.0|0.0  }
 0x7ad   : > { %9816 = vmatprep.subr.bf16.mxu0 %v9815_v29  ;;  %v11746_v34 = vpop.f32.mrb[47].mxu1  ;;  %9903 = vmatprep.subr.bf16.mxu1 %v10541_v7 }
 0x7b0   : > { %9818 = vmatpush3.bf16.msra.mxu0 %v9815_v29 }
 0x7b1   : > { %9820 = vmatprep.subr.bf16.mxu0 %v9819_v18 }
 0x7b4   : > { %9822 = vmatpush3.bf16.msra.mxu0 %v9819_v18 }
 0x7b5   : > { %9828 = vmatprep.subr.bf16.mxu0 %v9827_v59 }
 0x7b7   : > { %9261 = vmatmul.mubr.msk.f32.vlgmr.msra.gmra.mrb[102].mxu0 %vm1608_vm4, %v9243_v1  ;;  %v7909_v1 = vld [vmem:[%s11588_s30 + $0x208] sm:$0xff] }
 0x7b8   : > { %9830 = vmatpush3.bf16.msra.mxu0 %v9827_v59  ;;  %9286 = vmatprep.mubr.msk.f32.mxu0 %vm1608_vm4, %v5265_v62  ;;  %v9887_v20 = vpack.c.bf16 %v7909_v1, %v7908_v58 }
 0x7b9   : > { %9832 = vmatprep.subr.bf16.mxu0 %v9831_v53 }
 0x7bc   : > { %9834 = vmatpush3.bf16.msra.mxu0 %v9831_v53 }
 0x7bd   : > { %9836 = vmatprep.subr.bf16.mxu0 %v9835_v44 }
 0x7c0   : > { %9838 = vmatpush3.bf16.msra.mxu0 %v9835_v44 }
 0x7c1   : > { %9840 = vmatprep.subr.bf16.mxu0 %v9839_v21 }
 0x7c4   : > { %9842 = vmatpush3.bf16.msra.mxu0 %v9839_v21  ;;  %v5922_v21 = vld [vmem:[%s12104_s12] sm:$0x3] }
 0x7c5   : > { %9848 = vmatprep.subr.bf16.mxu0 %v9847_v49 }
 0x7c7   : > { %9287 = vmatmul.mubr.msk.f32.vlgmr.msra.gmra.mrb[102].mxu0 %vm1608_vm4, %v9269_v60  ;;  %v7912_v60 = vld [vmem:[%s11588_s30 + $0x220] sm:$0xff]  ;;  %s11825_s30 = scalar_lea.vmem %s12105_s13, %s10194_s16 }
 0x7c8   : > { %9850 = vmatpush3.bf16.msra.mxu0 %v9847_v49  ;;  %9312 = vmatprep.mubr.msk.f32.mxu0 %vm1608_vm4, %v5441_v24  ;;  %v9895_v62 = vpack.c.bf16 %v7913_v35, %v7912_v60  ;;  %v10543_v24 = vmov 0.0   ;;  %v6131_v19 = vld [vmem:[%s11825_s30 + $0x188] sm:$0xff]  ;;  %v6137_v49 = vld [vmem:[%s11825_s30 + $0x1b8] sm:$0xff]  ;;  %v6130_v28 = vld [vmem:[%s11825_s30 + $0x180] sm:$0xff] }
 0x7c9   : > { %9852 = vmatprep.subr.bf16.mxu0 %v9851_v3  ;;  %9371 = vmatprep.mubr.msk.f32.mxu1 %vm10542_vm6, %v10543_v24  ;;  %v7978_v39 = vld [vmem:[%s11825_s30 + $0x488] sm:$0xff]  ;;  %v9909_v47 = vpack.c.bf16 %v6137_v49, %v6131_v19  ;;  %v6136_v33 = vld [vmem:[%s11825_s30 + $0x1b0] sm:$0xff]  ;;  %v7977_v2 = vld [vmem:[%s11825_s30 + $0x480] sm:$0xff] }
 0x7ca   : > { %v9911_v9 = vpack.c.bf16 %v6136_v33, %v6130_v28  ;;  %v6143_v12 = vld [vmem:[%s11825_s30 + $0x1e8] sm:$0xff]  ;;  %v7996_v13 = vld [vmem:[%s11825_s30 + $0x518] sm:$0xff]  ;;  %v6142_v51 = vld [vmem:[%s11825_s30 + $0x1e0] sm:$0xff] }
 0x7cb   : > { %v7990_v48 = vld [vmem:[%s11825_s30 + $0x4e8] sm:$0xff]  ;;  %v7989_v16 = vld [vmem:[%s11825_s30 + $0x4e0] sm:$0xff]  ;;  %v6161_v1 = vld [vmem:[%s11825_s30 + $0x278] sm:$0xff] }
 0x7cc   : > { %9854 = vmatpush3.bf16.msra.mxu0 %v9851_v3  ;;  %v7984_v3 = vld [vmem:[%s11825_s30 + $0x4b8] sm:$0xff]  ;;  %v10009_v14 = vpack.c.bf16 %v7996_v13, %v7990_v48  ;;  %v6155_v58 = vld [vmem:[%s11825_s30 + $0x248] sm:$0xff]  ;;  %v6154_v60 = vld [vmem:[%s11825_s30 + $0x240] sm:$0xff] }
 0x7cd   : > { %9856 = vmatprep.subr.bf16.mxu0 %v9855_v45  ;;  %v9917_v5 = vpack.c.bf16 %v6161_v1, %v6155_v58  ;;  %v8002_v52 = vld [vmem:[%s11825_s30 + $0x548] sm:$0xff]  ;;  %v6132_v49 = vld [vmem:[%s11825_s30 + $0x190] sm:$0xff]  ;;  %v6145_v28 = vld [vmem:[%s11825_s30 + $0x1f8] sm:$0xff] }
 0x7ce   : > { %v7994_v33 = vld [vmem:[%s11825_s30 + $0x508] sm:$0xff]  ;;  %v7993_v48 = vld [vmem:[%s11825_s30 + $0x500] sm:$0xff]  ;;  %v7999_v13 = vld [vmem:[%s11825_s30 + $0x530] sm:$0xff] }
 0x7cf   : > { %v6156_v58 = vld [vmem:[%s11825_s30 + $0x250] sm:$0xff]  ;;  %v6162_v1 = vld [vmem:[%s11825_s30 + $0x280] sm:$0xff] }
 0x7d0   : > { %9858 = vmatpush3.bf16.msra.mxu0 %v9855_v45  ;;  %v10005_v45 = vpack.c.bf16 %v7984_v3, %v7978_v39  ;;  %v6138_v39 = vld [vmem:[%s11825_s30 + $0x1c0] sm:$0xff]  ;;  %v7987_v3 = vld [vmem:[%s11825_s30 + $0x4d0] sm:$0xff] }
 0x7d1   : > { %9860 = vmatprep.subr.bf16.mxu0 %v9859_v0 }
 0x7d4   : > { %9862 = vmatpush3.bf16.msra.mxu0 %v9859_v0  ;;  %v7983_v0 = vld [vmem:[%s11825_s30 + $0x4b0] sm:$0xff] }
 0x7d5   : > { %9868 = vmatprep.subr.bf16.mxu0 %v9867_v30  ;;  %v10007_v63 = vpack.c.bf16 %v7983_v0, %v7977_v2  ;;  %v6144_v0 = vld [vmem:[%s11825_s30 + $0x1f0] sm:$0xff] }
 0x7d7   : > { %9313 = vmatmul.mubr.msk.f32.vlgmr.msra.gmra.mrb[102].mxu0 %vm1608_vm4, %v11732_v57  ;;  %v9899_v57 = vpack.c.bf16 %v7915_v4, %v7914_v23  ;;  %v8001_v23 = vld [vmem:[%s11825_s30 + $0x540] sm:$0xff]  ;;  %v8007_v4 = vld [vmem:[%s11825_s30 + $0x570] sm:$0xff] }
 0x7d8   : > { %9870 = vmatpush3.bf16.msra.mxu0 %v9867_v30  ;;  %9338 = vmatprep.mubr.msk.f32.mxu0 %vm1608_vm4, %v11740_v40  ;;  %v6149_v30 = vld [vmem:[%s11825_s30 + $0x218] sm:$0xff] }
 0x7d9   : > { %9872 = vmatprep.subr.bf16.mxu0 %v9871_v10 }
 0x7dc   : > { %9874 = vmatpush3.bf16.msra.mxu0 %v9871_v10  ;;  %v9913_v10 = vpack.c.bf16 %v6149_v30, %v6143_v12  ;;  %v6150_v12 = vld [vmem:[%s11825_s30 + $0x220] sm:$0xff] }
 0x7dd   : > { %9876 = vmatprep.subr.bf16.mxu0 %v9875_v6 }
 0x7e0   : > { %9878 = vmatpush3.bf16.msra.mxu0 %v9875_v6  ;;  %v6148_v6 = vld [vmem:[%s11825_s30 + $0x210] sm:$0xff] }
 0x7e1   : > { %9880 = vmatprep.subr.bf16.mxu0 %v9879_v56  ;;  %v9915_v8 = vpack.c.bf16 %v6148_v6, %v6142_v51  ;;  %v6163_v51 = vld [vmem:[%s11825_s30 + $0x288] sm:$0xff] }
 0x7e2   : > { %v8006_v6 = vld [vmem:[%s11825_s30 + $0x568] sm:$0xff] }
 0x7e4   : > { %9882 = vmatpush3.bf16.msra.mxu0 %v9879_v56  ;;  %v7995_v56 = vld [vmem:[%s11825_s30 + $0x510] sm:$0xff] }
 0x7e5   : > { %9888 = vmatprep.subr.bf16.mxu0 %v9887_v20 }
 0x7e7   : > { %9339 = vmatmul.mubr.msk.f32.vlgmr.msra.gmra.mrb[102].mxu0 %vm1608_vm4, %v11738_v50 }
 0x7e8   : > { %9890 = vmatpush3.bf16.msra.mxu0 %v9887_v20  ;;  %9364 = vmatprep.mubr.msk.f32.mxu0 %vm1608_vm4, %v11746_v34  ;;  %v10011_v20 = vpack.c.bf16 %v7995_v56, %v7989_v16  ;;  %v8012_v16 = vld [vmem:[%s11825_s30 + $0x598] sm:$0xff]  ;;  %v10043_v56 = vpack.c.bf16 %v7999_v13, %v7993_v48 }
 0x7e9   : > { %9892 = vmatprep.subr.bf16.mxu0 %v9891_v22 }
 0x7ec   : > { %9894 = vmatpush3.bf16.msra.mxu0 %v9891_v22  ;;  %v8008_v22 = vld [vmem:[%s11825_s30 + $0x578] sm:$0xff] }
 0x7ed   : > { %9896 = vmatprep.subr.bf16.mxu0 %v9895_v62  ;;  %v10013_v35 = vpack.c.bf16 %v8008_v22, %v8002_v52  ;;  %v8005_v52 = vld [vmem:[%s11825_s30 + $0x560] sm:$0xff]  ;;  %v8011_v22 = vld [vmem:[%s11825_s30 + $0x590] sm:$0xff] }
 0x7f0   : > { %9898 = vmatpush3.bf16.msra.mxu0 %v9895_v62  ;;  %v6160_v62 = vld [vmem:[%s11825_s30 + $0x270] sm:$0xff] }
 0x7f1   : > { %9900 = vmatprep.subr.bf16.mxu0 %v9899_v57 }
 0x7f4   : > { %9902 = vmatpush3.bf16.msra.mxu0 %v9899_v57  ;;  %v9919_v57 = vpack.c.bf16 %v6160_v62, %v6154_v60  ;;  %v6169_v60 = vld [vmem:[%s11825_s30 + $0x2b8] sm:$0xff]  ;;  %v8018_v62 = vld [vmem:[%s11825_s30 + $0x5c8] sm:$0xff] }
 0x7f5   : > { %10006 = vmatprep.subr.bf16.mxu0 %v10005_v45  ;;  %v8000_v45 = vld [vmem:[%s11825_s30 + $0x538] sm:$0xff] }
 0x7f6   : > { %v10041_v30 = vpack.c.bf16 %v8000_v45, %v7994_v33  ;;  %v6159_v33 = vld [vmem:[%s11825_s30 + $0x268] sm:$0xff]  ;;  %v6165_v45 = vld [vmem:[%s11825_s30 + $0x298] sm:$0xff] }
 0x7f7   : > { %9365 = vmatmul.mubr.msk.f32.vlgmr.msra.gmra.mrb[102].mxu0 %vm1608_vm4, %v11744_v41  ;;  %v9949_v48 = vpack.c.bf16 %v6165_v45, %v6159_v33  ;;  %v6119_v33 = vld [vmem:[%s11825_s30 + $0x128] sm:$0xff]  ;;  %v6125_v45 = vld [vmem:[%s11825_s30 + $0x158] sm:$0xff] }
 0x7f8   : > { %6844 = vmatprep.mubr.f32.mxu0 %v10543_v24  ;;  %10008 = vmatpush1.bf16.msra.mxu0 %v10007_v63 }
 0x7f9   : > { %10010 = vmatprep.subr.bf16.mxu0 %v10009_v14 }
 0x7fc   : > { %10012 = vmatpush1.bf16.msra.mxu0 %v10011_v20 }
 0x7fd   : > { %10014 = vmatprep.subr.bf16.mxu0 %v10013_v35  ;;  %v6175_v35 = vld [vmem:[%s11825_s30 + $0x2e8] sm:$0xff] }
 0x8ca   : > { %v9366_v26 = vpop.f32.mrb[102].mxu0 }
 0x8cb   : > { %v10101_v50 = vadd.f32 %v9366_v26, %v11715_v11  ;;  %v5883_v29 = vpop.f32.mrb[103].mxu0  ;;  %v6173_v26 = vld [vmem:[%s11825_s30 + $0x2d8] sm:$0xff] }
 0x8cc   : > { %v10102_v40 = vadd.f32 %v5883_v29, %v11717_v37 }
 0x8cd   : > { %v5902_v31 = vadd.f32 %v10101_v50, %v7918_v27  ;;  %v10015_v50 = vpack.c.bf16 %v8007_v4, %v8001_v23  ;;  %v8024_v23 = vld [vmem:[%s11825_s30 + $0x5f8] sm:$0xff]  ;;  %v9935_v4 = vpack.c.bf16 %v6162_v1, %v6156_v58 }
 0x8ce   : > { %v5901_v32 = vadd.f32 %v10102_v40, %v7918_v27  ;;  %v8014_v27 = vld [vmem:[%s11825_s30 + $0x5a8] sm:$0xff]  ;;  %v8020_v40 = vld [vmem:[%s11825_s30 + $0x5d8] sm:$0xff] }
 0x8cf   : > { %v5904_v41 = vmax.f32 %v5902_v31, 0.0  ;;  %v6166_v31 = vld [vmem:[%s11825_s30 + $0x2a0] sm:$0xff]  ;;  %10016 = vmatpush1.bf16.msra.mxu0 %v10015_v50  ;;  %v9937_v50 = vpack.c.bf16 %v6175_v35, %v6169_v60  ;;  %v7971_v35 = vld [vmem:[%s11825_s30 + $0x450] sm:$0xff] }
 0x8d0   : > { %v5903_v18 = vmax.f32 %v5901_v32, 0.0  ;;  %v6172_v32 = vld [vmem:[%s11825_s30 + $0x2d0] sm:$0xff]  ;;  %v7965_v60 = vld [vmem:[%s11825_s30 + $0x420] sm:$0xff] }
 0x8d1   : > { %v5906_v34 = vadd.f32 %v11599_v17, %v5904_v41  ;;  %v10017_v41 = vpack.c.bf16 %v8020_v40, %v8014_v27  ;;  %v8017_v40 = vld [vmem:[%s11825_s30 + $0x5c0] sm:$0xff] }
 0x8d2   : > { %v5905_v38 = vadd.f32 %v11601_v15, %v5903_v18  ;;  %v8013_v18 = vld [vmem:[%s11825_s30 + $0x5a0] sm:$0xff] }
 0x8d3   : > { %v5910_v42 = vmax.f32 %v5906_v34, 1e-06  ;;  %v8019_v34 = vld [vmem:[%s11825_s30 + $0x5d0] sm:$0xff]  ;;  %10018 = vmatprep.subr.bf16.mxu0 %v10017_v41  ;;  %v6141_v41 = vld [vmem:[%s11825_s30 + $0x1d8] sm:$0xff] }
 0x8d4   : > { %v5909_v59 = vmax.f32 %v5905_v38, 1e-06  ;;  %v6133_v38 = vld [vmem:[%s11825_s30 + $0x198] sm:$0xff] }
 0x8d5   : > { %10461 = vlog2.f32 %v5910_v42  ;;  %v6139_v42 = vld [vmem:[%s11825_s30 + $0x1c8] sm:$0xff] }
 0x8d6   : > { %10463 = vlog2.f32 %v5909_v59  ;;  %v7982_v59 = vld [vmem:[%s11825_s30 + $0x4a8] sm:$0xff] }
 0x8df   : > { %v10462_v55 = vpop.eup %10461 }
 0x8e0   : > { %v10464_v11 = vpop.eup %10463  ;;  %v5914_v53 = vmul.f32 0.6931472, %v10462_v55  ;;  %v7988_v55 = vld [vmem:[%s11825_s30 + $0x4d8] sm:$0xff] }
 0x8e1   : > { %v5912_v37 = vmul.f32 0.6931472, %v10464_v11  ;;  %v9923_v11 = vpack.c.bf16 %v6172_v32, %v6166_v31  ;;  %v8023_v31 = vld [vmem:[%s11825_s30 + $0x5f0] sm:$0xff]  ;;  %v6135_v32 = vld [vmem:[%s11825_s30 + $0x1a8] sm:$0xff] }
 0x8e2   : > { %v5917_v43 = vmul.f32 %v11806_v25, %v5914_v53  ;;  %v10019_v53 = vpack.c.bf16 %v8019_v34, %v8013_v18  ;;  %v7930_v18 = vld [vmem:[%s11825_s30 + $0x308] sm:$0xff]  ;;  %v7936_v34 = vld [vmem:[%s11825_s30 + $0x338] sm:$0xff] }
 0x8e3   : > { %v5916_v61 = vmul.f32 %v11806_v25, %v5912_v37  ;;  %v9925_v37 = vpack.c.bf16 %v6139_v42, %v6133_v38 }
 0x8e4   : > { %v5920_v44 = vmul.f32 1.442695, %v5917_v43  ;;  %v10037_v43 = vpack.c.bf16 %v7988_v55, %v7982_v59  ;;  %10020 = vmatpush1.bf16.msra.mxu0 %v10019_v53  ;;  %v10051_v59 = vpack.c.bf16 %v8023_v31, %v8017_v40  ;;  %v6134_v55 = vld [vmem:[%s11825_s30 + $0x1a0] sm:$0xff]  ;;  %v9941_v53 = vpack.c.bf16 %v6141_v41, %v6135_v32  ;;  %v7939_v32 = vld [vmem:[%s11825_s30 + $0x350] sm:$0xff]  ;;  %v6095_v41 = vld [vmem:[%s11825_s30 + $0x68] sm:$0xff] }
 0x8e5   : > { %v5918_v17 = vmul.f32 1.442695, %v5916_v61  ;;  %v7933_v31 = vld [vmem:[%s11825_s30 + $0x320] sm:$0xff] }
 0x8e6   : > { %10465 = vpow2.f32 %v5920_v44  ;;  %10038 = vmatprep.subr.bf16.mxu0 %v10037_v43  ;;  %v7929_v43 = vld [vmem:[%s11825_s30 + $0x300] sm:$0xff] }
 0x8e7   : > { %10467 = vpow2.f32 %v5918_v17 }
 0x8f0   : > { %v10466_v15 = vpop.eup %10465 }
 0x8f1   : > { %v10468_v36 = vpop.eup %10467 }
 0x8f2   : > { %v9904_v54 = vpack.c.bf16 %v10466_v15, %v10468_v36 }
 0x8f4   : > { %9905 = vmatpush3.bf16.msra.mxu1 %v9904_v54 }
 0x8f5   : > { %9906 = vmatprep.subr.bf16.mxu1 %v10541_v7  ;;  %v6167_v7 = vld [vmem:[%s11825_s30 + $0x2a8] sm:$0xff] }
 0x8f6   : > { %v9921_v29 = vpack.c.bf16 %v6173_v26, %v6167_v7  ;;  %v6168_v7 = vld [vmem:[%s11825_s30 + $0x2b0] sm:$0xff]  ;;  %v6174_v26 = vld [vmem:[%s11825_s30 + $0x2e0] sm:$0xff] }
 0x8f7   : > { %9372 = vmatmul.mubr.msk.f32.vlgmr.msra.gmra.mrb[48].mxu1 %vm4317_vm5, %v5922_v21  ;;  %v9939_v42 = vpack.c.bf16 %v6174_v26, %v6168_v7  ;;  %v10067_v26 = vpack.c.bf16 %v7971_v35, %v7965_v60  ;;  %v6096_v60 = vld [vmem:[%s11825_s30 + $0x70] sm:$0xff]  ;;  %v6102_v35 = vld [vmem:[%s11825_s30 + $0xa0] sm:$0xff] }
 0x8f8   : > { %9908 = vmatpush3.bf16.msra.mxu1 %v9904_v54  ;;  %9378 = vmatprep.mubr.msk.f32.mxu1 %vm10542_vm6, %v10543_v24 }
 0x8f9   : > { %9910 = vmatprep.subr.bf16.mxu1 %v9909_v47  ;;  %v7981_v47 = vld [vmem:[%s11825_s30 + $0x4a0] sm:$0xff] }
 0x8fa   : > { %v10039_v2 = vpack.c.bf16 %v7987_v3, %v7981_v47 }
 0x8fb   : > { %9379 = vmatmul.mubr.msk.f32.vlgmr.msra.gmra.mrb[50].mxu1 %vm4317_vm5, %v7920_v46 }
 0x8fc   : > { %6245 = vmatprep.mubr.f32.mxu1 %v10543_v24  ;;  %9912 = vmatpush1.bf16.msra.mxu1 %v9911_v9  ;;  %v9927_v9 = vpack.c.bf16 %v6138_v39, %v6132_v49  ;;  %v6146_v49 = vld [vmem:[%s11825_s30 + $0x200] sm:$0xff]  ;;  %v6152_v39 = vld [vmem:[%s11825_s30 + $0x230] sm:$0xff] }
 0x8fd   : > { %9914 = vmatprep.subr.bf16.mxu1 %v9913_v10  ;;  %v6157_v10 = vld [vmem:[%s11825_s30 + $0x258] sm:$0xff] }
 0x8fe   : > { %v9933_v20 = vpack.c.bf16 %v6163_v51, %v6157_v10  ;;  %v7953_v10 = vld [vmem:[%s11825_s30 + $0x3c0] sm:$0xff]  ;;  %v7959_v51 = vld [vmem:[%s11825_s30 + $0x3f0] sm:$0xff] }
 0x8ff   : > { %v10063_v1 = vpack.c.bf16 %v7959_v51, %v7953_v10  ;;  %v7975_v10 = vld [vmem:[%s11825_s30 + $0x470] sm:$0xff]  ;;  %v6085_v51 = vld [vmem:[%s11825_s30 + $0x18] sm:$0xff] }
 0x900   : > { %9916 = vmatpush1.bf16.msra.mxu1 %v9915_v8  ;;  %v9931_v8 = vpack.c.bf16 %v6150_v12, %v6144_v0  ;;  %v9947_v0 = vpack.c.bf16 %v6152_v39, %v6146_v49  ;;  %v6106_v49 = vld [vmem:[%s11825_s30 + $0xc0] sm:$0xff]  ;;  %v6112_v39 = vld [vmem:[%s11825_s30 + $0xf0] sm:$0xff] }
 0x901   : > { %9918 = vmatprep.subr.bf16.mxu1 %v9917_v5  ;;  %v10045_v5 = vpack.c.bf16 %v8012_v16, %v8006_v6  ;;  %v6171_v6 = vld [vmem:[%s11825_s30 + $0x2c8] sm:$0xff]  ;;  %v6177_v16 = vld [vmem:[%s11825_s30 + $0x2f8] sm:$0xff] }
 0x904   : > { %9920 = vmatpush1.bf16.msra.mxu1 %v9919_v57  ;;  %v10047_v57 = vpack.c.bf16 %v8011_v22, %v8005_v52  ;;  %v9953_v52 = vpack.c.bf16 %v6177_v16, %v6171_v6  ;;  %v6091_v6 = vld [vmem:[%s11825_s30 + $0x48] sm:$0xff] }
 0x905   : > { %9922 = vmatprep.subr.bf16.mxu1 %v9921_v29  ;;  %v10049_v29 = vpack.c.bf16 %v8024_v23, %v8018_v62  ;;  %v6083_v62 = vld [vmem:[%s11825_s30 + $0x8] sm:$0xff]  ;;  %v6089_v23 = vld [vmem:[%s11825_s30 + $0x38] sm:$0xff] }
 0x908   : > { %9924 = vmatpush1.bf16.msra.mxu1 %v9923_v11  ;;  %v6140_v11 = vld [vmem:[%s11825_s30 + $0x1d0] sm:$0xff] }
 0x909   : > { %9926 = vmatprep.subr.bf16.mxu1 %v9925_v37  ;;  %v10053_v37 = vpack.c.bf16 %v7936_v34, %v7930_v18  ;;  %v6101_v18 = vld [vmem:[%s11825_s30 + $0x98] sm:$0xff]  ;;  %v7946_v34 = vld [vmem:[%s11825_s30 + $0x388] sm:$0xff] }
 0x9ca   : > { %v5992_v61 = vpop.f32.mrb[48].mxu1 }
 0x9cb   : > { %v9373_v44 = vpop.f32.mrb[49].mxu1 }
 0x9cc   : > { %v6147_v44 = vld [vmem:[%s11825_s30 + $0x208] sm:$0xff] }
 0x9ce   : > { %v6073_v17 = vpop.f32.mrb[50].mxu1 }
 0x9cf   : > { %10469 = vlog2.f32 %v6073_v17  ;;  %v9380_v15 = vpop.f32.mrb[51].mxu1  ;;  %v6153_v17 = vld [vmem:[%s11825_s30 + $0x238] sm:$0xff] }
 0x9d0   : > { %10471 = vrcp.f32 %v11806_v25  ;;  %v6151_v25 = vld [vmem:[%s11825_s30 + $0x228] sm:$0xff]  ;;  %v9945_v47 = vpack.c.bf16 %v6153_v17, %v6147_v44 }
 0x9d1   : > { %v9929_v63 = vpack.c.bf16 %v6151_v25, %v6145_v28  ;;  %v7942_v15 = vld [vmem:[%s11825_s30 + $0x368] sm:$0xff]  ;;  %v7941_v28 = vld [vmem:[%s11825_s30 + $0x360] sm:$0xff]  ;;  %v7947_v25 = vld [vmem:[%s11825_s30 + $0x390] sm:$0xff] }
 0x9d2   : > { %v10059_v12 = vpack.c.bf16 %v7947_v25, %v7941_v28  ;;  %v6107_v44 = vld [vmem:[%s11825_s30 + $0xc8] sm:$0xff]  ;;  %v7957_v28 = vld [vmem:[%s11825_s30 + $0x3e0] sm:$0xff]  ;;  %v7963_v25 = vld [vmem:[%s11825_s30 + $0x410] sm:$0xff] }
 0x9d9   : > { %v10470_v36 = vpop.eup %10469 }
 0x9da   : > { %v6078_v54 = vmul.f32 0.6931472, %v10470_v36  ;;  %v11864_v21 = vpop.eup %10471  ;;  %v7948_v36 = vld [vmem:[%s11825_s30 + $0x398] sm:$0xff] }
 0x9db   : > { %v10057_v3 = vpack.c.bf16 %v7948_v36, %v7942_v15  ;;  %v6113_v15 = vld [vmem:[%s11825_s30 + $0xf8] sm:$0xff]  ;;  %v7958_v36 = vld [vmem:[%s11825_s30 + $0x3e8] sm:$0xff] }
 0x9dc   : > { %v6079_v46 = vmul.f32 %v11864_v21, %v6078_v54 }
 0x9de   : > { %v6080_v19 = vmul.f32 1.442695, %v6079_v46  ;;  %v9943_v46 = vpack.c.bf16 %v6140_v11, %v6134_v55  ;;  %v6094_v55 = vld [vmem:[%s11825_s30 + $0x60] sm:$0xff]  ;;  %v6100_v11 = vld [vmem:[%s11825_s30 + $0x90] sm:$0xff] }
 0x9e0   : > { %10473 = vpow2.f32 %v6080_v19 }
 0x9e1   : > { %10475 = vlog2.f32 %v5992_v61  ;;  %v7935_v61 = vld [vmem:[%s11825_s30 + $0x330] sm:$0xff] }
 0x9e2   : > { %v10055_v19 = vpack.c.bf16 %v7935_v61, %v7929_v43  ;;  %v7945_v43 = vld [vmem:[%s11825_s30 + $0x380] sm:$0xff]  ;;  %v7951_v61 = vld [vmem:[%s11825_s30 + $0x3b0] sm:$0xff] }
 0x9ea   : > { %v11880_v14 = vpop.eup %10473 }
 0x9eb   : > { %7922 = vmatmul.mubr.msk.f32.vlgmr.msra.gmra.mrb[52].mxu1 %vm1608_vm4, %v11880_v14  ;;  %8025 = vmatmul.mubr.msk.f32.vlgmr.msra.gmra.mrb[104].mxu0 %vm1608_vm4, %v11880_v14  ;;  %v10476_v27 = vpop.eup %10475 }
 0x9ec   : > { %9928 = vmatpush1.bf16.msra.mxu1 %v9927_v9  ;;  %10040 = vmatpush1.bf16.msra.mxu0 %v10039_v2  ;;  %v5997_v38 = vmul.f32 0.6931472, %v10476_v27  ;;  %v7954_v9 = vld [vmem:[%s11825_s30 + $0x3c8] sm:$0xff]  ;;  %v6082_v27 = vld [vmem:[%s11825_s30] sm:$0xff] }
 0x9ed   : > { %9930 = vmatprep.subr.bf16.mxu1 %v9929_v63  ;;  %10042 = vmatprep.subr.bf16.mxu0 %v10041_v30  ;;  %v6158_v63 = vld [vmem:[%s11825_s30 + $0x260] sm:$0xff]  ;;  %v6164_v30 = vld [vmem:[%s11825_s30 + $0x290] sm:$0xff] }
 0x9ee   : > { %6316 = vmatprep.mubr.f32.mxu1 %v10543_v24  ;;  %6986 = vmatprep.mubr.f32.mxu0 %v10543_v24  ;;  %v5999_v54 = vmul.f32 %v11864_v21, %v5997_v38  ;;  %v7960_v21 = vld [vmem:[%s11825_s30 + $0x3f8] sm:$0xff]  ;;  %v9951_v58 = vpack.c.bf16 %v6164_v30, %v6158_v63  ;;  %v9969_v63 = vpack.c.bf16 %v6125_v45, %v6119_v33  ;;  %v7986_v45 = vld [vmem:[%s11825_s30 + $0x4c8] sm:$0xff] }
 0x9ef   : > { %v10061_v13 = vpack.c.bf16 %v7960_v21, %v7954_v9  ;;  %v7952_v38 = vld [vmem:[%s11825_s30 + $0x3b8] sm:$0xff]  ;;  %v7970_v9 = vld [vmem:[%s11825_s30 + $0x448] sm:$0xff] }
 0x9f0   : > { %9932 = vmatpush1.bf16.msra.mxu1 %v9931_v8  ;;  %10044 = vmatpush1.bf16.msra.mxu0 %v10043_v56  ;;  %v6000_v2 = vmul.f32 1.442695, %v5999_v54  ;;  %v7966_v8 = vld [vmem:[%s11825_s30 + $0x428] sm:$0xff]  ;;  %v7972_v56 = vld [vmem:[%s11825_s30 + $0x458] sm:$0xff] }
 0x9f1   : > { %9934 = vmatprep.subr.bf16.mxu1 %v9933_v20  ;;  %10046 = vmatprep.subr.bf16.mxu0 %v10045_v5  ;;  %v6170_v20 = vld [vmem:[%s11825_s30 + $0x2c0] sm:$0xff]  ;;  %v6176_v5 = vld [vmem:[%s11825_s30 + $0x2f0] sm:$0xff]  ;;  %v10065_v22 = vpack.c.bf16 %v7972_v56, %v7966_v8  ;;  %v7964_v54 = vld [vmem:[%s11825_s30 + $0x418] sm:$0xff]  ;;  %v9973_v56 = vpack.c.bf16 %v6091_v6, %v6085_v51 }
 0x9f2   : > { %10477 = vpow2.f32 %v6000_v2  ;;  %v9955_v7 = vpack.c.bf16 %v6176_v5, %v6170_v20  ;;  %v7976_v21 = vld [vmem:[%s11825_s30 + $0x478] sm:$0xff]  ;;  %v9967_v2 = vpack.c.bf16 %v6112_v39, %v6106_v49  ;;  %v6103_v5 = vld [vmem:[%s11825_s30 + $0xa8] sm:$0xff] }
 0x9f3   : > { %v10097_v30 = vpack.c.bf16 %v7976_v21, %v7970_v9  ;;  %v6097_v20 = vld [vmem:[%s11825_s30 + $0x78] sm:$0xff]  ;;  %v6123_v49 = vld [vmem:[%s11825_s30 + $0x148] sm:$0xff] }
 0x9f4   : > { %9936 = vmatpush1.bf16.msra.mxu1 %v9935_v4  ;;  %10048 = vmatpush1.bf16.msra.mxu0 %v10047_v57  ;;  %v7934_v4 = vld [vmem:[%s11825_s30 + $0x328] sm:$0xff]  ;;  %v7940_v57 = vld [vmem:[%s11825_s30 + $0x358] sm:$0xff] }
 0x9f5   : > { %9938 = vmatprep.subr.bf16.mxu1 %v9937_v50  ;;  %10050 = vmatprep.subr.bf16.mxu0 %v10049_v29  ;;  %v6088_v50 = vld [vmem:[%s11825_s30 + $0x30] sm:$0xff]  ;;  %v9957_v29 = vpack.c.bf16 %v6089_v23, %v6083_v62  ;;  %v10085_v40 = vpack.c.bf16 %v7940_v57, %v7934_v4  ;;  %v6109_v62 = vld [vmem:[%s11825_s30 + $0xd8] sm:$0xff]  ;;  %v6115_v23 = vld [vmem:[%s11825_s30 + $0x108] sm:$0xff]  ;;  %v9979_v4 = vpack.c.bf16 %v6102_v35, %v6096_v60 }
 0x9f6   : > { %v9981_v57 = vpack.c.bf16 %v6115_v23, %v6109_v62  ;;  %v6129_v39 = vld [vmem:[%s11825_s30 + $0x178] sm:$0xff]  ;;  %v8010_v6 = vld [vmem:[%s11825_s30 + $0x588] sm:$0xff]  ;;  %v8021_v60 = vld [vmem:[%s11825_s30 + $0x5e0] sm:$0xff] }
 0x9f7   : > { %v7980_v33 = vld [vmem:[%s11825_s30 + $0x498] sm:$0xff]  ;;  %v7938_v62 = vld [vmem:[%s11825_s30 + $0x348] sm:$0xff] }
 0x9f8   : > { %9940 = vmatpush1.bf16.msra.mxu1 %v9939_v42  ;;  %10052 = vmatpush1.bf16.msra.mxu0 %v10051_v59  ;;  %v9959_v42 = vpack.c.bf16 %v6088_v50, %v6082_v27  ;;  %v10087_v59 = vpack.c.bf16 %v7939_v32, %v7933_v31  ;;  %v6121_v27 = vld [vmem:[%s11825_s30 + $0x138] sm:$0xff]  ;;  %v6127_v50 = vld [vmem:[%s11825_s30 + $0x168] sm:$0xff]  ;;  %v6120_v31 = vld [vmem:[%s11825_s30 + $0x130] sm:$0xff]  ;;  %v10021_v21 = vpack.c.bf16 %v7986_v45, %v7980_v33 }
 0x9f9   : > { %9942 = vmatprep.subr.bf16.mxu1 %v9941_v53  ;;  %10054 = vmatprep.subr.bf16.mxu0 %v10053_v37  ;;  %v9961_v53 = vpack.c.bf16 %v6101_v18, %v6095_v41  ;;  %v10089_v37 = vpack.c.bf16 %v7952_v38, %v7946_v34  ;;  %v6126_v32 = vld [vmem:[%s11825_s30 + $0x160] sm:$0xff]  ;;  %v6087_v41 = vld [vmem:[%s11825_s30 + $0x28] sm:$0xff]  ;;  %v6093_v18 = vld [vmem:[%s11825_s30 + $0x58] sm:$0xff] }
 0x9fa   : > { %v9987_v34 = vpack.c.bf16 %v6126_v32, %v6120_v31  ;;  %v9989_v38 = vpack.c.bf16 %v6093_v18, %v6087_v41  ;;  %v8004_v51 = vld [vmem:[%s11825_s30 + $0x558] sm:$0xff]  ;;  %v7949_v31 = vld [vmem:[%s11825_s30 + $0x3a0] sm:$0xff]  ;;  %v7962_v41 = vld [vmem:[%s11825_s30 + $0x408] sm:$0xff] }
 0x9fb   : > { %7923 = vmatmul.mubr.msk.f32.vlgmr.msra.gmra.mrb[54].mxu1 %vm1608_vm4, %v11880_v14  ;;  %8027 = vmatmul.mubr.msk.f32.vlgmr.msra.gmra.mrb[106].mxu0 %vm1608_vm4, %v11880_v14  ;;  %v7932_v35 = vld [vmem:[%s11825_s30 + $0x318] sm:$0xff] }
 0x9fc   : > { %9944 = vmatpush1.bf16.msra.mxu1 %v9943_v46  ;;  %10056 = vmatpush1.bf16.msra.mxu0 %v10055_v19  ;;  %v11959_v17 = vpop.eup %10477  ;;  %v9963_v46 = vpack.c.bf16 %v6100_v11, %v6094_v55  ;;  %v10091_v19 = vpack.c.bf16 %v7951_v61, %v7945_v43  ;;  %v6099_v55 = vld [vmem:[%s11825_s30 + $0x88] sm:$0xff]  ;;  %v6105_v11 = vld [vmem:[%s11825_s30 + $0xb8] sm:$0xff]  ;;  %v6098_v43 = vld [vmem:[%s11825_s30 + $0x80] sm:$0xff] }
 0x9fd   : > { %9946 = vmatprep.subr.bf16.mxu1 %v9945_v47  ;;  %10058 = vmatprep.subr.bf16.mxu0 %v10057_v3  ;;  %v9965_v47 = vpack.c.bf16 %v6113_v15, %v6107_v44  ;;  %v10093_v3 = vpack.c.bf16 %v7964_v54, %v7958_v36  ;;  %v6104_v61 = vld [vmem:[%s11825_s30 + $0xb0] sm:$0xff]  ;;  %v6111_v44 = vld [vmem:[%s11825_s30 + $0xe8] sm:$0xff]  ;;  %v6117_v15 = vld [vmem:[%s11825_s30 + $0x118] sm:$0xff] }
 0x9fe   : > { %6387 = vmatprep.mubr.f32.mxu1 %v10543_v24  ;;  %7057 = vmatprep.mubr.f32.mxu0 %v10543_v24  ;;  %v9995_v36 = vpack.c.bf16 %v6104_v61, %v6098_v43  ;;  %v9997_v54 = vpack.c.bf16 %v6117_v15, %v6111_v44  ;;  %v7956_v32 = vld [vmem:[%s11825_s30 + $0x3d8] sm:$0xff]  ;;  %v7973_v43 = vld [vmem:[%s11825_s30 + $0x460] sm:$0xff] }
 0x9ff   : > { %v8031_v15 = vld [vmem:[%s674_s17 + $0x6] sm:$0x3f] }
 0xa00   : > { %9948 = vmatpush1.bf16.msra.mxu1 %v9947_v0  ;;  %10060 = vmatpush1.bf16.msra.mxu0 %v10059_v12  ;;  %v10095_v0 = vpack.c.bf16 %v7963_v25, %v7957_v28  ;;  %v6118_v12 = vld [vmem:[%s11825_s30 + $0x120] sm:$0xff]  ;;  %v6128_v25 = vld [vmem:[%s11825_s30 + $0x170] sm:$0xff] }
 0xa01   : > { %9950 = vmatprep.subr.bf16.mxu1 %v9949_v48  ;;  %10062 = vmatprep.subr.bf16.mxu0 %v10061_v13  ;;  %v6124_v48 = vld [vmem:[%s11825_s30 + $0x150] sm:$0xff]  ;;  %v7969_v13 = vld [vmem:[%s11825_s30 + $0x440] sm:$0xff] }
 0xa02   : > { %v9971_v16 = vpack.c.bf16 %v6124_v48, %v6118_v12  ;;  %v10099_v8 = vpack.c.bf16 %v7975_v10, %v7969_v13  ;;  %v6122_v28 = vld [vmem:[%s11825_s30 + $0x140] sm:$0xff]  ;;  %v7992_v12 = vld [vmem:[%s11825_s30 + $0x4f8] sm:$0xff]  ;;  %v7991_v13 = vld [vmem:[%s11825_s30 + $0x4f0] sm:$0xff] }
 0xa03   : > { %v10003_v9 = vpack.c.bf16 %v6128_v25, %v6122_v28  ;;  %v7997_v10 = vld [vmem:[%s11825_s30 + $0x520] sm:$0xff] }
 0xa04   : > { %9952 = vmatpush1.bf16.msra.mxu1 %v9951_v58  ;;  %10064 = vmatpush1.bf16.msra.mxu0 %v10063_v1  ;;  %v6084_v58 = vld [vmem:[%s11825_s30 + $0x10] sm:$0xff]  ;;  %v6090_v1 = vld [vmem:[%s11825_s30 + $0x40] sm:$0xff] }
 0xa05   : > { %9954 = vmatprep.subr.bf16.mxu1 %v9953_v52  ;;  %10066 = vmatprep.subr.bf16.mxu0 %v10065_v22  ;;  %v9975_v52 = vpack.c.bf16 %v6090_v1, %v6084_v58  ;;  %v9977_v22 = vpack.c.bf16 %v6103_v5, %v6097_v20  ;;  %v8009_v58 = vld [vmem:[%s11825_s30 + $0x580] sm:$0xff]  ;;  %v8016_v1 = vld [vmem:[%s11825_s30 + $0x5b8] sm:$0xff]  ;;  %v8022_v20 = vld [vmem:[%s11825_s30 + $0x5e8] sm:$0xff] }
 0xa06   : > { %v6610_v28 = vld [vmem:[%s674_s17] sm:$0x3f] }
 0xa08   : > { %9956 = vmatpush1.bf16.msra.mxu1 %v9955_v7  ;;  %10068 = vmatpush1.bf16.msra.mxu0 %v10067_v26  ;;  %v6108_v7 = vld [vmem:[%s11825_s30 + $0xd0] sm:$0xff]  ;;  %v6114_v26 = vld [vmem:[%s11825_s30 + $0x100] sm:$0xff] }
 0xa09   : > { %9958 = vmatprep.subr.bf16.mxu1 %v9957_v29  ;;  %10086 = vmatprep.subr.bf16.mxu0 %v10085_v40  ;;  %v9983_v29 = vpack.c.bf16 %v6114_v26, %v6108_v7  ;;  %v9985_v40 = vpack.c.bf16 %v6127_v50, %v6121_v27  ;;  %v7937_v7 = vld [vmem:[%s11825_s30 + $0x340] sm:$0xff]  ;;  %v7944_v26 = vld [vmem:[%s11825_s30 + $0x378] sm:$0xff]  ;;  %v7950_v27 = vld [vmem:[%s11825_s30 + $0x3a8] sm:$0xff] }
 0xa0b   : > { %7924 = vmatmul.mubr.msk.f32.vlgmr.msra.gmra.mrb[56].mxu1 %vm1608_vm4, %v11880_v14  ;;  %8028 = vmatmul.mubr.msk.f32.vlgmr.msra.gmra.mrb[104].mxu0 %vm1608_vm4, %v11959_v17 }
 0xa0c   : > { %9960 = vmatpush1.bf16.msra.mxu1 %v9959_v42  ;;  %10088 = vmatpush1.bf16.msra.mxu0 %v10087_v59  ;;  %v6086_v42 = vld [vmem:[%s11825_s30 + $0x20] sm:$0xff]  ;;  %v6092_v59 = vld [vmem:[%s11825_s30 + $0x50] sm:$0xff] }
 0xa0d   : > { %9962 = vmatprep.subr.bf16.mxu1 %v9961_v53  ;;  %10090 = vmatprep.subr.bf16.mxu0 %v10089_v37  ;;  %v9991_v53 = vpack.c.bf16 %v6092_v59, %v6086_v42  ;;  %v9993_v37 = vpack.c.bf16 %v6105_v11, %v6099_v55  ;;  %v7961_v42 = vld [vmem:[%s11825_s30 + $0x400] sm:$0xff]  ;;  %v7968_v59 = vld [vmem:[%s11825_s30 + $0x438] sm:$0xff]  ;;  %v7974_v55 = vld [vmem:[%s11825_s30 + $0x468] sm:$0xff] }
 0xa0e   : > { %6461 = vmatprep.mubr.f32.mxu1 %v10543_v24  ;;  %7199 = vmatprep.mubr.f32.mxu0 %v10543_v24 }
 0xa10   : > { %9964 = vmatpush1.bf16.msra.mxu1 %v9963_v46  ;;  %10092 = vmatpush1.bf16.msra.mxu0 %v10091_v19  ;;  %v6110_v46 = vld [vmem:[%s11825_s30 + $0xe0] sm:$0xff]  ;;  %v6116_v19 = vld [vmem:[%s11825_s30 + $0x110] sm:$0xff] }
 0xa11   : > { %9966 = vmatprep.subr.bf16.mxu1 %v9965_v47  ;;  %10094 = vmatprep.subr.bf16.mxu0 %v10093_v3  ;;  %v9999_v47 = vpack.c.bf16 %v6116_v19, %v6110_v46  ;;  %v10001_v3 = vpack.c.bf16 %v6129_v39, %v6123_v49 }
 0xa14   : > { %9968 = vmatpush1.bf16.msra.mxu1 %v9967_v2  ;;  %10096 = vmatpush1.bf16.msra.mxu0 %v10095_v0  ;;  %v7979_v2 = vld [vmem:[%s11825_s30 + $0x490] sm:$0xff]  ;;  %v7985_v0 = vld [vmem:[%s11825_s30 + $0x4c0] sm:$0xff] }
 0xa15   : > { %9970 = vmatprep.subr.bf16.mxu1 %v9969_v63  ;;  %10098 = vmatprep.subr.bf16.mxu0 %v10097_v30  ;;  %v7998_v63 = vld [vmem:[%s11825_s30 + $0x528] sm:$0xff]  ;;  %v10023_v30 = vpack.c.bf16 %v7985_v0, %v7979_v2 }
 0xa16   : > { %v10025_v48 = vpack.c.bf16 %v7998_v63, %v7992_v12 }
 0xa18   : > { %9972 = vmatpush1.bf16.msra.mxu1 %v9971_v16  ;;  %10100 = vmatpush1.bf16.msra.mxu0 %v10099_v8  ;;  %v10027_v16 = vpack.c.bf16 %v7997_v10, %v7991_v13  ;;  %v10029_v8 = vpack.c.bf16 %v8010_v6, %v8004_v51 }
 0xa19   : > { %9974 = vmatprep.subr.bf16.mxu1 %v9973_v56  ;;  %v8003_v56 = vld [vmem:[%s11825_s30 + $0x550] sm:$0xff] }
 0xa1a   : > { %v10031_v5 = vpack.c.bf16 %v8009_v58, %v8003_v56  ;;  %v10544_v56 = vmov 1983009808  }
 0xa1b   : > { %7925 = vmatmul.mubr.msk.f32.vlgmr.msra.gmra.mrb[52].mxu1 %vm1608_vm4, %v11959_v17  ;;  %8030 = vmatmul.mubr.msk.f32.vlgmr.msra.gmra.mrb[106].mxu0 %vm1608_vm4, %v11959_v17  ;;  %v6657_v58 = vunpack.c.l.s4 %v10544_v56 }
 0xa1c   : > { %9976 = vmatpush1.bf16.msra.mxu1 %v9975_v52  ;;  %6532 = vmatprep.mubr.f32.mxu1 %v10543_v24  ;;  %v10033_v52 = vpack.c.bf16 %v8022_v20, %v8016_v1 }
 0xa1d   : > { %9978 = vmatprep.subr.bf16.mxu1 %v9977_v22  ;;  %v8015_v22 = vld [vmem:[%s11825_s30 + $0x5b0] sm:$0xff] }
 0xa1e   : > { %v10035_v23 = vpack.c.bf16 %v8021_v60, %v8015_v22 }
 0xa20   : > { %9980 = vmatpush1.bf16.msra.mxu1 %v9979_v4  ;;  %v10069_v4 = vpack.c.bf16 %v7938_v62, %v7932_v35 }
 0xa21   : > { %9982 = vmatprep.subr.bf16.mxu1 %v9981_v57  ;;  %v7931_v57 = vld [vmem:[%s11825_s30 + $0x310] sm:$0xff] }
 0xa22   : > { %v10071_v50 = vpack.c.bf16 %v7937_v7, %v7931_v57 }
 0xa24   : > { %9984 = vmatpush1.bf16.msra.mxu1 %v9983_v29  ;;  %v10073_v29 = vpack.c.bf16 %v7950_v27, %v7944_v26 }
 0xa25   : > { %9986 = vmatprep.subr.bf16.mxu1 %v9985_v40  ;;  %v7943_v40 = vld [vmem:[%s11825_s30 + $0x370] sm:$0xff] }
 0xa26   : > { %v10075_v18 = vpack.c.bf16 %v7949_v31, %v7943_v40 }
 0xa28   : > { %9988 = vmatpush1.bf16.msra.mxu1 %v9987_v34  ;;  %v10077_v34 = vpack.c.bf16 %v7962_v41, %v7956_v32 }
 0xa29   : > { %9990 = vmatprep.subr.bf16.mxu1 %v9989_v38  ;;  %v7955_v38 = vld [vmem:[%s11825_s30 + $0x3d0] sm:$0xff] }
 0xa2a   : > { %v10079_v11 = vpack.c.bf16 %v7961_v42, %v7955_v38 }
 0xa2b   : > { %7926 = vmatmul.mubr.msk.f32.vlgmr.msra.gmra.mrb[54].mxu1 %vm1608_vm4, %v11959_v17 }
 0xa2c   : > { %9992 = vmatpush1.bf16.msra.mxu1 %v9991_v53  ;;  %6603 = vmatprep.mubr.f32.mxu1 %v10543_v24  ;;  %v10081_v53 = vpack.c.bf16 %v7974_v55, %v7968_v59 }
 0xa2d   : > { %9994 = vmatprep.subr.bf16.mxu1 %v9993_v37  ;;  %v7967_v37 = vld [vmem:[%s11825_s30 + $0x430] sm:$0xff] }
 0xa2e   : > { %v10083_v61 = vpack.c.bf16 %v7973_v43, %v7967_v37 }
 0xa30   : > { %9996 = vmatpush1.bf16.msra.mxu1 %v9995_v36 }
 0xa31   : > { %9998 = vmatprep.subr.bf16.mxu1 %v9997_v54 }
 0xa34   : > { %10000 = vmatpush1.bf16.msra.mxu1 %v9999_v47 }
 0xa35   : > { %10002 = vmatprep.subr.bf16.mxu1 %v10001_v3 }
 0xa38   : > { %10004 = vmatpush1.bf16.msra.mxu1 %v10003_v9 }
 0xa39   : > { %10022 = vmatprep.subr.bf16.mxu1 %v10021_v21 }
 0xa3b   : > { %7927 = vmatmul.mubr.msk.f32.vlgmr.msra.gmra.mrb[56].mxu1 %vm1608_vm4, %v11959_v17 }
 0xa3c   : > { %10024 = vmatpush1.bf16.msra.mxu1 %v10023_v30  ;;  %6915 = vmatprep.mubr.f32.mxu1 %v10543_v24 }
 0xa3d   : > { %10026 = vmatprep.subr.bf16.mxu1 %v10025_v48 }
 0xa40   : > { %10028 = vmatpush1.bf16.msra.mxu1 %v10027_v16 }
 0xa41   : > { %10030 = vmatprep.subr.bf16.mxu1 %v10029_v8 }
 0xa44   : > { %10032 = vmatpush1.bf16.msra.mxu1 %v10031_v5  ;;  %v6658_v5 = vunpack.c.0.s8 %v6657_v58 }
 0xa45   : > { %10034 = vmatprep.subr.bf16.mxu1 %v10033_v52 }
 0xa48   : > { %10036 = vmatpush1.bf16.msra.mxu1 %v10035_v23 }
 0xa49   : > { %10070 = vmatprep.subr.bf16.mxu1 %v10069_v4 }
 0xa4b   : > { %8026 = vmatmul.mubr.msk.f32.vlgmr.msra.gmra.mrb[58].mxu1 %vm1608_vm4, %v11880_v14 }
 0xa4c   : > { %10072 = vmatpush1.bf16.msra.mxu1 %v10071_v50  ;;  %7128 = vmatprep.mubr.f32.mxu1 %v10543_v24  ;;  %v6612_v24 = vlaneseq }
 0xa4d   : > { %10074 = vmatprep.subr.bf16.mxu1 %v10073_v29 }
 0xa4e   : > { %v6613_v14 = vshrl.u32 %v6612_v24, 7 }
 0xa50   : > { %10076 = vmatpush1.bf16.msra.mxu1 %v10075_v18  ;;  %v6614_v44 = vsub.s32 0, %v6613_v14  ;;  %v6618_v36 = vsub.s32 1, %v6613_v14  ;;  %v6634_v25 = vsub.s32 5, %v6613_v14  ;;  %v6622_v16 = vsub.s32 2, %v6613_v14 }
 0xa51   : > { %10078 = vmatprep.subr.bf16.mxu1 %v10077_v34  ;;  %v6626_v8 = vsub.s32 3, %v6613_v14  ;;  %v6661_v62 = vsub.s32 %v6658_v5, %v6613_v14 }
 0xa52   : > { %v7212_v54 = vrot.slane %v8031_v15, %v6614_v44  ;;  %v7216_v46 = vrot.slane %v8031_v15, %v6618_v36  ;;  %v6615_v33 = vrot.slane %v6610_v28, %v6614_v44  ;;  %v6619_v9 = vrot.slane %v6610_v28, %v6618_v36 }
 0xa53   : > { %v7232_v21 = vrot.slane %v8031_v15, %v6634_v25  ;;  %v6623_v1 = vrot.slane %v6610_v28, %v6622_v16  ;;  %v6627_v20 = vrot.slane %v6610_v28, %v6626_v8  ;;  %v6635_v27 = vrot.slane %v6610_v28, %v6634_v25 }
 0xa54   : > { %10080 = vmatpush1.bf16.msra.mxu1 %v10079_v11  ;;  %v7220_v41 = vrot.slane %v8031_v15, %v6622_v16  ;;  %v7224_v18 = vrot.slane %v8031_v15, %v6626_v8 }
 0xa55   : > { %10082 = vmatprep.subr.bf16.mxu1 %v10081_v53 }
 0xa58   : > { %10084 = vmatpush1.bf16.msra.mxu1 %v10083_v61 }
 0xa5b   : > { %8029 = vmatmul.mubr.msk.f32.vlgmr.msra.gmra.mrb[58].mxu1 %vm1608_vm4, %v11959_v17  ;;  %v6630_v17 = vsub.s32 4, %v6613_v14 }
 0xa5d   : > { %v7228_v45 = vrot.slane %v8031_v15, %v6630_v17  ;;  %v6631_v26 = vrot.slane %v6610_v28, %v6630_v17 }
 0xade   : > { %v7059_v19 = vpop.f32.mrb[104].mxu0 }
 0xadf   : > { %v7239_v49 = vadd.f32 %v7212_v54, %v7059_v19  ;;  %v7061_v39 = vpop.f32.mrb[105].mxu0 }
 0xae0   : > { %v7240_v47 = vadd.f32 %v7216_v46, %v7061_v39 }
 0xae2   : > { %v7251_v3 = vcombine.low %v7239_v49, %v7240_v47 }
 0xae4   : > { %v7259_v11 = vrot.slane %v7251_v3, %v6661_v62 }
 0xaee   : > { %v6463_v2 = vpop.f32.mrb[52].mxu1  ;;  %v7201_v0 = vpop.f32.mrb[106].mxu0 }
 0xaef   : > { %v6642_v12 = vadd.f32 %v6615_v33, %v6463_v2  ;;  %v7243_v63 = vadd.f32 %v7228_v45, %v7201_v0  ;;  %v6465_v30 = vpop.f32.mrb[53].mxu1  ;;  %v7203_v48 = vpop.f32.mrb[107].mxu0 }
 0xaf0   : > { %v6643_v13 = vadd.f32 %v6619_v9, %v6465_v30  ;;  %v7244_v10 = vadd.f32 %v7232_v21, %v7203_v48 }
 0xaf2   : > { %v6654_v51 = vcombine.low %v6642_v12, %v6643_v13  ;;  %v7268_v6 = vcombine.low %v7243_v63, %v7244_v10 }
 0xaf4   : > { %8037 = vst.sshfl [vmem:[%s12071_s23 + $0x14] sm:$0x33 pattern:$0x76325410] %v7268_v6  ;;  %v6662_v4 = vrot.slane %v6654_v51, %v6661_v62 }
 0xafe   : > { %v6534_v52 = vpop.f32.mrb[54].mxu1 }
 0xaff   : > { %v6644_v22 = vadd.f32 %v6623_v1, %v6534_v52  ;;  %v6536_v60 = vpop.f32.mrb[55].mxu1 }
 0xb00   : > { %v6645_v35 = vadd.f32 %v6627_v20, %v6536_v60 }
 0xb02   : > { %v6655_v23 = vcombine.low %v6644_v22, %v6645_v35 }
 0xb04   : > { %v6669_v57 = vrot.slane %v6655_v23, %v6661_v62 }
 0xb06   : > { %v6670_v7 = vcombine.low %v6662_v4, %v6669_v57 }
 0xb08   : > { %6681 = vst [vmem:[%s12071_s23] sm:$0xff] %v6670_v7 }
 0xb0e   : > { %v6605_v50 = vpop.f32.mrb[56].mxu1 }
 0xb0f   : > { %v6646_v29 = vadd.f32 %v6631_v26, %v6605_v50  ;;  %v6607_v40 = vpop.f32.mrb[57].mxu1 }
 0xb10   : > { %v6647_v31 = vadd.f32 %v6635_v27, %v6607_v40 }
 0xb12   : > { %v6671_v32 = vcombine.low %v6646_v29, %v6647_v31 }
 0xb14   : > { %7928 = vst.sshfl [vmem:[%s12071_s23 + $0x8] sm:$0x33 pattern:$0x76325410] %v6671_v32 }
 0xb2e   : > { %v7130_v34 = vpop.f32.mrb[58].mxu1 }
 0xb2f   : > { %v7241_v38 = vadd.f32 %v7220_v41, %v7130_v34  ;;  %v7132_v42 = vpop.f32.mrb[59].mxu1 }
 0xb30   : > { %v7242_v59 = vadd.f32 %v7224_v18, %v7132_v42 }
 0xb32   : > { %v7252_v55 = vcombine.low %v7241_v38, %v7242_v59 }
 0xb34   : > { %v7266_v53 = vrot.slane %v7252_v55, %v6661_v62 }
 0xb36   : > { %v7267_v37 = vcombine.low %v7259_v11, %v7266_v53 }
 0xb38   : > { %8032 = vst [vmem:[%s12071_s23 + $0xc] sm:$0xff] %v7267_v37 }
 0xb39 PF: > { %s26_s22 = sadd.s32 1, %s10536_s22   ;;  %s12116_s19 = sld [smem:[#allocation5_spill]] }
 0xb3a   : > { %p23_p3 = scmp.ge.s32.totalorder %s26_s22, 6   ;;  %s12117_s0 = sld [smem:[#allocation6_spill]] }
 0xb3b   : > { %s12118_s21 = sld [smem:[#allocation7_spill]]  ;;  %s12119_s18 = smov %s10528_s20 }
 0xb3c   :  { %25 = sbr.rel (!%p23_p3) target bundleno = 5 (0x5), region = 175 }
 0xb40   : > { %s12120_s20 = smov %s12117_s0 }
 0xb43   :  { %7310 = vsyncpa [#allocation3], 1 }
 0xb44   :  { %7312 = vsyncpa [#allocation3 + $0x1], 1 }

</bundles_post_ra>
